<compile_context>
chip_gen: v5e
topology: v5e:2x2
jax: 0.10.0
libtpu: 0.0.40
codegen_flags: <defaults>
</compile_context>

<pallas_src>
import functools

import jax
import jax.numpy as jnp
from jax.experimental import pallas as pl
from jax.experimental.pallas import tpu as pltpu

# ----------------------------- problem sizes --------------------------------
B, C_IN, H, W = 2, 4, 16, 16     # input (NCHW): (2, 4, 16, 16)
C_HID = 32                       # conv output channels
N_CLS = 8                        # classifier classes
KH = KW = 3                      # conv kernel (padding=1, stride=1)
LANES = 128                      # lane-dense padded width for the logits


# ------------------------- inner-model forward kernel -----------------------
def _model_kernel(xp_ref, wconv_ref, bconv_ref, wlin_ref, blin_ref,
                  out_ref, acc_ref):
    # xp_ref   : (B, H+2, W+2, C_IN)   f32   zero-padded NHWC activations
    # wconv_ref: (KH*KW, C_IN, C_HID)  bf16  per-tap conv weights
    # bconv_ref: (1, C_HID)            f32
    # wlin_ref : (C_HID, LANES)        bf16  zero-padded classifier weight
    # blin_ref : (1, LANES)            f32   zero-padded classifier bias
    # out_ref  : (B, LANES)            f32   lane-dense logits (first N_CLS valid)
    # acc_ref  : (B*H*W, C_HID)        f32   VMEM conv accumulator

    # 3x3 conv as 9 statically-sliced MXU matmuls; bf16 MXU operands only
    # (activations stay f32 on the VPU — v5e has no bf16 VPU).
    acc_ref[...] = jnp.zeros_like(acc_ref)
    for kh in range(KH):
        for kw in range(KW):
            tap = jnp.concatenate(
                [xp_ref[b, kh:kh + H, kw:kw + W, :].reshape(H * W, C_IN)
                 for b in range(B)], axis=0).astype(jnp.bfloat16)   # (B*H*W, Cin)
            acc_ref[...] += jnp.dot(tap, wconv_ref[kh * KW + kw],
                                    preferred_element_type=jnp.float32)

    # bias + ReLU + global average pool, per image, as an in-kernel sublane
    # reduction (replaces the DMA'd pooling matrix and the degenerate matmul).
    inv = 1.0 / float(H * W)
    pooled = jnp.concatenate(
        [jnp.sum(jnp.maximum(acc_ref[b * H * W:(b + 1) * H * W, :]
                             + bconv_ref[...], 0.0),
                 axis=0, keepdims=True)
         for b in range(B)], axis=0) * inv                          # (B, C_HID)

    # classifier head, zero-padded to 128 lanes -> unmasked lane-dense store.
    logits = jnp.dot(pooled.astype(jnp.bfloat16), wlin_ref[...],
                     preferred_element_type=jnp.float32)            # (B, LANES)
    out_ref[...] = logits + blin_ref[...]


def _forward_impl(params, x_nchw):
    """Synthetic inner model: Conv2d(C_IN,C_HID,3,pad=1)+ReLU -> GAP -> Linear."""
    x = jnp.transpose(x_nchw, (0, 2, 3, 1)).astype(jnp.float32)     # NCHW -> NHWC
    xp = jnp.pad(x, ((0, 0), (1, 1), (1, 1), (0, 0)))               # (B,H+2,W+2,Cin)

    # weight reshapes (fused under jit), matching PyTorch conv/linear semantics
    wconv = jnp.transpose(params["conv_w"], (2, 3, 1, 0)).reshape(
        KH * KW, C_IN, C_HID).astype(jnp.bfloat16)                  # (9, Cin, Chid)
    bconv = params["conv_b"].reshape(1, C_HID).astype(jnp.float32)
    wlin = jnp.zeros((C_HID, LANES), jnp.bfloat16).at[:, :N_CLS].set(
        params["lin_w"].T.astype(jnp.bfloat16))
    blin = jnp.zeros((1, LANES), jnp.float32).at[:, :N_CLS].set(
        params["lin_b"].astype(jnp.float32))

    flops = 2 * (B * H * W) * C_IN * C_HID * (KH * KW) + 2 * B * C_HID * LANES
    bytes_accessed = (xp.size * 4 + wconv.size * 2 + bconv.size * 4 +
                      wlin.size * 2 + blin.size * 4 + B * LANES * 4)

    out = pl.pallas_call(
        _model_kernel,
        out_shape=jax.ShapeDtypeStruct((B, LANES), jnp.float32),
        in_specs=[pl.BlockSpec(memory_space=pltpu.MemorySpace.VMEM)] * 5,
        out_specs=pl.BlockSpec(memory_space=pltpu.MemorySpace.VMEM),
        scratch_shapes=[pltpu.VMEM((B * H * W, C_HID), jnp.float32)],
        cost_estimate=pl.CostEstimate(flops=flops, transcendentals=0,
                                      bytes_accessed=bytes_accessed),
    )(xp, wconv, bconv, wlin, blin)
    return out[:, :N_CLS]                                           # (B, N_CLS)


model_forward = jax.jit(_forward_impl)


# ------------------------------ EMA update kernel ----------------------------
def _ema_kernel(n_leaves, m_ref, *refs):
    # refs = (target_0..n-1, online_0..n-1, out_0..n-1); outs alias the targets.
    m = m_ref[0]
    for i in range(n_leaves):
        t = refs[i][...]
        o = refs[n_leaves + i][...]
        refs[2 * n_leaves + i][...] = (1.0 - m) * t + m * o


def _ema_impl(target_params, online_params, momentum):
    """target <- (1-m)*target + m*online, all leaves in one aliased pallas_call."""
    leaves_t, treedef = jax.tree_util.tree_flatten(target_params)
    leaves_o, _ = jax.tree_util.tree_flatten(online_params)
    n = len(leaves_t)
    shapes = [l.shape for l in leaves_t]
    t2 = [l.reshape(1, l.size) for l in leaves_t]   # lane-dense 2-D views (free)
    o2 = [l.reshape(1, l.size) for l in leaves_o]
    m = jnp.asarray(momentum, jnp.float32).reshape(1)

    new = pl.pallas_call(
        functools.partial(_ema_kernel, n),
        out_shape=tuple(jax.ShapeDtypeStruct(t.shape, t.dtype) for t in t2),
        in_specs=[pl.BlockSpec(memory_space=pltpu.MemorySpace.SMEM)]
                 + [pl.BlockSpec(memory_space=pltpu.MemorySpace.VMEM)] * (2 * n),
        out_specs=tuple(pl.BlockSpec(memory_space=pltpu.MemorySpace.VMEM)
                        for _ in range(n)),
        input_output_aliases={i + 1: i for i in range(n)},   # in-place targets
    )(m, *t2, *o2)

    new_leaves = [v.reshape(s) for v, s in zip(new, shapes)]
    return jax.tree_util.tree_unflatten(treedef, new_leaves)


# Fused training step: online forward + EMA target update in one dispatch;
# target buffers donated so the EMA is a read-modify-write of existing HBM.
@functools.partial(jax.jit, donate_argnums=(1,))
def train_step(online_params, target_params, x_nchw, momentum):
    output = _forward_impl(online_params, x_nchw)
    new_target = _ema_impl(target_params, online_params, momentum)
    return output, new_target


ema_update = jax.jit(_ema_impl, donate_argnums=(0,))


# ------------------------------ wrapper class --------------------------------
class OnlineTargetWrapper:
    """JAX/Pallas port of models/PromptTTA/ours_ema.py::OnlineTargetWrapper."""

    def __init__(self, params, decay_factor=0.94, min_momentum_constant=0.005):
        copy_tree = lambda t: jax.tree_util.tree_map(lambda p: p.copy(), t)
        self.online_params = params
        self.target_params = copy_tree(params)        # deepcopy of online net
        self.pretrained_params = copy_tree(params)    # "pretrained_state_dict"
        self.decay_factor = decay_factor
        self.min_momentum_constant = min_momentum_constant
        self.mom_pre = 0.1

    def _next_momentum(self):
        mom_new = self.mom_pre * self.decay_factor
        self.mom_pre = mom_new
        return mom_new + self.min_momentum_constant

    def forward(self, x, training=False):
        if training:
            # TODO(synk): the PyTorch inner model returns (output, _, _, _) in
            # training mode; the synthetic inner model returns only `output`.
            momentum = self._next_momentum()
            output, self.target_params = train_step(
                self.online_params, self.target_params, x, jnp.float32(momentum))
            return output
        return model_forward(self.target_params, x)

    def reset_online_network(self, mode="from_target"):
        if mode == "from_target":
            src = self.target_params
        else:
            assert mode == "from_source"
            src = self.pretrained_params
        self.online_params = jax.tree_util.tree_map(lambda p: p.copy(), src)

    def update_target_network(self):
        # Standalone EMA update (all params treated as requires_grad=True).
        momentum = self._next_momentum()
        self.target_params = ema_update(self.target_params, self.online_params,
                                        jnp.float32(momentum))


# --------------------------------- main ---------------------------------------
def init_params(key):
    k1, k2, k3, k4 = jax.random.split(key, 4)
    return {
        "conv_w": 0.1 * jax.random.normal(k1, (C_HID, C_IN, KH, KW), jnp.float32),
        "conv_b": 0.1 * jax.random.normal(k2, (C_HID,), jnp.float32),
        "lin_w": 0.1 * jax.random.normal(k3, (N_CLS, C_HID), jnp.float32),
        "lin_b": 0.1 * jax.random.normal(k4, (N_CLS,), jnp.float32),
    }


if __name__ == "__main__":
    key = jax.random.PRNGKey(0)
    kx, kp = jax.random.split(key)
    x = jax.random.normal(kx, (B, C_IN, H, W), jnp.float32)   # NCHW like PyTorch

    wrapper = OnlineTargetWrapper(init_params(kp))

    out_eval = wrapper.forward(x, training=False)     # target-network path
    out_train = wrapper.forward(x, training=True)     # online path + EMA update

    jax.block_until_ready(out_eval)
    jax.block_until_ready(out_train)
    jax.block_until_ready(wrapper.target_params)

    assert out_eval.shape == (B, N_CLS) and out_train.shape == (B, N_CLS)
    print("KERNEL_OK")
</pallas_src>

<mosaic_0001>
module attributes {stable_mosaic.version = 11 : i64} {
  func.func @_model_kernel(%arg0: memref<2x18x18x4xf32, #tpu.memory_space<vmem>>, %arg1: memref<9x4x32xbf16, #tpu.memory_space<vmem>>, %arg2: memref<1x32xf32, #tpu.memory_space<vmem>>, %arg3: memref<32x128xbf16, #tpu.memory_space<vmem>>, %arg4: memref<1x128xf32, #tpu.memory_space<vmem>>, %arg5: memref<2x128xf32, #tpu.memory_space<vmem>>, %arg6: memref<512x32xf32, #tpu.memory_space<vmem>>) attributes {dimension_semantics = [], scalar_prefetch = 0 : i64, scratch_operands = 1 : i64, tpu.core_type = #tpu.core_type<tc>} {
    %cst = arith.constant 0.000000e+00 : f32
    %0 = vector.broadcast %cst : f32 to vector<512x32xf32>
    %c0 = arith.constant 0 : index
    %c0_0 = arith.constant 0 : index
    %1 = vector.load %arg6[%c0, %c0_0] : memref<512x32xf32, #tpu.memory_space<vmem>>, vector<512x32xf32>
    tpu.vector_store %arg6[%c0, %c0_0], %0 {strides = array<i32>} : memref<512x32xf32, #tpu.memory_space<vmem>>, vector<512x32xf32>,
    %c0_1 = arith.constant 0 : index
    %c0_2 = arith.constant 0 : index
    %c0_3 = arith.constant 0 : index
    %c0_4 = arith.constant 0 : index
    %2 = vector.load %arg0[%c0_1, %c0_2, %c0_3, %c0_4] : memref<2x18x18x4xf32, #tpu.memory_space<vmem>>, vector<1x16x16x4xf32>
    %3 = vector.shape_cast %2 : vector<1x16x16x4xf32> to vector<16x16x4xf32>
    %4 = vector.shape_cast %3 : vector<16x16x4xf32> to vector<256x4xf32>
    %c1 = arith.constant 1 : index
    %c0_5 = arith.constant 0 : index
    %c0_6 = arith.constant 0 : index
    %c0_7 = arith.constant 0 : index
    %5 = vector.load %arg0[%c1, %c0_5, %c0_6, %c0_7] : memref<2x18x18x4xf32, #tpu.memory_space<vmem>>, vector<1x16x16x4xf32>
    %6 = vector.shape_cast %5 : vector<1x16x16x4xf32> to vector<16x16x4xf32>
    %7 = vector.shape_cast %6 : vector<16x16x4xf32> to vector<256x4xf32>
    %8 = tpu.concatenate %4, %7 in 0 : vector<256x4xf32>, vector<256x4xf32> -> vector<512x4xf32>
    %9 = arith.truncf %8 : vector<512x4xf32> to vector<512x4xbf16>
    %c0_8 = arith.constant 0 : index
    %c0_9 = arith.constant 0 : index
    %10 = vector.load %arg6[%c0_8, %c0_9] : memref<512x32xf32, #tpu.memory_space<vmem>>, vector<512x32xf32>
    %c0_10 = arith.constant 0 : index
    %c0_11 = arith.constant 0 : index
    %c0_12 = arith.constant 0 : index
    %11 = vector.load %arg1[%c0_10, %c0_11, %c0_12] : memref<9x4x32xbf16, #tpu.memory_space<vmem>>, vector<1x4x32xbf16>
    %12 = vector.shape_cast %11 : vector<1x4x32xbf16> to vector<4x32xbf16>
    %cst_13 = arith.constant dense<0.000000e+00> : vector<512x32xf32>
    %13 = tpu.matmul %9, %12, %cst_13 {dimension_numbers = #tpu.dot_dimension_numbers<[1], [0], [0], [1], [0, 0, 1, 1], [], []>} : vector<512x4xbf16>, vector<4x32xbf16>, vector<512x32xf32> -> vector<512x32xf32>
    %14 = arith.addf %10, %13 : vector<512x32xf32>
    %c0_14 = arith.constant 0 : index
    %c0_15 = arith.constant 0 : index
    %15 = vector.load %arg6[%c0_14, %c0_15] : memref<512x32xf32, #tpu.memory_space<vmem>>, vector<512x32xf32>
    tpu.vector_store %arg6[%c0_14, %c0_15], %14 {strides = array<i32>} : memref<512x32xf32, #tpu.memory_space<vmem>>, vector<512x32xf32>,
    %c0_16 = arith.constant 0 : index
    %c0_17 = arith.constant 0 : index
    %c1_18 = arith.constant 1 : index
    %c0_19 = arith.constant 0 : index
    %16 = vector.load %arg0[%c0_16, %c0_17, %c1_18, %c0_19] : memref<2x18x18x4xf32, #tpu.memory_space<vmem>>, vector<1x16x16x4xf32>
    %17 = vector.shape_cast %16 : vector<1x16x16x4xf32> to vector<16x16x4xf32>
    %18 = vector.shape_cast %17 : vector<16x16x4xf32> to vector<256x4xf32>
    %c1_20 = arith.constant 1 : index
    %c0_21 = arith.constant 0 : index
    %c1_22 = arith.constant 1 : index
    %c0_23 = arith.constant 0 : index
    %19 = vector.load %arg0[%c1_20, %c0_21, %c1_22, %c0_23] : memref<2x18x18x4xf32, #tpu.memory_space<vmem>>, vector<1x16x16x4xf32>
    %20 = vector.shape_cast %19 : vector<1x16x16x4xf32> to vector<16x16x4xf32>
    %21 = vector.shape_cast %20 : vector<16x16x4xf32> to vector<256x4xf32>
    %22 = tpu.concatenate %18, %21 in 0 : vector<256x4xf32>, vector<256x4xf32> -> vector<512x4xf32>
    %23 = arith.truncf %22 : vector<512x4xf32> to vector<512x4xbf16>
    %c0_24 = arith.constant 0 : index
    %c0_25 = arith.constant 0 : index
    %24 = vector.load %arg6[%c0_24, %c0_25] : memref<512x32xf32, #tpu.memory_space<vmem>>, vector<512x32xf32>
    %c1_26 = arith.constant 1 : index
    %c0_27 = arith.constant 0 : index
    %c0_28 = arith.constant 0 : index
    %25 = vector.load %arg1[%c1_26, %c0_27, %c0_28] : memref<9x4x32xbf16, #tpu.memory_space<vmem>>, vector<1x4x32xbf16>
    %26 = vector.shape_cast %25 : vector<1x4x32xbf16> to vector<4x32xbf16>
    %cst_29 = arith.constant dense<0.000000e+00> : vector<512x32xf32>
    %27 = tpu.matmul %23, %26, %cst_29 {dimension_numbers = #tpu.dot_dimension_numbers<[1], [0], [0], [1], [0, 0, 1, 1], [], []>} : vector<512x4xbf16>, vector<4x32xbf16>, vector<512x32xf32> -> vector<512x32xf32>
    %28 = arith.addf %24, %27 : vector<512x32xf32>
    %c0_30 = arith.constant 0 : index
    %c0_31 = arith.constant 0 : index
    %29 = vector.load %arg6[%c0_30, %c0_31] : memref<512x32xf32, #tpu.memory_space<vmem>>, vector<512x32xf32>
    tpu.vector_store %arg6[%c0_30, %c0_31], %28 {strides = array<i32>} : memref<512x32xf32, #tpu.memory_space<vmem>>, vector<512x32xf32>,
    %c0_32 = arith.constant 0 : index
    %c0_33 = arith.constant 0 : index
    %c2 = arith.constant 2 : index
    %c0_34 = arith.constant 0 : index
    %30 = vector.load %arg0[%c0_32, %c0_33, %c2, %c0_34] : memref<2x18x18x4xf32, #tpu.memory_space<vmem>>, vector<1x16x16x4xf32>
    %31 = vector.shape_cast %30 : vector<1x16x16x4xf32> to vector<16x16x4xf32>
    %32 = vector.shape_cast %31 : vector<16x16x4xf32> to vector<256x4xf32>
    %c1_35 = arith.constant 1 : index
    %c0_36 = arith.constant 0 : index
    %c2_37 = arith.constant 2 : index
    %c0_38 = arith.constant 0 : index
    %33 = vector.load %arg0[%c1_35, %c0_36, %c2_37, %c0_38] : memref<2x18x18x4xf32, #tpu.memory_space<vmem>>, vector<1x16x16x4xf32>
    %34 = vector.shape_cast %33 : vector<1x16x16x4xf32> to vector<16x16x4xf32>
    %35 = vector.shape_cast %34 : vector<16x16x4xf32> to vector<256x4xf32>
    %36 = tpu.concatenate %32, %35 in 0 : vector<256x4xf32>, vector<256x4xf32> -> vector<512x4xf32>
    %37 = arith.truncf %36 : vector<512x4xf32> to vector<512x4xbf16>
    %c0_39 = arith.constant 0 : index
    %c0_40 = arith.constant 0 : index
    %38 = vector.load %arg6[%c0_39, %c0_40] : memref<512x32xf32, #tpu.memory_space<vmem>>, vector<512x32xf32>
    %c2_41 = arith.constant 2 : index
    %c0_42 = arith.constant 0 : index
    %c0_43 = arith.constant 0 : index
    %39 = vector.load %arg1[%c2_41, %c0_42, %c0_43] : memref<9x4x32xbf16, #tpu.memory_space<vmem>>, vector<1x4x32xbf16>
    %40 = vector.shape_cast %39 : vector<1x4x32xbf16> to vector<4x32xbf16>
    %cst_44 = arith.constant dense<0.000000e+00> : vector<512x32xf32>
    %41 = tpu.matmul %37, %40, %cst_44 {dimension_numbers = #tpu.dot_dimension_numbers<[1], [0], [0], [1], [0, 0, 1, 1], [], []>} : vector<512x4xbf16>, vector<4x32xbf16>, vector<512x32xf32> -> vector<512x32xf32>
    %42 = arith.addf %38, %41 : vector<512x32xf32>
    %c0_45 = arith.constant 0 : index
    %c0_46 = arith.constant 0 : index
    %43 = vector.load %arg6[%c0_45, %c0_46] : memref<512x32xf32, #tpu.memory_space<vmem>>, vector<512x32xf32>
    tpu.vector_store %arg6[%c0_45, %c0_46], %42 {strides = array<i32>} : memref<512x32xf32, #tpu.memory_space<vmem>>, vector<512x32xf32>,
    %c0_47 = arith.constant 0 : index
    %c1_48 = arith.constant 1 : index
    %c0_49 = arith.constant 0 : index
    %c0_50 = arith.constant 0 : index
    %44 = vector.load %arg0[%c0_47, %c1_48, %c0_49, %c0_50] : memref<2x18x18x4xf32, #tpu.memory_space<vmem>>, vector<1x16x16x4xf32>
    %45 = vector.shape_cast %44 : vector<1x16x16x4xf32> to vector<16x16x4xf32>
    %46 = vector.shape_cast %45 : vector<16x16x4xf32> to vector<256x4xf32>
    %c1_51 = arith.constant 1 : index
    %c1_52 = arith.constant 1 : index
    %c0_53 = arith.constant 0 : index
    %c0_54 = arith.constant 0 : index
    %47 = vector.load %arg0[%c1_51, %c1_52, %c0_53, %c0_54] : memref<2x18x18x4xf32, #tpu.memory_space<vmem>>, vector<1x16x16x4xf32>
    %48 = vector.shape_cast %47 : vector<1x16x16x4xf32> to vector<16x16x4xf32>
    %49 = vector.shape_cast %48 : vector<16x16x4xf32> to vector<256x4xf32>
    %50 = tpu.concatenate %46, %49 in 0 : vector<256x4xf32>, vector<256x4xf32> -> vector<512x4xf32>
    %51 = arith.truncf %50 : vector<512x4xf32> to vector<512x4xbf16>
    %c0_55 = arith.constant 0 : index
    %c0_56 = arith.constant 0 : index
    %52 = vector.load %arg6[%c0_55, %c0_56] : memref<512x32xf32, #tpu.memory_space<vmem>>, vector<512x32xf32>
    %c3 = arith.constant 3 : index
    %c0_57 = arith.constant 0 : index
    %c0_58 = arith.constant 0 : index
    %53 = vector.load %arg1[%c3, %c0_57, %c0_58] : memref<9x4x32xbf16, #tpu.memory_space<vmem>>, vector<1x4x32xbf16>
    %54 = vector.shape_cast %53 : vector<1x4x32xbf16> to vector<4x32xbf16>
    %cst_59 = arith.constant dense<0.000000e+00> : vector<512x32xf32>
    %55 = tpu.matmul %51, %54, %cst_59 {dimension_numbers = #tpu.dot_dimension_numbers<[1], [0], [0], [1], [0, 0, 1, 1], [], []>} : vector<512x4xbf16>, vector<4x32xbf16>, vector<512x32xf32> -> vector<512x32xf32>
    %56 = arith.addf %52, %55 : vector<512x32xf32>
    %c0_60 = arith.constant 0 : index
    %c0_61 = arith.constant 0 : index
    %57 = vector.load %arg6[%c0_60, %c0_61] : memref<512x32xf32, #tpu.memory_space<vmem>>, vector<512x32xf32>
    tpu.vector_store %arg6[%c0_60, %c0_61], %56 {strides = array<i32>} : memref<512x32xf32, #tpu.memory_space<vmem>>, vector<512x32xf32>,
    %c0_62 = arith.constant 0 : index
    %c1_63 = arith.constant 1 : index
    %c1_64 = arith.constant 1 : index
    %c0_65 = arith.constant 0 : index
    %58 = vector.load %arg0[%c0_62, %c1_63, %c1_64, %c0_65] : memref<2x18x18x4xf32, #tpu.memory_space<vmem>>, vector<1x16x16x4xf32>
    %59 = vector.shape_cast %58 : vector<1x16x16x4xf32> to vector<16x16x4xf32>
    %60 = vector.shape_cast %59 : vector<16x16x4xf32> to vector<256x4xf32>
    %c1_66 = arith.constant 1 : index
    %c1_67 = arith.constant 1 : index
    %c1_68 = arith.constant 1 : index
    %c0_69 = arith.constant 0 : index
    %61 = vector.load %arg0[%c1_66, %c1_67, %c1_68, %c0_69] : memref<2x18x18x4xf32, #tpu.memory_space<vmem>>, vector<1x16x16x4xf32>
    %62 = vector.shape_cast %61 : vector<1x16x16x4xf32> to vector<16x16x4xf32>
    %63 = vector.shape_cast %62 : vector<16x16x4xf32> to vector<256x4xf32>
    %64 = tpu.concatenate %60, %63 in 0 : vector<256x4xf32>, vector<256x4xf32> -> vector<512x4xf32>
    %65 = arith.truncf %64 : vector<512x4xf32> to vector<512x4xbf16>
    %c0_70 = arith.constant 0 : index
    %c0_71 = arith.constant 0 : index
    %66 = vector.load %arg6[%c0_70, %c0_71] : memref<512x32xf32, #tpu.memory_space<vmem>>, vector<512x32xf32>
    %c4 = arith.constant 4 : index
    %c0_72 = arith.constant 0 : index
    %c0_73 = arith.constant 0 : index
    %67 = vector.load %arg1[%c4, %c0_72, %c0_73] : memref<9x4x32xbf16, #tpu.memory_space<vmem>>, vector<1x4x32xbf16>
    %68 = vector.shape_cast %67 : vector<1x4x32xbf16> to vector<4x32xbf16>
    %cst_74 = arith.constant dense<0.000000e+00> : vector<512x32xf32>
    %69 = tpu.matmul %65, %68, %cst_74 {dimension_numbers = #tpu.dot_dimension_numbers<[1], [0], [0], [1], [0, 0, 1, 1], [], []>} : vector<512x4xbf16>, vector<4x32xbf16>, vector<512x32xf32> -> vector<512x32xf32>
    %70 = arith.addf %66, %69 : vector<512x32xf32>
    %c0_75 = arith.constant 0 : index
    %c0_76 = arith.constant 0 : index
    %71 = vector.load %arg6[%c0_75, %c0_76] : memref<512x32xf32, #tpu.memory_space<vmem>>, vector<512x32xf32>
    tpu.vector_store %arg6[%c0_75, %c0_76], %70 {strides = array<i32>} : memref<512x32xf32, #tpu.memory_space<vmem>>, vector<512x32xf32>,
    %c0_77 = arith.constant 0 : index
    %c1_78 = arith.constant 1 : index
    %c2_79 = arith.constant 2 : index
    %c0_80 = arith.constant 0 : index
    %72 = vector.load %arg0[%c0_77, %c1_78, %c2_79, %c0_80] : memref<2x18x18x4xf32, #tpu.memory_space<vmem>>, vector<1x16x16x4xf32>
    %73 = vector.shape_cast %72 : vector<1x16x16x4xf32> to vector<16x16x4xf32>
    %74 = vector.shape_cast %73 : vector<16x16x4xf32> to vector<256x4xf32>
    %c1_81 = arith.constant 1 : index
    %c1_82 = arith.constant 1 : index
    %c2_83 = arith.constant 2 : index
    %c0_84 = arith.constant 0 : index
    %75 = vector.load %arg0[%c1_81, %c1_82, %c2_83, %c0_84] : memref<2x18x18x4xf32, #tpu.memory_space<vmem>>, vector<1x16x16x4xf32>
    %76 = vector.shape_cast %75 : vector<1x16x16x4xf32> to vector<16x16x4xf32>
    %77 = vector.shape_cast %76 : vector<16x16x4xf32> to vector<256x4xf32>
    %78 = tpu.concatenate %74, %77 in 0 : vector<256x4xf32>, vector<256x4xf32> -> vector<512x4xf32>
    %79 = arith.truncf %78 : vector<512x4xf32> to vector<512x4xbf16>
    %c0_85 = arith.constant 0 : index
    %c0_86 = arith.constant 0 : index
    %80 = vector.load %arg6[%c0_85, %c0_86] : memref<512x32xf32, #tpu.memory_space<vmem>>, vector<512x32xf32>
    %c5 = arith.constant 5 : index
    %c0_87 = arith.constant 0 : index
    %c0_88 = arith.constant 0 : index
    %81 = vector.load %arg1[%c5, %c0_87, %c0_88] : memref<9x4x32xbf16, #tpu.memory_space<vmem>>, vector<1x4x32xbf16>
    %82 = vector.shape_cast %81 : vector<1x4x32xbf16> to vector<4x32xbf16>
    %cst_89 = arith.constant dense<0.000000e+00> : vector<512x32xf32>
    %83 = tpu.matmul %79, %82, %cst_89 {dimension_numbers = #tpu.dot_dimension_numbers<[1], [0], [0], [1], [0, 0, 1, 1], [], []>} : vector<512x4xbf16>, vector<4x32xbf16>, vector<512x32xf32> -> vector<512x32xf32>
    %84 = arith.addf %80, %83 : vector<512x32xf32>
    %c0_90 = arith.constant 0 : index
    %c0_91 = arith.constant 0 : index
    %85 = vector.load %arg6[%c0_90, %c0_91] : memref<512x32xf32, #tpu.memory_space<vmem>>, vector<512x32xf32>
    tpu.vector_store %arg6[%c0_90, %c0_91], %84 {strides = array<i32>} : memref<512x32xf32, #tpu.memory_space<vmem>>, vector<512x32xf32>,
    %c0_92 = arith.constant 0 : index
    %c2_93 = arith.constant 2 : index
    %c0_94 = arith.constant 0 : index
    %c0_95 = arith.constant 0 : index
    %86 = vector.load %arg0[%c0_92, %c2_93, %c0_94, %c0_95] : memref<2x18x18x4xf32, #tpu.memory_space<vmem>>, vector<1x16x16x4xf32>
    %87 = vector.shape_cast %86 : vector<1x16x16x4xf32> to vector<16x16x4xf32>
    %88 = vector.shape_cast %87 : vector<16x16x4xf32> to vector<256x4xf32>
    %c1_96 = arith.constant 1 : index
    %c2_97 = arith.constant 2 : index
    %c0_98 = arith.constant 0 : index
    %c0_99 = arith.constant 0 : index
    %89 = vector.load %arg0[%c1_96, %c2_97, %c0_98, %c0_99] : memref<2x18x18x4xf32, #tpu.memory_space<vmem>>, vector<1x16x16x4xf32>
    %90 = vector.shape_cast %89 : vector<1x16x16x4xf32> to vector<16x16x4xf32>
    %91 = vector.shape_cast %90 : vector<16x16x4xf32> to vector<256x4xf32>
    %92 = tpu.concatenate %88, %91 in 0 : vector<256x4xf32>, vector<256x4xf32> -> vector<512x4xf32>
    %93 = arith.truncf %92 : vector<512x4xf32> to vector<512x4xbf16>
    %c0_100 = arith.constant 0 : index
    %c0_101 = arith.constant 0 : index
    %94 = vector.load %arg6[%c0_100, %c0_101] : memref<512x32xf32, #tpu.memory_space<vmem>>, vector<512x32xf32>
    %c6 = arith.constant 6 : index
    %c0_102 = arith.constant 0 : index
    %c0_103 = arith.constant 0 : index
    %95 = vector.load %arg1[%c6, %c0_102, %c0_103] : memref<9x4x32xbf16, #tpu.memory_space<vmem>>, vector<1x4x32xbf16>
    %96 = vector.shape_cast %95 : vector<1x4x32xbf16> to vector<4x32xbf16>
    %cst_104 = arith.constant dense<0.000000e+00> : vector<512x32xf32>
    %97 = tpu.matmul %93, %96, %cst_104 {dimension_numbers = #tpu.dot_dimension_numbers<[1], [0], [0], [1], [0, 0, 1, 1], [], []>} : vector<512x4xbf16>, vector<4x32xbf16>, vector<512x32xf32> -> vector<512x32xf32>
    %98 = arith.addf %94, %97 : vector<512x32xf32>
    %c0_105 = arith.constant 0 : index
    %c0_106 = arith.constant 0 : index
    %99 = vector.load %arg6[%c0_105, %c0_106] : memref<512x32xf32, #tpu.memory_space<vmem>>, vector<512x32xf32>
    tpu.vector_store %arg6[%c0_105, %c0_106], %98 {strides = array<i32>} : memref<512x32xf32, #tpu.memory_space<vmem>>, vector<512x32xf32>,
    %c0_107 = arith.constant 0 : index
    %c2_108 = arith.constant 2 : index
    %c1_109 = arith.constant 1 : index
    %c0_110 = arith.constant 0 : index
    %100 = vector.load %arg0[%c0_107, %c2_108, %c1_109, %c0_110] : memref<2x18x18x4xf32, #tpu.memory_space<vmem>>, vector<1x16x16x4xf32>
    %101 = vector.shape_cast %100 : vector<1x16x16x4xf32> to vector<16x16x4xf32>
    %102 = vector.shape_cast %101 : vector<16x16x4xf32> to vector<256x4xf32>
    %c1_111 = arith.constant 1 : index
    %c2_112 = arith.constant 2 : index
    %c1_113 = arith.constant 1 : index
    %c0_114 = arith.constant 0 : index
    %103 = vector.load %arg0[%c1_111, %c2_112, %c1_113, %c0_114] : memref<2x18x18x4xf32, #tpu.memory_space<vmem>>, vector<1x16x16x4xf32>
    %104 = vector.shape_cast %103 : vector<1x16x16x4xf32> to vector<16x16x4xf32>
    %105 = vector.shape_cast %104 : vector<16x16x4xf32> to vector<256x4xf32>
    %106 = tpu.concatenate %102, %105 in 0 : vector<256x4xf32>, vector<256x4xf32> -> vector<512x4xf32>
    %107 = arith.truncf %106 : vector<512x4xf32> to vector<512x4xbf16>
    %c0_115 = arith.constant 0 : index
    %c0_116 = arith.constant 0 : index
    %108 = vector.load %arg6[%c0_115, %c0_116] : memref<512x32xf32, #tpu.memory_space<vmem>>, vector<512x32xf32>
    %c7 = arith.constant 7 : index
    %c0_117 = arith.constant 0 : index
    %c0_118 = arith.constant 0 : index
    %109 = vector.load %arg1[%c7, %c0_117, %c0_118] : memref<9x4x32xbf16, #tpu.memory_space<vmem>>, vector<1x4x32xbf16>
    %110 = vector.shape_cast %109 : vector<1x4x32xbf16> to vector<4x32xbf16>
    %cst_119 = arith.constant dense<0.000000e+00> : vector<512x32xf32>
    %111 = tpu.matmul %107, %110, %cst_119 {dimension_numbers = #tpu.dot_dimension_numbers<[1], [0], [0], [1], [0, 0, 1, 1], [], []>} : vector<512x4xbf16>, vector<4x32xbf16>, vector<512x32xf32> -> vector<512x32xf32>
    %112 = arith.addf %108, %111 : vector<512x32xf32>
    %c0_120 = arith.constant 0 : index
    %c0_121 = arith.constant 0 : index
    %113 = vector.load %arg6[%c0_120, %c0_121] : memref<512x32xf32, #tpu.memory_space<vmem>>, vector<512x32xf32>
    tpu.vector_store %arg6[%c0_120, %c0_121], %112 {strides = array<i32>} : memref<512x32xf32, #tpu.memory_space<vmem>>, vector<512x32xf32>,
    %c0_122 = arith.constant 0 : index
    %c2_123 = arith.constant 2 : index
    %c2_124 = arith.constant 2 : index
    %c0_125 = arith.constant 0 : index
    %114 = vector.load %arg0[%c0_122, %c2_123, %c2_124, %c0_125] : memref<2x18x18x4xf32, #tpu.memory_space<vmem>>, vector<1x16x16x4xf32>
    %115 = vector.shape_cast %114 : vector<1x16x16x4xf32> to vector<16x16x4xf32>
    %116 = vector.shape_cast %115 : vector<16x16x4xf32> to vector<256x4xf32>
    %c1_126 = arith.constant 1 : index
    %c2_127 = arith.constant 2 : index
    %c2_128 = arith.constant 2 : index
    %c0_129 = arith.constant 0 : index
    %117 = vector.load %arg0[%c1_126, %c2_127, %c2_128, %c0_129] : memref<2x18x18x4xf32, #tpu.memory_space<vmem>>, vector<1x16x16x4xf32>
    %118 = vector.shape_cast %117 : vector<1x16x16x4xf32> to vector<16x16x4xf32>
    %119 = vector.shape_cast %118 : vector<16x16x4xf32> to vector<256x4xf32>
    %120 = tpu.concatenate %116, %119 in 0 : vector<256x4xf32>, vector<256x4xf32> -> vector<512x4xf32>
    %121 = arith.truncf %120 : vector<512x4xf32> to vector<512x4xbf16>
    %c0_130 = arith.constant 0 : index
    %c0_131 = arith.constant 0 : index
    %122 = vector.load %arg6[%c0_130, %c0_131] : memref<512x32xf32, #tpu.memory_space<vmem>>, vector<512x32xf32>
    %c8 = arith.constant 8 : index
    %c0_132 = arith.constant 0 : index
    %c0_133 = arith.constant 0 : index
    %123 = vector.load %arg1[%c8, %c0_132, %c0_133] : memref<9x4x32xbf16, #tpu.memory_space<vmem>>, vector<1x4x32xbf16>
    %124 = vector.shape_cast %123 : vector<1x4x32xbf16> to vector<4x32xbf16>
    %cst_134 = arith.constant dense<0.000000e+00> : vector<512x32xf32>
    %125 = tpu.matmul %121, %124, %cst_134 {dimension_numbers = #tpu.dot_dimension_numbers<[1], [0], [0], [1], [0, 0, 1, 1], [], []>} : vector<512x4xbf16>, vector<4x32xbf16>, vector<512x32xf32> -> vector<512x32xf32>
    %126 = arith.addf %122, %125 : vector<512x32xf32>
    %c0_135 = arith.constant 0 : index
    %c0_136 = arith.constant 0 : index
    %127 = vector.load %arg6[%c0_135, %c0_136] : memref<512x32xf32, #tpu.memory_space<vmem>>, vector<512x32xf32>
    tpu.vector_store %arg6[%c0_135, %c0_136], %126 {strides = array<i32>} : memref<512x32xf32, #tpu.memory_space<vmem>>, vector<512x32xf32>,
    %c0_137 = arith.constant 0 : index
    %c0_138 = arith.constant 0 : index
    %128 = vector.load %arg6[%c0_137, %c0_138] : memref<512x32xf32, #tpu.memory_space<vmem>>, vector<256x32xf32>
    %c0_139 = arith.constant 0 : index
    %c0_140 = arith.constant 0 : index
    %129 = vector.load %arg2[%c0_139, %c0_140] : memref<1x32xf32, #tpu.memory_space<vmem>>, vector<1x32xf32>
    %130 = vector.broadcast %129 : vector<1x32xf32> to vector<256x32xf32>
    %131 = arith.addf %128, %130 : vector<256x32xf32>
    %cst_141 = arith.constant 0.000000e+00 : f32
    %132 = vector.broadcast %cst_141 : f32 to vector<256x32xf32>
    %133 = arith.maximumf %131, %132 : vector<256x32xf32>
    %cst_142 = arith.constant dense<0.000000e+00> : vector<32xf32>
    %134 = vector.multi_reduction <add>, %133, %cst_142 [0] : vector<256x32xf32> to vector<32xf32>
    %135 = vector.shape_cast %134 : vector<32xf32> to vector<1x32xf32>
    %c256 = arith.constant 256 : index
    %c0_143 = arith.constant 0 : index
    %136 = vector.load %arg6[%c256, %c0_143] : memref<512x32xf32, #tpu.memory_space<vmem>>, vector<256x32xf32>
    %c0_144 = arith.constant 0 : index
    %c0_145 = arith.constant 0 : index
    %137 = vector.load %arg2[%c0_144, %c0_145] : memref<1x32xf32, #tpu.memory_space<vmem>>, vector<1x32xf32>
    %138 = vector.broadcast %137 : vector<1x32xf32> to vector<256x32xf32>
    %139 = arith.addf %136, %138 : vector<256x32xf32>
    %cst_146 = arith.constant 0.000000e+00 : f32
    %140 = vector.broadcast %cst_146 : f32 to vector<256x32xf32>
    %141 = arith.maximumf %139, %140 : vector<256x32xf32>
    %cst_147 = arith.constant dense<0.000000e+00> : vector<32xf32>
    %142 = vector.multi_reduction <add>, %141, %cst_147 [0] : vector<256x32xf32> to vector<32xf32>
    %143 = vector.shape_cast %142 : vector<32xf32> to vector<1x32xf32>
    %144 = tpu.concatenate %135, %143 in 0 : vector<1x32xf32>, vector<1x32xf32> -> vector<2x32xf32>
    %cst_148 = arith.constant 3.906250e-03 : f32
    %145 = vector.broadcast %cst_148 : f32 to vector<2x32xf32>
    %146 = arith.mulf %144, %145 : vector<2x32xf32>
    %147 = arith.truncf %146 : vector<2x32xf32> to vector<2x32xbf16>
    %c0_149 = arith.constant 0 : index
    %c0_150 = arith.constant 0 : index
    %148 = vector.load %arg3[%c0_149, %c0_150] : memref<32x128xbf16, #tpu.memory_space<vmem>>, vector<32x128xbf16>
    %cst_151 = arith.constant dense<0.000000e+00> : vector<2x128xf32>
    %149 = tpu.matmul %147, %148, %cst_151 {dimension_numbers = #tpu.dot_dimension_numbers<[1], [0], [0], [1], [0, 0, 1, 1], [], []>} : vector<2x32xbf16>, vector<32x128xbf16>, vector<2x128xf32> -> vector<2x128xf32>
    %c0_152 = arith.constant 0 : index
    %c0_153 = arith.constant 0 : index
    %150 = vector.load %arg4[%c0_152, %c0_153] : memref<1x128xf32, #tpu.memory_space<vmem>>, vector<1x128xf32>
    %151 = vector.broadcast %150 : vector<1x128xf32> to vector<2x128xf32>
    %152 = arith.addf %149, %151 : vector<2x128xf32>
    %c0_154 = arith.constant 0 : index
    %c0_155 = arith.constant 0 : index
    %153 = vector.load %arg5[%c0_154, %c0_155] : memref<2x128xf32, #tpu.memory_space<vmem>>, vector<2x128xf32>
    tpu.vector_store %arg5[%c0_154, %c0_155], %152 {strides = array<i32>} : memref<2x128xf32, #tpu.memory_space<vmem>>, vector<2x128xf32>,
    return
  }
}

</mosaic_0001>

<bundles_post_ra>
// kernel: _forward_impl.1
= control target key start
LH: loop header
LB: loop body
LE: loop exit
PB: predicated region body
PF: predicated region fallthrough
CT: control target
= control target key end

     0   :  { %vm346_vm0 = vcmask 1041408   ;;  %vm249_vm1 = vcmask 31744   ;;  %s9457_s0 = inlined_call_operand.vmem [shape: f32[2,18,18,4], index: 0, kind: input, shape index: {}]   ;;  %s9458_s1 = inlined_call_operand.vmem [shape: bf16[9,4,32], index: 1, kind: input, shape index: {}]   ;;  %s9459_s2 = inlined_call_operand.vmem [shape: f32[1,32], index: 2, kind: input, shape index: {}]   ;;  %s9460_s3 = inlined_call_operand.vmem [shape: bf16[32,128], index: 3, kind: input, shape index: {}]   ;;  %s9461_s4 = inlined_call_operand.vmem [shape: f32[1,128], index: 4, kind: input, shape index: {}]   ;;  %s9462_s5 = inlined_call_operand.hbm [shape: f32[2,128], index: 5, kind: output, shape index: {}]  }
   0x1   :  { %v248_v0 = vld [vmem:[%s9458_s1] sm:$0x3]  ;;  %v105_v1 = vld [vmem:[%s9457_s0 + $0xd8] sm:$0xff]  ;;  %v115_v5 = vld [vmem:[%s9457_s0 + $0x150] sm:$0xff] }
   0x2   :  { %v106_v2 = vld [vmem:[%s9457_s0 + $0xe0] sm:$0xff]  ;;  %v348_v3 = vsel %vm346_vm0, %v248_v0, 0  ;;  %v116_v6 = vld [vmem:[%s9457_s0 + $0x158] sm:$0xff]  ;;  %v88_v16 = vld [vmem:[%s9457_s0 + $0x8] sm:$0xff] }
   0x3   :  { %v161_v4 = vpack.c.bf16 %v106_v2, %v105_v1  ;;  %v5667_v7 = vld [vmem:[%s9458_s1 + $0x4] sm:$0x3]  ;;  %6293 = vmatpush.bf16.msra.mxu1 %v348_v3  ;;  %6294 = vmatpush.bf16.msra.mxu2 %v348_v3  ;;  %v166_v8 = vpack.c.bf16 %v116_v6, %v115_v5  ;;  %v5520_v10 = vld [vmem:[%s9457_s0 + $0x258] sm:$0xff]  ;;  %v5764_v12 = vld [vmem:[%s9458_s1 + $0x6] sm:$0x3] }
   0x4   :  { %v1464_v9 = vsel %vm346_vm0, %v5667_v7, 0  ;;  %v5521_v11 = vld [vmem:[%s9457_s0 + $0x260] sm:$0xff]  ;;  %6295 = vmatpush.bf16.msra.mxu3 %v348_v3  ;;  %v2024_v14 = vsel %vm346_vm0, %v5764_v12, 0  ;;  %357 = vmatpush.bf16.msra.mxu0 %v348_v3  ;;  %v5861_v18 = vld [vmem:[%s9458_s1 + $0x8] sm:$0x3] }
   0x5   :  { %v175_v13 = vpack.c.bf16 %v5521_v11, %v5520_v10  ;;  %v87_v15 = vld [vmem:[%s9457_s0] sm:$0xff]  ;;  %v2582_v19 = vsel %vm346_vm0, %v5861_v18, 0 }
   0x6   :  { %5547 = vmatmul.msk.bf16.vlgmr.msra.gmra.mxu1 %vm249_vm1, %v161_v4  ;;  %5552 = vmatmul.msk.bf16.vlgmr.msra.gmra.mxu2 %vm249_vm1, %v166_v8  ;;  %v152_v17 = vpack.c.bf16 %v88_v16, %v87_v15 }
   0x7   :  { %1473 = vmatpush.bf16.msrb.mxu2 %v1464_v9  ;;  %5561 = vmatmul.msk.bf16.vlgmr.msra.gmra.mxu3 %vm249_vm1, %v175_v13 }
   0x8   :  { %2033 = vmatpush.bf16.msrb.mxu3 %v2024_v14  ;;  %5538 = vmatmul.msk.bf16.vlgmr.msra.gmra.mxu0 %vm249_vm1, %v152_v17 }
   0x9   :  { %2591 = vmatpush.bf16.msrb.mxu0 %v2582_v19 }
   0xa   :  { %10 = vsyncpa [#allocation4], 0  ;;  %v107_v20 = vld [vmem:[%s9457_s0 + $0xf0] sm:$0xff]  ;;  %v108_v21 = vld [vmem:[%s9457_s0 + $0xf8] sm:$0xff]  ;;  %vm22_vm2 = vcmask 261120   ;;  %v6326_v18 = vmov 0.0  }
   0xb   :  { %v117_v22 = vld [vmem:[%s9457_s0 + $0x168] sm:$0xff]  ;;  %v118_v23 = vld [vmem:[%s9457_s0 + $0x170] sm:$0xff]  ;;  %v5523_v25 = vld [vmem:[%s9457_s0 + $0x278] sm:$0xff]  ;;  %v162_v28 = vpack.c.bf16 %v108_v21, %v107_v20  ;;  %41 = vst.msk [vmem:[#allocation2 + $0x90] sm:$0xff] %vm22_vm2, %v6326_v18  ;;  %vm5449_vm3 = vcmask 1040384   ;;  %s6327_s16 = smov [#allocation3]  }
   0xc   :  { %v5522_v24 = vld [vmem:[%s9457_s0 + $0x270] sm:$0xff]  ;;  %v89_v26 = vld [vmem:[%s9457_s0 + $0x18] sm:$0xff]  ;;  %v90_v27 = vld [vmem:[%s9457_s0 + $0x20] sm:$0xff]  ;;  %v167_v29 = vpack.c.bf16 %v118_v23, %v117_v22  ;;  %23 = vst.msk [vmem:[#allocation2] sm:$0xff] %vm22_vm2, %v6326_v18  ;;  %s5495_s17 = sshll.u32 %s6327_s16, 4  ;;  %s5497_s20 = sshll.u32 %s9462_s5, 4  ;;  %s5496_s17 = int_to_ptr.vmem [resolvable:$true] %s5495_s17  ;;  %s5498_s20 = int_to_ptr.hbm [resolvable:$true] %s5497_s20 }
   0xd   :  { %v176_v30 = vpack.c.bf16 %v5523_v25, %v5522_v24  ;;  %v6426_v31 = vpack.c.bf16 %v90_v27, %v89_v26  ;;  %v5602_v32 = vld [vmem:[%s9458_s1 + $0x2] sm:$0x3]  ;;  %v109_v34 = vld [vmem:[%s9457_s0 + $0x108] sm:$0xff]  ;;  %v110_v35 = vld [vmem:[%s9457_s0 + $0x110] sm:$0xff]  ;;  %24 = vst.msk [vmem:[#allocation2 + $0x8] sm:$0xff] %vm22_vm2, %v6326_v18 }
   0xe   :  { %v906_v33 = vsel %vm346_vm0, %v5602_v32, 0  ;;  %v5506_v36 = vld [vmem:[%s9457_s0 + $0x1b0] sm:$0xff]  ;;  %v5507_v37 = vld [vmem:[%s9457_s0 + $0x1b8] sm:$0xff]  ;;  %v5524_v38 = vld [vmem:[%s9457_s0 + $0x288] sm:$0xff]  ;;  %v163_v42 = vpack.c.bf16 %v110_v35, %v109_v34  ;;  %25 = vst.msk [vmem:[#allocation2 + $0x10] sm:$0xff] %vm22_vm2, %v6326_v18 }
   0xf   :  { %915 = vmatpush.bf16.msrb.mxu1 %v906_v33  ;;  %v5525_v39 = vld [vmem:[%s9457_s0 + $0x290] sm:$0xff]  ;;  %v92_v41 = vld [vmem:[%s9457_s0 + $0x38] sm:$0xff]  ;;  %v168_v43 = vpack.c.bf16 %v5507_v37, %v5506_v36  ;;  %v111_v46 = vld [vmem:[%s9457_s0 + $0x120] sm:$0xff]  ;;  %26 = vst.msk [vmem:[#allocation2 + $0x18] sm:$0xff] %vm22_vm2, %v6326_v18 }
  0x10   :  { %v91_v40 = vld [vmem:[%s9457_s0 + $0x30] sm:$0xff]  ;;  %v177_v44 = vpack.c.bf16 %v5525_v39, %v5524_v38  ;;  %v112_v47 = vld [vmem:[%s9457_s0 + $0x128] sm:$0xff]  ;;  %v5526_v50 = vld [vmem:[%s9457_s0 + $0x2a0] sm:$0xff]  ;;  %27 = vst.msk [vmem:[#allocation2 + $0x20] sm:$0xff] %vm22_vm2, %v6326_v18 }
  0x11   :  { %v6461_v45 = vpack.c.bf16 %v92_v41, %v91_v40  ;;  %v5508_v48 = vld [vmem:[%s9457_s0 + $0x1c8] sm:$0xff]  ;;  %v5509_v49 = vld [vmem:[%s9457_s0 + $0x1d0] sm:$0xff]  ;;  %v164_v54 = vpack.c.bf16 %v112_v47, %v111_v46  ;;  %v113_v58 = vld [vmem:[%s9457_s0 + $0x138] sm:$0xff]  ;;  %28 = vst.msk [vmem:[#allocation2 + $0x28] sm:$0xff] %vm22_vm2, %v6326_v18 }
  0x12   :  { %v5527_v51 = vld [vmem:[%s9457_s0 + $0x2a8] sm:$0xff]  ;;  %v94_v53 = vld [vmem:[%s9457_s0 + $0x50] sm:$0xff]  ;;  %v169_v55 = vpack.c.bf16 %v5509_v49, %v5508_v48  ;;  %v114_v59 = vld [vmem:[%s9457_s0 + $0x140] sm:$0xff]  ;;  %29 = vst.msk [vmem:[#allocation2 + $0x30] sm:$0xff] %vm22_vm2, %v6326_v18 }
  0x13   :  { %v93_v52 = vld [vmem:[%s9457_s0 + $0x48] sm:$0xff]  ;;  %v178_v56 = vpack.c.bf16 %v5527_v51, %v5526_v50  ;;  %v5510_v60 = vld [vmem:[%s9457_s0 + $0x1e0] sm:$0xff]  ;;  %v5528_v62 = vld [vmem:[%s9457_s0 + $0x2b8] sm:$0xff]  ;;  %v165_v2 = vpack.c.bf16 %v114_v59, %v113_v58  ;;  %30 = vst.msk [vmem:[#allocation2 + $0x38] sm:$0xff] %vm22_vm2, %v6326_v18 }
  0x14   :  { %v6492_v57 = vpack.c.bf16 %v94_v53, %v93_v52  ;;  %v5511_v61 = vld [vmem:[%s9457_s0 + $0x1e8] sm:$0xff]  ;;  %v5529_v63 = vld [vmem:[%s9457_s0 + $0x2c0] sm:$0xff]  ;;  %v5512_v6 = vld [vmem:[%s9457_s0 + $0x1f8] sm:$0xff]  ;;  %31 = vst.msk [vmem:[#allocation2 + $0x40] sm:$0xff] %vm22_vm2, %v6326_v18 }
  0x15   :  { %v95_v0 = vld [vmem:[%s9457_s0 + $0x60] sm:$0xff]  ;;  %v96_v1 = vld [vmem:[%s9457_s0 + $0x68] sm:$0xff]  ;;  %v170_v3 = vpack.c.bf16 %v5511_v61, %v5510_v60  ;;  %v179_v4 = vpack.c.bf16 %v5529_v63, %v5528_v62  ;;  %v5530_v10 = vld [vmem:[%s9457_s0 + $0x2d0] sm:$0xff]  ;;  %32 = vst.msk [vmem:[#allocation2 + $0x48] sm:$0xff] %vm22_vm2, %v6326_v18 }
  0x16   :  { %5548 = vmatmul.msk.bf16.gmra.mxu1 %vm249_vm1, %v162_v28  ;;  %5553 = vmatmul.msk.bf16.gmra.mxu2 %vm249_vm1, %v167_v29  ;;  %v6523_v5 = vpack.c.bf16 %v96_v1, %v95_v0  ;;  %v5513_v7 = vld [vmem:[%s9457_s0 + $0x200] sm:$0xff]  ;;  %v648_v9 = vld [vmem:[%s9457_s0 + $0x9] sm:$0xff]  ;;  %v5531_v11 = vld [vmem:[%s9457_s0 + $0x2d8] sm:$0xff]  ;;  %33 = vst.msk [vmem:[#allocation2 + $0x50] sm:$0xff] %vm22_vm2, %v6326_v18 }
  0x17   :  { %5562 = vmatmul.msk.bf16.gmra.mxu3 %vm249_vm1, %v176_v30  ;;  %v647_v8 = vld [vmem:[%s9457_s0 + $0x1] sm:$0xff]  ;;  %v97_v12 = vld [vmem:[%s9457_s0 + $0x78] sm:$0xff]  ;;  %v171_v14 = vpack.c.bf16 %v5513_v7, %v5512_v6  ;;  %v180_v16 = vpack.c.bf16 %v5531_v11, %v5530_v10  ;;  %v5514_v19 = vld [vmem:[%s9457_s0 + $0x210] sm:$0xff]  ;;  %34 = vst.msk [vmem:[#allocation2 + $0x58] sm:$0xff] %vm22_vm2, %v6326_v18 }
  0x18   :  { %5539 = vmatmul.msk.bf16.gmra.mxu0 %vm249_vm1, %v6426_v31  ;;  %v98_v13 = vld [vmem:[%s9457_s0 + $0x80] sm:$0xff]  ;;  %v711_v15 = vpack.c.bf16 %v648_v9, %v647_v8  ;;  %v5515_v20 = vld [vmem:[%s9457_s0 + $0x218] sm:$0xff]  ;;  %v5532_v23 = vld [vmem:[%s9457_s0 + $0x2e8] sm:$0xff]  ;;  %35 = vst.msk [vmem:[#allocation2 + $0x60] sm:$0xff] %vm22_vm2, %v6326_v18 }
  0x19   :  { %v6554_v17 = vpack.c.bf16 %v98_v13, %v97_v12  ;;  %v649_v21 = vld [vmem:[%s9457_s0 + $0x19] sm:$0xff]  ;;  %v650_v22 = vld [vmem:[%s9457_s0 + $0x21] sm:$0xff]  ;;  %v5533_v24 = vld [vmem:[%s9457_s0 + $0x2f0] sm:$0xff]  ;;  %v172_v27 = vpack.c.bf16 %v5515_v20, %v5514_v19  ;;  %36 = vst.msk [vmem:[#allocation2 + $0x68] sm:$0xff] %vm22_vm2, %v6326_v18 }
  0x1a   :  { %v99_v25 = vld [vmem:[%s9457_s0 + $0x90] sm:$0xff]  ;;  %v100_v26 = vld [vmem:[%s9457_s0 + $0x98] sm:$0xff]  ;;  %v6605_v28 = vpack.c.bf16 %v650_v22, %v649_v21  ;;  %v181_v29 = vpack.c.bf16 %v5533_v24, %v5532_v23  ;;  %37 = vst.msk [vmem:[#allocation2 + $0x70] sm:$0xff] %vm22_vm2, %v6326_v18  ;;  %v5516_v32 = vld [vmem:[%s9457_s0 + $0x228] sm:$0xff] }
  0x1b   :  { %v6611_v30 = vpack.c.bf16 %v100_v26, %v99_v25  ;;  %38 = vst.msk [vmem:[#allocation2 + $0x78] sm:$0xff] %vm22_vm2, %v6326_v18  ;;  %v5517_v33 = vld [vmem:[%s9457_s0 + $0x230] sm:$0xff]  ;;  %v652_v35 = vld [vmem:[%s9457_s0 + $0x39] sm:$0xff]  ;;  %v5535_v37 = vld [vmem:[%s9457_s0 + $0x308] sm:$0xff] }
  0x1c   :  { %39 = vst.msk [vmem:[#allocation2 + $0x80] sm:$0xff] %vm22_vm2, %v6326_v18  ;;  %v651_v34 = vld [vmem:[%s9457_s0 + $0x31] sm:$0xff]  ;;  %v5534_v36 = vld [vmem:[%s9457_s0 + $0x300] sm:$0xff]  ;;  %v101_v38 = vld [vmem:[%s9457_s0 + $0xa8] sm:$0xff]  ;;  %v173_v40 = vpack.c.bf16 %v5517_v33, %v5516_v32 }
  0x1d   :  { %40 = vst.msk [vmem:[#allocation2 + $0x88] sm:$0xff] %vm22_vm2, %v6326_v18  ;;  %v102_v39 = vld [vmem:[%s9457_s0 + $0xb0] sm:$0xff]  ;;  %v6671_v41 = vpack.c.bf16 %v652_v35, %v651_v34  ;;  %v5518_v47 = vld [vmem:[%s9457_s0 + $0x240] sm:$0xff]  ;;  %v5519_v48 = vld [vmem:[%s9457_s0 + $0x248] sm:$0xff] }
  0x1e   :  { %42 = vst.msk [vmem:[#allocation2 + $0x98] sm:$0xff] %vm22_vm2, %v6326_v18  ;;  %v653_v49 = vld [vmem:[%s9457_s0 + $0x49] sm:$0xff]  ;;  %v654_v50 = vld [vmem:[%s9457_s0 + $0x51] sm:$0xff]  ;;  %v5537_v52 = vld [vmem:[%s9457_s0 + $0x320] sm:$0xff]  ;;  %v174_v59 = vpack.c.bf16 %v5519_v48, %v5518_v47 }
  0x1f   :  { %43 = vst.msk [vmem:[#allocation2 + $0xa0] sm:$0xff] %vm22_vm2, %v6326_v18  ;;  %v5536_v51 = vld [vmem:[%s9457_s0 + $0x318] sm:$0xff]  ;;  %v6055_v53 = vld [vmem:[%s9458_s1 + $0xc] sm:$0x3]  ;;  %v6747_v60 = vpack.c.bf16 %v654_v50, %v653_v49  ;;  %v6152_v63 = vld [vmem:[%s9458_s1 + $0xe] sm:$0x3] }
  0x20   :  { %44 = vst.msk [vmem:[#allocation2 + $0xa8] sm:$0xff] %vm22_vm2, %v6326_v18  ;;  %v104_v58 = vld [vmem:[%s9457_s0 + $0xc8] sm:$0xff]  ;;  %v183_v62 = vpack.c.bf16 %v5537_v52, %v5536_v51  ;;  %v6249_v10 = vld [vmem:[%s9458_s1 + $0x10] sm:$0x3]  ;;  %v657_v52 = vld [vmem:[%s9457_s0 + $0x79] sm:$0xff] }
  0x21   :  { %45 = vst.msk [vmem:[#allocation2 + $0xb0] sm:$0xff] %vm22_vm2, %v6326_v18  ;;  %v655_v9 = vld [vmem:[%s9457_s0 + $0x61] sm:$0xff]  ;;  %v656_v11 = vld [vmem:[%s9457_s0 + $0x69] sm:$0xff] }
  0x22   :  { %46 = vst.msk [vmem:[#allocation2 + $0xb8] sm:$0xff] %vm22_vm2, %v6326_v18  ;;  %v1205_v12 = vld [vmem:[%s9457_s0 + $0x2] sm:$0xff]  ;;  %v1206_v13 = vld [vmem:[%s9457_s0 + $0xa] sm:$0xff]  ;;  %v6812_v20 = vpack.c.bf16 %v656_v11, %v655_v9 }
  0x23   :  { %47 = vst.msk [vmem:[#allocation2 + $0xc0] sm:$0xff] %vm22_vm2, %v6326_v18  ;;  %v1269_v21 = vpack.c.bf16 %v1206_v13, %v1205_v12  ;;  %v188_v9 = vld [vmem:[#allocation2 + $0x20] sm:$0xff] }
  0x24   :  { %48 = vst.msk [vmem:[#allocation2 + $0xc8] sm:$0xff] %vm22_vm2, %v6326_v18 }
  0x25   :  { %49 = vst.msk [vmem:[#allocation2 + $0xd0] sm:$0xff] %vm22_vm2, %v6326_v18  ;;  %v203_v22 = vld [vmem:[#allocation2 + $0x98] sm:$0xff] }
  0x26   :  { %5549 = vmatmul.msk.bf16.gmra.mxu1 %vm249_vm1, %v163_v42  ;;  %5554 = vmatmul.msk.bf16.gmra.mxu2 %vm249_vm1, %v168_v43  ;;  %v182_v42 = vpack.c.bf16 %v5535_v37, %v5534_v36  ;;  %50 = vst.msk [vmem:[#allocation2 + $0xd8] sm:$0xff] %vm22_vm2, %v6326_v18  ;;  %v6679_v43 = vpack.c.bf16 %v102_v39, %v101_v38  ;;  %v204_v32 = vld [vmem:[#allocation2 + $0xa0] sm:$0xff] }
  0x27   :  { %5563 = vmatmul.msk.bf16.gmra.mxu3 %vm249_vm1, %v177_v44  ;;  %51 = vst.msk [vmem:[#allocation2 + $0xe0] sm:$0xff] %vm22_vm2, %v6326_v18  ;;  %v5958_v44 = vld [vmem:[%s9458_s1 + $0xa] sm:$0x3]  ;;  %v184_v36 = vld [vmem:[#allocation2] sm:$0xff] }
  0x28   :  { %5540 = vmatmul.msk.bf16.gmra.mxu0 %vm249_vm1, %v6461_v45  ;;  %52 = vst.msk [vmem:[#allocation2 + $0xe8] sm:$0xff] %vm22_vm2, %v6326_v18  ;;  %v3140_v46 = vsel %vm346_vm0, %v5958_v44, 0 }
  0x29   :  { %53 = vst.msk [vmem:[#allocation2 + $0xf0] sm:$0xff] %vm22_vm2, %v6326_v18  ;;  %3149 = vmatpush.bf16.msra.mxu1 %v3140_v46 }
  0x2a   :  { %54 = vst.msk [vmem:[#allocation2 + $0xf8] sm:$0xff] %vm22_vm2, %v6326_v18 }
  0x2b   :  { %55 = vst.msk [vmem:[#allocation2 + $0x100] sm:$0xff] %vm22_vm2, %v6326_v18 }
  0x2c   :  { %56 = vst.msk [vmem:[#allocation2 + $0x108] sm:$0xff] %vm22_vm2, %v6326_v18 }
  0x2d   :  { %57 = vst.msk [vmem:[#allocation2 + $0x110] sm:$0xff] %vm22_vm2, %v6326_v18 }
  0x2e   :  { %58 = vst.msk [vmem:[#allocation2 + $0x118] sm:$0xff] %vm22_vm2, %v6326_v18 }
  0x2f   :  { %59 = vst.msk [vmem:[#allocation2 + $0x120] sm:$0xff] %vm22_vm2, %v6326_v18  ;;  %v213_v26 = vld [vmem:[#allocation2 + $0xe8] sm:$0xff] }
  0x30   :  { %60 = vst.msk [vmem:[#allocation2 + $0x128] sm:$0xff] %vm22_vm2, %v6326_v18  ;;  %v214_v38 = vld [vmem:[#allocation2 + $0xf0] sm:$0xff] }
  0x31   :  { %61 = vst.msk [vmem:[#allocation2 + $0x130] sm:$0xff] %vm22_vm2, %v6326_v18  ;;  %v215_v51 = vld [vmem:[#allocation2 + $0xf8] sm:$0xff] }
  0x32   :  { %62 = vst.msk [vmem:[#allocation2 + $0x138] sm:$0xff] %vm22_vm2, %v6326_v18 }
  0x33   :  { %63 = vst.msk [vmem:[#allocation2 + $0x140] sm:$0xff] %vm22_vm2, %v6326_v18 }
  0x34   :  { %64 = vst.msk [vmem:[#allocation2 + $0x148] sm:$0xff] %vm22_vm2, %v6326_v18 }
  0x35   :  { %65 = vst.msk [vmem:[#allocation2 + $0x150] sm:$0xff] %vm22_vm2, %v6326_v18 }
  0x36   :  { %5550 = vmatmul.msk.bf16.gmra.mxu1 %vm249_vm1, %v164_v54  ;;  %5555 = vmatmul.msk.bf16.gmra.mxu2 %vm249_vm1, %v169_v55  ;;  %v202_v54 = vld [vmem:[#allocation2 + $0x90] sm:$0xff]  ;;  %v3700_v55 = vsel %vm346_vm0, %v6055_v53, 0  ;;  %66 = vst.msk [vmem:[#allocation2 + $0x158] sm:$0xff] %vm22_vm2, %v6326_v18 }
  0x37   :  { %5564 = vmatmul.msk.bf16.gmra.mxu3 %vm249_vm1, %v178_v56  ;;  %v103_v56 = vld [vmem:[%s9457_s0 + $0xc0] sm:$0xff]  ;;  %3709 = vmatpush.bf16.msra.mxu2 %v3700_v55  ;;  %67 = vst.msk [vmem:[#allocation2 + $0x160] sm:$0xff] %vm22_vm2, %v6326_v18 }
  0x38   :  { %5541 = vmatmul.msk.bf16.gmra.mxu0 %vm249_vm1, %v6492_v57  ;;  %v6756_v1 = vpack.c.bf16 %v104_v58, %v103_v56  ;;  %68 = vst.msk [vmem:[#allocation2 + $0x168] sm:$0xff] %vm22_vm2, %v6326_v18  ;;  %v1207_v55 = vld [vmem:[%s9457_s0 + $0x1a] sm:$0xff]  ;;  %v1208_v56 = vld [vmem:[%s9457_s0 + $0x22] sm:$0xff] }
  0x39   :  { %69 = vst.msk [vmem:[#allocation2 + $0x170] sm:$0xff] %vm22_vm2, %v6326_v18 }
  0x3a   :  { %70 = vst.msk [vmem:[#allocation2 + $0x178] sm:$0xff] %vm22_vm2, %v6326_v18 }
  0x3b   :  { %71 = vst.msk [vmem:[#allocation2 + $0x180] sm:$0xff] %vm22_vm2, %v6326_v18 }
  0x3c   :  { %72 = vst.msk [vmem:[#allocation2 + $0x188] sm:$0xff] %vm22_vm2, %v6326_v18 }
  0x3d   :  { %73 = vst.msk [vmem:[#allocation2 + $0x190] sm:$0xff] %vm22_vm2, %v6326_v18 }
  0x3e   :  { %74 = vst.msk [vmem:[#allocation2 + $0x198] sm:$0xff] %vm22_vm2, %v6326_v18 }
  0x3f   :  { %75 = vst.msk [vmem:[#allocation2 + $0x1a0] sm:$0xff] %vm22_vm2, %v6326_v18 }
  0x40   :  { %76 = vst.msk [vmem:[#allocation2 + $0x1a8] sm:$0xff] %vm22_vm2, %v6326_v18  ;;  %v230_v24 = vld [vmem:[#allocation2 + $0x170] sm:$0xff] }
  0x41   :  { %77 = vst.msk [vmem:[#allocation2 + $0x1b0] sm:$0xff] %vm22_vm2, %v6326_v18  ;;  %v231_v34 = vld [vmem:[#allocation2 + $0x178] sm:$0xff] }
  0x42   :  { %78 = vst.msk [vmem:[#allocation2 + $0x1b8] sm:$0xff] %vm22_vm2, %v6326_v18  ;;  %v232_v46 = vld [vmem:[#allocation2 + $0x180] sm:$0xff] }
  0x43   :  { %79 = vst.msk [vmem:[#allocation2 + $0x1c0] sm:$0xff] %vm22_vm2, %v6326_v18  ;;  %v233_v58 = vld [vmem:[#allocation2 + $0x188] sm:$0xff] }
  0x44   :  { %80 = vst.msk [vmem:[#allocation2 + $0x1c8] sm:$0xff] %vm22_vm2, %v6326_v18 }
  0x45   :  { %81 = vst.msk [vmem:[#allocation2 + $0x1d0] sm:$0xff] %vm22_vm2, %v6326_v18 }
  0x46   :  { %5551 = vmatmul.msk.bf16.gmra.mxu1 %vm249_vm1, %v165_v2  ;;  %5556 = vmatmul.msk.bf16.gmra.mxu2 %vm249_vm1, %v170_v3  ;;  %v4258_v2 = vsel %vm346_vm0, %v6152_v63, 0  ;;  %82 = vst.msk [vmem:[#allocation2 + $0x1d8] sm:$0xff] %vm22_vm2, %v6326_v18  ;;  %v187_v63 = vld [vmem:[#allocation2 + $0x18] sm:$0xff] }
  0x47   :  { %5565 = vmatmul.msk.bf16.gmra.mxu3 %vm249_vm1, %v179_v4  ;;  %83 = vst.msk [vmem:[#allocation2 + $0x1e0] sm:$0xff] %vm22_vm2, %v6326_v18 }
  0x48   :  { %5542 = vmatmul.msk.bf16.gmra.mxu0 %vm249_vm1, %v6523_v5  ;;  %4267 = vmatpush.bf16.msra.mxu3 %v4258_v2  ;;  %84 = vst.msk [vmem:[#allocation2 + $0x1e8] sm:$0xff] %vm22_vm2, %v6326_v18 }
  0x49   :  { %85 = vst.msk [vmem:[#allocation2 + $0x1f0] sm:$0xff] %vm22_vm2, %v6326_v18 }
  0x4a   :  { %86 = vst.msk [vmem:[#allocation2 + $0x1f8] sm:$0xff] %vm22_vm2, %v6326_v18 }
  0x56   :  { %5557 = vmatmul.msk.bf16.gmra.mxu2 %vm249_vm1, %v171_v14  ;;  %5603 = vmatmul.msk.bf16.vlgmr.msrb.gmra.mxu1 %vm249_vm1, %v711_v15  ;;  %v4816_v14 = vsel %vm346_vm0, %v6249_v10, 0 }
  0x57   :  { %5566 = vmatmul.msk.bf16.gmra.mxu3 %vm249_vm1, %v180_v16  ;;  %4825 = vmatpush.bf16.msra.mxu0 %v4816_v14  ;;  %v212_v16 = vld [vmem:[#allocation2 + $0xe0] sm:$0xff] }
  0x58   :  { %5543 = vmatmul.msk.bf16.gmra.mxu0 %vm249_vm1, %v6554_v17  ;;  %v216_v14 = vld [vmem:[#allocation2 + $0x100] sm:$0xff] }
  0x66   :  { %5558 = vmatmul.msk.bf16.gmra.mxu2 %vm249_vm1, %v172_v27  ;;  %5604 = vmatmul.msk.bf16.gmra.mxu1 %vm249_vm1, %v6605_v28 }
  0x67   :  { %5567 = vmatmul.msk.bf16.gmra.mxu3 %vm249_vm1, %v181_v29 }
  0x68   :  { %5544 = vmatmul.msk.bf16.gmra.mxu0 %vm249_vm1, %v6611_v30 }
  0x76   :  { %5559 = vmatmul.msk.bf16.gmra.mxu2 %vm249_vm1, %v173_v40  ;;  %5605 = vmatmul.msk.bf16.gmra.mxu1 %vm249_vm1, %v6671_v41 }
  0x77   :  { %5568 = vmatmul.msk.bf16.gmra.mxu3 %vm249_vm1, %v182_v42  ;;  %v205_v42 = vld [vmem:[#allocation2 + $0xa8] sm:$0xff] }
  0x78   :  { %5545 = vmatmul.msk.bf16.gmra.mxu0 %vm249_vm1, %v6679_v43 }
  0x83   :  { %v404_v61 = vpop.f32.mrf.mxu1 }
  0x84   :  { %v537_v0 = vadd.f32 %v404_v61, %v202_v54  ;;  %v658_v54 = vld [vmem:[%s9457_s0 + $0x81] sm:$0xff] }
  0x85   :  { %v6761_v3 = vpop.f32.mrf.mxu0 }
  0x86   :  { %601 = vst.msk [vmem:[#allocation2 + $0x90] sm:$0xff] %vm22_vm2, %v537_v0  ;;  %5560 = vmatmul.msk.bf16.gmra.mxu2 %vm249_vm1, %v174_v59  ;;  %5606 = vmatmul.msk.bf16.gmra.mxu1 %vm249_vm1, %v6747_v60  ;;  %v186_v59 = vld [vmem:[#allocation2 + $0x10] sm:$0xff] }
  0x87   :  { %5569 = vmatmul.msk.bf16.gmra.mxu3 %vm249_vm1, %v183_v62  ;;  %v206_v62 = vld [vmem:[#allocation2 + $0xb0] sm:$0xff] }
  0x88   :  { %5546 = vmatmul.msk.bf16.gmra.mxu0 %vm249_vm1, %v6756_v1 }
  0x89   :  { %v429_v4 = vpop.f32.mrf.mxu2 }
  0x8a   :  { %v474_v6 = vpop.f32.mrf.mxu3  ;;  %v547_v25 = vadd.f32 %v429_v4, %v212_v16  ;;  %v1270_v4 = vpack.c.bf16 %v1208_v56, %v1207_v55  ;;  %v191_v56 = vld [vmem:[#allocation2 + $0x38] sm:$0xff] }
  0x8b   :  { %v406_v7 = vpop.f32.mrf.mxu1  ;;  %v565_v33 = vadd.f32 %v474_v6, %v230_v24 }
  0x8c   :  { %v538_v29 = vadd.f32 %v406_v7, %v203_v22  ;;  %611 = vst.msk [vmem:[#allocation2 + $0xe0] sm:$0xff] %vm22_vm2, %v547_v25  ;;  %v189_v25 = vld [vmem:[#allocation2 + $0x28] sm:$0xff] }
  0x8d   :  { %v6784_v8 = vpop.f32.mrf.mxu0  ;;  %629 = vst.msk [vmem:[#allocation2 + $0x170] sm:$0xff] %vm22_vm2, %v565_v33  ;;  %v1209_v33 = vld [vmem:[%s9457_s0 + $0x32] sm:$0xff] }
  0x8e   :  { %602 = vst.msk [vmem:[#allocation2 + $0x98] sm:$0xff] %vm22_vm2, %v538_v29 }
  0x91   :  { %v431_v15 = vpop.f32.mrf.mxu2 }
  0x92   :  { %v476_v19 = vpop.f32.mrf.mxu3  ;;  %v548_v35 = vadd.f32 %v431_v15, %v213_v26  ;;  %v234_v15 = vld [vmem:[#allocation2 + $0x190] sm:$0xff] }
  0x93   :  { %v409_v23 = vpop.f32.mrf.mxu1  ;;  %v566_v40 = vadd.f32 %v476_v19, %v231_v34  ;;  %v207_v19 = vld [vmem:[#allocation2 + $0xb8] sm:$0xff] }
  0x94   :  { %v539_v37 = vadd.f32 %v409_v23, %v204_v32  ;;  %612 = vst.msk [vmem:[#allocation2 + $0xe8] sm:$0xff] %vm22_vm2, %v548_v35  ;;  %v660_v32 = vld [vmem:[%s9457_s0 + $0x99] sm:$0xff] }
  0x95   :  { %v364_v27 = vpop.f32.mrf.mxu0  ;;  %630 = vst.msk [vmem:[#allocation2 + $0x178] sm:$0xff] %vm22_vm2, %v566_v40  ;;  %v1210_v34 = vld [vmem:[%s9457_s0 + $0x3a] sm:$0xff] }
  0x96   :  { %5607 = vmatmul.msk.bf16.gmra.mxu1 %vm249_vm1, %v6812_v20  ;;  %5668 = vmatmul.msk.bf16.vlgmr.msrb.gmra.mxu2 %vm249_vm1, %v1269_v21  ;;  %603 = vst.msk [vmem:[#allocation2 + $0xa0] sm:$0xff] %vm22_vm2, %v539_v37  ;;  %v235_v35 = vld [vmem:[#allocation2 + $0x198] sm:$0xff]  ;;  %v208_v37 = vld [vmem:[#allocation2 + $0xc0] sm:$0xff] }
  0x97   :  { %5765 = vmatmul.msk.bf16.vlgmr.msrb.gmra.mxu3 %vm249_vm1, %v6426_v31  ;;  %v519_v31 = vadd.f32 %v6761_v3, %v184_v36  ;;  %v6857_v3 = vpack.c.bf16 %v658_v54, %v657_v52 }
  0x98   :  { %5862 = vmatmul.msk.bf16.vlgmr.msrb.gmra.mxu0 %vm249_vm1, %v6605_v28  ;;  %v185_v28 = vld [vmem:[#allocation2 + $0x8] sm:$0xff] }
  0x99   :  { %v434_v39 = vpop.f32.mrf.mxu2  ;;  %583 = vst.msk [vmem:[#allocation2] sm:$0xff] %vm22_vm2, %v519_v31  ;;  %v520_v53 = vadd.f32 %v6784_v8, %v185_v28  ;;  %v521_v8 = vadd.f32 %v364_v27, %v186_v59  ;;  %v217_v27 = vld [vmem:[#allocation2 + $0x108] sm:$0xff]  ;;  %v219_v59 = vld [vmem:[#allocation2 + $0x118] sm:$0xff] }
  0x9a   :  { %v479_v44 = vpop.f32.mrf.mxu3  ;;  %v549_v47 = vadd.f32 %v434_v39, %v214_v38 }
  0x9b   :  { %v411_v18 = vpop.f32.mrf.mxu1  ;;  %v567_v50 = vadd.f32 %v479_v44, %v232_v46  ;;  %584 = vst.msk [vmem:[#allocation2 + $0x8] sm:$0xff] %vm22_vm2, %v520_v53 }
  0x9c   :  { %v540_v48 = vadd.f32 %v411_v18, %v205_v42  ;;  %613 = vst.msk [vmem:[#allocation2 + $0xf0] sm:$0xff] %vm22_vm2, %v549_v47  ;;  %v1271_v42 = vpack.c.bf16 %v1210_v34, %v1209_v33  ;;  %v190_v18 = vld [vmem:[#allocation2 + $0x30] sm:$0xff]  ;;  %v1213_v34 = vld [vmem:[%s9457_s0 + $0x62] sm:$0xff] }
  0x9d   :  { %v366_v49 = vpop.f32.mrf.mxu0  ;;  %631 = vst.msk [vmem:[#allocation2 + $0x180] sm:$0xff] %vm22_vm2, %v567_v50  ;;  %v664_v33 = vld [vmem:[%s9457_s0 + $0xc9] sm:$0xff] }
  0x9e   :  { %604 = vst.msk [vmem:[#allocation2 + $0xa8] sm:$0xff] %vm22_vm2, %v540_v48  ;;  %v522_v11 = vadd.f32 %v366_v49, %v187_v63  ;;  %v218_v48 = vld [vmem:[#allocation2 + $0x110] sm:$0xff]  ;;  %v236_v49 = vld [vmem:[#allocation2 + $0x1a0] sm:$0xff] }
  0x9f   :  { %585 = vst.msk [vmem:[#allocation2 + $0x10] sm:$0xff] %vm22_vm2, %v521_v8  ;;  %v1211_v63 = vld [vmem:[%s9457_s0 + $0x4a] sm:$0xff] }
  0xa0   :  { %586 = vst.msk [vmem:[#allocation2 + $0x18] sm:$0xff] %vm22_vm2, %v522_v11 }
  0xa1   :  { %v436_v61 = vpop.f32.mrf.mxu2 }
  0xa2   :  { %v550_v0 = vadd.f32 %v436_v61, %v215_v51  ;;  %v481_v2 = vpop.f32.mrf.mxu3  ;;  %v209_v51 = vld [vmem:[#allocation2 + $0xc8] sm:$0xff] }
  0xa3   :  { %v414_v6 = vpop.f32.mrf.mxu1  ;;  %v568_v7 = vadd.f32 %v481_v2, %v233_v58  ;;  %v237_v2 = vld [vmem:[#allocation2 + $0x1a8] sm:$0xff] }
  0xa4   :  { %614 = vst.msk [vmem:[#allocation2 + $0xf8] sm:$0xff] %vm22_vm2, %v550_v0  ;;  %v541_v10 = vadd.f32 %v414_v6, %v206_v62  ;;  %v662_v62 = vld [vmem:[%s9457_s0 + $0xb1] sm:$0xff] }
  0xa5   :  { %632 = vst.msk [vmem:[#allocation2 + $0x188] sm:$0xff] %vm22_vm2, %v568_v7  ;;  %v369_v12 = vpop.f32.mrf.mxu0  ;;  %v1212_v0 = vld [vmem:[%s9457_s0 + $0x52] sm:$0xff] }
  0xa6   :  { %605 = vst.msk [vmem:[#allocation2 + $0xb0] sm:$0xff] %vm22_vm2, %v541_v10  ;;  %5608 = vmatmul.msk.bf16.gmra.mxu1 %vm249_vm1, %v6857_v3  ;;  %5669 = vmatmul.msk.bf16.gmra.mxu2 %vm249_vm1, %v1270_v4  ;;  %v523_v13 = vadd.f32 %v369_v12, %v188_v9  ;;  %v210_v6 = vld [vmem:[#allocation2 + $0xd0] sm:$0xff]  ;;  %v1272_v10 = vpack.c.bf16 %v1212_v0, %v1211_v63  ;;  %v1215_v63 = vld [vmem:[%s9457_s0 + $0x7a] sm:$0xff]  ;;  %v1216_v0 = vld [vmem:[%s9457_s0 + $0x82] sm:$0xff] }
  0xa7   :  { %5766 = vmatmul.msk.bf16.gmra.mxu3 %vm249_vm1, %v6461_v45 }
  0xa8   :  { %5863 = vmatmul.msk.bf16.gmra.mxu0 %vm249_vm1, %v6671_v41  ;;  %587 = vst.msk [vmem:[#allocation2 + $0x20] sm:$0xff] %vm22_vm2, %v523_v13  ;;  %v659_v41 = vld [vmem:[%s9457_s0 + $0x91] sm:$0xff]  ;;  %v192_v13 = vld [vmem:[#allocation2 + $0x40] sm:$0xff] }
  0xa9   :  { %v439_v16 = vpop.f32.mrf.mxu2  ;;  %v6889_v40 = vpack.c.bf16 %v660_v32, %v659_v41 }
  0xaa   :  { %v551_v21 = vadd.f32 %v439_v16, %v216_v14  ;;  %v484_v22 = vpop.f32.mrf.mxu3 }
  0xab   :  { %v416_v23 = vpop.f32.mrf.mxu1  ;;  %v569_v24 = vadd.f32 %v484_v22, %v234_v15 }
  0xac   :  { %615 = vst.msk [vmem:[#allocation2 + $0x100] sm:$0xff] %vm22_vm2, %v551_v21  ;;  %v542_v26 = vadd.f32 %v416_v23, %v207_v19  ;;  %v220_v19 = vld [vmem:[#allocation2 + $0x120] sm:$0xff]  ;;  %v238_v21 = vld [vmem:[#allocation2 + $0x1b0] sm:$0xff]  ;;  %v211_v23 = vld [vmem:[#allocation2 + $0xd8] sm:$0xff] }
  0xad   :  { %633 = vst.msk [vmem:[#allocation2 + $0x190] sm:$0xff] %vm22_vm2, %v569_v24  ;;  %v371_v45 = vpop.f32.mrf.mxu0 }
  0xae   :  { %606 = vst.msk [vmem:[#allocation2 + $0xb8] sm:$0xff] %vm22_vm2, %v542_v26  ;;  %v524_v29 = vadd.f32 %v371_v45, %v189_v25 }
  0xb0   :  { %588 = vst.msk [vmem:[#allocation2 + $0x28] sm:$0xff] %vm22_vm2, %v524_v29  ;;  %v221_v29 = vld [vmem:[#allocation2 + $0x128] sm:$0xff] }
  0xb1   :  { %v441_v36 = vpop.f32.mrf.mxu2 }
  0xb2   :  { %v552_v38 = vadd.f32 %v441_v36, %v217_v27  ;;  %v486_v39 = vpop.f32.mrf.mxu3  ;;  %v193_v27 = vld [vmem:[#allocation2 + $0x48] sm:$0xff]  ;;  %v239_v36 = vld [vmem:[#allocation2 + $0x1b8] sm:$0xff] }
  0xb3   :  { %v419_v44 = vpop.f32.mrf.mxu1  ;;  %v570_v31 = vadd.f32 %v486_v39, %v235_v35  ;;  %v1214_v35 = vld [vmem:[%s9457_s0 + $0x6a] sm:$0xff] }
  0xb4   :  { %616 = vst.msk [vmem:[#allocation2 + $0x108] sm:$0xff] %vm22_vm2, %v552_v38  ;;  %v543_v46 = vadd.f32 %v419_v44, %v208_v37  ;;  %v1273_v44 = vpack.c.bf16 %v1214_v35, %v1213_v34  ;;  %v1218_v34 = vld [vmem:[%s9457_s0 + $0x9a] sm:$0xff] }
  0xb5   :  { %634 = vst.msk [vmem:[#allocation2 + $0x198] sm:$0xff] %vm22_vm2, %v570_v31  ;;  %v374_v47 = vpop.f32.mrf.mxu0  ;;  %v243_v35 = vld [vmem:[#allocation2 + $0x1d8] sm:$0xff] }
  0xb6   :  { %607 = vst.msk [vmem:[#allocation2 + $0xc0] sm:$0xff] %vm22_vm2, %v543_v46  ;;  %5609 = vmatmul.msk.bf16.gmra.mxu1 %vm249_vm1, %v6889_v40  ;;  %5670 = vmatmul.msk.bf16.gmra.mxu2 %vm249_vm1, %v1271_v42  ;;  %v525_v28 = vadd.f32 %v374_v47, %v190_v18  ;;  %v743_v18 = vld [vmem:[#allocation2] sm:$0xff]  ;;  %v194_v47 = vld [vmem:[#allocation2 + $0x50] sm:$0xff] }
  0xb7   :  { %5767 = vmatmul.msk.bf16.gmra.mxu3 %vm249_vm1, %v6492_v57 }
  0xb8   :  { %589 = vst.msk [vmem:[#allocation2 + $0x30] sm:$0xff] %vm22_vm2, %v525_v28  ;;  %5864 = vmatmul.msk.bf16.gmra.mxu0 %vm249_vm1, %v6747_v60  ;;  %v661_v60 = vld [vmem:[%s9457_s0 + $0xa9] sm:$0xff] }
  0xb9   :  { %v444_v50 = vpop.f32.mrf.mxu2  ;;  %v6918_v9 = vpack.c.bf16 %v662_v62, %v661_v60  ;;  %v223_v60 = vld [vmem:[#allocation2 + $0x138] sm:$0xff]  ;;  %v666_v62 = vld [vmem:[%s9457_s0 + $0xe1] sm:$0xff] }
  0xba   :  { %v553_v52 = vadd.f32 %v444_v50, %v218_v48  ;;  %v489_v53 = vpop.f32.mrf.mxu3  ;;  %v222_v50 = vld [vmem:[#allocation2 + $0x130] sm:$0xff] }
  0xbb   :  { %v421_v54 = vpop.f32.mrf.mxu1  ;;  %v571_v55 = vadd.f32 %v489_v53, %v236_v49 }
  0xbc   :  { %617 = vst.msk [vmem:[#allocation2 + $0x110] sm:$0xff] %vm22_vm2, %v553_v52  ;;  %v544_v58 = vadd.f32 %v421_v54, %v209_v51  ;;  %v240_v51 = vld [vmem:[#allocation2 + $0x1c0] sm:$0xff] }
  0xbd   :  { %635 = vst.msk [vmem:[#allocation2 + $0x1a0] sm:$0xff] %vm22_vm2, %v571_v55  ;;  %v376_v57 = vpop.f32.mrf.mxu0 }
  0xbe   :  { %608 = vst.msk [vmem:[#allocation2 + $0xc8] sm:$0xff] %vm22_vm2, %v544_v58  ;;  %v526_v61 = vadd.f32 %v376_v57, %v191_v56  ;;  %v744_v56 = vld [vmem:[#allocation2 + $0x8] sm:$0xff]  ;;  %v195_v57 = vld [vmem:[#allocation2 + $0x58] sm:$0xff] }
  0xc0   :  { %590 = vst.msk [vmem:[#allocation2 + $0x38] sm:$0xff] %vm22_vm2, %v526_v61 }
  0xc1   :  { %v446_v4 = vpop.f32.mrf.mxu2 }
  0xc2   :  { %v554_v7 = vadd.f32 %v446_v4, %v219_v59  ;;  %v491_v8 = vpop.f32.mrf.mxu3 }
  0xc3   :  { %v424_v11 = vpop.f32.mrf.mxu1  ;;  %v572_v12 = vadd.f32 %v491_v8, %v237_v2  ;;  %v241_v2 = vld [vmem:[#allocation2 + $0x1c8] sm:$0xff] }
  0xc4   :  { %618 = vst.msk [vmem:[#allocation2 + $0x118] sm:$0xff] %vm22_vm2, %v554_v7  ;;  %v545_v14 = vadd.f32 %v424_v11, %v210_v6 }
  0xc5   :  { %636 = vst.msk [vmem:[#allocation2 + $0x1a8] sm:$0xff] %vm22_vm2, %v572_v12  ;;  %v379_v15 = vpop.f32.mrf.mxu0  ;;  %v745_v12 = vld [vmem:[#allocation2 + $0x10] sm:$0xff] }
  0xc6   :  { %609 = vst.msk [vmem:[#allocation2 + $0xd0] sm:$0xff] %vm22_vm2, %v545_v14  ;;  %5610 = vmatmul.msk.bf16.gmra.mxu1 %vm249_vm1, %v6918_v9  ;;  %5671 = vmatmul.msk.bf16.gmra.mxu2 %vm249_vm1, %v1272_v10  ;;  %v527_v16 = vadd.f32 %v379_v15, %v192_v13  ;;  %v1274_v10 = vpack.c.bf16 %v1216_v0, %v1215_v63  ;;  %v196_v14 = vld [vmem:[#allocation2 + $0x60] sm:$0xff]  ;;  %v245_v63 = vld [vmem:[#allocation2 + $0x1e8] sm:$0xff] }
  0xc7   :  { %5768 = vmatmul.msk.bf16.gmra.mxu3 %vm249_vm1, %v6523_v5 }
  0xc8   :  { %591 = vst.msk [vmem:[#allocation2 + $0x40] sm:$0xff] %vm22_vm2, %v527_v16  ;;  %5865 = vmatmul.msk.bf16.gmra.mxu0 %vm249_vm1, %v6812_v20  ;;  %v663_v20 = vld [vmem:[%s9457_s0 + $0xc1] sm:$0xff] }
  0xc9   :  { %v449_v22 = vpop.f32.mrf.mxu2  ;;  %v6947_v42 = vpack.c.bf16 %v664_v33, %v663_v20  ;;  %v1217_v33 = vld [vmem:[%s9457_s0 + $0x92] sm:$0xff] }
  0xca   :  { %v555_v24 = vadd.f32 %v449_v22, %v220_v19  ;;  %v494_v25 = vpop.f32.mrf.mxu3  ;;  %v242_v22 = vld [vmem:[#allocation2 + $0x1d0] sm:$0xff] }
  0xcb   :  { %v426_v26 = vpop.f32.mrf.mxu1  ;;  %v573_v45 = vadd.f32 %v494_v25, %v238_v21  ;;  %v224_v21 = vld [vmem:[#allocation2 + $0x140] sm:$0xff] }
  0xcc   :  { %619 = vst.msk [vmem:[#allocation2 + $0x120] sm:$0xff] %vm22_vm2, %v555_v24  ;;  %v546_v41 = vadd.f32 %v426_v26, %v211_v23 }
  0xcd   :  { %637 = vst.msk [vmem:[#allocation2 + $0x1b0] sm:$0xff] %vm22_vm2, %v573_v45  ;;  %v381_v5 = vpop.f32.mrf.mxu0  ;;  %v746_v45 = vld [vmem:[#allocation2 + $0x18] sm:$0xff] }
  0xce   :  { %610 = vst.msk [vmem:[#allocation2 + $0xd8] sm:$0xff] %vm22_vm2, %v546_v41  ;;  %v528_v32 = vadd.f32 %v381_v5, %v193_v27  ;;  %v197_v41 = vld [vmem:[#allocation2 + $0x68] sm:$0xff] }
  0xd0   :  { %592 = vst.msk [vmem:[#allocation2 + $0x48] sm:$0xff] %vm22_vm2, %v528_v32  ;;  %v668_v32 = vld [vmem:[%s9457_s0 + $0xf9] sm:$0xff] }
  0xd1   :  { %v451_v37 = vpop.f32.mrf.mxu2 }
  0xd2   :  { %v556_v38 = vadd.f32 %v451_v37, %v221_v29  ;;  %v496_v39 = vpop.f32.mrf.mxu3  ;;  %v225_v29 = vld [vmem:[#allocation2 + $0x148] sm:$0xff] }
  0xd3   :  { %v574_v31 = vadd.f32 %v496_v39, %v239_v36  ;;  %v917_v46 = vpop.f32.mrf.mxu1 }
  0xd4   :  { %620 = vst.msk [vmem:[#allocation2 + $0x128] sm:$0xff] %vm22_vm2, %v556_v38  ;;  %v1077_v28 = vadd.f32 %v917_v46, %v743_v18  ;;  %v747_v18 = vld [vmem:[#allocation2 + $0x20] sm:$0xff] }
  0xd5   :  { %638 = vst.msk [vmem:[#allocation2 + $0x1b8] sm:$0xff] %vm22_vm2, %v574_v31  ;;  %v384_v48 = vpop.f32.mrf.mxu0 }
  0xd6   :  { %1141 = vst.msk [vmem:[#allocation2] sm:$0xff] %vm22_vm2, %v1077_v28  ;;  %5611 = vmatmul.msk.bf16.gmra.mxu1 %vm249_vm1, %v6947_v42  ;;  %5672 = vmatmul.msk.bf16.gmra.mxu2 %vm249_vm1, %v1273_v44  ;;  %v529_v49 = vadd.f32 %v384_v48, %v194_v47  ;;  %v1275_v44 = vpack.c.bf16 %v1218_v34, %v1217_v33  ;;  %v198_v47 = vld [vmem:[#allocation2 + $0x70] sm:$0xff]  ;;  %v5716_v33 = vld [vmem:[%s9457_s0 + $0xd8] sm:$0xff]  ;;  %v5717_v34 = vld [vmem:[%s9457_s0 + $0xe0] sm:$0xff] }
  0xd7   :  { %5769 = vmatmul.msk.bf16.gmra.mxu3 %vm249_vm1, %v6554_v17 }
  0xd8   :  { %593 = vst.msk [vmem:[#allocation2 + $0x50] sm:$0xff] %vm22_vm2, %v529_v49  ;;  %5866 = vmatmul.msk.bf16.gmra.mxu0 %vm249_vm1, %v6857_v3  ;;  %v665_v3 = vld [vmem:[%s9457_s0 + $0xd9] sm:$0xff] }
  0xd9   :  { %v454_v52 = vpop.f32.mrf.mxu2  ;;  %v6976_v8 = vpack.c.bf16 %v666_v62, %v665_v3  ;;  %v670_v3 = vld [vmem:[%s9457_s0 + $0x111] sm:$0xff] }
  0xda   :  { %v557_v53 = vadd.f32 %v454_v52, %v222_v50  ;;  %v499_v54 = vpop.f32.mrf.mxu3  ;;  %v226_v50 = vld [vmem:[#allocation2 + $0x150] sm:$0xff] }
  0xdb   :  { %v575_v55 = vadd.f32 %v499_v54, %v240_v51  ;;  %v919_v58 = vpop.f32.mrf.mxu1  ;;  %v244_v51 = vld [vmem:[#allocation2 + $0x1e0] sm:$0xff]  ;;  %v1220_v62 = vld [vmem:[%s9457_s0 + $0xb2] sm:$0xff] }
  0xdc   :  { %621 = vst.msk [vmem:[#allocation2 + $0x130] sm:$0xff] %vm22_vm2, %v557_v53  ;;  %v1078_v59 = vadd.f32 %v919_v58, %v744_v56  ;;  %v748_v56 = vld [vmem:[#allocation2 + $0x28] sm:$0xff] }
  0xdd   :  { %639 = vst.msk [vmem:[#allocation2 + $0x1c0] sm:$0xff] %vm22_vm2, %v575_v55  ;;  %v386_v17 = vpop.f32.mrf.mxu0 }
  0xde   :  { %1142 = vst.msk [vmem:[#allocation2 + $0x8] sm:$0xff] %vm22_vm2, %v1078_v59  ;;  %v530_v61 = vadd.f32 %v386_v17, %v195_v57  ;;  %v199_v57 = vld [vmem:[#allocation2 + $0x78] sm:$0xff] }
  0xdf   :  { %v227_v17 = vld [vmem:[#allocation2 + $0x158] sm:$0xff] }
  0xe0   :  { %594 = vst.msk [vmem:[#allocation2 + $0x58] sm:$0xff] %vm22_vm2, %v530_v61  ;;  %v1219_v61 = vld [vmem:[%s9457_s0 + $0xaa] sm:$0xff] }
  0xe1   :  { %v456_v4 = vpop.f32.mrf.mxu2 }
  0xe2   :  { %v558_v6 = vadd.f32 %v456_v4, %v223_v60  ;;  %v501_v7 = vpop.f32.mrf.mxu3 }
  0xe3   :  { %v576_v11 = vadd.f32 %v501_v7, %v241_v2  ;;  %v922_v13 = vpop.f32.mrf.mxu1  ;;  %v1276_v7 = vpack.c.bf16 %v1220_v62, %v1219_v61 }
  0xe4   :  { %622 = vst.msk [vmem:[#allocation2 + $0x138] sm:$0xff] %vm22_vm2, %v558_v6  ;;  %v1079_v15 = vadd.f32 %v922_v13, %v745_v12  ;;  %v200_v13 = vld [vmem:[#allocation2 + $0x80] sm:$0xff] }
  0xe5   :  { %640 = vst.msk [vmem:[#allocation2 + $0x1c8] sm:$0xff] %vm22_vm2, %v576_v11  ;;  %v389_v16 = vpop.f32.mrf.mxu0  ;;  %v749_v11 = vld [vmem:[#allocation2 + $0x30] sm:$0xff] }
  0xe6   :  { %1143 = vst.msk [vmem:[#allocation2 + $0x10] sm:$0xff] %vm22_vm2, %v1079_v15  ;;  %5612 = vmatmul.msk.bf16.gmra.mxu1 %vm249_vm1, %v6976_v8  ;;  %5673 = vmatmul.msk.bf16.gmra.mxu2 %vm249_vm1, %v1274_v10  ;;  %v531_v19 = vadd.f32 %v389_v16, %v196_v14 }
  0xe7   :  { %5770 = vmatmul.msk.bf16.gmra.mxu3 %vm249_vm1, %v6611_v30 }
  0xe8   :  { %595 = vst.msk [vmem:[#allocation2 + $0x60] sm:$0xff] %vm22_vm2, %v531_v19  ;;  %5867 = vmatmul.msk.bf16.gmra.mxu0 %vm249_vm1, %v6889_v40  ;;  %v667_v40 = vld [vmem:[%s9457_s0 + $0xf1] sm:$0xff]  ;;  %v228_v19 = vld [vmem:[#allocation2 + $0x160] sm:$0xff] }
  0xe9   :  { %v459_v23 = vpop.f32.mrf.mxu2  ;;  %v7005_v39 = vpack.c.bf16 %v668_v32, %v667_v40  ;;  %v1221_v40 = vld [vmem:[%s9457_s0 + $0xc2] sm:$0xff]  ;;  %v247_v32 = vld [vmem:[#allocation2 + $0x1f8] sm:$0xff] }
  0xea   :  { %v559_v24 = vadd.f32 %v459_v23, %v224_v21  ;;  %v504_v25 = vpop.f32.mrf.mxu3  ;;  %v246_v21 = vld [vmem:[#allocation2 + $0x1f0] sm:$0xff] }
  0xeb   :  { %v577_v26 = vadd.f32 %v504_v25, %v242_v22  ;;  %v924_v27 = vpop.f32.mrf.mxu1 }
  0xec   :  { %623 = vst.msk [vmem:[#allocation2 + $0x140] sm:$0xff] %vm22_vm2, %v559_v24  ;;  %v1080_v5 = vadd.f32 %v924_v27, %v746_v45  ;;  %v201_v27 = vld [vmem:[#allocation2 + $0x88] sm:$0xff] }
  0xed   :  { %641 = vst.msk [vmem:[#allocation2 + $0x1d0] sm:$0xff] %vm22_vm2, %v577_v26  ;;  %v391_v30 = vpop.f32.mrf.mxu0  ;;  %v750_v26 = vld [vmem:[#allocation2 + $0x38] sm:$0xff] }
  0xee   :  { %1144 = vst.msk [vmem:[#allocation2 + $0x18] sm:$0xff] %vm22_vm2, %v1080_v5  ;;  %v532_v20 = vadd.f32 %v391_v30, %v197_v41  ;;  %v229_v5 = vld [vmem:[#allocation2 + $0x168] sm:$0xff] }
  0xf0   :  { %596 = vst.msk [vmem:[#allocation2 + $0x68] sm:$0xff] %vm22_vm2, %v532_v20  ;;  %v1222_v20 = vld [vmem:[%s9457_s0 + $0xca] sm:$0xff] }
  0xf1   :  { %v461_v36 = vpop.f32.mrf.mxu2 }
  0xf2   :  { %v560_v37 = vadd.f32 %v461_v36, %v225_v29  ;;  %v506_v38 = vpop.f32.mrf.mxu3  ;;  %v672_v29 = vld [vmem:[%s9457_s0 + $0x129] sm:$0xff] }
  0xf3   :  { %v578_v31 = vadd.f32 %v506_v38, %v243_v35  ;;  %v927_v46 = vpop.f32.mrf.mxu1 }
  0xf4   :  { %624 = vst.msk [vmem:[#allocation2 + $0x148] sm:$0xff] %vm22_vm2, %v560_v37  ;;  %v1081_v28 = vadd.f32 %v927_v46, %v747_v18  ;;  %v751_v18 = vld [vmem:[#allocation2 + $0x40] sm:$0xff] }
  0xf5   :  { %642 = vst.msk [vmem:[#allocation2 + $0x1d8] sm:$0xff] %vm22_vm2, %v578_v31  ;;  %v394_v48 = vpop.f32.mrf.mxu0 }
  0xf6   :  { %1145 = vst.msk [vmem:[#allocation2 + $0x20] sm:$0xff] %vm22_vm2, %v1081_v28  ;;  %5613 = vmatmul.msk.bf16.gmra.mxu1 %vm249_vm1, %v7005_v39  ;;  %5674 = vmatmul.msk.bf16.gmra.mxu2 %vm249_vm1, %v1275_v44  ;;  %v533_v49 = vadd.f32 %v394_v48, %v198_v47  ;;  %v1277_v44 = vpack.c.bf16 %v1222_v20, %v1221_v40 }
  0xf7   :  { %5771 = vmatmul.msk.bf16.gmra.mxu3 %vm249_vm1, %v6679_v43  ;;  %v1837_v47 = vpack.c.bf16 %v5717_v34, %v5716_v33 }
  0xf8   :  { %597 = vst.msk [vmem:[#allocation2 + $0x70] sm:$0xff] %vm22_vm2, %v533_v49  ;;  %5868 = vmatmul.msk.bf16.gmra.mxu0 %vm249_vm1, %v6918_v9  ;;  %v669_v9 = vld [vmem:[%s9457_s0 + $0x109] sm:$0xff]  ;;  %v1301_v49 = vld [vmem:[#allocation2] sm:$0xff] }
  0xf9   :  { %v464_v52 = vpop.f32.mrf.mxu2  ;;  %v7034_v6 = vpack.c.bf16 %v670_v3, %v669_v9  ;;  %v1302_v9 = vld [vmem:[#allocation2 + $0x8] sm:$0xff] }
  0xfa   :  { %v561_v53 = vadd.f32 %v464_v52, %v226_v50  ;;  %v509_v54 = vpop.f32.mrf.mxu3 }
  0xfb   :  { %v579_v55 = vadd.f32 %v509_v54, %v244_v51  ;;  %v929_v58 = vpop.f32.mrf.mxu1 }
  0xfc   :  { %625 = vst.msk [vmem:[#allocation2 + $0x150] sm:$0xff] %vm22_vm2, %v561_v53  ;;  %v1082_v59 = vadd.f32 %v929_v58, %v748_v56  ;;  %v752_v53 = vld [vmem:[#allocation2 + $0x48] sm:$0xff]  ;;  %v673_v58 = vld [vmem:[%s9457_s0 + $0x139] sm:$0xff] }
  0xfd   :  { %643 = vst.msk [vmem:[#allocation2 + $0x1e0] sm:$0xff] %vm22_vm2, %v579_v55  ;;  %v396_v43 = vpop.f32.mrf.mxu0 }
  0xfe   :  { %1146 = vst.msk [vmem:[#allocation2 + $0x28] sm:$0xff] %vm22_vm2, %v1082_v59  ;;  %v534_v60 = vadd.f32 %v396_v43, %v199_v57  ;;  %v1223_v57 = vld [vmem:[%s9457_s0 + $0xda] sm:$0xff]  ;;  %v1224_v59 = vld [vmem:[%s9457_s0 + $0xe2] sm:$0xff]  ;;  %v5718_v43 = vld [vmem:[%s9457_s0 + $0xf0] sm:$0xff] }
 0x100   :  { %598 = vst.msk [vmem:[#allocation2 + $0x78] sm:$0xff] %vm22_vm2, %v534_v60 }
 0x101   :  { %v466_v0 = vpop.f32.mrf.mxu2 }
 0x102   :  { %v562_v2 = vadd.f32 %v466_v0, %v227_v17  ;;  %v511_v4 = vpop.f32.mrf.mxu3  ;;  %v5719_v17 = vld [vmem:[%s9457_s0 + $0xf8] sm:$0xff] }
 0x103   :  { %v580_v10 = vadd.f32 %v511_v4, %v245_v63  ;;  %v932_v12 = vpop.f32.mrf.mxu1  ;;  %v1278_v63 = vpack.c.bf16 %v1224_v59, %v1223_v57  ;;  %v678_v57 = vld [vmem:[%s9457_s0 + $0x171] sm:$0xff] }
 0x104   :  { %626 = vst.msk [vmem:[#allocation2 + $0x158] sm:$0xff] %vm22_vm2, %v562_v2  ;;  %v1083_v14 = vadd.f32 %v932_v12, %v749_v11  ;;  %v753_v2 = vld [vmem:[#allocation2 + $0x50] sm:$0xff] }
 0x105   :  { %644 = vst.msk [vmem:[#allocation2 + $0x1e8] sm:$0xff] %vm22_vm2, %v580_v10  ;;  %v399_v15 = vpop.f32.mrf.mxu0  ;;  %v1227_v59 = vld [vmem:[%s9457_s0 + $0x10a] sm:$0xff] }
 0x106   :  { %1147 = vst.msk [vmem:[#allocation2 + $0x30] sm:$0xff] %vm22_vm2, %v1083_v14  ;;  %5614 = vmatmul.msk.bf16.gmra.mxu1 %vm249_vm1, %v7034_v6  ;;  %5675 = vmatmul.msk.bf16.gmra.mxu2 %vm249_vm1, %v1276_v7  ;;  %v535_v16 = vadd.f32 %v399_v15, %v200_v13  ;;  %v1838_v7 = vpack.c.bf16 %v5719_v17, %v5718_v43  ;;  %v1303_v13 = vld [vmem:[#allocation2 + $0x10] sm:$0xff]  ;;  %v5722_v17 = vld [vmem:[%s9457_s0 + $0x120] sm:$0xff] }
 0x107   :  { %5772 = vmatmul.msk.bf16.gmra.mxu3 %vm249_vm1, %v6756_v1  ;;  %v1228_v43 = vld [vmem:[%s9457_s0 + $0x112] sm:$0xff] }
 0x108   :  { %599 = vst.msk [vmem:[#allocation2 + $0x80] sm:$0xff] %vm22_vm2, %v535_v16  ;;  %5869 = vmatmul.msk.bf16.gmra.mxu0 %vm249_vm1, %v6947_v42  ;;  %v671_v42 = vld [vmem:[%s9457_s0 + $0x121] sm:$0xff] }
 0x109   :  { %v469_v22 = vpop.f32.mrf.mxu2  ;;  %v7069_v38 = vpack.c.bf16 %v672_v29, %v671_v42  ;;  %v5721_v42 = vld [vmem:[%s9457_s0 + $0x110] sm:$0xff] }
 0x10a   :  { %v563_v23 = vadd.f32 %v469_v22, %v228_v19  ;;  %v514_v24 = vpop.f32.mrf.mxu3 }
 0x10b   :  { %v581_v25 = vadd.f32 %v514_v24, %v246_v21  ;;  %v934_v45 = vpop.f32.mrf.mxu1  ;;  %v754_v21 = vld [vmem:[#allocation2 + $0x58] sm:$0xff] }
 0x10c   :  { %627 = vst.msk [vmem:[#allocation2 + $0x160] sm:$0xff] %vm22_vm2, %v563_v23  ;;  %v1084_v41 = vadd.f32 %v934_v45, %v750_v26 }
 0x10d   :  { %645 = vst.msk [vmem:[#allocation2 + $0x1f0] sm:$0xff] %vm22_vm2, %v581_v25  ;;  %v401_v1 = vpop.f32.mrf.mxu0 }
 0x10e   :  { %1148 = vst.msk [vmem:[#allocation2 + $0x38] sm:$0xff] %vm22_vm2, %v1084_v41  ;;  %v536_v30 = vadd.f32 %v401_v1, %v201_v27  ;;  %v676_v27 = vld [vmem:[%s9457_s0 + $0x159] sm:$0xff] }
 0x10f   :  { %v1225_v41 = vld [vmem:[%s9457_s0 + $0xf2] sm:$0xff]  ;;  %v1226_v1 = vld [vmem:[%s9457_s0 + $0xfa] sm:$0xff] }
 0x110   :  { %600 = vst.msk [vmem:[#allocation2 + $0x88] sm:$0xff] %vm22_vm2, %v536_v30  ;;  %v1304_v30 = vld [vmem:[#allocation2 + $0x18] sm:$0xff]  ;;  %v1279_v33 = vpack.c.bf16 %v1226_v1, %v1225_v41 }
 0x111   :  { %v471_v35 = vpop.f32.mrf.mxu2 }
 0x112   :  { %v564_v36 = vadd.f32 %v471_v35, %v229_v5  ;;  %v516_v37 = vpop.f32.mrf.mxu3  ;;  %v5720_v5 = vld [vmem:[%s9457_s0 + $0x108] sm:$0xff]  ;;  %v755_v35 = vld [vmem:[#allocation2 + $0x60] sm:$0xff] }
 0x113   :  { %v582_v31 = vadd.f32 %v516_v37, %v247_v32  ;;  %v937_v46 = vpop.f32.mrf.mxu1  ;;  %v1839_v37 = vpack.c.bf16 %v5721_v42, %v5720_v5  ;;  %v5571_v5 = vld [vmem:[%s9457_s0 + $0x1b9] sm:$0xff]  ;;  %v1229_v42 = vld [vmem:[%s9457_s0 + $0x122] sm:$0xff] }
 0x114   :  { %628 = vst.msk [vmem:[#allocation2 + $0x168] sm:$0xff] %vm22_vm2, %v564_v36  ;;  %v1085_v28 = vadd.f32 %v937_v46, %v751_v18 }
 0x115   :  { %646 = vst.msk [vmem:[#allocation2 + $0x1f8] sm:$0xff] %vm22_vm2, %v582_v31  ;;  %v2593_v48 = vpop.f32.mrf.mxu0 }
 0x116   :  { %1149 = vst.msk [vmem:[#allocation2 + $0x40] sm:$0xff] %vm22_vm2, %v1085_v28  ;;  %5615 = vmatmul.msk.bf16.gmra.mxu1 %vm249_vm1, %v7069_v38  ;;  %5676 = vmatmul.msk.bf16.gmra.mxu2 %vm249_vm1, %v1277_v44  ;;  %v1305_v28 = vld [vmem:[#allocation2 + $0x20] sm:$0xff] }
 0x117   :  { %5773 = vmatmul.msk.bf16.gmra.mxu3 %vm249_vm1, %v1837_v47 }
 0x118   :  { %5870 = vmatmul.msk.bf16.gmra.mxu0 %vm249_vm1, %v6976_v8  ;;  %v674_v8 = vld [vmem:[%s9457_s0 + $0x141] sm:$0xff] }
 0x119   :  { %v1475_v50 = vpop.f32.mrf.mxu2  ;;  %v7102_v62 = vpack.c.bf16 %v674_v8, %v673_v58 }
 0x11a   :  { %v1635_v51 = vadd.f32 %v1475_v50, %v1301_v49  ;;  %v2035_v52 = vpop.f32.mrf.mxu3 }
 0x11b   :  { %v939_v54 = vpop.f32.mrf.mxu1 }
 0x11c   :  { %1699 = vst.msk [vmem:[#allocation2] sm:$0xff] %vm22_vm2, %v1635_v51  ;;  %v1086_v55 = vadd.f32 %v939_v54, %v752_v53 }
 0x11d   :  { %v7081_v56 = vpop.f32.mrf.mxu0 }
 0x11e   :  { %1150 = vst.msk [vmem:[#allocation2 + $0x48] sm:$0xff] %vm22_vm2, %v1086_v55 }
 0x121   :  { %v1477_v60 = vpop.f32.mrf.mxu2 }
 0x122   :  { %v1636_v3 = vadd.f32 %v1477_v60, %v1302_v9  ;;  %v2037_v61 = vpop.f32.mrf.mxu3  ;;  %v5723_v9 = vld [vmem:[%s9457_s0 + $0x128] sm:$0xff] }
 0x123   :  { %v1861_v0 = vld [vmem:[#allocation2] sm:$0xff]  ;;  %v942_v4 = vpop.f32.mrf.mxu1  ;;  %v1306_v60 = vld [vmem:[#allocation2 + $0x28] sm:$0xff] }
 0x124   :  { %v2195_v10 = vadd.f32 %v2035_v52, %v1861_v0  ;;  %1700 = vst.msk [vmem:[#allocation2 + $0x8] sm:$0xff] %vm22_vm2, %v1636_v3  ;;  %v1087_v11 = vadd.f32 %v942_v4, %v753_v2  ;;  %v756_v52 = vld [vmem:[#allocation2 + $0x68] sm:$0xff]  ;;  %v1280_v2 = vpack.c.bf16 %v1228_v43, %v1227_v59 }
 0x125   :  { %v7105_v12 = vpop.f32.mrf.mxu0 }
 0x126   :  { %2259 = vst.msk [vmem:[#allocation2] sm:$0xff] %vm22_vm2, %v2195_v10  ;;  %5616 = vmatmul.msk.bf16.gmra.mxu1 %vm249_vm1, %v7102_v62  ;;  %5677 = vmatmul.msk.bf16.gmra.mxu2 %vm249_vm1, %v1278_v63 }
 0x127   :  { %1151 = vst.msk [vmem:[#allocation2 + $0x50] sm:$0xff] %vm22_vm2, %v1087_v11  ;;  %5774 = vmatmul.msk.bf16.gmra.mxu3 %vm249_vm1, %v1838_v7  ;;  %v757_v7 = vld [vmem:[#allocation2 + $0x70] sm:$0xff]  ;;  %v1840_v11 = vpack.c.bf16 %v5723_v9, %v5722_v17  ;;  %v1231_v9 = vld [vmem:[%s9457_s0 + $0x13a] sm:$0xff] }
 0x128   :  { %5871 = vmatmul.msk.bf16.gmra.mxu0 %vm249_vm1, %v7005_v39  ;;  %v675_v39 = vld [vmem:[%s9457_s0 + $0x151] sm:$0xff] }
 0x129   :  { %v1480_v14 = vpop.f32.mrf.mxu2  ;;  %v7139_v32 = vpack.c.bf16 %v676_v27, %v675_v39  ;;  %v5573_v17 = vld [vmem:[%s9457_s0 + $0x1d1] sm:$0xff] }
 0x12a   :  { %v1637_v15 = vadd.f32 %v1480_v14, %v1303_v13  ;;  %v2040_v16 = vpop.f32.mrf.mxu3 }
 0x12b   :  { %v1862_v19 = vld [vmem:[#allocation2 + $0x8] sm:$0xff]  ;;  %v944_v22 = vpop.f32.mrf.mxu1 }
 0x12c   :  { %v2196_v23 = vadd.f32 %v2037_v61, %v1862_v19  ;;  %1701 = vst.msk [vmem:[#allocation2 + $0x10] sm:$0xff] %vm22_vm2, %v1637_v15  ;;  %v1088_v24 = vadd.f32 %v944_v22, %v754_v21  ;;  %v1307_v19 = vld [vmem:[#allocation2 + $0x30] sm:$0xff] }
 0x12d   :  { %v2419_v25 = vld [vmem:[#allocation2] sm:$0xff]  ;;  %v7116_v26 = vpop.f32.mrf.mxu0 }
 0x12e   :  { %2260 = vst.msk [vmem:[#allocation2 + $0x8] sm:$0xff] %vm22_vm2, %v2196_v23  ;;  %v2753_v45 = vadd.f32 %v2593_v48, %v2419_v25  ;;  %v758_v25 = vld [vmem:[#allocation2 + $0x78] sm:$0xff] }
 0x12f   :  { %1152 = vst.msk [vmem:[#allocation2 + $0x58] sm:$0xff] %vm22_vm2, %v1088_v24 }
 0x130   :  { %2817 = vst.msk [vmem:[#allocation2] sm:$0xff] %vm22_vm2, %v2753_v45 }
 0x131   :  { %v1482_v29 = vpop.f32.mrf.mxu2 }
 0x132   :  { %v1638_v40 = vadd.f32 %v1482_v29, %v1304_v30  ;;  %v2042_v20 = vpop.f32.mrf.mxu3  ;;  %v1230_v30 = vld [vmem:[%s9457_s0 + $0x12a] sm:$0xff]  ;;  %v5724_v29 = vld [vmem:[%s9457_s0 + $0x138] sm:$0xff] }
 0x133   :  { %v1863_v34 = vld [vmem:[#allocation2 + $0x10] sm:$0xff]  ;;  %v947_v36 = vpop.f32.mrf.mxu1 }
 0x134   :  { %v2197_v44 = vadd.f32 %v2040_v16, %v1863_v34  ;;  %1702 = vst.msk [vmem:[#allocation2 + $0x18] sm:$0xff] %vm22_vm2, %v1638_v40  ;;  %v1089_v31 = vadd.f32 %v947_v36, %v755_v35  ;;  %v5725_v40 = vld [vmem:[%s9457_s0 + $0x140] sm:$0xff] }
 0x135   :  { %v2420_v18 = vld [vmem:[#allocation2 + $0x8] sm:$0xff]  ;;  %v7142_v46 = vpop.f32.mrf.mxu0 }
 0x136   :  { %2261 = vst.msk [vmem:[#allocation2 + $0x10] sm:$0xff] %vm22_vm2, %v2197_v44  ;;  %v2754_v47 = vadd.f32 %v7081_v56, %v2420_v18  ;;  %5617 = vmatmul.msk.bf16.gmra.mxu1 %vm249_vm1, %v7139_v32  ;;  %5678 = vmatmul.msk.bf16.gmra.mxu2 %vm249_vm1, %v1279_v33 }
 0x137   :  { %1153 = vst.msk [vmem:[#allocation2 + $0x60] sm:$0xff] %vm22_vm2, %v1089_v31  ;;  %5775 = vmatmul.msk.bf16.gmra.mxu3 %vm249_vm1, %v1839_v37  ;;  %v1281_v37 = vpack.c.bf16 %v1230_v30, %v1229_v42  ;;  %v759_v31 = vld [vmem:[#allocation2 + $0x80] sm:$0xff] }
 0x138   :  { %2818 = vst.msk [vmem:[#allocation2 + $0x8] sm:$0xff] %vm22_vm2, %v2754_v47  ;;  %5872 = vmatmul.msk.bf16.gmra.mxu0 %vm249_vm1, %v7034_v6  ;;  %v677_v6 = vld [vmem:[%s9457_s0 + $0x169] sm:$0xff] }
 0x139   :  { %v1485_v48 = vpop.f32.mrf.mxu2  ;;  %v7179_v0 = vpack.c.bf16 %v678_v57, %v677_v6 }
 0x13a   :  { %v1639_v49 = vadd.f32 %v1485_v48, %v1305_v28  ;;  %v2045_v50 = vpop.f32.mrf.mxu3 }
 0x13b   :  { %v1864_v51 = vld [vmem:[#allocation2 + $0x18] sm:$0xff]  ;;  %v949_v53 = vpop.f32.mrf.mxu1 }
 0x13c   :  { %v2198_v54 = vadd.f32 %v2042_v20, %v1864_v51  ;;  %1703 = vst.msk [vmem:[#allocation2 + $0x20] sm:$0xff] %vm22_vm2, %v1639_v49  ;;  %v1090_v55 = vadd.f32 %v949_v53, %v756_v52  ;;  %v1308_v20 = vld [vmem:[#allocation2 + $0x38] sm:$0xff]  ;;  %v1309_v51 = vld [vmem:[#allocation2 + $0x40] sm:$0xff] }
 0x13d   :  { %v2421_v56 = vld [vmem:[#allocation2 + $0x10] sm:$0xff]  ;;  %v7155_v58 = vpop.f32.mrf.mxu0 }
 0x13e   :  { %2262 = vst.msk [vmem:[#allocation2 + $0x18] sm:$0xff] %vm22_vm2, %v2198_v54  ;;  %v2755_v8 = vadd.f32 %v7105_v12, %v2421_v56  ;;  %v760_v56 = vld [vmem:[#allocation2 + $0x88] sm:$0xff] }
 0x13f   :  { %1154 = vst.msk [vmem:[#allocation2 + $0x68] sm:$0xff] %vm22_vm2, %v1090_v55 }
 0x140   :  { %2819 = vst.msk [vmem:[#allocation2 + $0x10] sm:$0xff] %vm22_vm2, %v2755_v8 }
 0x141   :  { %v1487_v3 = vpop.f32.mrf.mxu2 }
 0x142   :  { %v1640_v61 = vadd.f32 %v1487_v3, %v1306_v60  ;;  %v2047_v63 = vpop.f32.mrf.mxu3  ;;  %v1232_v60 = vld [vmem:[%s9457_s0 + $0x142] sm:$0xff]  ;;  %v5726_v3 = vld [vmem:[%s9457_s0 + $0x150] sm:$0xff] }
 0x143   :  { %v1865_v4 = vld [vmem:[#allocation2 + $0x20] sm:$0xff]  ;;  %v952_v10 = vpop.f32.mrf.mxu1 }
 0x144   :  { %v2199_v12 = vadd.f32 %v2045_v50, %v1865_v4  ;;  %1704 = vst.msk [vmem:[#allocation2 + $0x28] sm:$0xff] %vm22_vm2, %v1640_v61  ;;  %v1091_v13 = vadd.f32 %v952_v10, %v757_v7  ;;  %v5727_v61 = vld [vmem:[%s9457_s0 + $0x158] sm:$0xff] }
 0x145   :  { %v2422_v14 = vld [vmem:[#allocation2 + $0x18] sm:$0xff]  ;;  %v7182_v15 = vpop.f32.mrf.mxu0 }
 0x146   :  { %2263 = vst.msk [vmem:[#allocation2 + $0x20] sm:$0xff] %vm22_vm2, %v2199_v12  ;;  %v2756_v16 = vadd.f32 %v7116_v26, %v2422_v14  ;;  %5618 = vmatmul.msk.bf16.gmra.mxu1 %vm249_vm1, %v7179_v0  ;;  %5679 = vmatmul.msk.bf16.gmra.mxu2 %vm249_vm1, %v1280_v2 }
 0x147   :  { %1155 = vst.msk [vmem:[#allocation2 + $0x70] sm:$0xff] %vm22_vm2, %v1091_v13  ;;  %5776 = vmatmul.msk.bf16.gmra.mxu3 %vm249_vm1, %v1840_v11  ;;  %v1282_v11 = vpack.c.bf16 %v1232_v60, %v1231_v9  ;;  %v761_v13 = vld [vmem:[#allocation2 + $0x90] sm:$0xff]  ;;  %v5577_v60 = vld [vmem:[%s9457_s0 + $0x201] sm:$0xff] }
 0x148   :  { %2820 = vst.msk [vmem:[#allocation2 + $0x18] sm:$0xff] %vm22_vm2, %v2756_v16  ;;  %5873 = vmatmul.msk.bf16.gmra.mxu0 %vm249_vm1, %v7069_v38  ;;  %v5570_v38 = vld [vmem:[%s9457_s0 + $0x1b1] sm:$0xff] }
 0x149   :  { %v1490_v21 = vpop.f32.mrf.mxu2  ;;  %v727_v36 = vpack.c.bf16 %v5571_v5, %v5570_v38 }
 0x14a   :  { %v1641_v22 = vadd.f32 %v1490_v21, %v1307_v19  ;;  %v2050_v23 = vpop.f32.mrf.mxu3 }
 0x14b   :  { %v1866_v24 = vld [vmem:[#allocation2 + $0x28] sm:$0xff]  ;;  %v954_v26 = vpop.f32.mrf.mxu1 }
 0x14c   :  { %v2200_v45 = vadd.f32 %v2047_v63, %v1866_v24  ;;  %1705 = vst.msk [vmem:[#allocation2 + $0x30] sm:$0xff] %vm22_vm2, %v1641_v22  ;;  %v1092_v39 = vadd.f32 %v954_v26, %v758_v25  ;;  %v1310_v63 = vld [vmem:[#allocation2 + $0x48] sm:$0xff]  ;;  %v1311_v24 = vld [vmem:[#allocation2 + $0x50] sm:$0xff] }
 0x14d   :  { %v2423_v27 = vld [vmem:[#allocation2 + $0x20] sm:$0xff]  ;;  %v7195_v41 = vpop.f32.mrf.mxu0 }
 0x14e   :  { %2264 = vst.msk [vmem:[#allocation2 + $0x28] sm:$0xff] %vm22_vm2, %v2200_v45  ;;  %v2757_v1 = vadd.f32 %v7142_v46, %v2423_v27  ;;  %v1841_v46 = vpack.c.bf16 %v5725_v40, %v5724_v29  ;;  %v762_v27 = vld [vmem:[#allocation2 + $0x98] sm:$0xff]  ;;  %v5575_v29 = vld [vmem:[%s9457_s0 + $0x1e9] sm:$0xff] }
 0x14f   :  { %1156 = vst.msk [vmem:[#allocation2 + $0x78] sm:$0xff] %vm22_vm2, %v1092_v39  ;;  %v1233_v40 = vld [vmem:[%s9457_s0 + $0x152] sm:$0xff] }
 0x150   :  { %2821 = vst.msk [vmem:[#allocation2 + $0x20] sm:$0xff] %vm22_vm2, %v2757_v1 }
 0x151   :  { %v1492_v33 = vpop.f32.mrf.mxu2 }
 0x152   :  { %v1642_v34 = vadd.f32 %v1492_v33, %v1308_v20  ;;  %v2052_v35 = vpop.f32.mrf.mxu3  ;;  %v1234_v20 = vld [vmem:[%s9457_s0 + $0x15a] sm:$0xff]  ;;  %v5728_v33 = vld [vmem:[%s9457_s0 + $0x168] sm:$0xff] }
 0x153   :  { %v1867_v44 = vld [vmem:[#allocation2 + $0x30] sm:$0xff]  ;;  %v957_v18 = vpop.f32.mrf.mxu1 }
 0x154   :  { %v2201_v47 = vadd.f32 %v2050_v23, %v1867_v44  ;;  %1706 = vst.msk [vmem:[#allocation2 + $0x38] sm:$0xff] %vm22_vm2, %v1642_v34  ;;  %v1093_v28 = vadd.f32 %v957_v18, %v759_v31  ;;  %v5729_v34 = vld [vmem:[%s9457_s0 + $0x170] sm:$0xff]  ;;  %v1283_v18 = vpack.c.bf16 %v1234_v20, %v1233_v40 }
 0x155   :  { %v2424_v48 = vld [vmem:[#allocation2 + $0x28] sm:$0xff]  ;;  %v7220_v49 = vpop.f32.mrf.mxu0 }
 0x156   :  { %2265 = vst.msk [vmem:[#allocation2 + $0x30] sm:$0xff] %vm22_vm2, %v2201_v47  ;;  %v2758_v50 = vadd.f32 %v7155_v58, %v2424_v48  ;;  %5619 = vmatmul.msk.bf16.gmra.mxu1 %vm249_vm1, %v727_v36  ;;  %5680 = vmatmul.msk.bf16.gmra.mxu2 %vm249_vm1, %v1281_v37  ;;  %v763_v47 = vld [vmem:[#allocation2 + $0xa0] sm:$0xff]  ;;  %v1843_v48 = vpack.c.bf16 %v5729_v34, %v5728_v33 }
 0x157   :  { %1157 = vst.msk [vmem:[#allocation2 + $0x80] sm:$0xff] %vm22_vm2, %v1093_v28  ;;  %5777 = vmatmul.msk.bf16.gmra.mxu3 %vm249_vm1, %v1841_v46 }
 0x158   :  { %2822 = vst.msk [vmem:[#allocation2 + $0x28] sm:$0xff] %vm22_vm2, %v2758_v50  ;;  %5874 = vmatmul.msk.bf16.gmra.mxu0 %vm249_vm1, %v7102_v62  ;;  %v5572_v62 = vld [vmem:[%s9457_s0 + $0x1c9] sm:$0xff] }
 0x159   :  { %v1495_v52 = vpop.f32.mrf.mxu2  ;;  %v7256_v10 = vpack.c.bf16 %v5573_v17, %v5572_v62 }
 0x15a   :  { %v1643_v53 = vadd.f32 %v1495_v52, %v1309_v51  ;;  %v2055_v54 = vpop.f32.mrf.mxu3 }
 0x15b   :  { %v1868_v55 = vld [vmem:[#allocation2 + $0x38] sm:$0xff]  ;;  %v959_v58 = vpop.f32.mrf.mxu1 }
 0x15c   :  { %v2202_v8 = vadd.f32 %v2052_v35, %v1868_v55  ;;  %1707 = vst.msk [vmem:[#allocation2 + $0x40] sm:$0xff] %vm22_vm2, %v1643_v53  ;;  %v1094_v6 = vadd.f32 %v959_v58, %v760_v56  ;;  %v1312_v35 = vld [vmem:[#allocation2 + $0x58] sm:$0xff] }
 0x15d   :  { %v2425_v57 = vld [vmem:[#allocation2 + $0x30] sm:$0xff]  ;;  %v7232_v59 = vpop.f32.mrf.mxu0 }
 0x15e   :  { %2266 = vst.msk [vmem:[#allocation2 + $0x38] sm:$0xff] %vm22_vm2, %v2202_v8  ;;  %v2759_v43 = vadd.f32 %v7182_v15, %v2425_v57  ;;  %v1842_v15 = vpack.c.bf16 %v5727_v61, %v5726_v3  ;;  %v1235_v3 = vld [vmem:[%s9457_s0 + $0x16a] sm:$0xff]  ;;  %v1236_v61 = vld [vmem:[%s9457_s0 + $0x172] sm:$0xff] }
 0x15f   :  { %1158 = vst.msk [vmem:[#allocation2 + $0x88] sm:$0xff] %vm22_vm2, %v1094_v6  ;;  %v764_v6 = vld [vmem:[#allocation2 + $0xa8] sm:$0xff] }
 0x160   :  { %2823 = vst.msk [vmem:[#allocation2 + $0x30] sm:$0xff] %vm22_vm2, %v2759_v43 }
 0x161   :  { %v1497_v2 = vpop.f32.mrf.mxu2 }
 0x162   :  { %v1644_v4 = vadd.f32 %v1497_v2, %v1310_v63  ;;  %v2057_v7 = vpop.f32.mrf.mxu3  ;;  %v5730_v63 = vld [vmem:[%s9457_s0 + $0x180] sm:$0xff]  ;;  %v5731_v2 = vld [vmem:[%s9457_s0 + $0x188] sm:$0xff] }
 0x163   :  { %v1869_v12 = vld [vmem:[#allocation2 + $0x40] sm:$0xff]  ;;  %v962_v14 = vpop.f32.mrf.mxu1 }
 0x164   :  { %v2203_v16 = vadd.f32 %v2055_v54, %v1869_v12  ;;  %1708 = vst.msk [vmem:[#allocation2 + $0x48] sm:$0xff] %vm22_vm2, %v1644_v4  ;;  %v1095_v19 = vadd.f32 %v962_v14, %v761_v13  ;;  %v1313_v54 = vld [vmem:[#allocation2 + $0x60] sm:$0xff]  ;;  %v1314_v4 = vld [vmem:[#allocation2 + $0x68] sm:$0xff]  ;;  %v1284_v14 = vpack.c.bf16 %v1236_v61, %v1235_v3 }
 0x165   :  { %v2426_v21 = vld [vmem:[#allocation2 + $0x38] sm:$0xff]  ;;  %v7259_v22 = vpop.f32.mrf.mxu0 }
 0x166   :  { %2267 = vst.msk [vmem:[#allocation2 + $0x40] sm:$0xff] %vm22_vm2, %v2203_v16  ;;  %v2760_v23 = vadd.f32 %v7195_v41, %v2426_v21  ;;  %5620 = vmatmul.msk.bf16.gmra.mxu1 %vm249_vm1, %v7256_v10  ;;  %5681 = vmatmul.msk.bf16.gmra.mxu2 %vm249_vm1, %v1282_v11  ;;  %v5828_v16 = vld [vmem:[%s9457_s0 + $0x189] sm:$0xff] }
 0x167   :  { %1159 = vst.msk [vmem:[#allocation2 + $0x90] sm:$0xff] %vm22_vm2, %v1095_v19  ;;  %5778 = vmatmul.msk.bf16.gmra.mxu3 %vm249_vm1, %v1842_v15  ;;  %v5827_v15 = vld [vmem:[%s9457_s0 + $0x181] sm:$0xff]  ;;  %v765_v21 = vld [vmem:[#allocation2 + $0xb0] sm:$0xff] }
 0x168   :  { %2824 = vst.msk [vmem:[#allocation2 + $0x38] sm:$0xff] %vm22_vm2, %v2760_v23  ;;  %5875 = vmatmul.msk.bf16.gmra.mxu0 %vm249_vm1, %v7139_v32  ;;  %v5574_v32 = vld [vmem:[%s9457_s0 + $0x1e1] sm:$0xff]  ;;  %v1844_v23 = vpack.c.bf16 %v5731_v2, %v5730_v63 }
 0x169   :  { %v1500_v25 = vpop.f32.mrf.mxu2  ;;  %v7296_v31 = vpack.c.bf16 %v5575_v29, %v5574_v32  ;;  %v766_v32 = vld [vmem:[#allocation2 + $0xb8] sm:$0xff] }
 0x16a   :  { %v1645_v26 = vadd.f32 %v1500_v25, %v1311_v24  ;;  %v2060_v45 = vpop.f32.mrf.mxu3 }
 0x16b   :  { %v1870_v39 = vld [vmem:[#allocation2 + $0x48] sm:$0xff]  ;;  %v964_v41 = vpop.f32.mrf.mxu1 }
 0x16c   :  { %v2204_v1 = vadd.f32 %v2057_v7, %v1870_v39  ;;  %1709 = vst.msk [vmem:[#allocation2 + $0x50] sm:$0xff] %vm22_vm2, %v1645_v26  ;;  %v1096_v38 = vadd.f32 %v964_v41, %v762_v27  ;;  %v2402_v26 = vpack.c.bf16 %v5828_v16, %v5827_v15  ;;  %v1315_v41 = vld [vmem:[#allocation2 + $0x70] sm:$0xff]  ;;  %v5735_v15 = vld [vmem:[%s9457_s0 + $0x1e8] sm:$0xff] }
 0x16d   :  { %v2427_v5 = vld [vmem:[#allocation2 + $0x40] sm:$0xff]  ;;  %v7272_v42 = vpop.f32.mrf.mxu0  ;;  %v1318_v16 = vld [vmem:[#allocation2 + $0x88] sm:$0xff] }
 0x16e   :  { %2268 = vst.msk [vmem:[#allocation2 + $0x48] sm:$0xff] %vm22_vm2, %v2204_v1  ;;  %v2761_v30 = vadd.f32 %v7220_v49, %v2427_v5 }
 0x16f   :  { %1160 = vst.msk [vmem:[#allocation2 + $0x98] sm:$0xff] %vm22_vm2, %v1096_v38 }
 0x170   :  { %2825 = vst.msk [vmem:[#allocation2 + $0x40] sm:$0xff] %vm22_vm2, %v2761_v30 }
 0x171   :  { %v1502_v36 = vpop.f32.mrf.mxu2 }
 0x172   :  { %v1646_v37 = vadd.f32 %v1502_v36, %v1312_v35  ;;  %v2062_v44 = vpop.f32.mrf.mxu3  ;;  %v5578_v35 = vld [vmem:[%s9457_s0 + $0x211] sm:$0xff]  ;;  %v5579_v36 = vld [vmem:[%s9457_s0 + $0x219] sm:$0xff] }
 0x173   :  { %v1871_v46 = vld [vmem:[#allocation2 + $0x50] sm:$0xff]  ;;  %v967_v28 = vpop.f32.mrf.mxu1 }
 0x174   :  { %v2205_v49 = vadd.f32 %v2060_v45, %v1871_v46  ;;  %1710 = vst.msk [vmem:[#allocation2 + $0x58] sm:$0xff] %vm22_vm2, %v1646_v37  ;;  %v1097_v50 = vadd.f32 %v967_v28, %v763_v47  ;;  %v5635_v37 = vld [vmem:[%s9457_s0 + $0x1b2] sm:$0xff] }
 0x175   :  { %v2428_v51 = vld [vmem:[#allocation2 + $0x48] sm:$0xff]  ;;  %v7299_v52 = vpop.f32.mrf.mxu0  ;;  %v5733_v46 = vld [vmem:[%s9457_s0 + $0x1d0] sm:$0xff]  ;;  %v1316_v47 = vld [vmem:[#allocation2 + $0x78] sm:$0xff] }
 0x176   :  { %2269 = vst.msk [vmem:[#allocation2 + $0x50] sm:$0xff] %vm22_vm2, %v2205_v49  ;;  %v2762_v53 = vadd.f32 %v7232_v59, %v2428_v51  ;;  %5621 = vmatmul.msk.bf16.gmra.mxu1 %vm249_vm1, %v7296_v31  ;;  %5682 = vmatmul.msk.bf16.gmra.mxu2 %vm249_vm1, %v1283_v18  ;;  %v5732_v18 = vld [vmem:[%s9457_s0 + $0x1c8] sm:$0xff] }
 0x177   :  { %1161 = vst.msk [vmem:[#allocation2 + $0xa0] sm:$0xff] %vm22_vm2, %v1097_v50  ;;  %5779 = vmatmul.msk.bf16.gmra.mxu3 %vm249_vm1, %v1843_v48  ;;  %v7381_v50 = vpack.c.bf16 %v5579_v36, %v5578_v35 }
 0x178   :  { %2826 = vst.msk [vmem:[#allocation2 + $0x48] sm:$0xff] %vm22_vm2, %v2762_v53  ;;  %5876 = vmatmul.msk.bf16.gmra.mxu0 %vm249_vm1, %v7179_v0  ;;  %v5576_v0 = vld [vmem:[%s9457_s0 + $0x1f9] sm:$0xff] }
 0x179   :  { %v1505_v55 = vpop.f32.mrf.mxu2  ;;  %v7336_v13 = vpack.c.bf16 %v5577_v60, %v5576_v0  ;;  %v767_v53 = vld [vmem:[#allocation2 + $0xc0] sm:$0xff] }
 0x17a   :  { %v1647_v56 = vadd.f32 %v1505_v55, %v1313_v54  ;;  %v2065_v58 = vpop.f32.mrf.mxu3  ;;  %v1845_v55 = vpack.c.bf16 %v5733_v46, %v5732_v18  ;;  %v5583_v18 = vld [vmem:[%s9457_s0 + $0x249] sm:$0xff] }
 0x17b   :  { %v1872_v8 = vld [vmem:[#allocation2 + $0x58] sm:$0xff]  ;;  %v969_v57 = vpop.f32.mrf.mxu1  ;;  %v5639_v46 = vld [vmem:[%s9457_s0 + $0x1e2] sm:$0xff] }
 0x17c   :  { %v2206_v59 = vadd.f32 %v2062_v44, %v1872_v8  ;;  %1711 = vst.msk [vmem:[#allocation2 + $0x60] sm:$0xff] %vm22_vm2, %v1647_v56  ;;  %v1098_v43 = vadd.f32 %v969_v57, %v764_v6  ;;  %v5636_v44 = vld [vmem:[%s9457_s0 + $0x1ba] sm:$0xff] }
 0x17d   :  { %v2429_v62 = vld [vmem:[#allocation2 + $0x50] sm:$0xff]  ;;  %v7312_v17 = vpop.f32.mrf.mxu0  ;;  %v1285_v51 = vpack.c.bf16 %v5636_v44, %v5635_v37 }
 0x17e   :  { %2270 = vst.msk [vmem:[#allocation2 + $0x58] sm:$0xff] %vm22_vm2, %v2206_v59  ;;  %v2763_v9 = vadd.f32 %v7259_v22, %v2429_v62  ;;  %v1317_v59 = vld [vmem:[#allocation2 + $0x80] sm:$0xff] }
 0x17f   :  { %1162 = vst.msk [vmem:[#allocation2 + $0xa8] sm:$0xff] %vm22_vm2, %v1098_v43 }
 0x180   :  { %2827 = vst.msk [vmem:[#allocation2 + $0x50] sm:$0xff] %vm22_vm2, %v2763_v9 }
 0x181   :  { %v1507_v7 = vpop.f32.mrf.mxu2 }
 0x182   :  { %v1648_v11 = vadd.f32 %v1507_v7, %v1314_v4  ;;  %v2067_v12 = vpop.f32.mrf.mxu3  ;;  %v5581_v7 = vld [vmem:[%s9457_s0 + $0x231] sm:$0xff] }
 0x183   :  { %v1873_v19 = vld [vmem:[#allocation2 + $0x60] sm:$0xff]  ;;  %v972_v22 = vpop.f32.mrf.mxu1 }
 0x184   :  { %v2207_v24 = vadd.f32 %v2065_v58, %v1873_v19  ;;  %1712 = vst.msk [vmem:[#allocation2 + $0x68] sm:$0xff] %vm22_vm2, %v1648_v11  ;;  %v1099_v25 = vadd.f32 %v972_v22, %v765_v21  ;;  %v5637_v11 = vld [vmem:[%s9457_s0 + $0x1ca] sm:$0xff] }
 0x185   :  { %v2430_v45 = vld [vmem:[#allocation2 + $0x58] sm:$0xff]  ;;  %v7345_v39 = vpop.f32.mrf.mxu0 }
 0x186   :  { %2271 = vst.msk [vmem:[#allocation2 + $0x60] sm:$0xff] %vm22_vm2, %v2207_v24  ;;  %v2764_v27 = vadd.f32 %v7272_v42, %v2430_v45  ;;  %5622 = vmatmul.msk.bf16.gmra.mxu1 %vm249_vm1, %v7336_v13  ;;  %5683 = vmatmul.msk.bf16.gmra.mxu2 %vm249_vm1, %v1284_v14  ;;  %v5734_v14 = vld [vmem:[%s9457_s0 + $0x1e0] sm:$0xff] }
 0x187   :  { %1163 = vst.msk [vmem:[#allocation2 + $0xb0] sm:$0xff] %vm22_vm2, %v1099_v25  ;;  %5780 = vmatmul.msk.bf16.gmra.mxu3 %vm249_vm1, %v1844_v23 }
 0x188   :  { %2828 = vst.msk [vmem:[#allocation2 + $0x58] sm:$0xff] %vm22_vm2, %v2764_v27  ;;  %5877 = vmatmul.msk.bf16.gmra.mxu0 %vm249_vm1, %v2402_v26  ;;  %v769_v26 = vld [vmem:[#allocation2 + $0xd0] sm:$0xff] }
 0x189   :  { %v1510_v1 = vpop.f32.mrf.mxu2 }
 0x18a   :  { %v1649_v38 = vadd.f32 %v1510_v1, %v1315_v41  ;;  %v2070_v5 = vpop.f32.mrf.mxu3 }
 0x18b   :  { %v1874_v30 = vld [vmem:[#allocation2 + $0x68] sm:$0xff]  ;;  %v974_v42 = vpop.f32.mrf.mxu1 }
 0x18c   :  { %v2208_v29 = vadd.f32 %v2067_v12, %v1874_v30  ;;  %1713 = vst.msk [vmem:[#allocation2 + $0x70] sm:$0xff] %vm22_vm2, %v1649_v38  ;;  %v1100_v40 = vadd.f32 %v974_v42, %v766_v32  ;;  %v5638_v12 = vld [vmem:[%s9457_s0 + $0x1d2] sm:$0xff] }
 0x18d   :  { %v2431_v20 = vld [vmem:[#allocation2 + $0x60] sm:$0xff]  ;;  %v7357_v33 = vpop.f32.mrf.mxu0  ;;  %v1286_v24 = vpack.c.bf16 %v5638_v12, %v5637_v11  ;;  %v1319_v30 = vld [vmem:[#allocation2 + $0x90] sm:$0xff] }
 0x18e   :  { %2272 = vst.msk [vmem:[#allocation2 + $0x68] sm:$0xff] %vm22_vm2, %v2208_v29  ;;  %v2765_v34 = vadd.f32 %v7299_v52, %v2431_v20  ;;  %v770_v20 = vld [vmem:[#allocation2 + $0xd8] sm:$0xff] }
 0x18f   :  { %1164 = vst.msk [vmem:[#allocation2 + $0xb8] sm:$0xff] %vm22_vm2, %v1100_v40 }
 0x190   :  { %2829 = vst.msk [vmem:[#allocation2 + $0x60] sm:$0xff] %vm22_vm2, %v2765_v34 }
 0x191   :  { %v1512_v28 = vpop.f32.mrf.mxu2 }
 0x192   :  { %v1650_v48 = vadd.f32 %v1512_v28, %v1316_v47  ;;  %v2072_v49 = vpop.f32.mrf.mxu3  ;;  %v5640_v47 = vld [vmem:[%s9457_s0 + $0x1ea] sm:$0xff]  ;;  %v5736_v28 = vld [vmem:[%s9457_s0 + $0x1f8] sm:$0xff] }
 0x193   :  { %v1875_v52 = vld [vmem:[#allocation2 + $0x70] sm:$0xff]  ;;  %v977_v54 = vpop.f32.mrf.mxu1 }
 0x194   :  { %v2209_v56 = vadd.f32 %v2070_v5, %v1875_v52  ;;  %1714 = vst.msk [vmem:[#allocation2 + $0x78] sm:$0xff] %vm22_vm2, %v1650_v48  ;;  %v1101_v58 = vadd.f32 %v977_v54, %v767_v53  ;;  %v5737_v48 = vld [vmem:[%s9457_s0 + $0x200] sm:$0xff] }
 0x195   :  { %v2432_v8 = vld [vmem:[#allocation2 + $0x68] sm:$0xff]  ;;  %v7384_v6 = vpop.f32.mrf.mxu0 }
 0x196   :  { %2273 = vst.msk [vmem:[#allocation2 + $0x70] sm:$0xff] %vm22_vm2, %v2209_v56  ;;  %v2766_v57 = vadd.f32 %v7312_v17, %v2432_v8  ;;  %5623 = vmatmul.msk.bf16.gmra.mxu1 %vm249_vm1, %v7381_v50  ;;  %5684 = vmatmul.msk.bf16.gmra.mxu2 %vm249_vm1, %v1285_v51  ;;  %v768_v17 = vld [vmem:[#allocation2 + $0xc8] sm:$0xff] }
 0x197   :  { %1165 = vst.msk [vmem:[#allocation2 + $0xc0] sm:$0xff] %vm22_vm2, %v1101_v58  ;;  %5781 = vmatmul.msk.bf16.gmra.mxu3 %vm249_vm1, %v1845_v55  ;;  %v1287_v55 = vpack.c.bf16 %v5640_v47, %v5639_v46  ;;  %v771_v58 = vld [vmem:[#allocation2 + $0xe0] sm:$0xff] }
 0x198   :  { %2830 = vst.msk [vmem:[#allocation2 + $0x68] sm:$0xff] %vm22_vm2, %v2766_v57  ;;  %5878 = vmatmul.msk.bf16.gmra.mxu0 %vm249_vm1, %v7256_v10  ;;  %v5580_v10 = vld [vmem:[%s9457_s0 + $0x229] sm:$0xff] }
 0x199   :  { %v1515_v43 = vpop.f32.mrf.mxu2  ;;  %v7421_v23 = vpack.c.bf16 %v5581_v7, %v5580_v10 }
 0x19a   :  { %v1651_v62 = vadd.f32 %v1515_v43, %v1317_v59  ;;  %v2075_v9 = vpop.f32.mrf.mxu3 }
 0x19b   :  { %v1876_v0 = vld [vmem:[#allocation2 + $0x78] sm:$0xff]  ;;  %v979_v60 = vpop.f32.mrf.mxu1 }
 0x19c   :  { %v2210_v3 = vadd.f32 %v2072_v49, %v1876_v0  ;;  %1715 = vst.msk [vmem:[#allocation2 + $0x80] sm:$0xff] %vm22_vm2, %v1651_v62  ;;  %v1102_v61 = vadd.f32 %v979_v60, %v768_v17  ;;  %v1320_v49 = vld [vmem:[#allocation2 + $0x98] sm:$0xff]  ;;  %v1321_v0 = vld [vmem:[#allocation2 + $0xa0] sm:$0xff] }
 0x19d   :  { %v2433_v63 = vld [vmem:[#allocation2 + $0x70] sm:$0xff]  ;;  %v7397_v2 = vpop.f32.mrf.mxu0 }
 0x19e   :  { %2274 = vst.msk [vmem:[#allocation2 + $0x78] sm:$0xff] %vm22_vm2, %v2210_v3  ;;  %v2767_v4 = vadd.f32 %v7345_v39, %v2433_v63  ;;  %v1846_v39 = vpack.c.bf16 %v5735_v15, %v5734_v14  ;;  %v772_v63 = vld [vmem:[#allocation2 + $0xe8] sm:$0xff]  ;;  %v5641_v15 = vld [vmem:[%s9457_s0 + $0x1fa] sm:$0xff] }
 0x19f   :  { %1166 = vst.msk [vmem:[#allocation2 + $0xc8] sm:$0xff] %vm22_vm2, %v1102_v61  ;;  %v5585_v14 = vld [vmem:[%s9457_s0 + $0x261] sm:$0xff] }
 0x1a0   :  { %2831 = vst.msk [vmem:[#allocation2 + $0x70] sm:$0xff] %vm22_vm2, %v2767_v4 }
 0x1a1   :  { %v1517_v19 = vpop.f32.mrf.mxu2 }
 0x1a2   :  { %v1652_v21 = vadd.f32 %v1517_v19, %v1318_v16  ;;  %v2077_v22 = vpop.f32.mrf.mxu3  ;;  %v5642_v16 = vld [vmem:[%s9457_s0 + $0x202] sm:$0xff]  ;;  %v5738_v19 = vld [vmem:[%s9457_s0 + $0x210] sm:$0xff] }
 0x1a3   :  { %v1877_v25 = vld [vmem:[#allocation2 + $0x80] sm:$0xff]  ;;  %v982_v45 = vpop.f32.mrf.mxu1 }
 0x1a4   :  { %v2211_v27 = vadd.f32 %v2075_v9, %v1877_v25  ;;  %1716 = vst.msk [vmem:[#allocation2 + $0x88] sm:$0xff] %vm22_vm2, %v1652_v21  ;;  %v1103_v41 = vadd.f32 %v982_v45, %v769_v26  ;;  %v5739_v21 = vld [vmem:[%s9457_s0 + $0x218] sm:$0xff] }
 0x1a5   :  { %v2434_v1 = vld [vmem:[#allocation2 + $0x78] sm:$0xff]  ;;  %v7424_v38 = vpop.f32.mrf.mxu0 }
 0x1a6   :  { %2275 = vst.msk [vmem:[#allocation2 + $0x80] sm:$0xff] %vm22_vm2, %v2211_v27  ;;  %v2768_v5 = vadd.f32 %v7357_v33, %v2434_v1  ;;  %5624 = vmatmul.msk.bf16.gmra.mxu1 %vm249_vm1, %v7421_v23  ;;  %5685 = vmatmul.msk.bf16.gmra.mxu2 %vm249_vm1, %v1286_v24 }
 0x1a7   :  { %1167 = vst.msk [vmem:[#allocation2 + $0xd0] sm:$0xff] %vm22_vm2, %v1103_v41  ;;  %5782 = vmatmul.msk.bf16.gmra.mxu3 %vm249_vm1, %v1846_v39  ;;  %v1288_v39 = vpack.c.bf16 %v5642_v16, %v5641_v15  ;;  %v773_v41 = vld [vmem:[#allocation2 + $0xf0] sm:$0xff] }
 0x1a8   :  { %2832 = vst.msk [vmem:[#allocation2 + $0x78] sm:$0xff] %vm22_vm2, %v2768_v5  ;;  %5879 = vmatmul.msk.bf16.gmra.mxu0 %vm249_vm1, %v7296_v31  ;;  %v5582_v31 = vld [vmem:[%s9457_s0 + $0x241] sm:$0xff] }
 0x1a9   :  { %v1520_v32 = vpop.f32.mrf.mxu2  ;;  %v7461_v54 = vpack.c.bf16 %v5583_v18, %v5582_v31 }
 0x1aa   :  { %v1653_v42 = vadd.f32 %v1520_v32, %v1319_v30  ;;  %v2080_v29 = vpop.f32.mrf.mxu3 }
 0x1ab   :  { %v1878_v40 = vld [vmem:[#allocation2 + $0x88] sm:$0xff]  ;;  %v984_v33 = vpop.f32.mrf.mxu1 }
 0x1ac   :  { %v2212_v34 = vadd.f32 %v2077_v22, %v1878_v40  ;;  %1717 = vst.msk [vmem:[#allocation2 + $0x90] sm:$0xff] %vm22_vm2, %v1653_v42  ;;  %v1104_v35 = vadd.f32 %v984_v33, %v770_v20  ;;  %v1322_v22 = vld [vmem:[#allocation2 + $0xa8] sm:$0xff]  ;;  %v1323_v40 = vld [vmem:[#allocation2 + $0xb0] sm:$0xff] }
 0x1ad   :  { %v2435_v36 = vld [vmem:[#allocation2 + $0x80] sm:$0xff]  ;;  %v7437_v37 = vpop.f32.mrf.mxu0 }
 0x1ae   :  { %2276 = vst.msk [vmem:[#allocation2 + $0x88] sm:$0xff] %vm22_vm2, %v2212_v34  ;;  %v2769_v44 = vadd.f32 %v7384_v6, %v2435_v36  ;;  %v1847_v6 = vpack.c.bf16 %v5737_v48, %v5736_v28  ;;  %v774_v36 = vld [vmem:[#allocation2 + $0xf8] sm:$0xff] }
 0x1af   :  { %1168 = vst.msk [vmem:[#allocation2 + $0xd8] sm:$0xff] %vm22_vm2, %v1104_v35  ;;  %v5587_v28 = vld [vmem:[%s9457_s0 + $0x279] sm:$0xff] }
 0x1b0   :  { %2833 = vst.msk [vmem:[#allocation2 + $0x80] sm:$0xff] %vm22_vm2, %v2769_v44  ;;  %v5643_v48 = vld [vmem:[%s9457_s0 + $0x212] sm:$0xff] }
 0x1b1   :  { %v1522_v51 = vpop.f32.mrf.mxu2 }
 0x1b2   :  { %v1654_v52 = vadd.f32 %v1522_v51, %v1320_v49  ;;  %v2082_v53 = vpop.f32.mrf.mxu3  ;;  %v5644_v49 = vld [vmem:[%s9457_s0 + $0x21a] sm:$0xff]  ;;  %v5740_v51 = vld [vmem:[%s9457_s0 + $0x228] sm:$0xff] }
 0x1b3   :  { %v1879_v56 = vld [vmem:[#allocation2 + $0x90] sm:$0xff]  ;;  %v987_v8 = vpop.f32.mrf.mxu1 }
 0x1b4   :  { %v2213_v57 = vadd.f32 %v2080_v29, %v1879_v56  ;;  %1718 = vst.msk [vmem:[#allocation2 + $0x98] sm:$0xff] %vm22_vm2, %v1654_v52  ;;  %v1105_v59 = vadd.f32 %v987_v8, %v771_v58  ;;  %v5741_v52 = vld [vmem:[%s9457_s0 + $0x230] sm:$0xff] }
 0x1b5   :  { %v2436_v43 = vld [vmem:[#allocation2 + $0x88] sm:$0xff]  ;;  %v7464_v62 = vpop.f32.mrf.mxu0 }
 0x1b6   :  { %2277 = vst.msk [vmem:[#allocation2 + $0x90] sm:$0xff] %vm22_vm2, %v2213_v57  ;;  %v2770_v9 = vadd.f32 %v7397_v2, %v2436_v43  ;;  %5625 = vmatmul.msk.bf16.gmra.mxu1 %vm249_vm1, %v7461_v54  ;;  %5686 = vmatmul.msk.bf16.gmra.mxu2 %vm249_vm1, %v1287_v55 }
 0x1b7   :  { %1169 = vst.msk [vmem:[#allocation2 + $0xe0] sm:$0xff] %vm22_vm2, %v1105_v59  ;;  %5783 = vmatmul.msk.bf16.gmra.mxu3 %vm249_vm1, %v1847_v6  ;;  %v1289_v6 = vpack.c.bf16 %v5644_v49, %v5643_v48  ;;  %v775_v59 = vld [vmem:[#allocation2 + $0x100] sm:$0xff] }
 0x1b8   :  { %2834 = vst.msk [vmem:[#allocation2 + $0x88] sm:$0xff] %vm22_vm2, %v2770_v9  ;;  %5880 = vmatmul.msk.bf16.gmra.mxu0 %vm249_vm1, %v7336_v13  ;;  %v5584_v13 = vld [vmem:[%s9457_s0 + $0x259] sm:$0xff] }
 0x1b9   :  { %v1525_v17 = vpop.f32.mrf.mxu2  ;;  %v7501_v45 = vpack.c.bf16 %v5585_v14, %v5584_v13 }
 0x1ba   :  { %v1655_v60 = vadd.f32 %v1525_v17, %v1321_v0  ;;  %v2085_v3 = vpop.f32.mrf.mxu3 }
 0x1bb   :  { %v1880_v61 = vld [vmem:[#allocation2 + $0x98] sm:$0xff]  ;;  %v989_v2 = vpop.f32.mrf.mxu1 }
 0x1bc   :  { %v2214_v4 = vadd.f32 %v2082_v53, %v1880_v61  ;;  %1719 = vst.msk [vmem:[#allocation2 + $0xa0] sm:$0xff] %vm22_vm2, %v1655_v60  ;;  %v1106_v10 = vadd.f32 %v989_v2, %v772_v63  ;;  %v1324_v53 = vld [vmem:[#allocation2 + $0xb8] sm:$0xff]  ;;  %v1325_v61 = vld [vmem:[#allocation2 + $0xc0] sm:$0xff] }
 0x1bd   :  { %v2437_v7 = vld [vmem:[#allocation2 + $0x90] sm:$0xff]  ;;  %v7477_v11 = vpop.f32.mrf.mxu0 }
 0x1be   :  { %2278 = vst.msk [vmem:[#allocation2 + $0x98] sm:$0xff] %vm22_vm2, %v2214_v4  ;;  %v2771_v12 = vadd.f32 %v7424_v38, %v2437_v7  ;;  %v1848_v38 = vpack.c.bf16 %v5739_v21, %v5738_v19  ;;  %v776_v7 = vld [vmem:[#allocation2 + $0x108] sm:$0xff]  ;;  %v5589_v19 = vld [vmem:[%s9457_s0 + $0x291] sm:$0xff] }
 0x1bf   :  { %1170 = vst.msk [vmem:[#allocation2 + $0xe8] sm:$0xff] %vm22_vm2, %v1106_v10  ;;  %v5645_v21 = vld [vmem:[%s9457_s0 + $0x22a] sm:$0xff] }
 0x1c0   :  { %2835 = vst.msk [vmem:[#allocation2 + $0x90] sm:$0xff] %vm22_vm2, %v2771_v12 }
 0x1c1   :  { %v1527_v24 = vpop.f32.mrf.mxu2 }
 0x1c2   :  { %v1656_v25 = vadd.f32 %v1527_v24, %v1322_v22  ;;  %v2087_v26 = vpop.f32.mrf.mxu3  ;;  %v5646_v22 = vld [vmem:[%s9457_s0 + $0x232] sm:$0xff]  ;;  %v5742_v24 = vld [vmem:[%s9457_s0 + $0x240] sm:$0xff] }
 0x1c3   :  { %v1881_v27 = vld [vmem:[#allocation2 + $0xa0] sm:$0xff]  ;;  %v992_v1 = vpop.f32.mrf.mxu1 }
 0x1c4   :  { %v2215_v5 = vadd.f32 %v2085_v3, %v1881_v27  ;;  %1720 = vst.msk [vmem:[#allocation2 + $0xa8] sm:$0xff] %vm22_vm2, %v1656_v25  ;;  %v1107_v30 = vadd.f32 %v992_v1, %v773_v41  ;;  %v5743_v25 = vld [vmem:[%s9457_s0 + $0x248] sm:$0xff] }
 0x1c5   :  { %v2438_v32 = vld [vmem:[#allocation2 + $0x98] sm:$0xff]  ;;  %v7504_v42 = vpop.f32.mrf.mxu0 }
 0x1c6   :  { %2279 = vst.msk [vmem:[#allocation2 + $0xa0] sm:$0xff] %vm22_vm2, %v2215_v5  ;;  %v2772_v29 = vadd.f32 %v7437_v37, %v2438_v32  ;;  %5626 = vmatmul.msk.bf16.gmra.mxu1 %vm249_vm1, %v7501_v45  ;;  %5687 = vmatmul.msk.bf16.gmra.mxu2 %vm249_vm1, %v1288_v39 }
 0x1c7   :  { %1171 = vst.msk [vmem:[#allocation2 + $0xf0] sm:$0xff] %vm22_vm2, %v1107_v30  ;;  %5784 = vmatmul.msk.bf16.gmra.mxu3 %vm249_vm1, %v1848_v38  ;;  %v1290_v38 = vpack.c.bf16 %v5646_v22, %v5645_v21  ;;  %v777_v30 = vld [vmem:[#allocation2 + $0x110] sm:$0xff] }
 0x1c8   :  { %2836 = vst.msk [vmem:[#allocation2 + $0x98] sm:$0xff] %vm22_vm2, %v2772_v29  ;;  %5881 = vmatmul.msk.bf16.gmra.mxu0 %vm249_vm1, %v7381_v50  ;;  %v5586_v50 = vld [vmem:[%s9457_s0 + $0x271] sm:$0xff] }
 0x1c9   :  { %v1530_v20 = vpop.f32.mrf.mxu2  ;;  %v7541_v8 = vpack.c.bf16 %v5587_v28, %v5586_v50 }
 0x1ca   :  { %v1657_v33 = vadd.f32 %v1530_v20, %v1323_v40  ;;  %v2090_v34 = vpop.f32.mrf.mxu3 }
 0x1cb   :  { %v1882_v35 = vld [vmem:[#allocation2 + $0xa8] sm:$0xff]  ;;  %v994_v37 = vpop.f32.mrf.mxu1 }
 0x1cc   :  { %v2216_v44 = vadd.f32 %v2087_v26, %v1882_v35  ;;  %1721 = vst.msk [vmem:[#allocation2 + $0xb0] sm:$0xff] %vm22_vm2, %v1657_v33  ;;  %v1108_v31 = vadd.f32 %v994_v37, %v774_v36  ;;  %v1326_v26 = vld [vmem:[#allocation2 + $0xc8] sm:$0xff]  ;;  %v1327_v35 = vld [vmem:[#allocation2 + $0xd0] sm:$0xff] }
 0x1cd   :  { %v2439_v18 = vld [vmem:[#allocation2 + $0xa0] sm:$0xff]  ;;  %v7517_v46 = vpop.f32.mrf.mxu0 }
 0x1ce   :  { %2280 = vst.msk [vmem:[#allocation2 + $0xa8] sm:$0xff] %vm22_vm2, %v2216_v44  ;;  %v2773_v47 = vadd.f32 %v7464_v62, %v2439_v18  ;;  %v1849_v62 = vpack.c.bf16 %v5741_v52, %v5740_v51  ;;  %v778_v18 = vld [vmem:[#allocation2 + $0x118] sm:$0xff]  ;;  %v5591_v51 = vld [vmem:[%s9457_s0 + $0x2a9] sm:$0xff] }
 0x1cf   :  { %1172 = vst.msk [vmem:[#allocation2 + $0xf8] sm:$0xff] %vm22_vm2, %v1108_v31  ;;  %v5647_v52 = vld [vmem:[%s9457_s0 + $0x242] sm:$0xff] }
 0x1d0   :  { %2837 = vst.msk [vmem:[#allocation2 + $0xa0] sm:$0xff] %vm22_vm2, %v2773_v47 }
 0x1d1   :  { %v1532_v55 = vpop.f32.mrf.mxu2 }
 0x1d2   :  { %v1658_v56 = vadd.f32 %v1532_v55, %v1324_v53  ;;  %v2092_v58 = vpop.f32.mrf.mxu3  ;;  %v5648_v53 = vld [vmem:[%s9457_s0 + $0x24a] sm:$0xff]  ;;  %v5744_v55 = vld [vmem:[%s9457_s0 + $0x258] sm:$0xff] }
 0x1d3   :  { %v1883_v57 = vld [vmem:[#allocation2 + $0xb0] sm:$0xff]  ;;  %v997_v43 = vpop.f32.mrf.mxu1 }
 0x1d4   :  { %v2217_v9 = vadd.f32 %v2090_v34, %v1883_v57  ;;  %1722 = vst.msk [vmem:[#allocation2 + $0xb8] sm:$0xff] %vm22_vm2, %v1658_v56  ;;  %v1109_v0 = vadd.f32 %v997_v43, %v775_v59  ;;  %v5745_v56 = vld [vmem:[%s9457_s0 + $0x260] sm:$0xff] }
 0x1d5   :  { %v2440_v17 = vld [vmem:[#allocation2 + $0xa8] sm:$0xff]  ;;  %v7544_v60 = vpop.f32.mrf.mxu0 }
 0x1d6   :  { %2281 = vst.msk [vmem:[#allocation2 + $0xb0] sm:$0xff] %vm22_vm2, %v2217_v9  ;;  %v2774_v3 = vadd.f32 %v7477_v11, %v2440_v17  ;;  %5627 = vmatmul.msk.bf16.gmra.mxu1 %vm249_vm1, %v7541_v8  ;;  %5688 = vmatmul.msk.bf16.gmra.mxu2 %vm249_vm1, %v1289_v6 }
 0x1d7   :  { %1173 = vst.msk [vmem:[#allocation2 + $0x100] sm:$0xff] %vm22_vm2, %v1109_v0  ;;  %5785 = vmatmul.msk.bf16.gmra.mxu3 %vm249_vm1, %v1849_v62  ;;  %v1291_v62 = vpack.c.bf16 %v5648_v53, %v5647_v52  ;;  %v779_v0 = vld [vmem:[#allocation2 + $0x120] sm:$0xff] }
 0x1d8   :  { %2838 = vst.msk [vmem:[#allocation2 + $0xa8] sm:$0xff] %vm22_vm2, %v2774_v3  ;;  %5882 = vmatmul.msk.bf16.gmra.mxu0 %vm249_vm1, %v7421_v23  ;;  %v5588_v23 = vld [vmem:[%s9457_s0 + $0x289] sm:$0xff] }
 0x1d9   :  { %v1535_v63 = vpop.f32.mrf.mxu2  ;;  %v7581_v1 = vpack.c.bf16 %v5589_v19, %v5588_v23 }
 0x1da   :  { %v1659_v2 = vadd.f32 %v1535_v63, %v1325_v61  ;;  %v2095_v4 = vpop.f32.mrf.mxu3 }
 0x1db   :  { %v1884_v10 = vld [vmem:[#allocation2 + $0xb8] sm:$0xff]  ;;  %v999_v11 = vpop.f32.mrf.mxu1 }
 0x1dc   :  { %v2218_v12 = vadd.f32 %v2092_v58, %v1884_v10  ;;  %1723 = vst.msk [vmem:[#allocation2 + $0xc0] sm:$0xff] %vm22_vm2, %v1659_v2  ;;  %v1110_v13 = vadd.f32 %v999_v11, %v776_v7  ;;  %v1328_v58 = vld [vmem:[#allocation2 + $0xd8] sm:$0xff]  ;;  %v1329_v10 = vld [vmem:[#allocation2 + $0xe0] sm:$0xff] }
 0x1dd   :  { %v2441_v14 = vld [vmem:[#allocation2 + $0xb0] sm:$0xff]  ;;  %v7557_v15 = vpop.f32.mrf.mxu0 }
 0x1de   :  { %2282 = vst.msk [vmem:[#allocation2 + $0xb8] sm:$0xff] %vm22_vm2, %v2218_v12  ;;  %v2775_v16 = vadd.f32 %v7504_v42, %v2441_v14  ;;  %v1850_v42 = vpack.c.bf16 %v5743_v25, %v5742_v24  ;;  %v780_v14 = vld [vmem:[#allocation2 + $0x128] sm:$0xff]  ;;  %v5649_v25 = vld [vmem:[%s9457_s0 + $0x25a] sm:$0xff] }
 0x1df   :  { %1174 = vst.msk [vmem:[#allocation2 + $0x108] sm:$0xff] %vm22_vm2, %v1110_v13  ;;  %v5593_v24 = vld [vmem:[%s9457_s0 + $0x2c1] sm:$0xff] }
 0x1e0   :  { %2839 = vst.msk [vmem:[#allocation2 + $0xb0] sm:$0xff] %vm22_vm2, %v2775_v16 }
 0x1e1   :  { %v1537_v39 = vpop.f32.mrf.mxu2 }
 0x1e2   :  { %v1660_v27 = vadd.f32 %v1537_v39, %v1326_v26  ;;  %v2097_v41 = vpop.f32.mrf.mxu3  ;;  %v5650_v26 = vld [vmem:[%s9457_s0 + $0x262] sm:$0xff]  ;;  %v5746_v39 = vld [vmem:[%s9457_s0 + $0x270] sm:$0xff] }
 0x1e3   :  { %v1885_v5 = vld [vmem:[#allocation2 + $0xc0] sm:$0xff]  ;;  %v1002_v32 = vpop.f32.mrf.mxu1 }
 0x1e4   :  { %v2219_v29 = vadd.f32 %v2095_v4, %v1885_v5  ;;  %1724 = vst.msk [vmem:[#allocation2 + $0xc8] sm:$0xff] %vm22_vm2, %v1660_v27  ;;  %v1111_v40 = vadd.f32 %v1002_v32, %v777_v30  ;;  %v5747_v27 = vld [vmem:[%s9457_s0 + $0x278] sm:$0xff] }
 0x1e5   :  { %v2442_v20 = vld [vmem:[#allocation2 + $0xb8] sm:$0xff]  ;;  %v7584_v33 = vpop.f32.mrf.mxu0 }
 0x1e6   :  { %2283 = vst.msk [vmem:[#allocation2 + $0xc0] sm:$0xff] %vm22_vm2, %v2219_v29  ;;  %v2776_v34 = vadd.f32 %v7517_v46, %v2442_v20  ;;  %5628 = vmatmul.msk.bf16.gmra.mxu1 %vm249_vm1, %v7581_v1  ;;  %5689 = vmatmul.msk.bf16.gmra.mxu2 %vm249_vm1, %v1290_v38 }
 0x1e7   :  { %1175 = vst.msk [vmem:[#allocation2 + $0x110] sm:$0xff] %vm22_vm2, %v1111_v40  ;;  %5786 = vmatmul.msk.bf16.gmra.mxu3 %vm249_vm1, %v1850_v42  ;;  %v1292_v42 = vpack.c.bf16 %v5650_v26, %v5649_v25  ;;  %v781_v40 = vld [vmem:[#allocation2 + $0x130] sm:$0xff] }
 0x1e8   :  { %2840 = vst.msk [vmem:[#allocation2 + $0xb8] sm:$0xff] %vm22_vm2, %v2776_v34  ;;  %5883 = vmatmul.msk.bf16.gmra.mxu0 %vm249_vm1, %v7461_v54  ;;  %v5590_v54 = vld [vmem:[%s9457_s0 + $0x2a1] sm:$0xff] }
 0x1e9   :  { %v1540_v36 = vpop.f32.mrf.mxu2  ;;  %v7621_v43 = vpack.c.bf16 %v5591_v51, %v5590_v54 }
 0x1ea   :  { %v1661_v37 = vadd.f32 %v1540_v36, %v1327_v35  ;;  %v2100_v44 = vpop.f32.mrf.mxu3 }
 0x1eb   :  { %v1886_v31 = vld [vmem:[#allocation2 + $0xc8] sm:$0xff]  ;;  %v1004_v46 = vpop.f32.mrf.mxu1 }
 0x1ec   :  { %v2220_v47 = vadd.f32 %v2097_v41, %v1886_v31  ;;  %1725 = vst.msk [vmem:[#allocation2 + $0xd0] sm:$0xff] %vm22_vm2, %v1661_v37  ;;  %v1112_v50 = vadd.f32 %v1004_v46, %v778_v18  ;;  %v1330_v41 = vld [vmem:[#allocation2 + $0xe8] sm:$0xff]  ;;  %v1331_v31 = vld [vmem:[#allocation2 + $0xf0] sm:$0xff] }
 0x1ed   :  { %v2443_v28 = vld [vmem:[#allocation2 + $0xc0] sm:$0xff]  ;;  %v7597_v48 = vpop.f32.mrf.mxu0 }
 0x1ee   :  { %2284 = vst.msk [vmem:[#allocation2 + $0xc8] sm:$0xff] %vm22_vm2, %v2220_v47  ;;  %v2777_v49 = vadd.f32 %v7544_v60, %v2443_v28  ;;  %v1851_v60 = vpack.c.bf16 %v5745_v56, %v5744_v55  ;;  %v782_v28 = vld [vmem:[#allocation2 + $0x138] sm:$0xff] }
 0x1ef   :  { %1176 = vst.msk [vmem:[#allocation2 + $0x118] sm:$0xff] %vm22_vm2, %v1112_v50  ;;  %v5595_v55 = vld [vmem:[%s9457_s0 + $0x2d9] sm:$0xff] }
 0x1f0   :  { %2841 = vst.msk [vmem:[#allocation2 + $0xc0] sm:$0xff] %vm22_vm2, %v2777_v49  ;;  %v5651_v56 = vld [vmem:[%s9457_s0 + $0x272] sm:$0xff] }
 0x1f1   :  { %v1542_v6 = vpop.f32.mrf.mxu2 }
 0x1f2   :  { %v1662_v57 = vadd.f32 %v1542_v6, %v1328_v58  ;;  %v2102_v59 = vpop.f32.mrf.mxu3  ;;  %v5652_v58 = vld [vmem:[%s9457_s0 + $0x27a] sm:$0xff]  ;;  %v5748_v6 = vld [vmem:[%s9457_s0 + $0x288] sm:$0xff] }
 0x1f3   :  { %v1887_v9 = vld [vmem:[#allocation2 + $0xd0] sm:$0xff]  ;;  %v1007_v17 = vpop.f32.mrf.mxu1 }
 0x1f4   :  { %v2221_v3 = vadd.f32 %v2100_v44, %v1887_v9  ;;  %1726 = vst.msk [vmem:[#allocation2 + $0xd8] sm:$0xff] %vm22_vm2, %v1662_v57  ;;  %v1113_v61 = vadd.f32 %v1007_v17, %v779_v0  ;;  %v5749_v57 = vld [vmem:[%s9457_s0 + $0x290] sm:$0xff] }
 0x1f5   :  { %v2444_v63 = vld [vmem:[#allocation2 + $0xc8] sm:$0xff]  ;;  %v7624_v2 = vpop.f32.mrf.mxu0 }
 0x1f6   :  { %2285 = vst.msk [vmem:[#allocation2 + $0xd0] sm:$0xff] %vm22_vm2, %v2221_v3  ;;  %v2778_v4 = vadd.f32 %v7557_v15, %v2444_v63  ;;  %5629 = vmatmul.msk.bf16.gmra.mxu1 %vm249_vm1, %v7621_v43  ;;  %5690 = vmatmul.msk.bf16.gmra.mxu2 %vm249_vm1, %v1291_v62 }
 0x1f7   :  { %1177 = vst.msk [vmem:[#allocation2 + $0x120] sm:$0xff] %vm22_vm2, %v1113_v61  ;;  %5787 = vmatmul.msk.bf16.gmra.mxu3 %vm249_vm1, %v1851_v60  ;;  %v1293_v60 = vpack.c.bf16 %v5652_v58, %v5651_v56  ;;  %v783_v61 = vld [vmem:[#allocation2 + $0x140] sm:$0xff] }
 0x1f8   :  { %2842 = vst.msk [vmem:[#allocation2 + $0xc8] sm:$0xff] %vm22_vm2, %v2778_v4  ;;  %5884 = vmatmul.msk.bf16.gmra.mxu0 %vm249_vm1, %v7501_v45  ;;  %v5592_v45 = vld [vmem:[%s9457_s0 + $0x2b9] sm:$0xff] }
 0x1f9   :  { %v1545_v7 = vpop.f32.mrf.mxu2  ;;  %v7661_v32 = vpack.c.bf16 %v5593_v24, %v5592_v45 }
 0x1fa   :  { %v1663_v11 = vadd.f32 %v1545_v7, %v1329_v10  ;;  %v2105_v12 = vpop.f32.mrf.mxu3 }
 0x1fb   :  { %v1888_v13 = vld [vmem:[#allocation2 + $0xd8] sm:$0xff]  ;;  %v1009_v15 = vpop.f32.mrf.mxu1 }
 0x1fc   :  { %v2222_v16 = vadd.f32 %v2102_v59, %v1888_v13  ;;  %1727 = vst.msk [vmem:[#allocation2 + $0xe0] sm:$0xff] %vm22_vm2, %v1663_v11  ;;  %v1114_v23 = vadd.f32 %v1009_v15, %v780_v14  ;;  %v1332_v59 = vld [vmem:[#allocation2 + $0xf8] sm:$0xff]  ;;  %v1333_v13 = vld [vmem:[#allocation2 + $0x100] sm:$0xff] }
 0x1fd   :  { %v2445_v19 = vld [vmem:[#allocation2 + $0xd0] sm:$0xff]  ;;  %v7637_v21 = vpop.f32.mrf.mxu0 }
 0x1fe   :  { %2286 = vst.msk [vmem:[#allocation2 + $0xd8] sm:$0xff] %vm22_vm2, %v2222_v16  ;;  %v2779_v22 = vadd.f32 %v7584_v33, %v2445_v19  ;;  %v1852_v33 = vpack.c.bf16 %v5747_v27, %v5746_v39  ;;  %v784_v19 = vld [vmem:[#allocation2 + $0x148] sm:$0xff]  ;;  %v5597_v39 = vld [vmem:[%s9457_s0 + $0x2f1] sm:$0xff] }
 0x1ff   :  { %1178 = vst.msk [vmem:[#allocation2 + $0x128] sm:$0xff] %vm22_vm2, %v1114_v23  ;;  %v5653_v27 = vld [vmem:[%s9457_s0 + $0x28a] sm:$0xff] }
 0x200   :  { %2843 = vst.msk [vmem:[#allocation2 + $0xd0] sm:$0xff] %vm22_vm2, %v2779_v22 }
 0x201   :  { %v1547_v38 = vpop.f32.mrf.mxu2 }
 0x202   :  { %v1664_v5 = vadd.f32 %v1547_v38, %v1330_v41  ;;  %v2107_v30 = vpop.f32.mrf.mxu3  ;;  %v5654_v41 = vld [vmem:[%s9457_s0 + $0x292] sm:$0xff]  ;;  %v5750_v38 = vld [vmem:[%s9457_s0 + $0x2a0] sm:$0xff] }
 0x203   :  { %v1889_v29 = vld [vmem:[#allocation2 + $0xe0] sm:$0xff]  ;;  %v1012_v20 = vpop.f32.mrf.mxu1 }
 0x204   :  { %v2223_v34 = vadd.f32 %v2105_v12, %v1889_v29  ;;  %1728 = vst.msk [vmem:[#allocation2 + $0xe8] sm:$0xff] %vm22_vm2, %v1664_v5  ;;  %v1115_v35 = vadd.f32 %v1012_v20, %v781_v40  ;;  %v5751_v5 = vld [vmem:[%s9457_s0 + $0x2a8] sm:$0xff] }
 0x205   :  { %v2446_v36 = vld [vmem:[#allocation2 + $0xd8] sm:$0xff]  ;;  %v7664_v37 = vpop.f32.mrf.mxu0 }
 0x206   :  { %2287 = vst.msk [vmem:[#allocation2 + $0xe0] sm:$0xff] %vm22_vm2, %v2223_v34  ;;  %v2780_v44 = vadd.f32 %v7597_v48, %v2446_v36  ;;  %5630 = vmatmul.msk.bf16.gmra.mxu1 %vm249_vm1, %v7661_v32  ;;  %5691 = vmatmul.msk.bf16.gmra.mxu2 %vm249_vm1, %v1292_v42 }
 0x207   :  { %1179 = vst.msk [vmem:[#allocation2 + $0x130] sm:$0xff] %vm22_vm2, %v1115_v35  ;;  %5788 = vmatmul.msk.bf16.gmra.mxu3 %vm249_vm1, %v1852_v33  ;;  %v1294_v33 = vpack.c.bf16 %v5654_v41, %v5653_v27  ;;  %v785_v35 = vld [vmem:[#allocation2 + $0x150] sm:$0xff] }
 0x208   :  { %2844 = vst.msk [vmem:[#allocation2 + $0xd8] sm:$0xff] %vm22_vm2, %v2780_v44  ;;  %5885 = vmatmul.msk.bf16.gmra.mxu0 %vm249_vm1, %v7541_v8  ;;  %v5594_v8 = vld [vmem:[%s9457_s0 + $0x2d1] sm:$0xff] }
 0x209   :  { %v1550_v18 = vpop.f32.mrf.mxu2  ;;  %v7701_v17 = vpack.c.bf16 %v5595_v55, %v5594_v8 }
 0x20a   :  { %v1665_v46 = vadd.f32 %v1550_v18, %v1331_v31  ;;  %v2110_v47 = vpop.f32.mrf.mxu3 }
 0x20b   :  { %v1890_v50 = vld [vmem:[#allocation2 + $0xe8] sm:$0xff]  ;;  %v1014_v48 = vpop.f32.mrf.mxu1 }
 0x20c   :  { %v2224_v49 = vadd.f32 %v2107_v30, %v1890_v50  ;;  %1729 = vst.msk [vmem:[#allocation2 + $0xf0] sm:$0xff] %vm22_vm2, %v1665_v46  ;;  %v1116_v54 = vadd.f32 %v1014_v48, %v782_v28  ;;  %v1334_v30 = vld [vmem:[#allocation2 + $0x108] sm:$0xff]  ;;  %v1335_v50 = vld [vmem:[#allocation2 + $0x110] sm:$0xff] }
 0x20d   :  { %v2447_v51 = vld [vmem:[#allocation2 + $0xe0] sm:$0xff]  ;;  %v7677_v52 = vpop.f32.mrf.mxu0 }
 0x20e   :  { %2288 = vst.msk [vmem:[#allocation2 + $0xe8] sm:$0xff] %vm22_vm2, %v2224_v49  ;;  %v2781_v53 = vadd.f32 %v7624_v2, %v2447_v51  ;;  %v1853_v2 = vpack.c.bf16 %v5749_v57, %v5748_v6  ;;  %v786_v51 = vld [vmem:[#allocation2 + $0x158] sm:$0xff]  ;;  %v5599_v6 = vld [vmem:[%s9457_s0 + $0x309] sm:$0xff] }
 0x20f   :  { %1180 = vst.msk [vmem:[#allocation2 + $0x138] sm:$0xff] %vm22_vm2, %v1116_v54  ;;  %v5655_v57 = vld [vmem:[%s9457_s0 + $0x2a2] sm:$0xff] }
 0x210   :  { %2845 = vst.msk [vmem:[#allocation2 + $0xe0] sm:$0xff] %vm22_vm2, %v2781_v53 }
 0x211   :  { %v1552_v62 = vpop.f32.mrf.mxu2 }
 0x212   :  { %v1666_v9 = vadd.f32 %v1552_v62, %v1332_v59  ;;  %v2112_v0 = vpop.f32.mrf.mxu3  ;;  %v5656_v59 = vld [vmem:[%s9457_s0 + $0x2aa] sm:$0xff]  ;;  %v5752_v62 = vld [vmem:[%s9457_s0 + $0x2b8] sm:$0xff] }
 0x213   :  { %v1891_v3 = vld [vmem:[#allocation2 + $0xf0] sm:$0xff]  ;;  %v1017_v63 = vpop.f32.mrf.mxu1 }
 0x214   :  { %v2225_v4 = vadd.f32 %v2110_v47, %v1891_v3  ;;  %1730 = vst.msk [vmem:[#allocation2 + $0xf8] sm:$0xff] %vm22_vm2, %v1666_v9  ;;  %v1117_v10 = vadd.f32 %v1017_v63, %v783_v61  ;;  %v5753_v9 = vld [vmem:[%s9457_s0 + $0x2c0] sm:$0xff] }
 0x215   :  { %v2448_v7 = vld [vmem:[#allocation2 + $0xe8] sm:$0xff]  ;;  %v7704_v11 = vpop.f32.mrf.mxu0 }
 0x216   :  { %2289 = vst.msk [vmem:[#allocation2 + $0xf0] sm:$0xff] %vm22_vm2, %v2225_v4  ;;  %v2782_v12 = vadd.f32 %v7637_v21, %v2448_v7  ;;  %5631 = vmatmul.msk.bf16.gmra.mxu1 %vm249_vm1, %v7701_v17  ;;  %5692 = vmatmul.msk.bf16.gmra.mxu2 %vm249_vm1, %v1293_v60 }
 0x217   :  { %1181 = vst.msk [vmem:[#allocation2 + $0x140] sm:$0xff] %vm22_vm2, %v1117_v10  ;;  %5789 = vmatmul.msk.bf16.gmra.mxu3 %vm249_vm1, %v1853_v2  ;;  %v1295_v2 = vpack.c.bf16 %v5656_v59, %v5655_v57  ;;  %v787_v10 = vld [vmem:[#allocation2 + $0x160] sm:$0xff] }
 0x218   :  { %2846 = vst.msk [vmem:[#allocation2 + $0xe8] sm:$0xff] %vm22_vm2, %v2782_v12  ;;  %5886 = vmatmul.msk.bf16.gmra.mxu0 %vm249_vm1, %v7581_v1  ;;  %v5596_v1 = vld [vmem:[%s9457_s0 + $0x2e9] sm:$0xff] }
 0x219   :  { %v1555_v14 = vpop.f32.mrf.mxu2  ;;  %v7741_v20 = vpack.c.bf16 %v5597_v39, %v5596_v1 }
 0x21a   :  { %v1667_v15 = vadd.f32 %v1555_v14, %v1333_v13  ;;  %v2115_v16 = vpop.f32.mrf.mxu3 }
 0x21b   :  { %v1892_v23 = vld [vmem:[#allocation2 + $0xf8] sm:$0xff]  ;;  %v1019_v21 = vpop.f32.mrf.mxu1 }
 0x21c   :  { %v2226_v22 = vadd.f32 %v2112_v0, %v1892_v23  ;;  %1731 = vst.msk [vmem:[#allocation2 + $0x100] sm:$0xff] %vm22_vm2, %v1667_v15  ;;  %v1118_v45 = vadd.f32 %v1019_v21, %v784_v19  ;;  %v1336_v0 = vld [vmem:[#allocation2 + $0x118] sm:$0xff]  ;;  %v1337_v23 = vld [vmem:[#allocation2 + $0x120] sm:$0xff] }
 0x21d   :  { %v2449_v24 = vld [vmem:[#allocation2 + $0xf0] sm:$0xff]  ;;  %v7717_v25 = vpop.f32.mrf.mxu0 }
 0x21e   :  { %2290 = vst.msk [vmem:[#allocation2 + $0xf8] sm:$0xff] %vm22_vm2, %v2226_v22  ;;  %v2783_v26 = vadd.f32 %v7664_v37, %v2449_v24  ;;  %v1854_v37 = vpack.c.bf16 %v5751_v5, %v5750_v38  ;;  %v788_v24 = vld [vmem:[#allocation2 + $0x168] sm:$0xff]  ;;  %v5657_v5 = vld [vmem:[%s9457_s0 + $0x2ba] sm:$0xff] }
 0x21f   :  { %1182 = vst.msk [vmem:[#allocation2 + $0x148] sm:$0xff] %vm22_vm2, %v1118_v45  ;;  %v5601_v38 = vld [vmem:[%s9457_s0 + $0x321] sm:$0xff] }
 0x220   :  { %2847 = vst.msk [vmem:[#allocation2 + $0xf0] sm:$0xff] %vm22_vm2, %v2783_v26 }
 0x221   :  { %v1557_v42 = vpop.f32.mrf.mxu2 }
 0x222   :  { %v1668_v29 = vadd.f32 %v1557_v42, %v1334_v30  ;;  %v2117_v40 = vpop.f32.mrf.mxu3  ;;  %v5658_v30 = vld [vmem:[%s9457_s0 + $0x2c2] sm:$0xff]  ;;  %v5754_v42 = vld [vmem:[%s9457_s0 + $0x2d0] sm:$0xff] }
 0x223   :  { %v1893_v34 = vld [vmem:[#allocation2 + $0x100] sm:$0xff]  ;;  %v1022_v36 = vpop.f32.mrf.mxu1 }
 0x224   :  { %v2227_v44 = vadd.f32 %v2115_v16, %v1893_v34  ;;  %1732 = vst.msk [vmem:[#allocation2 + $0x108] sm:$0xff] %vm22_vm2, %v1668_v29  ;;  %v1119_v31 = vadd.f32 %v1022_v36, %v785_v35  ;;  %v5755_v29 = vld [vmem:[%s9457_s0 + $0x2d8] sm:$0xff] }
 0x225   :  { %v2450_v18 = vld [vmem:[#allocation2 + $0xf8] sm:$0xff]  ;;  %v7744_v46 = vpop.f32.mrf.mxu0 }
 0x226   :  { %2291 = vst.msk [vmem:[#allocation2 + $0x100] sm:$0xff] %vm22_vm2, %v2227_v44  ;;  %v2784_v47 = vadd.f32 %v7677_v52, %v2450_v18  ;;  %5632 = vmatmul.msk.bf16.gmra.mxu1 %vm249_vm1, %v7741_v20  ;;  %5693 = vmatmul.msk.bf16.gmra.mxu2 %vm249_vm1, %v1294_v33 }
 0x227   :  { %1183 = vst.msk [vmem:[#allocation2 + $0x150] sm:$0xff] %vm22_vm2, %v1119_v31  ;;  %5790 = vmatmul.msk.bf16.gmra.mxu3 %vm249_vm1, %v1854_v37  ;;  %v1296_v37 = vpack.c.bf16 %v5658_v30, %v5657_v5  ;;  %v789_v31 = vld [vmem:[#allocation2 + $0x170] sm:$0xff] }
 0x228   :  { %2848 = vst.msk [vmem:[#allocation2 + $0xf8] sm:$0xff] %vm22_vm2, %v2784_v47  ;;  %5887 = vmatmul.msk.bf16.gmra.mxu0 %vm249_vm1, %v7621_v43  ;;  %v5598_v43 = vld [vmem:[%s9457_s0 + $0x301] sm:$0xff] }
 0x229   :  { %v1560_v28 = vpop.f32.mrf.mxu2  ;;  %v7781_v63 = vpack.c.bf16 %v5599_v6, %v5598_v43 }
 0x22a   :  { %v1669_v48 = vadd.f32 %v1560_v28, %v1335_v50  ;;  %v2120_v49 = vpop.f32.mrf.mxu3 }
 0x22b   :  { %v1894_v54 = vld [vmem:[#allocation2 + $0x108] sm:$0xff]  ;;  %v1024_v52 = vpop.f32.mrf.mxu1 }
 0x22c   :  { %v2228_v53 = vadd.f32 %v2117_v40, %v1894_v54  ;;  %1733 = vst.msk [vmem:[#allocation2 + $0x110] sm:$0xff] %vm22_vm2, %v1669_v48  ;;  %v1120_v8 = vadd.f32 %v1024_v52, %v786_v51  ;;  %v1338_v40 = vld [vmem:[#allocation2 + $0x128] sm:$0xff]  ;;  %v1339_v54 = vld [vmem:[#allocation2 + $0x130] sm:$0xff] }
 0x22d   :  { %v2451_v55 = vld [vmem:[#allocation2 + $0x100] sm:$0xff]  ;;  %v7757_v56 = vpop.f32.mrf.mxu0 }
 0x22e   :  { %2292 = vst.msk [vmem:[#allocation2 + $0x108] sm:$0xff] %vm22_vm2, %v2228_v53  ;;  %v2785_v58 = vadd.f32 %v7704_v11, %v2451_v55  ;;  %v1855_v11 = vpack.c.bf16 %v5753_v9, %v5752_v62  ;;  %v790_v55 = vld [vmem:[#allocation2 + $0x178] sm:$0xff] }
 0x22f   :  { %1184 = vst.msk [vmem:[#allocation2 + $0x158] sm:$0xff] %vm22_vm2, %v1120_v8  ;;  %v5660_v62 = vld [vmem:[%s9457_s0 + $0x2da] sm:$0xff] }
 0x230   :  { %2849 = vst.msk [vmem:[#allocation2 + $0x100] sm:$0xff] %vm22_vm2, %v2785_v58  ;;  %v5894_v9 = vld [vmem:[%s9457_s0 + $0x1a] sm:$0xff] }
 0x231   :  { %v1562_v60 = vpop.f32.mrf.mxu2 }
 0x232   :  { %v1670_v3 = vadd.f32 %v1562_v60, %v1336_v0  ;;  %v2122_v61 = vpop.f32.mrf.mxu3  ;;  %v5895_v0 = vld [vmem:[%s9457_s0 + $0x22] sm:$0xff] }
 0x233   :  { %v1895_v4 = vld [vmem:[#allocation2 + $0x110] sm:$0xff]  ;;  %v1027_v7 = vpop.f32.mrf.mxu1  ;;  %v5756_v60 = vld [vmem:[%s9457_s0 + $0x2e8] sm:$0xff] }
 0x234   :  { %v2229_v12 = vadd.f32 %v2120_v49, %v1895_v4  ;;  %1734 = vst.msk [vmem:[#allocation2 + $0x118] sm:$0xff] %vm22_vm2, %v1670_v3  ;;  %v1121_v13 = vadd.f32 %v1027_v7, %v787_v10  ;;  %v5757_v3 = vld [vmem:[%s9457_s0 + $0x2f0] sm:$0xff] }
 0x235   :  { %v2452_v14 = vld [vmem:[#allocation2 + $0x108] sm:$0xff]  ;;  %v7784_v15 = vpop.f32.mrf.mxu0 }
 0x236   :  { %2293 = vst.msk [vmem:[#allocation2 + $0x110] sm:$0xff] %vm22_vm2, %v2229_v12  ;;  %v2786_v16 = vadd.f32 %v7717_v25, %v2452_v14  ;;  %5633 = vmatmul.msk.bf16.gmra.mxu1 %vm249_vm1, %v7781_v63  ;;  %5694 = vmatmul.msk.bf16.gmra.mxu2 %vm249_vm1, %v1295_v2 }
 0x237   :  { %1185 = vst.msk [vmem:[#allocation2 + $0x160] sm:$0xff] %vm22_vm2, %v1121_v13  ;;  %5791 = vmatmul.msk.bf16.gmra.mxu3 %vm249_vm1, %v1855_v11  ;;  %v2945_v11 = vpack.c.bf16 %v5895_v0, %v5894_v9  ;;  %v791_v13 = vld [vmem:[#allocation2 + $0x180] sm:$0xff] }
 0x238   :  { %2850 = vst.msk [vmem:[#allocation2 + $0x108] sm:$0xff] %vm22_vm2, %v2786_v16  ;;  %5888 = vmatmul.msk.bf16.gmra.mxu0 %vm249_vm1, %v7661_v32  ;;  %v5600_v32 = vld [vmem:[%s9457_s0 + $0x319] sm:$0xff] }
 0x239   :  { %v1565_v19 = vpop.f32.mrf.mxu2  ;;  %v7821_v36 = vpack.c.bf16 %v5601_v38, %v5600_v32 }
 0x23a   :  { %v1671_v21 = vadd.f32 %v1565_v19, %v1337_v23  ;;  %v2125_v22 = vpop.f32.mrf.mxu3 }
 0x23b   :  { %v1896_v45 = vld [vmem:[#allocation2 + $0x118] sm:$0xff]  ;;  %v1029_v25 = vpop.f32.mrf.mxu1 }
 0x23c   :  { %v2230_v26 = vadd.f32 %v2122_v61, %v1896_v45  ;;  %1735 = vst.msk [vmem:[#allocation2 + $0x120] sm:$0xff] %vm22_vm2, %v1671_v21  ;;  %v1122_v1 = vadd.f32 %v1029_v25, %v788_v24  ;;  %v1340_v61 = vld [vmem:[#allocation2 + $0x138] sm:$0xff]  ;;  %v1341_v45 = vld [vmem:[#allocation2 + $0x140] sm:$0xff] }
 0x23d   :  { %v2453_v39 = vld [vmem:[#allocation2 + $0x110] sm:$0xff]  ;;  %v7797_v27 = vpop.f32.mrf.mxu0 }
 0x23e   :  { %2294 = vst.msk [vmem:[#allocation2 + $0x118] sm:$0xff] %vm22_vm2, %v2230_v26  ;;  %v2787_v41 = vadd.f32 %v7744_v46, %v2453_v39  ;;  %v1856_v46 = vpack.c.bf16 %v5755_v29, %v5754_v42  ;;  %v792_v39 = vld [vmem:[#allocation2 + $0x188] sm:$0xff]  ;;  %v5662_v42 = vld [vmem:[%s9457_s0 + $0x2f2] sm:$0xff] }
 0x23f   :  { %1186 = vst.msk [vmem:[#allocation2 + $0x168] sm:$0xff] %vm22_vm2, %v1122_v1  ;;  %v5896_v29 = vld [vmem:[%s9457_s0 + $0x32] sm:$0xff] }
 0x240   :  { %2851 = vst.msk [vmem:[#allocation2 + $0x110] sm:$0xff] %vm22_vm2, %v2787_v41 }
 0x241   :  { %v1567_v33 = vpop.f32.mrf.mxu2 }
 0x242   :  { %v1672_v34 = vadd.f32 %v1567_v33, %v1338_v40  ;;  %v2127_v35 = vpop.f32.mrf.mxu3  ;;  %v5897_v40 = vld [vmem:[%s9457_s0 + $0x3a] sm:$0xff] }
 0x243   :  { %v1897_v44 = vld [vmem:[#allocation2 + $0x120] sm:$0xff]  ;;  %v1032_v18 = vpop.f32.mrf.mxu1 }
 0x244   :  { %v2231_v47 = vadd.f32 %v2125_v22, %v1897_v44  ;;  %1736 = vst.msk [vmem:[#allocation2 + $0x128] sm:$0xff] %vm22_vm2, %v1672_v34  ;;  %v1123_v50 = vadd.f32 %v1032_v18, %v789_v31  ;;  %v5758_v33 = vld [vmem:[%s9457_s0 + $0x300] sm:$0xff]  ;;  %v5759_v34 = vld [vmem:[%s9457_s0 + $0x308] sm:$0xff] }
 0x245   :  { %v2454_v28 = vld [vmem:[#allocation2 + $0x118] sm:$0xff]  ;;  %v7824_v48 = vpop.f32.mrf.mxu0 }
 0x246   :  { %2295 = vst.msk [vmem:[#allocation2 + $0x120] sm:$0xff] %vm22_vm2, %v2231_v47  ;;  %v2788_v49 = vadd.f32 %v7757_v56, %v2454_v28  ;;  %5634 = vmatmul.msk.bf16.gmra.mxu1 %vm249_vm1, %v7821_v36  ;;  %5695 = vmatmul.msk.bf16.gmra.mxu2 %vm249_vm1, %v1296_v37 }
 0x247   :  { %1187 = vst.msk [vmem:[#allocation2 + $0x170] sm:$0xff] %vm22_vm2, %v1123_v50  ;;  %5792 = vmatmul.msk.bf16.gmra.mxu3 %vm249_vm1, %v1856_v46  ;;  %v7898_v46 = vpack.c.bf16 %v5897_v40, %v5896_v29  ;;  %v793_v50 = vld [vmem:[#allocation2 + $0x190] sm:$0xff]  ;;  %v5666_v40 = vld [vmem:[%s9457_s0 + $0x322] sm:$0xff] }
 0x248   :  { %2852 = vst.msk [vmem:[#allocation2 + $0x118] sm:$0xff] %vm22_vm2, %v2788_v49  ;;  %5889 = vmatmul.msk.bf16.gmra.mxu0 %vm249_vm1, %v7701_v17  ;;  %v5659_v17 = vld [vmem:[%s9457_s0 + $0x2d2] sm:$0xff] }
 0x249   :  { %v1570_v51 = vpop.f32.mrf.mxu2  ;;  %v1297_v7 = vpack.c.bf16 %v5660_v62, %v5659_v17 }
 0x24a   :  { %v1673_v52 = vadd.f32 %v1570_v51, %v1339_v54  ;;  %v2130_v53 = vpop.f32.mrf.mxu3 }
 0x24b   :  { %v1898_v8 = vld [vmem:[#allocation2 + $0x128] sm:$0xff]  ;;  %v1034_v56 = vpop.f32.mrf.mxu1 }
 0x24c   :  { %v2232_v58 = vadd.f32 %v2127_v35, %v1898_v8  ;;  %1737 = vst.msk [vmem:[#allocation2 + $0x130] sm:$0xff] %vm22_vm2, %v1673_v52  ;;  %v1124_v43 = vadd.f32 %v1034_v56, %v790_v55  ;;  %v1342_v35 = vld [vmem:[#allocation2 + $0x148] sm:$0xff]  ;;  %v1343_v8 = vld [vmem:[#allocation2 + $0x150] sm:$0xff] }
 0x24d   :  { %v2455_v6 = vld [vmem:[#allocation2 + $0x120] sm:$0xff]  ;;  %v7837_v57 = vpop.f32.mrf.mxu0 }
 0x24e   :  { %2296 = vst.msk [vmem:[#allocation2 + $0x128] sm:$0xff] %vm22_vm2, %v2232_v58  ;;  %v2789_v59 = vadd.f32 %v7784_v15, %v2455_v6  ;;  %v1857_v15 = vpack.c.bf16 %v5757_v3, %v5756_v60  ;;  %v794_v6 = vld [vmem:[#allocation2 + $0x198] sm:$0xff]  ;;  %v5664_v60 = vld [vmem:[%s9457_s0 + $0x30a] sm:$0xff] }
 0x24f   :  { %1188 = vst.msk [vmem:[#allocation2 + $0x178] sm:$0xff] %vm22_vm2, %v1124_v43  ;;  %v5898_v3 = vld [vmem:[%s9457_s0 + $0x4a] sm:$0xff] }
 0x250   :  { %2853 = vst.msk [vmem:[#allocation2 + $0x120] sm:$0xff] %vm22_vm2, %v2789_v59 }
 0x251   :  { %v1572_v2 = vpop.f32.mrf.mxu2 }
 0x252   :  { %v1674_v4 = vadd.f32 %v1572_v2, %v1340_v61  ;;  %v2132_v10 = vpop.f32.mrf.mxu3  ;;  %v5899_v61 = vld [vmem:[%s9457_s0 + $0x52] sm:$0xff] }
 0x253   :  { %v1899_v12 = vld [vmem:[#allocation2 + $0x130] sm:$0xff]  ;;  %v1037_v14 = vpop.f32.mrf.mxu1  ;;  %v5760_v2 = vld [vmem:[%s9457_s0 + $0x318] sm:$0xff] }
 0x254   :  { %v2233_v16 = vadd.f32 %v2130_v53, %v1899_v12  ;;  %1738 = vst.msk [vmem:[#allocation2 + $0x138] sm:$0xff] %vm22_vm2, %v1674_v4  ;;  %v1125_v23 = vadd.f32 %v1037_v14, %v791_v13  ;;  %v5761_v4 = vld [vmem:[%s9457_s0 + $0x320] sm:$0xff]  ;;  %v7938_v14 = vpack.c.bf16 %v5899_v61, %v5898_v3 }
 0x255   :  { %v2456_v19 = vld [vmem:[#allocation2 + $0x128] sm:$0xff]  ;;  %v7862_v21 = vpop.f32.mrf.mxu0 }
 0x256   :  { %2297 = vst.msk [vmem:[#allocation2 + $0x130] sm:$0xff] %vm22_vm2, %v2233_v16  ;;  %v2790_v22 = vadd.f32 %v7797_v27, %v2456_v19  ;;  %5696 = vmatmul.msk.bf16.gmra.mxu2 %vm249_vm1, %v1297_v7  ;;  %5959 = vmatmul.msk.bf16.vlgmr.msra.gmra.mxu1 %vm249_vm1, %v2945_v11  ;;  %v795_v16 = vld [vmem:[#allocation2 + $0x1a0] sm:$0xff]  ;;  %v1859_v19 = vpack.c.bf16 %v5761_v4, %v5760_v2 }
 0x257   :  { %1189 = vst.msk [vmem:[#allocation2 + $0x180] sm:$0xff] %vm22_vm2, %v1125_v23  ;;  %5793 = vmatmul.msk.bf16.gmra.mxu3 %vm249_vm1, %v1857_v15 }
 0x258   :  { %2854 = vst.msk [vmem:[#allocation2 + $0x128] sm:$0xff] %vm22_vm2, %v2790_v22  ;;  %5890 = vmatmul.msk.bf16.gmra.mxu0 %vm249_vm1, %v7741_v20  ;;  %v5661_v20 = vld [vmem:[%s9457_s0 + $0x2ea] sm:$0xff] }
 0x259   :  { %v1575_v24 = vpop.f32.mrf.mxu2  ;;  %v1298_v18 = vpack.c.bf16 %v5662_v42, %v5661_v20 }
 0x25a   :  { %v1675_v25 = vadd.f32 %v1575_v24, %v1341_v45  ;;  %v2135_v26 = vpop.f32.mrf.mxu3 }
 0x25b   :  { %v1900_v1 = vld [vmem:[#allocation2 + $0x138] sm:$0xff]  ;;  %v1039_v27 = vpop.f32.mrf.mxu1 }
 0x25c   :  { %v2234_v41 = vadd.f32 %v2132_v10, %v1900_v1  ;;  %1739 = vst.msk [vmem:[#allocation2 + $0x140] sm:$0xff] %vm22_vm2, %v1675_v25  ;;  %v1126_v32 = vadd.f32 %v1039_v27, %v792_v39  ;;  %v1344_v10 = vld [vmem:[#allocation2 + $0x158] sm:$0xff] }
 0x25d   :  { %v2457_v38 = vld [vmem:[#allocation2 + $0x130] sm:$0xff]  ;;  %v7874_v5 = vpop.f32.mrf.mxu0 }
 0x25e   :  { %2298 = vst.msk [vmem:[#allocation2 + $0x138] sm:$0xff] %vm22_vm2, %v2234_v41  ;;  %v2791_v30 = vadd.f32 %v7824_v48, %v2457_v38  ;;  %v1858_v48 = vpack.c.bf16 %v5759_v34, %v5758_v33  ;;  %v5900_v33 = vld [vmem:[%s9457_s0 + $0x62] sm:$0xff]  ;;  %v5901_v34 = vld [vmem:[%s9457_s0 + $0x6a] sm:$0xff] }
 0x25f   :  { %1190 = vst.msk [vmem:[#allocation2 + $0x188] sm:$0xff] %vm22_vm2, %v1126_v32  ;;  %v796_v32 = vld [vmem:[#allocation2 + $0x1a8] sm:$0xff] }
 0x260   :  { %2855 = vst.msk [vmem:[#allocation2 + $0x130] sm:$0xff] %vm22_vm2, %v2791_v30 }
 0x261   :  { %v1577_v37 = vpop.f32.mrf.mxu2 }
 0x262   :  { %v1676_v44 = vadd.f32 %v1577_v37, %v1342_v35  ;;  %v2137_v31 = vpop.f32.mrf.mxu3  ;;  %v5762_v35 = vld [vmem:[%s9457_s0 + $0x330] sm:$0xff]  ;;  %v5763_v37 = vld [vmem:[%s9457_s0 + $0x338] sm:$0xff] }
 0x263   :  { %v1901_v47 = vld [vmem:[#allocation2 + $0x140] sm:$0xff]  ;;  %v1042_v28 = vpop.f32.mrf.mxu1 }
 0x264   :  { %v2235_v49 = vadd.f32 %v2135_v26, %v1901_v47  ;;  %1740 = vst.msk [vmem:[#allocation2 + $0x148] sm:$0xff] %vm22_vm2, %v1676_v44  ;;  %v1127_v54 = vadd.f32 %v1042_v28, %v793_v50  ;;  %v1345_v26 = vld [vmem:[#allocation2 + $0x160] sm:$0xff]  ;;  %v1346_v44 = vld [vmem:[#allocation2 + $0x168] sm:$0xff] }
 0x265   :  { %v2458_v51 = vld [vmem:[#allocation2 + $0x138] sm:$0xff]  ;;  %v7901_v52 = vpop.f32.mrf.mxu0 }
 0x266   :  { %2299 = vst.msk [vmem:[#allocation2 + $0x140] sm:$0xff] %vm22_vm2, %v2235_v49  ;;  %v2792_v53 = vadd.f32 %v7837_v57, %v2458_v51  ;;  %5697 = vmatmul.msk.bf16.gmra.mxu2 %vm249_vm1, %v1298_v18  ;;  %5960 = vmatmul.msk.bf16.gmra.mxu1 %vm249_vm1, %v7898_v46  ;;  %v5859_v18 = vld [vmem:[%s9457_s0 + $0x331] sm:$0xff]  ;;  %v5860_v47 = vld [vmem:[%s9457_s0 + $0x339] sm:$0xff]  ;;  %v7984_v49 = vpack.c.bf16 %v5901_v34, %v5900_v33 }
 0x267   :  { %1191 = vst.msk [vmem:[#allocation2 + $0x190] sm:$0xff] %vm22_vm2, %v1127_v54  ;;  %5794 = vmatmul.msk.bf16.gmra.mxu3 %vm249_vm1, %v1858_v48  ;;  %v797_v51 = vld [vmem:[#allocation2 + $0x1b0] sm:$0xff] }
 0x268   :  { %2856 = vst.msk [vmem:[#allocation2 + $0x138] sm:$0xff] %vm22_vm2, %v2792_v53  ;;  %5891 = vmatmul.msk.bf16.gmra.mxu0 %vm249_vm1, %v7781_v63  ;;  %v5663_v63 = vld [vmem:[%s9457_s0 + $0x302] sm:$0xff]  ;;  %v1860_v53 = vpack.c.bf16 %v5763_v37, %v5762_v35 }
 0x269   :  { %v1580_v55 = vpop.f32.mrf.mxu2  ;;  %v1299_v13 = vpack.c.bf16 %v5664_v60, %v5663_v63  ;;  %v798_v63 = vld [vmem:[#allocation2 + $0x1b8] sm:$0xff] }
 0x26a   :  { %v1677_v56 = vadd.f32 %v1580_v55, %v1343_v8  ;;  %v2140_v58 = vpop.f32.mrf.mxu3 }
 0x26b   :  { %v1902_v43 = vld [vmem:[#allocation2 + $0x148] sm:$0xff]  ;;  %v1044_v57 = vpop.f32.mrf.mxu1 }
 0x26c   :  { %v2236_v59 = vadd.f32 %v2137_v31, %v1902_v43  ;;  %1741 = vst.msk [vmem:[#allocation2 + $0x150] sm:$0xff] %vm22_vm2, %v1677_v56  ;;  %v1128_v17 = vadd.f32 %v1044_v57, %v794_v6  ;;  %v2418_v56 = vpack.c.bf16 %v5860_v47, %v5859_v18  ;;  %v1347_v57 = vld [vmem:[#allocation2 + $0x170] sm:$0xff]  ;;  %v5993_v18 = vld [vmem:[%s9457_s0 + $0x48] sm:$0xff] }
 0x26d   :  { %v2459_v62 = vld [vmem:[#allocation2 + $0x140] sm:$0xff]  ;;  %v7914_v9 = vpop.f32.mrf.mxu0  ;;  %v5994_v47 = vld [vmem:[%s9457_s0 + $0x50] sm:$0xff] }
 0x26e   :  { %2300 = vst.msk [vmem:[#allocation2 + $0x148] sm:$0xff] %vm22_vm2, %v2236_v59  ;;  %v2793_v0 = vadd.f32 %v7862_v21, %v2459_v62 }
 0x26f   :  { %1192 = vst.msk [vmem:[#allocation2 + $0x198] sm:$0xff] %vm22_vm2, %v1128_v17 }
 0x270   :  { %2857 = vst.msk [vmem:[#allocation2 + $0x140] sm:$0xff] %vm22_vm2, %v2793_v0 }
 0x271   :  { %v1582_v7 = vpop.f32.mrf.mxu2 }
 0x272   :  { %v1678_v11 = vadd.f32 %v1582_v7, %v1344_v10  ;;  %v2142_v12 = vpop.f32.mrf.mxu3  ;;  %v5902_v10 = vld [vmem:[%s9457_s0 + $0x7a] sm:$0xff]  ;;  %v5903_v7 = vld [vmem:[%s9457_s0 + $0x82] sm:$0xff] }
 0x273   :  { %v1903_v15 = vld [vmem:[#allocation2 + $0x150] sm:$0xff]  ;;  %v1047_v23 = vpop.f32.mrf.mxu1 }
 0x274   :  { %v2237_v21 = vadd.f32 %v2140_v58, %v1903_v15  ;;  %1742 = vst.msk [vmem:[#allocation2 + $0x158] sm:$0xff] %vm22_vm2, %v1678_v11  ;;  %v1129_v22 = vadd.f32 %v1047_v23, %v795_v16  ;;  %v5991_v11 = vld [vmem:[%s9457_s0 + $0x30] sm:$0xff]  ;;  %v6089_v15 = vld [vmem:[%s9457_s0 + $0x39] sm:$0xff] }
 0x275   :  { %v2460_v45 = vld [vmem:[#allocation2 + $0x148] sm:$0xff]  ;;  %v7941_v24 = vpop.f32.mrf.mxu0  ;;  %v1348_v16 = vld [vmem:[#allocation2 + $0x178] sm:$0xff] }
 0x276   :  { %2301 = vst.msk [vmem:[#allocation2 + $0x150] sm:$0xff] %vm22_vm2, %v2237_v21  ;;  %v2794_v25 = vadd.f32 %v7874_v5, %v2460_v45  ;;  %5698 = vmatmul.msk.bf16.gmra.mxu2 %vm249_vm1, %v1299_v13  ;;  %5961 = vmatmul.msk.bf16.gmra.mxu1 %vm249_vm1, %v7938_v14  ;;  %v6088_v13 = vld [vmem:[%s9457_s0 + $0x31] sm:$0xff] }
 0x277   :  { %1193 = vst.msk [vmem:[#allocation2 + $0x1a0] sm:$0xff] %vm22_vm2, %v1129_v22  ;;  %5795 = vmatmul.msk.bf16.gmra.mxu3 %vm249_vm1, %v1859_v19  ;;  %v8023_v22 = vpack.c.bf16 %v5903_v7, %v5902_v10 }
 0x278   :  { %2858 = vst.msk [vmem:[#allocation2 + $0x148] sm:$0xff] %vm22_vm2, %v2794_v25  ;;  %5892 = vmatmul.msk.bf16.gmra.mxu0 %vm249_vm1, %v7821_v36  ;;  %v5665_v36 = vld [vmem:[%s9457_s0 + $0x31a] sm:$0xff] }
 0x279   :  { %v1585_v1 = vpop.f32.mrf.mxu2  ;;  %v1300_v48 = vpack.c.bf16 %v5666_v40, %v5665_v36  ;;  %v799_v25 = vld [vmem:[#allocation2 + $0x1c0] sm:$0xff] }
 0x27a   :  { %v1679_v39 = vadd.f32 %v1585_v1, %v1345_v26  ;;  %v2145_v27 = vpop.f32.mrf.mxu3  ;;  %v4063_v1 = vpack.c.bf16 %v6089_v15, %v6088_v13  ;;  %v5907_v13 = vld [vmem:[%s9457_s0 + $0xb2] sm:$0xff]  ;;  %v5995_v15 = vld [vmem:[%s9457_s0 + $0x60] sm:$0xff] }
 0x27b   :  { %v1904_v41 = vld [vmem:[#allocation2 + $0x158] sm:$0xff]  ;;  %v1049_v38 = vpop.f32.mrf.mxu1 }
 0x27c   :  { %v2238_v5 = vadd.f32 %v2142_v12, %v1904_v41  ;;  %1743 = vst.msk [vmem:[#allocation2 + $0x160] sm:$0xff] %vm22_vm2, %v1679_v39  ;;  %v1130_v30 = vadd.f32 %v1049_v38, %v796_v32  ;;  %v5992_v12 = vld [vmem:[%s9457_s0 + $0x38] sm:$0xff] }
 0x27d   :  { %v2461_v20 = vld [vmem:[#allocation2 + $0x150] sm:$0xff]  ;;  %v7954_v42 = vpop.f32.mrf.mxu0  ;;  %v3505_v45 = vpack.c.bf16 %v5992_v12, %v5991_v11 }
 0x27e   :  { %2302 = vst.msk [vmem:[#allocation2 + $0x158] sm:$0xff] %vm22_vm2, %v2238_v5  ;;  %v2795_v29 = vadd.f32 %v7901_v52, %v2461_v20  ;;  %v1349_v5 = vld [vmem:[#allocation2 + $0x180] sm:$0xff] }
 0x27f   :  { %1194 = vst.msk [vmem:[#allocation2 + $0x1a8] sm:$0xff] %vm22_vm2, %v1130_v30 }
 0x280   :  { %2859 = vst.msk [vmem:[#allocation2 + $0x150] sm:$0xff] %vm22_vm2, %v2795_v29 }
 0x281   :  { %v1587_v31 = vpop.f32.mrf.mxu2 }
 0x282   :  { %v1680_v50 = vadd.f32 %v1587_v31, %v1346_v44  ;;  %v2147_v28 = vpop.f32.mrf.mxu3  ;;  %v5905_v31 = vld [vmem:[%s9457_s0 + $0x9a] sm:$0xff] }
 0x283   :  { %v1905_v54 = vld [vmem:[#allocation2 + $0x160] sm:$0xff]  ;;  %v1052_v52 = vpop.f32.mrf.mxu1 }
 0x284   :  { %v2239_v8 = vadd.f32 %v2145_v27, %v1905_v54  ;;  %1744 = vst.msk [vmem:[#allocation2 + $0x168] sm:$0xff] %vm22_vm2, %v1680_v50  ;;  %v1131_v55 = vadd.f32 %v1052_v52, %v797_v51  ;;  %v6090_v50 = vld [vmem:[%s9457_s0 + $0x49] sm:$0xff] }
 0x285   :  { %v2462_v58 = vld [vmem:[#allocation2 + $0x158] sm:$0xff]  ;;  %v7987_v43 = vpop.f32.mrf.mxu0 }
 0x286   :  { %2303 = vst.msk [vmem:[#allocation2 + $0x160] sm:$0xff] %vm22_vm2, %v2239_v8  ;;  %v2796_v6 = vadd.f32 %v7914_v9, %v2462_v58  ;;  %5699 = vmatmul.msk.bf16.gmra.mxu2 %vm249_vm1, %v1300_v48  ;;  %5962 = vmatmul.msk.bf16.gmra.mxu1 %vm249_vm1, %v7984_v49  ;;  %v1350_v48 = vld [vmem:[#allocation2 + $0x188] sm:$0xff]  ;;  %v3506_v8 = vpack.c.bf16 %v5994_v47, %v5993_v18 }
 0x287   :  { %1195 = vst.msk [vmem:[#allocation2 + $0x1b0] sm:$0xff] %vm22_vm2, %v1131_v55  ;;  %5796 = vmatmul.msk.bf16.gmra.mxu3 %vm249_vm1, %v1860_v53 }
 0x288   :  { %2860 = vst.msk [vmem:[#allocation2 + $0x158] sm:$0xff] %vm22_vm2, %v2796_v6  ;;  %5893 = vmatmul.msk.bf16.gmra.mxu0 %vm249_vm1, %v2418_v56  ;;  %v801_v56 = vld [vmem:[#allocation2 + $0x1d0] sm:$0xff] }
 0x289   :  { %v1590_v59 = vpop.f32.mrf.mxu2 }
 0x28a   :  { %v1681_v17 = vadd.f32 %v1590_v59, %v1347_v57  ;;  %v2150_v62 = vpop.f32.mrf.mxu3 }
 0x28b   :  { %v1906_v0 = vld [vmem:[#allocation2 + $0x168] sm:$0xff]  ;;  %v1054_v9 = vpop.f32.mrf.mxu1 }
 0x28c   :  { %v2240_v60 = vadd.f32 %v2147_v28, %v1906_v0  ;;  %1745 = vst.msk [vmem:[#allocation2 + $0x170] sm:$0xff] %vm22_vm2, %v1681_v17  ;;  %v1132_v3 = vadd.f32 %v1054_v9, %v798_v63  ;;  %v6091_v28 = vld [vmem:[%s9457_s0 + $0x51] sm:$0xff] }
 0x28d   :  { %v2463_v61 = vld [vmem:[#allocation2 + $0x160] sm:$0xff]  ;;  %v7999_v2 = vpop.f32.mrf.mxu0  ;;  %v1351_v0 = vld [vmem:[#allocation2 + $0x190] sm:$0xff] }
 0x28e   :  { %2304 = vst.msk [vmem:[#allocation2 + $0x168] sm:$0xff] %vm22_vm2, %v2240_v60  ;;  %v2797_v4 = vadd.f32 %v7941_v24, %v2463_v61  ;;  %v802_v61 = vld [vmem:[#allocation2 + $0x1d8] sm:$0xff] }
 0x28f   :  { %1196 = vst.msk [vmem:[#allocation2 + $0x1b8] sm:$0xff] %vm22_vm2, %v1132_v3 }
 0x290   :  { %2861 = vst.msk [vmem:[#allocation2 + $0x160] sm:$0xff] %vm22_vm2, %v2797_v4 }
 0x291   :  { %v1592_v23 = vpop.f32.mrf.mxu2 }
 0x292   :  { %v1682_v19 = vadd.f32 %v1592_v23, %v1348_v16  ;;  %v2152_v21 = vpop.f32.mrf.mxu3  ;;  %v5996_v16 = vld [vmem:[%s9457_s0 + $0x68] sm:$0xff] }
 0x293   :  { %v1907_v24 = vld [vmem:[#allocation2 + $0x170] sm:$0xff]  ;;  %v1057_v26 = vpop.f32.mrf.mxu1  ;;  %v6092_v23 = vld [vmem:[%s9457_s0 + $0x61] sm:$0xff] }
 0x294   :  { %v2241_v39 = vadd.f32 %v2150_v62, %v1907_v24  ;;  %1746 = vst.msk [vmem:[#allocation2 + $0x178] sm:$0xff] %vm22_vm2, %v1682_v19  ;;  %v1133_v27 = vadd.f32 %v1057_v26, %v799_v25  ;;  %v6093_v19 = vld [vmem:[%s9457_s0 + $0x69] sm:$0xff] }
 0x295   :  { %v2464_v41 = vld [vmem:[#allocation2 + $0x168] sm:$0xff]  ;;  %v8026_v32 = vpop.f32.mrf.mxu0 }
 0x296   :  { %2305 = vst.msk [vmem:[#allocation2 + $0x170] sm:$0xff] %vm22_vm2, %v2241_v39  ;;  %v2798_v38 = vadd.f32 %v7954_v42, %v2464_v41  ;;  %5963 = vmatmul.msk.bf16.gmra.mxu1 %vm249_vm1, %v8023_v22  ;;  %6056 = vmatmul.msk.bf16.vlgmr.msra.gmra.mxu2 %vm249_vm1, %v3505_v45  ;;  %v800_v42 = vld [vmem:[#allocation2 + $0x1c8] sm:$0xff] }
 0x297   :  { %1197 = vst.msk [vmem:[#allocation2 + $0x1c0] sm:$0xff] %vm22_vm2, %v1133_v27  ;;  %6153 = vmatmul.msk.bf16.vlgmr.msra.gmra.mxu3 %vm249_vm1, %v4063_v1  ;;  %v3507_v1 = vpack.c.bf16 %v5996_v16, %v5995_v15  ;;  %v803_v27 = vld [vmem:[#allocation2 + $0x1e0] sm:$0xff] }
 0x298   :  { %2862 = vst.msk [vmem:[#allocation2 + $0x168] sm:$0xff] %vm22_vm2, %v2798_v38  ;;  %6250 = vmatmul.msk.bf16.vlgmr.msra.gmra.mxu0 %vm249_vm1, %v7898_v46  ;;  %v5904_v46 = vld [vmem:[%s9457_s0 + $0x92] sm:$0xff] }
 0x299   :  { %v1595_v30 = vpop.f32.mrf.mxu2  ;;  %v8063_v53 = vpack.c.bf16 %v5905_v31, %v5904_v46 }
 0x29a   :  { %v1683_v20 = vadd.f32 %v1595_v30, %v1349_v5  ;;  %v2155_v29 = vpop.f32.mrf.mxu3 }
 0x29b   :  { %v1908_v36 = vld [vmem:[#allocation2 + $0x178] sm:$0xff]  ;;  %v1059_v40 = vpop.f32.mrf.mxu1 }
 0x29c   :  { %v2242_v33 = vadd.f32 %v2152_v21, %v1908_v36  ;;  %1747 = vst.msk [vmem:[#allocation2 + $0x180] sm:$0xff] %vm22_vm2, %v1683_v20  ;;  %v1134_v34 = vadd.f32 %v1059_v40, %v800_v42  ;;  %v1352_v21 = vld [vmem:[#allocation2 + $0x198] sm:$0xff]  ;;  %v1353_v36 = vld [vmem:[#allocation2 + $0x1a0] sm:$0xff] }
 0x29d   :  { %v2465_v35 = vld [vmem:[#allocation2 + $0x170] sm:$0xff]  ;;  %v8039_v37 = vpop.f32.mrf.mxu0 }
 0x29e   :  { %2306 = vst.msk [vmem:[#allocation2 + $0x178] sm:$0xff] %vm22_vm2, %v2242_v33  ;;  %v2799_v44 = vadd.f32 %v7987_v43, %v2465_v35  ;;  %v4064_v43 = vpack.c.bf16 %v6091_v28, %v6090_v50  ;;  %v804_v35 = vld [vmem:[#allocation2 + $0x1e8] sm:$0xff]  ;;  %v5997_v28 = vld [vmem:[%s9457_s0 + $0x78] sm:$0xff] }
 0x29f   :  { %1198 = vst.msk [vmem:[#allocation2 + $0x1c8] sm:$0xff] %vm22_vm2, %v1134_v34  ;;  %v5909_v50 = vld [vmem:[%s9457_s0 + $0xca] sm:$0xff] }
 0x2a0   :  { %2863 = vst.msk [vmem:[#allocation2 + $0x170] sm:$0xff] %vm22_vm2, %v2799_v44 }
 0x2a1   :  { %v1597_v54 = vpop.f32.mrf.mxu2 }
 0x2a2   :  { %v1684_v51 = vadd.f32 %v1597_v54, %v1350_v48  ;;  %v2157_v52 = vpop.f32.mrf.mxu3  ;;  %v5998_v48 = vld [vmem:[%s9457_s0 + $0x80] sm:$0xff] }
 0x2a3   :  { %v1909_v55 = vld [vmem:[#allocation2 + $0x180] sm:$0xff]  ;;  %v1062_v58 = vpop.f32.mrf.mxu1 }
 0x2a4   :  { %v2243_v6 = vadd.f32 %v2155_v29, %v1909_v55  ;;  %1748 = vst.msk [vmem:[#allocation2 + $0x188] sm:$0xff] %vm22_vm2, %v1684_v51  ;;  %v1135_v57 = vadd.f32 %v1062_v58, %v801_v56  ;;  %v6094_v54 = vld [vmem:[%s9457_s0 + $0x79] sm:$0xff]  ;;  %v6095_v51 = vld [vmem:[%s9457_s0 + $0x81] sm:$0xff] }
 0x2a5   :  { %v2466_v59 = vld [vmem:[#allocation2 + $0x178] sm:$0xff]  ;;  %v8066_v17 = vpop.f32.mrf.mxu0 }
 0x2a6   :  { %2307 = vst.msk [vmem:[#allocation2 + $0x180] sm:$0xff] %vm22_vm2, %v2243_v6  ;;  %v2800_v62 = vadd.f32 %v7999_v2, %v2466_v59  ;;  %5964 = vmatmul.msk.bf16.gmra.mxu1 %vm249_vm1, %v8063_v53  ;;  %6057 = vmatmul.msk.bf16.gmra.mxu2 %vm249_vm1, %v3506_v8 }
 0x2a7   :  { %1199 = vst.msk [vmem:[#allocation2 + $0x1d0] sm:$0xff] %vm22_vm2, %v1135_v57  ;;  %6154 = vmatmul.msk.bf16.gmra.mxu3 %vm249_vm1, %v4064_v43  ;;  %v3508_v43 = vpack.c.bf16 %v5998_v48, %v5997_v28  ;;  %v805_v57 = vld [vmem:[#allocation2 + $0x1f0] sm:$0xff] }
 0x2a8   :  { %2864 = vst.msk [vmem:[#allocation2 + $0x178] sm:$0xff] %vm22_vm2, %v2800_v62  ;;  %6251 = vmatmul.msk.bf16.gmra.mxu0 %vm249_vm1, %v7938_v14  ;;  %v5906_v14 = vld [vmem:[%s9457_s0 + $0xaa] sm:$0xff] }
 0x2a9   :  { %v1600_v63 = vpop.f32.mrf.mxu2  ;;  %v8103_v26 = vpack.c.bf16 %v5907_v13, %v5906_v14 }
 0x2aa   :  { %v1685_v9 = vadd.f32 %v1600_v63, %v1351_v0  ;;  %v2160_v60 = vpop.f32.mrf.mxu3 }
 0x2ab   :  { %v1910_v3 = vld [vmem:[#allocation2 + $0x188] sm:$0xff]  ;;  %v1064_v2 = vpop.f32.mrf.mxu1 }
 0x2ac   :  { %v2244_v4 = vadd.f32 %v2157_v52, %v1910_v3  ;;  %1749 = vst.msk [vmem:[#allocation2 + $0x190] sm:$0xff] %vm22_vm2, %v1685_v9  ;;  %v1136_v10 = vadd.f32 %v1064_v2, %v802_v61  ;;  %v1354_v52 = vld [vmem:[#allocation2 + $0x1a8] sm:$0xff]  ;;  %v1355_v3 = vld [vmem:[#allocation2 + $0x1b0] sm:$0xff] }
 0x2ad   :  { %v2467_v7 = vld [vmem:[#allocation2 + $0x180] sm:$0xff]  ;;  %v8079_v11 = vpop.f32.mrf.mxu0 }
 0x2ae   :  { %2308 = vst.msk [vmem:[#allocation2 + $0x188] sm:$0xff] %vm22_vm2, %v2244_v4  ;;  %v2801_v12 = vadd.f32 %v8026_v32, %v2467_v7  ;;  %v4065_v32 = vpack.c.bf16 %v6093_v19, %v6092_v23  ;;  %v806_v7 = vld [vmem:[#allocation2 + $0x1f8] sm:$0xff]  ;;  %v5911_v23 = vld [vmem:[%s9457_s0 + $0xe2] sm:$0xff]  ;;  %v5999_v19 = vld [vmem:[%s9457_s0 + $0x90] sm:$0xff] }
 0x2af   :  { %1200 = vst.msk [vmem:[#allocation2 + $0x1d8] sm:$0xff] %vm22_vm2, %v1136_v10 }
 0x2b0   :  { %2865 = vst.msk [vmem:[#allocation2 + $0x180] sm:$0xff] %vm22_vm2, %v2801_v12 }
 0x2b1   :  { %v1602_v45 = vpop.f32.mrf.mxu2 }
 0x2b2   :  { %v1686_v24 = vadd.f32 %v1602_v45, %v1352_v21  ;;  %v2162_v25 = vpop.f32.mrf.mxu3  ;;  %v6000_v21 = vld [vmem:[%s9457_s0 + $0x98] sm:$0xff] }
 0x2b3   :  { %v1911_v39 = vld [vmem:[#allocation2 + $0x190] sm:$0xff]  ;;  %v1067_v41 = vpop.f32.mrf.mxu1 }
 0x2b4   :  { %v2245_v38 = vadd.f32 %v2160_v60, %v1911_v39  ;;  %1750 = vst.msk [vmem:[#allocation2 + $0x198] sm:$0xff] %vm22_vm2, %v1686_v24  ;;  %v1137_v5 = vadd.f32 %v1067_v41, %v803_v27  ;;  %v6096_v45 = vld [vmem:[%s9457_s0 + $0x91] sm:$0xff]  ;;  %v6097_v24 = vld [vmem:[%s9457_s0 + $0x99] sm:$0xff] }
 0x2b5   :  { %v2468_v30 = vld [vmem:[#allocation2 + $0x188] sm:$0xff]  ;;  %v8106_v20 = vpop.f32.mrf.mxu0 }
 0x2b6   :  { %2309 = vst.msk [vmem:[#allocation2 + $0x190] sm:$0xff] %vm22_vm2, %v2245_v38  ;;  %v2802_v29 = vadd.f32 %v8039_v37, %v2468_v30  ;;  %5965 = vmatmul.msk.bf16.gmra.mxu1 %vm249_vm1, %v8103_v26  ;;  %6058 = vmatmul.msk.bf16.gmra.mxu2 %vm249_vm1, %v3507_v1 }
 0x2b7   :  { %1201 = vst.msk [vmem:[#allocation2 + $0x1e0] sm:$0xff] %vm22_vm2, %v1137_v5  ;;  %6155 = vmatmul.msk.bf16.gmra.mxu3 %vm249_vm1, %v4065_v32  ;;  %v3509_v32 = vpack.c.bf16 %v6000_v21, %v5999_v19  ;;  %v2977_v5 = vld [vmem:[#allocation2] sm:$0xff] }
 0x2b8   :  { %2866 = vst.msk [vmem:[#allocation2 + $0x188] sm:$0xff] %vm22_vm2, %v2802_v29  ;;  %6252 = vmatmul.msk.bf16.gmra.mxu0 %vm249_vm1, %v7984_v49  ;;  %v5908_v49 = vld [vmem:[%s9457_s0 + $0xc2] sm:$0xff] }
 0x2b9   :  { %v1605_v42 = vpop.f32.mrf.mxu2  ;;  %v8143_v58 = vpack.c.bf16 %v5909_v50, %v5908_v49 }
 0x2ba   :  { %v1687_v40 = vadd.f32 %v1605_v42, %v1353_v36  ;;  %v2165_v33 = vpop.f32.mrf.mxu3 }
 0x2bb   :  { %v1912_v34 = vld [vmem:[#allocation2 + $0x198] sm:$0xff]  ;;  %v1069_v37 = vpop.f32.mrf.mxu1 }
 0x2bc   :  { %v2246_v44 = vadd.f32 %v2162_v25, %v1912_v34  ;;  %1751 = vst.msk [vmem:[#allocation2 + $0x1a0] sm:$0xff] %vm22_vm2, %v1687_v40  ;;  %v1138_v46 = vadd.f32 %v1069_v37, %v804_v35  ;;  %v1356_v25 = vld [vmem:[#allocation2 + $0x1b8] sm:$0xff]  ;;  %v1357_v34 = vld [vmem:[#allocation2 + $0x1c0] sm:$0xff] }
 0x2bd   :  { %v2469_v31 = vld [vmem:[#allocation2 + $0x190] sm:$0xff]  ;;  %v8119_v18 = vpop.f32.mrf.mxu0 }
 0x2be   :  { %2310 = vst.msk [vmem:[#allocation2 + $0x198] sm:$0xff] %vm22_vm2, %v2246_v44  ;;  %v2803_v47 = vadd.f32 %v8066_v17, %v2469_v31  ;;  %v4066_v17 = vpack.c.bf16 %v6095_v51, %v6094_v54  ;;  %v2978_v31 = vld [vmem:[#allocation2 + $0x8] sm:$0xff]  ;;  %v5913_v54 = vld [vmem:[%s9457_s0 + $0xfa] sm:$0xff] }
 0x2bf   :  { %1202 = vst.msk [vmem:[#allocation2 + $0x1e8] sm:$0xff] %vm22_vm2, %v1138_v46  ;;  %v6001_v51 = vld [vmem:[%s9457_s0 + $0xa8] sm:$0xff] }
 0x2c0   :  { %2867 = vst.msk [vmem:[#allocation2 + $0x190] sm:$0xff] %vm22_vm2, %v2803_v47 }
 0x2c1   :  { %v1607_v8 = vpop.f32.mrf.mxu2 }
 0x2c2   :  { %v1688_v55 = vadd.f32 %v1607_v8, %v1354_v52  ;;  %v2167_v56 = vpop.f32.mrf.mxu3  ;;  %v6002_v52 = vld [vmem:[%s9457_s0 + $0xb0] sm:$0xff] }
 0x2c3   :  { %v1913_v6 = vld [vmem:[#allocation2 + $0x1a0] sm:$0xff]  ;;  %v1072_v59 = vpop.f32.mrf.mxu1  ;;  %v6098_v8 = vld [vmem:[%s9457_s0 + $0xa9] sm:$0xff] }
 0x2c4   :  { %v2247_v62 = vadd.f32 %v2165_v33, %v1913_v6  ;;  %1752 = vst.msk [vmem:[#allocation2 + $0x1a8] sm:$0xff] %vm22_vm2, %v1688_v55  ;;  %v1139_v0 = vadd.f32 %v1072_v59, %v805_v57  ;;  %v6099_v55 = vld [vmem:[%s9457_s0 + $0xb1] sm:$0xff] }
 0x2c5   :  { %v2470_v63 = vld [vmem:[#allocation2 + $0x198] sm:$0xff]  ;;  %v8146_v9 = vpop.f32.mrf.mxu0 }
 0x2c6   :  { %2311 = vst.msk [vmem:[#allocation2 + $0x1a0] sm:$0xff] %vm22_vm2, %v2247_v62  ;;  %v2804_v60 = vadd.f32 %v8079_v11, %v2470_v63  ;;  %5966 = vmatmul.msk.bf16.gmra.mxu1 %vm249_vm1, %v8143_v58  ;;  %6059 = vmatmul.msk.bf16.gmra.mxu2 %vm249_vm1, %v3508_v43 }
 0x2c7   :  { %1203 = vst.msk [vmem:[#allocation2 + $0x1f0] sm:$0xff] %vm22_vm2, %v1139_v0  ;;  %6156 = vmatmul.msk.bf16.gmra.mxu3 %vm249_vm1, %v4066_v17  ;;  %v3510_v17 = vpack.c.bf16 %v6002_v52, %v6001_v51  ;;  %v2979_v0 = vld [vmem:[#allocation2 + $0x10] sm:$0xff] }
 0x2c8   :  { %2868 = vst.msk [vmem:[#allocation2 + $0x198] sm:$0xff] %vm22_vm2, %v2804_v60  ;;  %6253 = vmatmul.msk.bf16.gmra.mxu0 %vm249_vm1, %v8023_v22  ;;  %v5910_v22 = vld [vmem:[%s9457_s0 + $0xda] sm:$0xff] }
 0x2c9   :  { %v1610_v61 = vpop.f32.mrf.mxu2  ;;  %v8183_v41 = vpack.c.bf16 %v5911_v23, %v5910_v22 }
 0x2ca   :  { %v1689_v2 = vadd.f32 %v1610_v61, %v1355_v3  ;;  %v2170_v4 = vpop.f32.mrf.mxu3 }
 0x2cb   :  { %v1914_v10 = vld [vmem:[#allocation2 + $0x1a8] sm:$0xff]  ;;  %v1074_v11 = vpop.f32.mrf.mxu1 }
 0x2cc   :  { %v2248_v12 = vadd.f32 %v2167_v56, %v1914_v10  ;;  %1753 = vst.msk [vmem:[#allocation2 + $0x1b0] sm:$0xff] %vm22_vm2, %v1689_v2  ;;  %v1140_v14 = vadd.f32 %v1074_v11, %v806_v7  ;;  %v1358_v56 = vld [vmem:[#allocation2 + $0x1c8] sm:$0xff]  ;;  %v1359_v10 = vld [vmem:[#allocation2 + $0x1d0] sm:$0xff] }
 0x2cd   :  { %v2471_v13 = vld [vmem:[#allocation2 + $0x1a0] sm:$0xff]  ;;  %v8159_v15 = vpop.f32.mrf.mxu0 }
 0x2ce   :  { %2312 = vst.msk [vmem:[#allocation2 + $0x1a8] sm:$0xff] %vm22_vm2, %v2248_v12  ;;  %v2805_v16 = vadd.f32 %v8106_v20, %v2471_v13  ;;  %v4067_v20 = vpack.c.bf16 %v6097_v24, %v6096_v45  ;;  %v2980_v13 = vld [vmem:[#allocation2 + $0x18] sm:$0xff]  ;;  %v6003_v24 = vld [vmem:[%s9457_s0 + $0xc0] sm:$0xff] }
 0x2cf   :  { %1204 = vst.msk [vmem:[#allocation2 + $0x1f8] sm:$0xff] %vm22_vm2, %v1140_v14  ;;  %v5915_v45 = vld [vmem:[%s9457_s0 + $0x112] sm:$0xff] }
 0x2d0   :  { %2869 = vst.msk [vmem:[#allocation2 + $0x1a0] sm:$0xff] %vm22_vm2, %v2805_v16 }
 0x2d1   :  { %v1612_v1 = vpop.f32.mrf.mxu2 }
 0x2d2   :  { %v1690_v39 = vadd.f32 %v1612_v1, %v1356_v25  ;;  %v2172_v27 = vpop.f32.mrf.mxu3  ;;  %v6004_v25 = vld [vmem:[%s9457_s0 + $0xc8] sm:$0xff] }
 0x2d3   :  { %v1915_v38 = vld [vmem:[#allocation2 + $0x1b0] sm:$0xff]  ;;  %v3151_v30 = vpop.f32.mrf.mxu1  ;;  %v6100_v1 = vld [vmem:[%s9457_s0 + $0xc1] sm:$0xff] }
 0x2d4   :  { %v2249_v29 = vadd.f32 %v2170_v4, %v1915_v38  ;;  %1754 = vst.msk [vmem:[#allocation2 + $0x1b8] sm:$0xff] %vm22_vm2, %v1690_v39  ;;  %v3311_v36 = vadd.f32 %v3151_v30, %v2977_v5  ;;  %v6101_v39 = vld [vmem:[%s9457_s0 + $0xc9] sm:$0xff] }
 0x2d5   :  { %v2472_v42 = vld [vmem:[#allocation2 + $0x1a8] sm:$0xff]  ;;  %v8186_v40 = vpop.f32.mrf.mxu0 }
 0x2d6   :  { %2313 = vst.msk [vmem:[#allocation2 + $0x1b0] sm:$0xff] %vm22_vm2, %v2249_v29  ;;  %v2806_v33 = vadd.f32 %v8119_v18, %v2472_v42  ;;  %5967 = vmatmul.msk.bf16.gmra.mxu1 %vm249_vm1, %v8183_v41  ;;  %6060 = vmatmul.msk.bf16.gmra.mxu2 %vm249_vm1, %v3509_v32 }
 0x2d7   :  { %3375 = vst.msk [vmem:[#allocation2] sm:$0xff] %vm22_vm2, %v3311_v36  ;;  %6157 = vmatmul.msk.bf16.gmra.mxu3 %vm249_vm1, %v4067_v20  ;;  %v3511_v20 = vpack.c.bf16 %v6004_v25, %v6003_v24  ;;  %v2981_v36 = vld [vmem:[#allocation2 + $0x20] sm:$0xff] }
 0x2d8   :  { %2870 = vst.msk [vmem:[#allocation2 + $0x1a8] sm:$0xff] %vm22_vm2, %v2806_v33  ;;  %6254 = vmatmul.msk.bf16.gmra.mxu0 %vm249_vm1, %v8063_v53  ;;  %v5912_v53 = vld [vmem:[%s9457_s0 + $0xf2] sm:$0xff] }
 0x2d9   :  { %v1615_v35 = vpop.f32.mrf.mxu2  ;;  %v8223_v59 = vpack.c.bf16 %v5913_v54, %v5912_v53 }
 0x2da   :  { %v1691_v37 = vadd.f32 %v1615_v35, %v1357_v34  ;;  %v2175_v44 = vpop.f32.mrf.mxu3 }
 0x2db   :  { %v1916_v46 = vld [vmem:[#allocation2 + $0x1b8] sm:$0xff]  ;;  %v3153_v18 = vpop.f32.mrf.mxu1 }
 0x2dc   :  { %v2250_v47 = vadd.f32 %v2172_v27, %v1916_v46  ;;  %1755 = vst.msk [vmem:[#allocation2 + $0x1c0] sm:$0xff] %vm22_vm2, %v1691_v37  ;;  %v3312_v49 = vadd.f32 %v3153_v18, %v2978_v31  ;;  %v1360_v27 = vld [vmem:[#allocation2 + $0x1d8] sm:$0xff]  ;;  %v1361_v46 = vld [vmem:[#allocation2 + $0x1e0] sm:$0xff] }
 0x2dd   :  { %v2473_v50 = vld [vmem:[#allocation2 + $0x1b0] sm:$0xff]  ;;  %v8199_v28 = vpop.f32.mrf.mxu0 }
 0x2de   :  { %2314 = vst.msk [vmem:[#allocation2 + $0x1b8] sm:$0xff] %vm22_vm2, %v2250_v47  ;;  %v2807_v48 = vadd.f32 %v8146_v9, %v2473_v50  ;;  %v4068_v9 = vpack.c.bf16 %v6099_v55, %v6098_v8  ;;  %v2982_v50 = vld [vmem:[#allocation2 + $0x28] sm:$0xff]  ;;  %v6005_v55 = vld [vmem:[%s9457_s0 + $0xd8] sm:$0xff] }
 0x2df   :  { %3376 = vst.msk [vmem:[#allocation2 + $0x8] sm:$0xff] %vm22_vm2, %v3312_v49  ;;  %v5917_v8 = vld [vmem:[%s9457_s0 + $0x12a] sm:$0xff] }
 0x2e0   :  { %2871 = vst.msk [vmem:[#allocation2 + $0x1b0] sm:$0xff] %vm22_vm2, %v2807_v48 }
 0x2e1   :  { %v1617_v43 = vpop.f32.mrf.mxu2 }
 0x2e2   :  { %v1692_v6 = vadd.f32 %v1617_v43, %v1358_v56  ;;  %v2177_v57 = vpop.f32.mrf.mxu3  ;;  %v6006_v56 = vld [vmem:[%s9457_s0 + $0xe0] sm:$0xff] }
 0x2e3   :  { %v1917_v62 = vld [vmem:[#allocation2 + $0x1c0] sm:$0xff]  ;;  %v3156_v63 = vpop.f32.mrf.mxu1 }
 0x2e4   :  { %v2251_v60 = vadd.f32 %v2175_v44, %v1917_v62  ;;  %1756 = vst.msk [vmem:[#allocation2 + $0x1c8] sm:$0xff] %vm22_vm2, %v1692_v6  ;;  %v3313_v3 = vadd.f32 %v3156_v63, %v2979_v0  ;;  %v6102_v43 = vld [vmem:[%s9457_s0 + $0xd9] sm:$0xff]  ;;  %v6103_v6 = vld [vmem:[%s9457_s0 + $0xe1] sm:$0xff] }
 0x2e5   :  { %v2474_v61 = vld [vmem:[#allocation2 + $0x1b8] sm:$0xff]  ;;  %v8226_v2 = vpop.f32.mrf.mxu0 }
 0x2e6   :  { %2315 = vst.msk [vmem:[#allocation2 + $0x1c0] sm:$0xff] %vm22_vm2, %v2251_v60  ;;  %v2808_v4 = vadd.f32 %v8159_v15, %v2474_v61  ;;  %5968 = vmatmul.msk.bf16.gmra.mxu1 %vm249_vm1, %v8223_v59  ;;  %6061 = vmatmul.msk.bf16.gmra.mxu2 %vm249_vm1, %v3510_v17 }
 0x2e7   :  { %3377 = vst.msk [vmem:[#allocation2 + $0x10] sm:$0xff] %vm22_vm2, %v3313_v3  ;;  %6158 = vmatmul.msk.bf16.gmra.mxu3 %vm249_vm1, %v4068_v9  ;;  %v3512_v9 = vpack.c.bf16 %v6006_v56, %v6005_v55  ;;  %v2983_v3 = vld [vmem:[#allocation2 + $0x30] sm:$0xff] }
 0x2e8   :  { %2872 = vst.msk [vmem:[#allocation2 + $0x1b8] sm:$0xff] %vm22_vm2, %v2808_v4  ;;  %6255 = vmatmul.msk.bf16.gmra.mxu0 %vm249_vm1, %v8103_v26  ;;  %v5914_v26 = vld [vmem:[%s9457_s0 + $0x10a] sm:$0xff] }
 0x2e9   :  { %v1620_v7 = vpop.f32.mrf.mxu2  ;;  %v8263_v30 = vpack.c.bf16 %v5915_v45, %v5914_v26 }
 0x2ea   :  { %v1693_v11 = vadd.f32 %v1620_v7, %v1359_v10  ;;  %v2180_v12 = vpop.f32.mrf.mxu3 }
 0x2eb   :  { %v1918_v14 = vld [vmem:[#allocation2 + $0x1c8] sm:$0xff]  ;;  %v3158_v15 = vpop.f32.mrf.mxu1 }
 0x2ec   :  { %v2252_v16 = vadd.f32 %v2177_v57, %v1918_v14  ;;  %1757 = vst.msk [vmem:[#allocation2 + $0x1d0] sm:$0xff] %vm22_vm2, %v1693_v11  ;;  %v3314_v22 = vadd.f32 %v3158_v15, %v2980_v13  ;;  %v1362_v57 = vld [vmem:[#allocation2 + $0x1e8] sm:$0xff]  ;;  %v1363_v14 = vld [vmem:[#allocation2 + $0x1f0] sm:$0xff] }
 0x2ed   :  { %v2475_v23 = vld [vmem:[#allocation2 + $0x1c0] sm:$0xff]  ;;  %v8239_v19 = vpop.f32.mrf.mxu0 }
 0x2ee   :  { %2316 = vst.msk [vmem:[#allocation2 + $0x1c8] sm:$0xff] %vm22_vm2, %v2252_v16  ;;  %v2809_v21 = vadd.f32 %v8186_v40, %v2475_v23  ;;  %v4069_v40 = vpack.c.bf16 %v6101_v39, %v6100_v1  ;;  %v2984_v23 = vld [vmem:[#allocation2 + $0x38] sm:$0xff]  ;;  %v5919_v1 = vld [vmem:[%s9457_s0 + $0x142] sm:$0xff]  ;;  %v6007_v39 = vld [vmem:[%s9457_s0 + $0xf0] sm:$0xff] }
 0x2ef   :  { %3378 = vst.msk [vmem:[#allocation2 + $0x18] sm:$0xff] %vm22_vm2, %v3314_v22 }
 0x2f0   :  { %2873 = vst.msk [vmem:[#allocation2 + $0x1c0] sm:$0xff] %vm22_vm2, %v2809_v21 }
 0x2f1   :  { %v1622_v32 = vpop.f32.mrf.mxu2 }
 0x2f2   :  { %v1694_v38 = vadd.f32 %v1622_v32, %v1360_v27  ;;  %v2182_v5 = vpop.f32.mrf.mxu3  ;;  %v6008_v27 = vld [vmem:[%s9457_s0 + $0xf8] sm:$0xff] }
 0x2f3   :  { %v1919_v29 = vld [vmem:[#allocation2 + $0x1d0] sm:$0xff]  ;;  %v3161_v42 = vpop.f32.mrf.mxu1 }
 0x2f4   :  { %v2253_v33 = vadd.f32 %v2180_v12, %v1919_v29  ;;  %1758 = vst.msk [vmem:[#allocation2 + $0x1d8] sm:$0xff] %vm22_vm2, %v1694_v38  ;;  %v3315_v34 = vadd.f32 %v3161_v42, %v2981_v36  ;;  %v6104_v32 = vld [vmem:[%s9457_s0 + $0xf1] sm:$0xff]  ;;  %v6105_v38 = vld [vmem:[%s9457_s0 + $0xf9] sm:$0xff] }
 0x2f5   :  { %v2476_v35 = vld [vmem:[#allocation2 + $0x1c8] sm:$0xff]  ;;  %v8266_v37 = vpop.f32.mrf.mxu0 }
 0x2f6   :  { %2317 = vst.msk [vmem:[#allocation2 + $0x1d0] sm:$0xff] %vm22_vm2, %v2253_v33  ;;  %v2810_v44 = vadd.f32 %v8199_v28, %v2476_v35  ;;  %5969 = vmatmul.msk.bf16.gmra.mxu1 %vm249_vm1, %v8263_v30  ;;  %6062 = vmatmul.msk.bf16.gmra.mxu2 %vm249_vm1, %v3511_v20 }
 0x2f7   :  { %3379 = vst.msk [vmem:[#allocation2 + $0x20] sm:$0xff] %vm22_vm2, %v3315_v34  ;;  %6159 = vmatmul.msk.bf16.gmra.mxu3 %vm249_vm1, %v4069_v40  ;;  %v3513_v40 = vpack.c.bf16 %v6008_v27, %v6007_v39  ;;  %v2985_v34 = vld [vmem:[#allocation2 + $0x40] sm:$0xff] }
 0x2f8   :  { %2874 = vst.msk [vmem:[#allocation2 + $0x1c8] sm:$0xff] %vm22_vm2, %v2810_v44  ;;  %6256 = vmatmul.msk.bf16.gmra.mxu0 %vm249_vm1, %v8143_v58  ;;  %v5916_v58 = vld [vmem:[%s9457_s0 + $0x122] sm:$0xff] }
 0x2f9   :  { %v1625_v31 = vpop.f32.mrf.mxu2  ;;  %v8303_v63 = vpack.c.bf16 %v5917_v8, %v5916_v58 }
 0x2fa   :  { %v1695_v18 = vadd.f32 %v1625_v31, %v1361_v46  ;;  %v2185_v47 = vpop.f32.mrf.mxu3 }
 0x2fb   :  { %v1920_v49 = vld [vmem:[#allocation2 + $0x1d8] sm:$0xff]  ;;  %v3163_v28 = vpop.f32.mrf.mxu1 }
 0x2fc   :  { %v2254_v48 = vadd.f32 %v2182_v5, %v1920_v49  ;;  %1759 = vst.msk [vmem:[#allocation2 + $0x1e0] sm:$0xff] %vm22_vm2, %v1695_v18  ;;  %v3316_v53 = vadd.f32 %v3163_v28, %v2982_v50  ;;  %v1364_v5 = vld [vmem:[#allocation2 + $0x1f8] sm:$0xff]  ;;  %v3537_v49 = vld [vmem:[#allocation2] sm:$0xff] }
 0x2fd   :  { %v2477_v54 = vld [vmem:[#allocation2 + $0x1d0] sm:$0xff]  ;;  %v8279_v51 = vpop.f32.mrf.mxu0 }
 0x2fe   :  { %2318 = vst.msk [vmem:[#allocation2 + $0x1d8] sm:$0xff] %vm22_vm2, %v2254_v48  ;;  %v2811_v52 = vadd.f32 %v8226_v2, %v2477_v54  ;;  %v4070_v2 = vpack.c.bf16 %v6103_v6, %v6102_v43  ;;  %v2986_v54 = vld [vmem:[#allocation2 + $0x48] sm:$0xff]  ;;  %v5921_v43 = vld [vmem:[%s9457_s0 + $0x15a] sm:$0xff] }
 0x2ff   :  { %3380 = vst.msk [vmem:[#allocation2 + $0x28] sm:$0xff] %vm22_vm2, %v3316_v53  ;;  %v6009_v6 = vld [vmem:[%s9457_s0 + $0x108] sm:$0xff] }
 0x300   :  { %2875 = vst.msk [vmem:[#allocation2 + $0x1d0] sm:$0xff] %vm22_vm2, %v2811_v52 }
 0x301   :  { %v1627_v17 = vpop.f32.mrf.mxu2 }
 0x302   :  { %v1696_v62 = vadd.f32 %v1627_v17, %v1362_v57  ;;  %v2187_v0 = vpop.f32.mrf.mxu3  ;;  %v6010_v57 = vld [vmem:[%s9457_s0 + $0x110] sm:$0xff] }
 0x303   :  { %v1921_v60 = vld [vmem:[#allocation2 + $0x1e0] sm:$0xff]  ;;  %v3166_v61 = vpop.f32.mrf.mxu1  ;;  %v6106_v17 = vld [vmem:[%s9457_s0 + $0x109] sm:$0xff] }
 0x304   :  { %v2255_v4 = vadd.f32 %v2185_v47, %v1921_v60  ;;  %1760 = vst.msk [vmem:[#allocation2 + $0x1e8] sm:$0xff] %vm22_vm2, %v1696_v62  ;;  %v3317_v10 = vadd.f32 %v3166_v61, %v2983_v3  ;;  %v6107_v62 = vld [vmem:[%s9457_s0 + $0x111] sm:$0xff] }
 0x305   :  { %v2478_v7 = vld [vmem:[#allocation2 + $0x1d8] sm:$0xff]  ;;  %v8306_v11 = vpop.f32.mrf.mxu0 }
 0x306   :  { %2319 = vst.msk [vmem:[#allocation2 + $0x1e0] sm:$0xff] %vm22_vm2, %v2255_v4  ;;  %v2812_v12 = vadd.f32 %v8239_v19, %v2478_v7  ;;  %5970 = vmatmul.msk.bf16.gmra.mxu1 %vm249_vm1, %v8303_v63  ;;  %6063 = vmatmul.msk.bf16.gmra.mxu2 %vm249_vm1, %v3512_v9 }
 0x307   :  { %3381 = vst.msk [vmem:[#allocation2 + $0x30] sm:$0xff] %vm22_vm2, %v3317_v10  ;;  %6160 = vmatmul.msk.bf16.gmra.mxu3 %vm249_vm1, %v4070_v2  ;;  %v3514_v2 = vpack.c.bf16 %v6010_v57, %v6009_v6  ;;  %v2987_v10 = vld [vmem:[#allocation2 + $0x50] sm:$0xff]  ;;  %v6292_v6 = vld [vmem:[%s9460_s3 + $0x8] sm:$0xff] }
 0x308   :  { %2876 = vst.msk [vmem:[#allocation2 + $0x1d8] sm:$0xff] %vm22_vm2, %v2812_v12  ;;  %6257 = vmatmul.msk.bf16.gmra.mxu0 %vm249_vm1, %v8183_v41  ;;  %v5918_v41 = vld [vmem:[%s9457_s0 + $0x13a] sm:$0xff]  ;;  %5482 = vmatpush.bf16.msrb.mxu1 %v6292_v6  ;;  %v2994_v6 = vld [vmem:[#allocation2 + $0x88] sm:$0xff] }
 0x309   :  { %v1630_v13 = vpop.f32.mrf.mxu2  ;;  %v8343_v42 = vpack.c.bf16 %v5919_v1, %v5918_v41 }
 0x30a   :  { %v1697_v15 = vadd.f32 %v1630_v13, %v1363_v14  ;;  %v2190_v16 = vpop.f32.mrf.mxu3 }
 0x30b   :  { %v1922_v22 = vld [vmem:[#allocation2 + $0x1e8] sm:$0xff]  ;;  %v3168_v19 = vpop.f32.mrf.mxu1 }
 0x30c   :  { %v2256_v21 = vadd.f32 %v2187_v0, %v1922_v22  ;;  %1761 = vst.msk [vmem:[#allocation2 + $0x1f0] sm:$0xff] %vm22_vm2, %v1697_v15  ;;  %v3318_v26 = vadd.f32 %v3168_v19, %v2984_v23  ;;  %v3538_v0 = vld [vmem:[#allocation2 + $0x8] sm:$0xff]  ;;  %v3539_v22 = vld [vmem:[#allocation2 + $0x10] sm:$0xff] }
 0x30d   :  { %v2479_v45 = vld [vmem:[#allocation2 + $0x1e0] sm:$0xff]  ;;  %v8319_v24 = vpop.f32.mrf.mxu0 }
 0x30e   :  { %2320 = vst.msk [vmem:[#allocation2 + $0x1e8] sm:$0xff] %vm22_vm2, %v2256_v21  ;;  %v2813_v25 = vadd.f32 %v8266_v37, %v2479_v45  ;;  %v4071_v37 = vpack.c.bf16 %v6105_v38, %v6104_v32  ;;  %v2988_v45 = vld [vmem:[#allocation2 + $0x58] sm:$0xff]  ;;  %v6011_v38 = vld [vmem:[%s9457_s0 + $0x120] sm:$0xff] }
 0x30f   :  { %3382 = vst.msk [vmem:[#allocation2 + $0x38] sm:$0xff] %vm22_vm2, %v3318_v26  ;;  %v5923_v32 = vld [vmem:[%s9457_s0 + $0x172] sm:$0xff] }
 0x310   :  { %2877 = vst.msk [vmem:[#allocation2 + $0x1e0] sm:$0xff] %vm22_vm2, %v2813_v25 }
 0x311   :  { %v1632_v20 = vpop.f32.mrf.mxu2 }
 0x312   :  { %v1698_v29 = vadd.f32 %v1632_v20, %v1364_v5  ;;  %v2192_v36 = vpop.f32.mrf.mxu3  ;;  %v6012_v5 = vld [vmem:[%s9457_s0 + $0x128] sm:$0xff] }
 0x313   :  { %v1923_v33 = vld [vmem:[#allocation2 + $0x1f0] sm:$0xff]  ;;  %v3171_v35 = vpop.f32.mrf.mxu1  ;;  %v6108_v20 = vld [vmem:[%s9457_s0 + $0x121] sm:$0xff] }
 0x314   :  { %v2257_v44 = vadd.f32 %v2190_v16, %v1923_v33  ;;  %1762 = vst.msk [vmem:[#allocation2 + $0x1f8] sm:$0xff] %vm22_vm2, %v1698_v29  ;;  %v3319_v46 = vadd.f32 %v3171_v35, %v2985_v34  ;;  %v6109_v29 = vld [vmem:[%s9457_s0 + $0x129] sm:$0xff] }
 0x315   :  { %v2480_v31 = vld [vmem:[#allocation2 + $0x1e8] sm:$0xff]  ;;  %v8346_v18 = vpop.f32.mrf.mxu0 }
 0x316   :  { %2321 = vst.msk [vmem:[#allocation2 + $0x1f0] sm:$0xff] %vm22_vm2, %v2257_v44  ;;  %v2814_v47 = vadd.f32 %v8279_v51, %v2480_v31  ;;  %5971 = vmatmul.msk.bf16.gmra.mxu1 %vm249_vm1, %v8343_v42  ;;  %6064 = vmatmul.msk.bf16.gmra.mxu2 %vm249_vm1, %v3513_v40 }
 0x317   :  { %3383 = vst.msk [vmem:[#allocation2 + $0x40] sm:$0xff] %vm22_vm2, %v3319_v46  ;;  %6161 = vmatmul.msk.bf16.gmra.mxu3 %vm249_vm1, %v4071_v37  ;;  %v3515_v37 = vpack.c.bf16 %v6012_v5, %v6011_v38  ;;  %v2989_v46 = vld [vmem:[#allocation2 + $0x60] sm:$0xff] }
 0x318   :  { %2878 = vst.msk [vmem:[#allocation2 + $0x1e8] sm:$0xff] %vm22_vm2, %v2814_v47  ;;  %6258 = vmatmul.msk.bf16.gmra.mxu0 %vm249_vm1, %v8223_v59  ;;  %v5920_v59 = vld [vmem:[%s9457_s0 + $0x152] sm:$0xff] }
 0x319   :  { %v3711_v50 = vpop.f32.mrf.mxu2  ;;  %v8383_v61 = vpack.c.bf16 %v5921_v43, %v5920_v59 }
 0x31a   :  { %v3871_v28 = vadd.f32 %v3711_v50, %v3537_v49  ;;  %v4269_v48 = vpop.f32.mrf.mxu3 }
 0x31b   :  { %v1924_v53 = vld [vmem:[#allocation2 + $0x1f8] sm:$0xff]  ;;  %v3173_v51 = vpop.f32.mrf.mxu1 }
 0x31c   :  { %v2258_v52 = vadd.f32 %v2192_v36, %v1924_v53  ;;  %3935 = vst.msk [vmem:[#allocation2] sm:$0xff] %vm22_vm2, %v3871_v28  ;;  %v3320_v58 = vadd.f32 %v3173_v51, %v2986_v54  ;;  %v3540_v36 = vld [vmem:[#allocation2 + $0x18] sm:$0xff]  ;;  %v3541_v53 = vld [vmem:[#allocation2 + $0x20] sm:$0xff] }
 0x31d   :  { %v2481_v8 = vld [vmem:[#allocation2 + $0x1f0] sm:$0xff]  ;;  %v8359_v55 = vpop.f32.mrf.mxu0 }
 0x31e   :  { %2322 = vst.msk [vmem:[#allocation2 + $0x1f8] sm:$0xff] %vm22_vm2, %v2258_v52  ;;  %v2815_v56 = vadd.f32 %v8306_v11, %v2481_v8  ;;  %v4072_v11 = vpack.c.bf16 %v6107_v62, %v6106_v17  ;;  %v2990_v8 = vld [vmem:[#allocation2 + $0x68] sm:$0xff] }
 0x31f   :  { %3384 = vst.msk [vmem:[#allocation2 + $0x48] sm:$0xff] %vm22_vm2, %v3320_v58  ;;  %v5924_v17 = vld [vmem:[%s9457_s0 + $0x182] sm:$0xff]  ;;  %v5925_v62 = vld [vmem:[%s9457_s0 + $0x18a] sm:$0xff] }
 0x320   :  { %2879 = vst.msk [vmem:[#allocation2 + $0x1f0] sm:$0xff] %vm22_vm2, %v2815_v56 }
 0x321   :  { %v3713_v9 = vpop.f32.mrf.mxu2 }
 0x322   :  { %v3872_v60 = vadd.f32 %v3713_v9, %v3538_v0  ;;  %v4271_v3 = vpop.f32.mrf.mxu3  ;;  %v6013_v0 = vld [vmem:[%s9457_s0 + $0x138] sm:$0xff]  ;;  %v6014_v9 = vld [vmem:[%s9457_s0 + $0x140] sm:$0xff] }
 0x323   :  { %v4095_v4 = vld [vmem:[#allocation2] sm:$0xff]  ;;  %v3176_v7 = vpop.f32.mrf.mxu1 }
 0x324   :  { %v4429_v12 = vadd.f32 %v4269_v48, %v4095_v4  ;;  %3936 = vst.msk [vmem:[#allocation2 + $0x8] sm:$0xff] %vm22_vm2, %v3872_v60  ;;  %v3321_v14 = vadd.f32 %v3176_v7, %v2987_v10  ;;  %v6110_v60 = vld [vmem:[%s9457_s0 + $0x139] sm:$0xff] }
 0x325   :  { %v2482_v13 = vld [vmem:[#allocation2 + $0x1f8] sm:$0xff]  ;;  %v8386_v15 = vpop.f32.mrf.mxu0 }
 0x326   :  { %4493 = vst.msk [vmem:[#allocation2] sm:$0xff] %vm22_vm2, %v4429_v12  ;;  %v2816_v16 = vadd.f32 %v8319_v24, %v2482_v13  ;;  %5972 = vmatmul.msk.bf16.gmra.mxu1 %vm249_vm1, %v8383_v61  ;;  %6065 = vmatmul.msk.bf16.gmra.mxu2 %vm249_vm1, %v3514_v2  ;;  %v3542_v2 = vld [vmem:[#allocation2 + $0x28] sm:$0xff]  ;;  %v3516_v12 = vpack.c.bf16 %v6014_v9, %v6013_v0  ;;  %v2991_v13 = vld [vmem:[#allocation2 + $0x70] sm:$0xff] }
 0x327   :  { %3385 = vst.msk [vmem:[#allocation2 + $0x50] sm:$0xff] %vm22_vm2, %v3321_v14  ;;  %6162 = vmatmul.msk.bf16.gmra.mxu3 %vm249_vm1, %v4072_v11  ;;  %v8466_v11 = vpack.c.bf16 %v5925_v62, %v5924_v17 }
 0x328   :  { %2880 = vst.msk [vmem:[#allocation2 + $0x1f8] sm:$0xff] %vm22_vm2, %v2816_v16  ;;  %6259 = vmatmul.msk.bf16.gmra.mxu0 %vm249_vm1, %v8263_v30  ;;  %v5922_v30 = vld [vmem:[%s9457_s0 + $0x16a] sm:$0xff] }
 0x329   :  { %v3716_v23 = vpop.f32.mrf.mxu2  ;;  %v8423_v35 = vpack.c.bf16 %v5923_v32, %v5922_v30 }
 0x32a   :  { %v3873_v19 = vadd.f32 %v3716_v23, %v3539_v22  ;;  %v4274_v21 = vpop.f32.mrf.mxu3 }
 0x32b   :  { %v4096_v26 = vld [vmem:[#allocation2 + $0x8] sm:$0xff]  ;;  %v3178_v24 = vpop.f32.mrf.mxu1 }
 0x32c   :  { %v4430_v25 = vadd.f32 %v4271_v3, %v4096_v26  ;;  %3937 = vst.msk [vmem:[#allocation2 + $0x10] sm:$0xff] %vm22_vm2, %v3873_v19  ;;  %v3322_v41 = vadd.f32 %v3178_v24, %v2988_v45  ;;  %v6111_v3 = vld [vmem:[%s9457_s0 + $0x141] sm:$0xff]  ;;  %v3543_v45 = vld [vmem:[#allocation2 + $0x30] sm:$0xff] }
 0x32d   :  { %v4653_v1 = vld [vmem:[#allocation2] sm:$0xff]  ;;  %v8399_v39 = vpop.f32.mrf.mxu0  ;;  %v4074_v16 = vpack.c.bf16 %v6111_v3, %v6110_v60  ;;  %v5929_v60 = vld [vmem:[%s9457_s0 + $0x1ea] sm:$0xff] }
 0x32e   :  { %4494 = vst.msk [vmem:[#allocation2 + $0x8] sm:$0xff] %vm22_vm2, %v4430_v25  ;;  %v4987_v27 = vadd.f32 %v8346_v18, %v4653_v1  ;;  %v4073_v18 = vpack.c.bf16 %v6109_v29, %v6108_v20  ;;  %v5927_v29 = vld [vmem:[%s9457_s0 + $0x1d2] sm:$0xff]  ;;  %v6017_v3 = vld [vmem:[%s9457_s0 + $0x168] sm:$0xff] }
 0x32f   :  { %3386 = vst.msk [vmem:[#allocation2 + $0x58] sm:$0xff] %vm22_vm2, %v3322_v41 }
 0x330   :  { %5051 = vst.msk [vmem:[#allocation2] sm:$0xff] %vm22_vm2, %v4987_v27 }
 0x331   :  { %v3718_v40 = vpop.f32.mrf.mxu2 }
 0x332   :  { %v3874_v33 = vadd.f32 %v3718_v40, %v3540_v36  ;;  %v4276_v34 = vpop.f32.mrf.mxu3  ;;  %v6015_v36 = vld [vmem:[%s9457_s0 + $0x150] sm:$0xff]  ;;  %v6016_v40 = vld [vmem:[%s9457_s0 + $0x158] sm:$0xff] }
 0x333   :  { %v4097_v44 = vld [vmem:[#allocation2 + $0x10] sm:$0xff]  ;;  %v3181_v31 = vpop.f32.mrf.mxu1 }
 0x334   :  { %v4431_v47 = vadd.f32 %v4274_v21, %v4097_v44  ;;  %3938 = vst.msk [vmem:[#allocation2 + $0x18] sm:$0xff] %vm22_vm2, %v3874_v33  ;;  %v3323_v49 = vadd.f32 %v3181_v31, %v2989_v46  ;;  %v6112_v33 = vld [vmem:[%s9457_s0 + $0x151] sm:$0xff] }
 0x335   :  { %v4654_v50 = vld [vmem:[#allocation2 + $0x8] sm:$0xff]  ;;  %v8426_v28 = vpop.f32.mrf.mxu0 }
 0x336   :  { %4495 = vst.msk [vmem:[#allocation2 + $0x10] sm:$0xff] %vm22_vm2, %v4431_v47  ;;  %v4988_v48 = vadd.f32 %v8359_v55, %v4654_v50  ;;  %5973 = vmatmul.msk.bf16.gmra.mxu1 %vm249_vm1, %v8423_v35  ;;  %6066 = vmatmul.msk.bf16.gmra.mxu2 %vm249_vm1, %v3515_v37  ;;  %v3544_v37 = vld [vmem:[#allocation2 + $0x38] sm:$0xff]  ;;  %v3517_v47 = vpack.c.bf16 %v6016_v40, %v6015_v36  ;;  %v2993_v50 = vld [vmem:[#allocation2 + $0x80] sm:$0xff] }
 0x337   :  { %3387 = vst.msk [vmem:[#allocation2 + $0x60] sm:$0xff] %vm22_vm2, %v3323_v49  ;;  %6163 = vmatmul.msk.bf16.gmra.mxu3 %vm249_vm1, %v4073_v18 }
 0x338   :  { %5052 = vst.msk [vmem:[#allocation2 + $0x8] sm:$0xff] %vm22_vm2, %v4988_v48  ;;  %6260 = vmatmul.msk.bf16.gmra.mxu0 %vm249_vm1, %v8303_v63 }
 0x339   :  { %v3721_v54 = vpop.f32.mrf.mxu2 }
 0x33a   :  { %v3875_v51 = vadd.f32 %v3721_v54, %v3541_v53  ;;  %v4279_v52 = vpop.f32.mrf.mxu3 }
 0x33b   :  { %v4098_v58 = vld [vmem:[#allocation2 + $0x18] sm:$0xff]  ;;  %v3183_v55 = vpop.f32.mrf.mxu1 }
 0x33c   :  { %v4432_v56 = vadd.f32 %v4276_v34, %v4098_v58  ;;  %3939 = vst.msk [vmem:[#allocation2 + $0x20] sm:$0xff] %vm22_vm2, %v3875_v51  ;;  %v3324_v59 = vadd.f32 %v3183_v55, %v2990_v8  ;;  %v6113_v34 = vld [vmem:[%s9457_s0 + $0x159] sm:$0xff] }
 0x33d   :  { %v4655_v43 = vld [vmem:[#allocation2 + $0x10] sm:$0xff]  ;;  %v8442_v57 = vpop.f32.mrf.mxu0  ;;  %v4075_v48 = vpack.c.bf16 %v6113_v34, %v6112_v33  ;;  %v3545_v8 = vld [vmem:[#allocation2 + $0x40] sm:$0xff] }
 0x33e   :  { %4496 = vst.msk [vmem:[#allocation2 + $0x18] sm:$0xff] %vm22_vm2, %v4432_v56  ;;  %v4989_v63 = vadd.f32 %v8386_v15, %v4655_v43  ;;  %v5931_v33 = vld [vmem:[%s9457_s0 + $0x202] sm:$0xff] }
 0x33f   :  { %3388 = vst.msk [vmem:[#allocation2 + $0x68] sm:$0xff] %vm22_vm2, %v3324_v59  ;;  %v6019_v34 = vld [vmem:[%s9457_s0 + $0x180] sm:$0xff] }
 0x340   :  { %5053 = vst.msk [vmem:[#allocation2 + $0x10] sm:$0xff] %vm22_vm2, %v4989_v63 }
 0x341   :  { %v3723_v4 = vpop.f32.mrf.mxu2 }
 0x342   :  { %v3876_v10 = vadd.f32 %v3723_v4, %v3542_v2  ;;  %v4281_v7 = vpop.f32.mrf.mxu3  ;;  %v6018_v2 = vld [vmem:[%s9457_s0 + $0x170] sm:$0xff] }
 0x343   :  { %v4099_v14 = vld [vmem:[#allocation2 + $0x20] sm:$0xff]  ;;  %v3186_v15 = vpop.f32.mrf.mxu1  ;;  %v6114_v4 = vld [vmem:[%s9457_s0 + $0x169] sm:$0xff] }
 0x344   :  { %v4433_v22 = vadd.f32 %v4279_v52, %v4099_v14  ;;  %3940 = vst.msk [vmem:[#allocation2 + $0x28] sm:$0xff] %vm22_vm2, %v3876_v10  ;;  %v3325_v23 = vadd.f32 %v3186_v15, %v2991_v13  ;;  %v6115_v10 = vld [vmem:[%s9457_s0 + $0x171] sm:$0xff] }
 0x345   :  { %v4656_v19 = vld [vmem:[#allocation2 + $0x18] sm:$0xff]  ;;  %v8469_v21 = vpop.f32.mrf.mxu0 }
 0x346   :  { %4497 = vst.msk [vmem:[#allocation2 + $0x20] sm:$0xff] %vm22_vm2, %v4433_v22  ;;  %v4990_v26 = vadd.f32 %v8399_v39, %v4656_v19  ;;  %5974 = vmatmul.msk.bf16.gmra.mxu1 %vm249_vm1, %v8466_v11  ;;  %6067 = vmatmul.msk.bf16.gmra.mxu2 %vm249_vm1, %v3516_v12  ;;  %v2992_v39 = vld [vmem:[#allocation2 + $0x78] sm:$0xff] }
 0x347   :  { %3389 = vst.msk [vmem:[#allocation2 + $0x70] sm:$0xff] %vm22_vm2, %v3325_v23  ;;  %6164 = vmatmul.msk.bf16.gmra.mxu3 %vm249_vm1, %v4074_v16  ;;  %v3518_v16 = vpack.c.bf16 %v6018_v2, %v6017_v3  ;;  %v2995_v23 = vld [vmem:[#allocation2 + $0x90] sm:$0xff]  ;;  %v5933_v2 = vld [vmem:[%s9457_s0 + $0x21a] sm:$0xff] }
 0x348   :  { %5054 = vst.msk [vmem:[#allocation2 + $0x18] sm:$0xff] %vm22_vm2, %v4990_v26  ;;  %6261 = vmatmul.msk.bf16.gmra.mxu0 %vm249_vm1, %v8343_v42  ;;  %v5926_v42 = vld [vmem:[%s9457_s0 + $0x1ca] sm:$0xff] }
 0x349   :  { %v3726_v24 = vpop.f32.mrf.mxu2  ;;  %v2961_v18 = vpack.c.bf16 %v5927_v29, %v5926_v42 }
 0x34a   :  { %v3877_v25 = vadd.f32 %v3726_v24, %v3543_v45  ;;  %v4284_v41 = vpop.f32.mrf.mxu3 }
 0x34b   :  { %v4100_v1 = vld [vmem:[#allocation2 + $0x28] sm:$0xff]  ;;  %v3188_v27 = vpop.f32.mrf.mxu1 }
 0x34c   :  { %v4434_v30 = vadd.f32 %v4281_v7, %v4100_v1  ;;  %3941 = vst.msk [vmem:[#allocation2 + $0x30] sm:$0xff] %vm22_vm2, %v3877_v25  ;;  %v3326_v32 = vadd.f32 %v3188_v27, %v2992_v39  ;;  %v3546_v7 = vld [vmem:[#allocation2 + $0x48] sm:$0xff]  ;;  %v3547_v1 = vld [vmem:[#allocation2 + $0x50] sm:$0xff] }
 0x34d   :  { %v4657_v38 = vld [vmem:[#allocation2 + $0x20] sm:$0xff]  ;;  %v8482_v5 = vpop.f32.mrf.mxu0 }
 0x34e   :  { %4498 = vst.msk [vmem:[#allocation2 + $0x28] sm:$0xff] %vm22_vm2, %v4434_v30  ;;  %v4991_v20 = vadd.f32 %v8426_v28, %v4657_v38  ;;  %v2996_v38 = vld [vmem:[#allocation2 + $0x98] sm:$0xff] }
 0x34f   :  { %3390 = vst.msk [vmem:[#allocation2 + $0x78] sm:$0xff] %vm22_vm2, %v3326_v32 }
 0x350   :  { %5055 = vst.msk [vmem:[#allocation2 + $0x20] sm:$0xff] %vm22_vm2, %v4991_v20 }
 0x351   :  { %v3728_v44 = vpop.f32.mrf.mxu2 }
 0x352   :  { %v3878_v46 = vadd.f32 %v3728_v44, %v3544_v37  ;;  %v4286_v31 = vpop.f32.mrf.mxu3  ;;  %v6020_v37 = vld [vmem:[%s9457_s0 + $0x188] sm:$0xff] }
 0x353   :  { %v4101_v49 = vld [vmem:[#allocation2 + $0x30] sm:$0xff]  ;;  %v3191_v28 = vpop.f32.mrf.mxu1  ;;  %v6116_v44 = vld [vmem:[%s9457_s0 + $0x181] sm:$0xff] }
 0x354   :  { %v4435_v53 = vadd.f32 %v4284_v41, %v4101_v49  ;;  %3942 = vst.msk [vmem:[#allocation2 + $0x38] sm:$0xff] %vm22_vm2, %v3878_v46  ;;  %v3327_v54 = vadd.f32 %v3191_v28, %v2993_v50  ;;  %v6117_v46 = vld [vmem:[%s9457_s0 + $0x189] sm:$0xff]  ;;  %v3519_v28 = vpack.c.bf16 %v6020_v37, %v6019_v34 }
 0x355   :  { %v4658_v51 = vld [vmem:[#allocation2 + $0x28] sm:$0xff]  ;;  %v8507_v52 = vpop.f32.mrf.mxu0 }
 0x356   :  { %4499 = vst.msk [vmem:[#allocation2 + $0x30] sm:$0xff] %vm22_vm2, %v4435_v53  ;;  %v4992_v58 = vadd.f32 %v8442_v57, %v4658_v51  ;;  %5975 = vmatmul.msk.bf16.gmra.mxu1 %vm249_vm1, %v2961_v18  ;;  %6068 = vmatmul.msk.bf16.gmra.mxu2 %vm249_vm1, %v3517_v47  ;;  %v2997_v53 = vld [vmem:[#allocation2 + $0xa0] sm:$0xff]  ;;  %v4077_v51 = vpack.c.bf16 %v6117_v46, %v6116_v44 }
 0x357   :  { %3391 = vst.msk [vmem:[#allocation2 + $0x80] sm:$0xff] %vm22_vm2, %v3327_v54  ;;  %6165 = vmatmul.msk.bf16.gmra.mxu3 %vm249_vm1, %v4075_v48 }
 0x358   :  { %5056 = vst.msk [vmem:[#allocation2 + $0x28] sm:$0xff] %vm22_vm2, %v4992_v58  ;;  %6262 = vmatmul.msk.bf16.gmra.mxu0 %vm249_vm1, %v8383_v61  ;;  %v5928_v61 = vld [vmem:[%s9457_s0 + $0x1e2] sm:$0xff] }
 0x359   :  { %v3731_v55 = vpop.f32.mrf.mxu2  ;;  %v8543_v15 = vpack.c.bf16 %v5929_v60, %v5928_v61 }
 0x35a   :  { %v3879_v56 = vadd.f32 %v3731_v55, %v3545_v8  ;;  %v4289_v59 = vpop.f32.mrf.mxu3 }
 0x35b   :  { %v4102_v43 = vld [vmem:[#allocation2 + $0x38] sm:$0xff]  ;;  %v3193_v57 = vpop.f32.mrf.mxu1 }
 0x35c   :  { %v4436_v63 = vadd.f32 %v4286_v31, %v4102_v43  ;;  %3943 = vst.msk [vmem:[#allocation2 + $0x40] sm:$0xff] %vm22_vm2, %v3879_v56  ;;  %v3328_v17 = vadd.f32 %v3193_v57, %v2994_v6  ;;  %v3548_v31 = vld [vmem:[#allocation2 + $0x58] sm:$0xff] }
 0x35d   :  { %v4659_v62 = vld [vmem:[#allocation2 + $0x30] sm:$0xff]  ;;  %v8519_v0 = vpop.f32.mrf.mxu0 }
 0x35e   :  { %4500 = vst.msk [vmem:[#allocation2 + $0x38] sm:$0xff] %vm22_vm2, %v4436_v63  ;;  %v4993_v9 = vadd.f32 %v8469_v21, %v4659_v62  ;;  %v4076_v21 = vpack.c.bf16 %v6115_v10, %v6114_v4  ;;  %v6021_v4 = vld [vmem:[%s9457_s0 + $0x198] sm:$0xff]  ;;  %v6022_v10 = vld [vmem:[%s9457_s0 + $0x1a0] sm:$0xff] }
 0x35f   :  { %3392 = vst.msk [vmem:[#allocation2 + $0x88] sm:$0xff] %vm22_vm2, %v3328_v17  ;;  %v2998_v17 = vld [vmem:[#allocation2 + $0xa8] sm:$0xff] }
 0x360   :  { %5057 = vst.msk [vmem:[#allocation2 + $0x30] sm:$0xff] %vm22_vm2, %v4993_v9 }
 0x361   :  { %v3733_v12 = vpop.f32.mrf.mxu2 }
 0x362   :  { %v3880_v14 = vadd.f32 %v3733_v12, %v3546_v7  ;;  %v4291_v13 = vpop.f32.mrf.mxu3  ;;  %v6118_v7 = vld [vmem:[%s9457_s0 + $0x199] sm:$0xff]  ;;  %v6119_v12 = vld [vmem:[%s9457_s0 + $0x1a1] sm:$0xff] }
 0x363   :  { %v4103_v22 = vld [vmem:[#allocation2 + $0x40] sm:$0xff]  ;;  %v3196_v19 = vpop.f32.mrf.mxu1 }
 0x364   :  { %v4437_v26 = vadd.f32 %v4289_v59, %v4103_v22  ;;  %3944 = vst.msk [vmem:[#allocation2 + $0x48] sm:$0xff] %vm22_vm2, %v3880_v14  ;;  %v3329_v45 = vadd.f32 %v3196_v19, %v2995_v23  ;;  %v3549_v59 = vld [vmem:[#allocation2 + $0x60] sm:$0xff]  ;;  %v3550_v14 = vld [vmem:[#allocation2 + $0x68] sm:$0xff]  ;;  %v3520_v19 = vpack.c.bf16 %v6022_v10, %v6021_v4 }
 0x365   :  { %v4660_v24 = vld [vmem:[#allocation2 + $0x38] sm:$0xff]  ;;  %v8546_v25 = vpop.f32.mrf.mxu0 }
 0x366   :  { %4501 = vst.msk [vmem:[#allocation2 + $0x40] sm:$0xff] %vm22_vm2, %v4437_v26  ;;  %v4994_v41 = vadd.f32 %v8482_v5, %v4660_v24  ;;  %5976 = vmatmul.msk.bf16.gmra.mxu1 %vm249_vm1, %v8543_v15  ;;  %6069 = vmatmul.msk.bf16.gmra.mxu2 %vm249_vm1, %v3518_v16 }
 0x367   :  { %3393 = vst.msk [vmem:[#allocation2 + $0x90] sm:$0xff] %vm22_vm2, %v3329_v45  ;;  %6166 = vmatmul.msk.bf16.gmra.mxu3 %vm249_vm1, %v4076_v21  ;;  %v6215_v21 = vld [vmem:[%s9457_s0 + $0x19a] sm:$0xff]  ;;  %v2999_v45 = vld [vmem:[#allocation2 + $0xb0] sm:$0xff] }
 0x368   :  { %5058 = vst.msk [vmem:[#allocation2 + $0x38] sm:$0xff] %vm22_vm2, %v4994_v41  ;;  %6263 = vmatmul.msk.bf16.gmra.mxu0 %vm249_vm1, %v8423_v35  ;;  %v5930_v35 = vld [vmem:[%s9457_s0 + $0x1fa] sm:$0xff]  ;;  %v6216_v41 = vld [vmem:[%s9457_s0 + $0x1a2] sm:$0xff] }
 0x369   :  { %v3736_v39 = vpop.f32.mrf.mxu2  ;;  %v8583_v50 = vpack.c.bf16 %v5931_v33, %v5930_v35  ;;  %v3000_v35 = vld [vmem:[#allocation2 + $0xb8] sm:$0xff] }
 0x36a   :  { %v3881_v27 = vadd.f32 %v3736_v39, %v3547_v1  ;;  %v4294_v30 = vpop.f32.mrf.mxu3 }
 0x36b   :  { %v4104_v32 = vld [vmem:[#allocation2 + $0x48] sm:$0xff]  ;;  %v3198_v5 = vpop.f32.mrf.mxu1 }
 0x36c   :  { %v4438_v20 = vadd.f32 %v4291_v13, %v4104_v32  ;;  %3945 = vst.msk [vmem:[#allocation2 + $0x50] sm:$0xff] %vm22_vm2, %v3881_v27  ;;  %v3330_v42 = vadd.f32 %v3198_v5, %v2996_v38  ;;  %v4636_v27 = vpack.c.bf16 %v6216_v41, %v6215_v21  ;;  %v3551_v5 = vld [vmem:[#allocation2 + $0x70] sm:$0xff]  ;;  %v6123_v21 = vld [vmem:[%s9457_s0 + $0x201] sm:$0xff] }
 0x36d   :  { %v4661_v29 = vld [vmem:[#allocation2 + $0x40] sm:$0xff]  ;;  %v8559_v36 = vpop.f32.mrf.mxu0 }
 0x36e   :  { %4502 = vst.msk [vmem:[#allocation2 + $0x48] sm:$0xff] %vm22_vm2, %v4438_v20  ;;  %v4995_v40 = vadd.f32 %v8507_v52, %v4661_v29 }
 0x36f   :  { %3394 = vst.msk [vmem:[#allocation2 + $0x98] sm:$0xff] %vm22_vm2, %v3330_v42 }
 0x370   :  { %5059 = vst.msk [vmem:[#allocation2 + $0x40] sm:$0xff] %vm22_vm2, %v4995_v40 }
 0x371   :  { %v3738_v18 = vpop.f32.mrf.mxu2 }
 0x372   :  { %v3882_v47 = vadd.f32 %v3738_v18, %v3548_v31  ;;  %v4296_v49 = vpop.f32.mrf.mxu3  ;;  %v5934_v31 = vld [vmem:[%s9457_s0 + $0x22a] sm:$0xff]  ;;  %v5935_v18 = vld [vmem:[%s9457_s0 + $0x232] sm:$0xff] }
 0x373   :  { %v4105_v48 = vld [vmem:[#allocation2 + $0x50] sm:$0xff]  ;;  %v3201_v54 = vpop.f32.mrf.mxu1 }
 0x374   :  { %v4439_v52 = vadd.f32 %v4294_v30, %v4105_v48  ;;  %3946 = vst.msk [vmem:[#allocation2 + $0x58] sm:$0xff] %vm22_vm2, %v3882_v47  ;;  %v3331_v58 = vadd.f32 %v3201_v54, %v2997_v53  ;;  %v6023_v47 = vld [vmem:[%s9457_s0 + $0x1e0] sm:$0xff]  ;;  %v6121_v48 = vld [vmem:[%s9457_s0 + $0x1e9] sm:$0xff]  ;;  %v3552_v53 = vld [vmem:[#allocation2 + $0x78] sm:$0xff] }
 0x375   :  { %v4662_v8 = vld [vmem:[#allocation2 + $0x48] sm:$0xff]  ;;  %v8586_v55 = vpop.f32.mrf.mxu0 }
 0x376   :  { %4503 = vst.msk [vmem:[#allocation2 + $0x50] sm:$0xff] %vm22_vm2, %v4439_v52  ;;  %v4996_v56 = vadd.f32 %v8519_v0, %v4662_v8  ;;  %5977 = vmatmul.msk.bf16.gmra.mxu1 %vm249_vm1, %v8583_v50  ;;  %6070 = vmatmul.msk.bf16.gmra.mxu2 %vm249_vm1, %v3519_v28  ;;  %v6120_v28 = vld [vmem:[%s9457_s0 + $0x1e1] sm:$0xff] }
 0x377   :  { %3395 = vst.msk [vmem:[#allocation2 + $0xa0] sm:$0xff] %vm22_vm2, %v3331_v58  ;;  %6167 = vmatmul.msk.bf16.gmra.mxu3 %vm249_vm1, %v4077_v51  ;;  %v8668_v58 = vpack.c.bf16 %v5935_v18, %v5934_v31 }
 0x378   :  { %5060 = vst.msk [vmem:[#allocation2 + $0x48] sm:$0xff] %vm22_vm2, %v4996_v56  ;;  %6264 = vmatmul.msk.bf16.gmra.mxu0 %vm249_vm1, %v8466_v11  ;;  %v5932_v11 = vld [vmem:[%s9457_s0 + $0x212] sm:$0xff]  ;;  %v3001_v56 = vld [vmem:[#allocation2 + $0xc0] sm:$0xff] }
 0x379   :  { %v3741_v43 = vpop.f32.mrf.mxu2  ;;  %v8623_v23 = vpack.c.bf16 %v5933_v2, %v5932_v11 }
 0x37a   :  { %v3883_v6 = vadd.f32 %v3741_v43, %v3549_v59  ;;  %v4299_v57 = vpop.f32.mrf.mxu3  ;;  %v4079_v43 = vpack.c.bf16 %v6121_v48, %v6120_v28  ;;  %v5939_v28 = vld [vmem:[%s9457_s0 + $0x262] sm:$0xff]  ;;  %v6027_v48 = vld [vmem:[%s9457_s0 + $0x210] sm:$0xff] }
 0x37b   :  { %v4106_v63 = vld [vmem:[#allocation2 + $0x58] sm:$0xff]  ;;  %v3203_v62 = vpop.f32.mrf.mxu1 }
 0x37c   :  { %v4440_v0 = vadd.f32 %v4296_v49, %v4106_v63  ;;  %3947 = vst.msk [vmem:[#allocation2 + $0x60] sm:$0xff] %vm22_vm2, %v3883_v6  ;;  %v3332_v9 = vadd.f32 %v3203_v62, %v2998_v17  ;;  %v6024_v49 = vld [vmem:[%s9457_s0 + $0x1e8] sm:$0xff] }
 0x37d   :  { %v4663_v61 = vld [vmem:[#allocation2 + $0x50] sm:$0xff]  ;;  %v8599_v60 = vpop.f32.mrf.mxu0  ;;  %v3521_v8 = vpack.c.bf16 %v6024_v49, %v6023_v47 }
 0x37e   :  { %4504 = vst.msk [vmem:[#allocation2 + $0x58] sm:$0xff] %vm22_vm2, %v4440_v0  ;;  %v4997_v3 = vadd.f32 %v8546_v25, %v4663_v61  ;;  %v4078_v25 = vpack.c.bf16 %v6119_v12, %v6118_v7  ;;  %v3553_v0 = vld [vmem:[#allocation2 + $0x80] sm:$0xff] }
 0x37f   :  { %3396 = vst.msk [vmem:[#allocation2 + $0xa8] sm:$0xff] %vm22_vm2, %v3332_v9 }
 0x380   :  { %5061 = vst.msk [vmem:[#allocation2 + $0x50] sm:$0xff] %vm22_vm2, %v4997_v3 }
 0x381   :  { %v3743_v13 = vpop.f32.mrf.mxu2 }
 0x382   :  { %v3884_v16 = vadd.f32 %v3743_v13, %v3550_v14  ;;  %v4301_v22 = vpop.f32.mrf.mxu3  ;;  %v5937_v13 = vld [vmem:[%s9457_s0 + $0x24a] sm:$0xff] }
 0x383   :  { %v4107_v26 = vld [vmem:[#allocation2 + $0x60] sm:$0xff]  ;;  %v3206_v24 = vpop.f32.mrf.mxu1 }
 0x384   :  { %v4441_v1 = vadd.f32 %v4299_v57, %v4107_v26  ;;  %3948 = vst.msk [vmem:[#allocation2 + $0x68] sm:$0xff] %vm22_vm2, %v3884_v16  ;;  %v3333_v39 = vadd.f32 %v3206_v24, %v2999_v45  ;;  %v6025_v16 = vld [vmem:[%s9457_s0 + $0x1f8] sm:$0xff]  ;;  %v3554_v26 = vld [vmem:[#allocation2 + $0x88] sm:$0xff] }
 0x385   :  { %v4664_v30 = vld [vmem:[#allocation2 + $0x58] sm:$0xff]  ;;  %v8632_v32 = vpop.f32.mrf.mxu0 }
 0x386   :  { %4505 = vst.msk [vmem:[#allocation2 + $0x60] sm:$0xff] %vm22_vm2, %v4441_v1  ;;  %v4998_v38 = vadd.f32 %v8559_v36, %v4664_v30  ;;  %5978 = vmatmul.msk.bf16.gmra.mxu1 %vm249_vm1, %v8623_v23  ;;  %6071 = vmatmul.msk.bf16.gmra.mxu2 %vm249_vm1, %v3520_v19  ;;  %v6122_v19 = vld [vmem:[%s9457_s0 + $0x1f9] sm:$0xff] }
 0x387   :  { %3397 = vst.msk [vmem:[#allocation2 + $0xb0] sm:$0xff] %vm22_vm2, %v3333_v39  ;;  %6168 = vmatmul.msk.bf16.gmra.mxu3 %vm249_vm1, %v4078_v25 }
 0x388   :  { %5062 = vst.msk [vmem:[#allocation2 + $0x58] sm:$0xff] %vm22_vm2, %v4998_v38  ;;  %6265 = vmatmul.msk.bf16.gmra.mxu0 %vm249_vm1, %v4636_v27  ;;  %v3003_v27 = vld [vmem:[#allocation2 + $0xd0] sm:$0xff] }
 0x389   :  { %v3746_v20 = vpop.f32.mrf.mxu2 }
 0x38a   :  { %v3885_v42 = vadd.f32 %v3746_v20, %v3551_v5  ;;  %v4304_v29 = vpop.f32.mrf.mxu3 }
 0x38b   :  { %v4108_v40 = vld [vmem:[#allocation2 + $0x68] sm:$0xff]  ;;  %v3208_v36 = vpop.f32.mrf.mxu1 }
 0x38c   :  { %v4442_v33 = vadd.f32 %v4301_v22, %v4108_v40  ;;  %3949 = vst.msk [vmem:[#allocation2 + $0x70] sm:$0xff] %vm22_vm2, %v3885_v42  ;;  %v3334_v34 = vadd.f32 %v3208_v36, %v3000_v35  ;;  %v6026_v22 = vld [vmem:[%s9457_s0 + $0x200] sm:$0xff]  ;;  %v3555_v40 = vld [vmem:[#allocation2 + $0x90] sm:$0xff] }
 0x38d   :  { %v4665_v37 = vld [vmem:[#allocation2 + $0x60] sm:$0xff]  ;;  %v8644_v44 = vpop.f32.mrf.mxu0  ;;  %v3522_v1 = vpack.c.bf16 %v6026_v22, %v6025_v16 }
 0x38e   :  { %4506 = vst.msk [vmem:[#allocation2 + $0x68] sm:$0xff] %vm22_vm2, %v4442_v33  ;;  %v4999_v46 = vadd.f32 %v8586_v55, %v4665_v37  ;;  %v3004_v37 = vld [vmem:[#allocation2 + $0xd8] sm:$0xff] }
 0x38f   :  { %3398 = vst.msk [vmem:[#allocation2 + $0xb8] sm:$0xff] %vm22_vm2, %v3334_v34 }
 0x390   :  { %5063 = vst.msk [vmem:[#allocation2 + $0x60] sm:$0xff] %vm22_vm2, %v4999_v46 }
 0x391   :  { %v3748_v54 = vpop.f32.mrf.mxu2 }
 0x392   :  { %v3886_v51 = vadd.f32 %v3748_v54, %v3552_v53  ;;  %v4306_v52 = vpop.f32.mrf.mxu3  ;;  %v6028_v53 = vld [vmem:[%s9457_s0 + $0x218] sm:$0xff] }
 0x393   :  { %v4109_v55 = vld [vmem:[#allocation2 + $0x70] sm:$0xff]  ;;  %v3211_v59 = vpop.f32.mrf.mxu1 }
 0x394   :  { %v4443_v6 = vadd.f32 %v4304_v29, %v4109_v55  ;;  %3950 = vst.msk [vmem:[#allocation2 + $0x78] sm:$0xff] %vm22_vm2, %v3886_v51  ;;  %v3335_v57 = vadd.f32 %v3211_v59, %v3001_v56  ;;  %v6124_v54 = vld [vmem:[%s9457_s0 + $0x211] sm:$0xff]  ;;  %v6125_v51 = vld [vmem:[%s9457_s0 + $0x219] sm:$0xff] }
 0x395   :  { %v4666_v63 = vld [vmem:[#allocation2 + $0x68] sm:$0xff]  ;;  %v8671_v17 = vpop.f32.mrf.mxu0 }
 0x396   :  { %4507 = vst.msk [vmem:[#allocation2 + $0x70] sm:$0xff] %vm22_vm2, %v4443_v6  ;;  %v5000_v62 = vadd.f32 %v8599_v60, %v4666_v63  ;;  %5979 = vmatmul.msk.bf16.gmra.mxu1 %vm249_vm1, %v8668_v58  ;;  %6072 = vmatmul.msk.bf16.gmra.mxu2 %vm249_vm1, %v3521_v8  ;;  %v3002_v60 = vld [vmem:[#allocation2 + $0xc8] sm:$0xff] }
 0x397   :  { %3399 = vst.msk [vmem:[#allocation2 + $0xc0] sm:$0xff] %vm22_vm2, %v3335_v57  ;;  %6169 = vmatmul.msk.bf16.gmra.mxu3 %vm249_vm1, %v4079_v43  ;;  %v3523_v43 = vpack.c.bf16 %v6028_v53, %v6027_v48  ;;  %v3005_v57 = vld [vmem:[#allocation2 + $0xe0] sm:$0xff] }
 0x398   :  { %5064 = vst.msk [vmem:[#allocation2 + $0x68] sm:$0xff] %vm22_vm2, %v5000_v62  ;;  %6266 = vmatmul.msk.bf16.gmra.mxu0 %vm249_vm1, %v8543_v15  ;;  %v5936_v15 = vld [vmem:[%s9457_s0 + $0x242] sm:$0xff] }
 0x399   :  { %v3751_v9 = vpop.f32.mrf.mxu2  ;;  %v8708_v41 = vpack.c.bf16 %v5937_v13, %v5936_v15 }
 0x39a   :  { %v3887_v61 = vadd.f32 %v3751_v9, %v3553_v0  ;;  %v4309_v3 = vpop.f32.mrf.mxu3 }
 0x39b   :  { %v4110_v11 = vld [vmem:[#allocation2 + $0x78] sm:$0xff]  ;;  %v3213_v2 = vpop.f32.mrf.mxu1 }
 0x39c   :  { %v4444_v4 = vadd.f32 %v4306_v52, %v4110_v11  ;;  %3951 = vst.msk [vmem:[#allocation2 + $0x80] sm:$0xff] %vm22_vm2, %v3887_v61  ;;  %v3336_v10 = vadd.f32 %v3213_v2, %v3002_v60  ;;  %v3556_v52 = vld [vmem:[#allocation2 + $0x98] sm:$0xff]  ;;  %v3557_v11 = vld [vmem:[#allocation2 + $0xa0] sm:$0xff] }
 0x39d   :  { %v4667_v7 = vld [vmem:[#allocation2 + $0x70] sm:$0xff]  ;;  %v8684_v12 = vpop.f32.mrf.mxu0 }
 0x39e   :  { %4508 = vst.msk [vmem:[#allocation2 + $0x78] sm:$0xff] %vm22_vm2, %v4444_v4  ;;  %v5001_v14 = vadd.f32 %v8632_v32, %v4667_v7  ;;  %v4080_v32 = vpack.c.bf16 %v6123_v21, %v6122_v19  ;;  %v3006_v7 = vld [vmem:[#allocation2 + $0xe8] sm:$0xff]  ;;  %v5941_v19 = vld [vmem:[%s9457_s0 + $0x27a] sm:$0xff] }
 0x39f   :  { %3400 = vst.msk [vmem:[#allocation2 + $0xc8] sm:$0xff] %vm22_vm2, %v3336_v10  ;;  %v6029_v21 = vld [vmem:[%s9457_s0 + $0x228] sm:$0xff] }
 0x3a0   :  { %5065 = vst.msk [vmem:[#allocation2 + $0x70] sm:$0xff] %vm22_vm2, %v5001_v14 }
 0x3a1   :  { %v3753_v45 = vpop.f32.mrf.mxu2 }
 0x3a2   :  { %v3888_v24 = vadd.f32 %v3753_v45, %v3554_v26  ;;  %v4311_v25 = vpop.f32.mrf.mxu3  ;;  %v6030_v26 = vld [vmem:[%s9457_s0 + $0x230] sm:$0xff] }
 0x3a3   :  { %v4111_v39 = vld [vmem:[#allocation2 + $0x80] sm:$0xff]  ;;  %v3216_v30 = vpop.f32.mrf.mxu1  ;;  %v6126_v45 = vld [vmem:[%s9457_s0 + $0x229] sm:$0xff] }
 0x3a4   :  { %v4445_v38 = vadd.f32 %v4309_v3, %v4111_v39  ;;  %3952 = vst.msk [vmem:[#allocation2 + $0x88] sm:$0xff] %vm22_vm2, %v3888_v24  ;;  %v3337_v5 = vadd.f32 %v3216_v30, %v3003_v27  ;;  %v6127_v24 = vld [vmem:[%s9457_s0 + $0x231] sm:$0xff] }
 0x3a5   :  { %v4668_v20 = vld [vmem:[#allocation2 + $0x78] sm:$0xff]  ;;  %v8711_v42 = vpop.f32.mrf.mxu0 }
 0x3a6   :  { %4509 = vst.msk [vmem:[#allocation2 + $0x80] sm:$0xff] %vm22_vm2, %v4445_v38  ;;  %v5002_v29 = vadd.f32 %v8644_v44, %v4668_v20  ;;  %5980 = vmatmul.msk.bf16.gmra.mxu1 %vm249_vm1, %v8708_v41  ;;  %6073 = vmatmul.msk.bf16.gmra.mxu2 %vm249_vm1, %v3522_v1 }
 0x3a7   :  { %3401 = vst.msk [vmem:[#allocation2 + $0xd0] sm:$0xff] %vm22_vm2, %v3337_v5  ;;  %6170 = vmatmul.msk.bf16.gmra.mxu3 %vm249_vm1, %v4080_v32  ;;  %v3524_v32 = vpack.c.bf16 %v6030_v26, %v6029_v21  ;;  %v3007_v5 = vld [vmem:[#allocation2 + $0xf0] sm:$0xff] }
 0x3a8   :  { %5066 = vst.msk [vmem:[#allocation2 + $0x78] sm:$0xff] %vm22_vm2, %v5002_v29  ;;  %6267 = vmatmul.msk.bf16.gmra.mxu0 %vm249_vm1, %v8583_v50  ;;  %v5938_v50 = vld [vmem:[%s9457_s0 + $0x25a] sm:$0xff] }
 0x3a9   :  { %v3756_v35 = vpop.f32.mrf.mxu2  ;;  %v8748_v59 = vpack.c.bf16 %v5939_v28, %v5938_v50 }
 0x3aa   :  { %v3889_v36 = vadd.f32 %v3756_v35, %v3555_v40  ;;  %v4314_v33 = vpop.f32.mrf.mxu3 }
 0x3ab   :  { %v4112_v34 = vld [vmem:[#allocation2 + $0x88] sm:$0xff]  ;;  %v3218_v44 = vpop.f32.mrf.mxu1 }
 0x3ac   :  { %v4446_v46 = vadd.f32 %v4311_v25, %v4112_v34  ;;  %3953 = vst.msk [vmem:[#allocation2 + $0x90] sm:$0xff] %vm22_vm2, %v3889_v36  ;;  %v3338_v31 = vadd.f32 %v3218_v44, %v3004_v37  ;;  %v3558_v25 = vld [vmem:[#allocation2 + $0xa8] sm:$0xff]  ;;  %v3559_v34 = vld [vmem:[#allocation2 + $0xb0] sm:$0xff] }
 0x3ad   :  { %v4669_v18 = vld [vmem:[#allocation2 + $0x80] sm:$0xff]  ;;  %v8724_v47 = vpop.f32.mrf.mxu0 }
 0x3ae   :  { %4510 = vst.msk [vmem:[#allocation2 + $0x88] sm:$0xff] %vm22_vm2, %v4446_v46  ;;  %v5003_v49 = vadd.f32 %v8671_v17, %v4669_v18  ;;  %v4081_v17 = vpack.c.bf16 %v6125_v51, %v6124_v54  ;;  %v3008_v18 = vld [vmem:[#allocation2 + $0xf8] sm:$0xff]  ;;  %v6031_v51 = vld [vmem:[%s9457_s0 + $0x240] sm:$0xff] }
 0x3af   :  { %3402 = vst.msk [vmem:[#allocation2 + $0xd8] sm:$0xff] %vm22_vm2, %v3338_v31  ;;  %v5943_v54 = vld [vmem:[%s9457_s0 + $0x292] sm:$0xff] }
 0x3b0   :  { %5067 = vst.msk [vmem:[#allocation2 + $0x80] sm:$0xff] %vm22_vm2, %v5003_v49 }
 0x3b1   :  { %v3758_v8 = vpop.f32.mrf.mxu2 }
 0x3b2   :  { %v3890_v55 = vadd.f32 %v3758_v8, %v3556_v52  ;;  %v4316_v56 = vpop.f32.mrf.mxu3  ;;  %v6032_v52 = vld [vmem:[%s9457_s0 + $0x248] sm:$0xff] }
 0x3b3   :  { %v4113_v6 = vld [vmem:[#allocation2 + $0x90] sm:$0xff]  ;;  %v3221_v63 = vpop.f32.mrf.mxu1  ;;  %v6128_v8 = vld [vmem:[%s9457_s0 + $0x241] sm:$0xff] }
 0x3b4   :  { %v4447_v62 = vadd.f32 %v4314_v33, %v4113_v6  ;;  %3954 = vst.msk [vmem:[#allocation2 + $0x98] sm:$0xff] %vm22_vm2, %v3890_v55  ;;  %v3339_v0 = vadd.f32 %v3221_v63, %v3005_v57  ;;  %v6129_v55 = vld [vmem:[%s9457_s0 + $0x249] sm:$0xff] }
 0x3b5   :  { %v4670_v9 = vld [vmem:[#allocation2 + $0x88] sm:$0xff]  ;;  %v8751_v61 = vpop.f32.mrf.mxu0 }
 0x3b6   :  { %4511 = vst.msk [vmem:[#allocation2 + $0x90] sm:$0xff] %vm22_vm2, %v4447_v62  ;;  %v5004_v3 = vadd.f32 %v8684_v12, %v4670_v9  ;;  %5981 = vmatmul.msk.bf16.gmra.mxu1 %vm249_vm1, %v8748_v59  ;;  %6074 = vmatmul.msk.bf16.gmra.mxu2 %vm249_vm1, %v3523_v43 }
 0x3b7   :  { %3403 = vst.msk [vmem:[#allocation2 + $0xe0] sm:$0xff] %vm22_vm2, %v3339_v0  ;;  %6171 = vmatmul.msk.bf16.gmra.mxu3 %vm249_vm1, %v4081_v17  ;;  %v3525_v17 = vpack.c.bf16 %v6032_v52, %v6031_v51  ;;  %v3009_v0 = vld [vmem:[#allocation2 + $0x100] sm:$0xff] }
 0x3b8   :  { %5068 = vst.msk [vmem:[#allocation2 + $0x88] sm:$0xff] %vm22_vm2, %v5004_v3  ;;  %6268 = vmatmul.msk.bf16.gmra.mxu0 %vm249_vm1, %v8623_v23  ;;  %v5940_v23 = vld [vmem:[%s9457_s0 + $0x272] sm:$0xff] }
 0x3b9   :  { %v3761_v60 = vpop.f32.mrf.mxu2  ;;  %v8788_v30 = vpack.c.bf16 %v5941_v19, %v5940_v23 }
 0x3ba   :  { %v3891_v2 = vadd.f32 %v3761_v60, %v3557_v11  ;;  %v4319_v4 = vpop.f32.mrf.mxu3 }
 0x3bb   :  { %v4114_v10 = vld [vmem:[#allocation2 + $0x98] sm:$0xff]  ;;  %v3223_v12 = vpop.f32.mrf.mxu1 }
 0x3bc   :  { %v4448_v14 = vadd.f32 %v4316_v56, %v4114_v10  ;;  %3955 = vst.msk [vmem:[#allocation2 + $0xa0] sm:$0xff] %vm22_vm2, %v3891_v2  ;;  %v3340_v15 = vadd.f32 %v3223_v12, %v3006_v7  ;;  %v3560_v56 = vld [vmem:[#allocation2 + $0xb8] sm:$0xff]  ;;  %v3561_v10 = vld [vmem:[#allocation2 + $0xc0] sm:$0xff] }
 0x3bd   :  { %v4671_v13 = vld [vmem:[#allocation2 + $0x90] sm:$0xff]  ;;  %v8764_v16 = vpop.f32.mrf.mxu0 }
 0x3be   :  { %4512 = vst.msk [vmem:[#allocation2 + $0x98] sm:$0xff] %vm22_vm2, %v4448_v14  ;;  %v5005_v22 = vadd.f32 %v8711_v42, %v4671_v13  ;;  %v4082_v42 = vpack.c.bf16 %v6127_v24, %v6126_v45  ;;  %v3010_v13 = vld [vmem:[#allocation2 + $0x108] sm:$0xff]  ;;  %v6033_v24 = vld [vmem:[%s9457_s0 + $0x258] sm:$0xff] }
 0x3bf   :  { %3404 = vst.msk [vmem:[#allocation2 + $0xe8] sm:$0xff] %vm22_vm2, %v3340_v15  ;;  %v5945_v45 = vld [vmem:[%s9457_s0 + $0x2aa] sm:$0xff] }
 0x3c0   :  { %5069 = vst.msk [vmem:[#allocation2 + $0x90] sm:$0xff] %vm22_vm2, %v5005_v22 }
 0x3c1   :  { %v3763_v1 = vpop.f32.mrf.mxu2 }
 0x3c2   :  { %v3892_v39 = vadd.f32 %v3763_v1, %v3558_v25  ;;  %v4321_v27 = vpop.f32.mrf.mxu3  ;;  %v6034_v25 = vld [vmem:[%s9457_s0 + $0x260] sm:$0xff] }
 0x3c3   :  { %v4115_v38 = vld [vmem:[#allocation2 + $0xa0] sm:$0xff]  ;;  %v3226_v20 = vpop.f32.mrf.mxu1 }
 0x3c4   :  { %v4449_v29 = vadd.f32 %v4319_v4, %v4115_v38  ;;  %3956 = vst.msk [vmem:[#allocation2 + $0xa8] sm:$0xff] %vm22_vm2, %v3892_v39  ;;  %v3341_v40 = vadd.f32 %v3226_v20, %v3007_v5  ;;  %v6130_v1 = vld [vmem:[%s9457_s0 + $0x259] sm:$0xff]  ;;  %v6131_v39 = vld [vmem:[%s9457_s0 + $0x261] sm:$0xff] }
 0x3c5   :  { %v4672_v35 = vld [vmem:[#allocation2 + $0x98] sm:$0xff]  ;;  %v8791_v36 = vpop.f32.mrf.mxu0 }
 0x3c6   :  { %4513 = vst.msk [vmem:[#allocation2 + $0xa0] sm:$0xff] %vm22_vm2, %v4449_v29  ;;  %v5006_v33 = vadd.f32 %v8724_v47, %v4672_v35  ;;  %5982 = vmatmul.msk.bf16.gmra.mxu1 %vm249_vm1, %v8788_v30  ;;  %6075 = vmatmul.msk.bf16.gmra.mxu2 %vm249_vm1, %v3524_v32 }
 0x3c7   :  { %3405 = vst.msk [vmem:[#allocation2 + $0xf0] sm:$0xff] %vm22_vm2, %v3341_v40  ;;  %6172 = vmatmul.msk.bf16.gmra.mxu3 %vm249_vm1, %v4082_v42  ;;  %v3526_v42 = vpack.c.bf16 %v6034_v25, %v6033_v24  ;;  %v3011_v40 = vld [vmem:[#allocation2 + $0x110] sm:$0xff] }
 0x3c8   :  { %5070 = vst.msk [vmem:[#allocation2 + $0x98] sm:$0xff] %vm22_vm2, %v5006_v33  ;;  %6269 = vmatmul.msk.bf16.gmra.mxu0 %vm249_vm1, %v8668_v58  ;;  %v5942_v58 = vld [vmem:[%s9457_s0 + $0x28a] sm:$0xff] }
 0x3c9   :  { %v3766_v37 = vpop.f32.mrf.mxu2  ;;  %v8828_v63 = vpack.c.bf16 %v5943_v54, %v5942_v58 }
 0x3ca   :  { %v3893_v44 = vadd.f32 %v3766_v37, %v3559_v34  ;;  %v4324_v46 = vpop.f32.mrf.mxu3 }
 0x3cb   :  { %v4116_v31 = vld [vmem:[#allocation2 + $0xa8] sm:$0xff]  ;;  %v3228_v47 = vpop.f32.mrf.mxu1 }
 0x3cc   :  { %v4450_v49 = vadd.f32 %v4321_v27, %v4116_v31  ;;  %3957 = vst.msk [vmem:[#allocation2 + $0xb0] sm:$0xff] %vm22_vm2, %v3893_v44  ;;  %v3342_v50 = vadd.f32 %v3228_v47, %v3008_v18  ;;  %v3562_v27 = vld [vmem:[#allocation2 + $0xc8] sm:$0xff]  ;;  %v3563_v31 = vld [vmem:[#allocation2 + $0xd0] sm:$0xff] }
 0x3cd   :  { %v4673_v28 = vld [vmem:[#allocation2 + $0xa0] sm:$0xff]  ;;  %v8804_v48 = vpop.f32.mrf.mxu0 }
 0x3ce   :  { %4514 = vst.msk [vmem:[#allocation2 + $0xa8] sm:$0xff] %vm22_vm2, %v4450_v49  ;;  %v5007_v53 = vadd.f32 %v8751_v61, %v4673_v28  ;;  %v4083_v61 = vpack.c.bf16 %v6129_v55, %v6128_v8  ;;  %v3012_v28 = vld [vmem:[#allocation2 + $0x118] sm:$0xff]  ;;  %v5947_v8 = vld [vmem:[%s9457_s0 + $0x2c2] sm:$0xff]  ;;  %v6035_v55 = vld [vmem:[%s9457_s0 + $0x270] sm:$0xff] }
 0x3cf   :  { %3406 = vst.msk [vmem:[#allocation2 + $0xf8] sm:$0xff] %vm22_vm2, %v3342_v50 }
 0x3d0   :  { %5071 = vst.msk [vmem:[#allocation2 + $0xa0] sm:$0xff] %vm22_vm2, %v5007_v53 }
 0x3d1   :  { %v3768_v43 = vpop.f32.mrf.mxu2 }
 0x3d2   :  { %v3894_v6 = vadd.f32 %v3768_v43, %v3560_v56  ;;  %v4326_v57 = vpop.f32.mrf.mxu3  ;;  %v6036_v56 = vld [vmem:[%s9457_s0 + $0x278] sm:$0xff] }
 0x3d3   :  { %v4117_v62 = vld [vmem:[#allocation2 + $0xb0] sm:$0xff]  ;;  %v3231_v9 = vpop.f32.mrf.mxu1 }
 0x3d4   :  { %v4451_v3 = vadd.f32 %v4324_v46, %v4117_v62  ;;  %3958 = vst.msk [vmem:[#allocation2 + $0xb8] sm:$0xff] %vm22_vm2, %v3894_v6  ;;  %v3343_v11 = vadd.f32 %v3231_v9, %v3009_v0  ;;  %v6132_v43 = vld [vmem:[%s9457_s0 + $0x271] sm:$0xff]  ;;  %v6133_v6 = vld [vmem:[%s9457_s0 + $0x279] sm:$0xff] }
 0x3d5   :  { %v4674_v60 = vld [vmem:[#allocation2 + $0xa8] sm:$0xff]  ;;  %v8831_v2 = vpop.f32.mrf.mxu0 }
 0x3d6   :  { %4515 = vst.msk [vmem:[#allocation2 + $0xb0] sm:$0xff] %vm22_vm2, %v4451_v3  ;;  %v5008_v4 = vadd.f32 %v8764_v16, %v4674_v60  ;;  %5983 = vmatmul.msk.bf16.gmra.mxu1 %vm249_vm1, %v8828_v63  ;;  %6076 = vmatmul.msk.bf16.gmra.mxu2 %vm249_vm1, %v3525_v17 }
 0x3d7   :  { %3407 = vst.msk [vmem:[#allocation2 + $0x100] sm:$0xff] %vm22_vm2, %v3343_v11  ;;  %6173 = vmatmul.msk.bf16.gmra.mxu3 %vm249_vm1, %v4083_v61  ;;  %v3527_v61 = vpack.c.bf16 %v6036_v56, %v6035_v55  ;;  %v3013_v11 = vld [vmem:[#allocation2 + $0x120] sm:$0xff] }
 0x3d8   :  { %5072 = vst.msk [vmem:[#allocation2 + $0xa8] sm:$0xff] %vm22_vm2, %v5008_v4  ;;  %6270 = vmatmul.msk.bf16.gmra.mxu0 %vm249_vm1, %v8708_v41  ;;  %v5944_v41 = vld [vmem:[%s9457_s0 + $0x2a2] sm:$0xff] }
 0x3d9   :  { %v3771_v7 = vpop.f32.mrf.mxu2  ;;  %v8868_v20 = vpack.c.bf16 %v5945_v45, %v5944_v41 }
 0x3da   :  { %v3895_v12 = vadd.f32 %v3771_v7, %v3561_v10  ;;  %v4329_v14 = vpop.f32.mrf.mxu3 }
 0x3db   :  { %v4118_v15 = vld [vmem:[#allocation2 + $0xb8] sm:$0xff]  ;;  %v3233_v16 = vpop.f32.mrf.mxu1 }
 0x3dc   :  { %v4452_v22 = vadd.f32 %v4326_v57, %v4118_v15  ;;  %3959 = vst.msk [vmem:[#allocation2 + $0xc0] sm:$0xff] %vm22_vm2, %v3895_v12  ;;  %v3344_v23 = vadd.f32 %v3233_v16, %v3010_v13  ;;  %v3564_v57 = vld [vmem:[#allocation2 + $0xd8] sm:$0xff]  ;;  %v3565_v15 = vld [vmem:[#allocation2 + $0xe0] sm:$0xff] }
 0x3dd   :  { %v4675_v19 = vld [vmem:[#allocation2 + $0xb0] sm:$0xff]  ;;  %v8844_v21 = vpop.f32.mrf.mxu0 }
 0x3de   :  { %4516 = vst.msk [vmem:[#allocation2 + $0xb8] sm:$0xff] %vm22_vm2, %v4452_v22  ;;  %v5009_v26 = vadd.f32 %v8791_v36, %v4675_v19  ;;  %v4084_v36 = vpack.c.bf16 %v6131_v39, %v6130_v1  ;;  %v3014_v19 = vld [vmem:[#allocation2 + $0x128] sm:$0xff]  ;;  %v5949_v1 = vld [vmem:[%s9457_s0 + $0x2da] sm:$0xff] }
 0x3df   :  { %3408 = vst.msk [vmem:[#allocation2 + $0x108] sm:$0xff] %vm22_vm2, %v3344_v23  ;;  %v6037_v39 = vld [vmem:[%s9457_s0 + $0x288] sm:$0xff] }
 0x3e0   :  { %5073 = vst.msk [vmem:[#allocation2 + $0xb0] sm:$0xff] %vm22_vm2, %v5009_v26 }
 0x3e1   :  { %v3773_v32 = vpop.f32.mrf.mxu2 }
 0x3e2   :  { %v3896_v38 = vadd.f32 %v3773_v32, %v3562_v27  ;;  %v4331_v5 = vpop.f32.mrf.mxu3  ;;  %v6038_v27 = vld [vmem:[%s9457_s0 + $0x290] sm:$0xff] }
 0x3e3   :  { %v4119_v29 = vld [vmem:[#allocation2 + $0xc0] sm:$0xff]  ;;  %v3236_v35 = vpop.f32.mrf.mxu1  ;;  %v6134_v32 = vld [vmem:[%s9457_s0 + $0x289] sm:$0xff] }
 0x3e4   :  { %v4453_v33 = vadd.f32 %v4329_v14, %v4119_v29  ;;  %3960 = vst.msk [vmem:[#allocation2 + $0xc8] sm:$0xff] %vm22_vm2, %v3896_v38  ;;  %v3345_v34 = vadd.f32 %v3236_v35, %v3011_v40  ;;  %v6135_v38 = vld [vmem:[%s9457_s0 + $0x291] sm:$0xff] }
 0x3e5   :  { %v4676_v37 = vld [vmem:[#allocation2 + $0xb8] sm:$0xff]  ;;  %v8871_v44 = vpop.f32.mrf.mxu0 }
 0x3e6   :  { %4517 = vst.msk [vmem:[#allocation2 + $0xc0] sm:$0xff] %vm22_vm2, %v4453_v33  ;;  %v5010_v46 = vadd.f32 %v8804_v48, %v4676_v37  ;;  %5984 = vmatmul.msk.bf16.gmra.mxu1 %vm249_vm1, %v8868_v20  ;;  %6077 = vmatmul.msk.bf16.gmra.mxu2 %vm249_vm1, %v3526_v42 }
 0x3e7   :  { %3409 = vst.msk [vmem:[#allocation2 + $0x110] sm:$0xff] %vm22_vm2, %v3345_v34  ;;  %6174 = vmatmul.msk.bf16.gmra.mxu3 %vm249_vm1, %v4084_v36  ;;  %v3528_v36 = vpack.c.bf16 %v6038_v27, %v6037_v39  ;;  %v3015_v34 = vld [vmem:[#allocation2 + $0x130] sm:$0xff] }
 0x3e8   :  { %5074 = vst.msk [vmem:[#allocation2 + $0xb8] sm:$0xff] %vm22_vm2, %v5010_v46  ;;  %6271 = vmatmul.msk.bf16.gmra.mxu0 %vm249_vm1, %v8748_v59  ;;  %v5946_v59 = vld [vmem:[%s9457_s0 + $0x2ba] sm:$0xff] }
 0x3e9   :  { %v3776_v18 = vpop.f32.mrf.mxu2  ;;  %v8908_v9 = vpack.c.bf16 %v5947_v8, %v5946_v59 }
 0x3ea   :  { %v3897_v47 = vadd.f32 %v3776_v18, %v3563_v31  ;;  %v4334_v49 = vpop.f32.mrf.mxu3 }
 0x3eb   :  { %v4120_v50 = vld [vmem:[#allocation2 + $0xc8] sm:$0xff]  ;;  %v3238_v48 = vpop.f32.mrf.mxu1 }
 0x3ec   :  { %v4454_v53 = vadd.f32 %v4331_v5, %v4120_v50  ;;  %3961 = vst.msk [vmem:[#allocation2 + $0xd0] sm:$0xff] %vm22_vm2, %v3897_v47  ;;  %v3346_v58 = vadd.f32 %v3238_v48, %v3012_v28  ;;  %v3566_v5 = vld [vmem:[#allocation2 + $0xe8] sm:$0xff]  ;;  %v3567_v50 = vld [vmem:[#allocation2 + $0xf0] sm:$0xff] }
 0x3ed   :  { %v4677_v54 = vld [vmem:[#allocation2 + $0xc0] sm:$0xff]  ;;  %v8884_v51 = vpop.f32.mrf.mxu0 }
 0x3ee   :  { %4518 = vst.msk [vmem:[#allocation2 + $0xc8] sm:$0xff] %vm22_vm2, %v4454_v53  ;;  %v5011_v52 = vadd.f32 %v8831_v2, %v4677_v54  ;;  %v4085_v2 = vpack.c.bf16 %v6133_v6, %v6132_v43  ;;  %v3016_v54 = vld [vmem:[#allocation2 + $0x138] sm:$0xff]  ;;  %v6039_v6 = vld [vmem:[%s9457_s0 + $0x2a0] sm:$0xff] }
 0x3ef   :  { %3410 = vst.msk [vmem:[#allocation2 + $0x118] sm:$0xff] %vm22_vm2, %v3346_v58  ;;  %v5951_v43 = vld [vmem:[%s9457_s0 + $0x2f2] sm:$0xff] }
 0x3f0   :  { %5075 = vst.msk [vmem:[#allocation2 + $0xc0] sm:$0xff] %vm22_vm2, %v5011_v52 }
 0x3f1   :  { %v3778_v17 = vpop.f32.mrf.mxu2 }
 0x3f2   :  { %v3898_v62 = vadd.f32 %v3778_v17, %v3564_v57  ;;  %v4336_v0 = vpop.f32.mrf.mxu3  ;;  %v6040_v57 = vld [vmem:[%s9457_s0 + $0x2a8] sm:$0xff] }
 0x3f3   :  { %v4121_v3 = vld [vmem:[#allocation2 + $0xd0] sm:$0xff]  ;;  %v3241_v60 = vpop.f32.mrf.mxu1  ;;  %v6136_v17 = vld [vmem:[%s9457_s0 + $0x2a1] sm:$0xff] }
 0x3f4   :  { %v4455_v4 = vadd.f32 %v4334_v49, %v4121_v3  ;;  %3962 = vst.msk [vmem:[#allocation2 + $0xd8] sm:$0xff] %vm22_vm2, %v3898_v62  ;;  %v3347_v10 = vadd.f32 %v3241_v60, %v3013_v11  ;;  %v6137_v62 = vld [vmem:[%s9457_s0 + $0x2a9] sm:$0xff] }
 0x3f5   :  { %v4678_v7 = vld [vmem:[#allocation2 + $0xc8] sm:$0xff]  ;;  %v8911_v12 = vpop.f32.mrf.mxu0 }
 0x3f6   :  { %4519 = vst.msk [vmem:[#allocation2 + $0xd0] sm:$0xff] %vm22_vm2, %v4455_v4  ;;  %v5012_v14 = vadd.f32 %v8844_v21, %v4678_v7  ;;  %5985 = vmatmul.msk.bf16.gmra.mxu1 %vm249_vm1, %v8908_v9  ;;  %6078 = vmatmul.msk.bf16.gmra.mxu2 %vm249_vm1, %v3527_v61 }
 0x3f7   :  { %3411 = vst.msk [vmem:[#allocation2 + $0x120] sm:$0xff] %vm22_vm2, %v3347_v10  ;;  %6175 = vmatmul.msk.bf16.gmra.mxu3 %vm249_vm1, %v4085_v2  ;;  %v3529_v2 = vpack.c.bf16 %v6040_v57, %v6039_v6  ;;  %v3017_v10 = vld [vmem:[#allocation2 + $0x140] sm:$0xff] }
 0x3f8   :  { %5076 = vst.msk [vmem:[#allocation2 + $0xc8] sm:$0xff] %vm22_vm2, %v5012_v14  ;;  %6272 = vmatmul.msk.bf16.gmra.mxu0 %vm249_vm1, %v8788_v30  ;;  %v5948_v30 = vld [vmem:[%s9457_s0 + $0x2d2] sm:$0xff] }
 0x3f9   :  { %v3781_v13 = vpop.f32.mrf.mxu2  ;;  %v8948_v35 = vpack.c.bf16 %v5949_v1, %v5948_v30 }
 0x3fa   :  { %v3899_v16 = vadd.f32 %v3781_v13, %v3565_v15  ;;  %v4339_v22 = vpop.f32.mrf.mxu3 }
 0x3fb   :  { %v4122_v23 = vld [vmem:[#allocation2 + $0xd8] sm:$0xff]  ;;  %v3243_v21 = vpop.f32.mrf.mxu1 }
 0x3fc   :  { %v4456_v26 = vadd.f32 %v4336_v0, %v4122_v23  ;;  %3963 = vst.msk [vmem:[#allocation2 + $0xe0] sm:$0xff] %vm22_vm2, %v3899_v16  ;;  %v3348_v41 = vadd.f32 %v3243_v21, %v3014_v19  ;;  %v3568_v0 = vld [vmem:[#allocation2 + $0xf8] sm:$0xff]  ;;  %v3569_v23 = vld [vmem:[#allocation2 + $0x100] sm:$0xff] }
 0x3fd   :  { %v4679_v45 = vld [vmem:[#allocation2 + $0xd0] sm:$0xff]  ;;  %v8924_v24 = vpop.f32.mrf.mxu0 }
 0x3fe   :  { %4520 = vst.msk [vmem:[#allocation2 + $0xd8] sm:$0xff] %vm22_vm2, %v4456_v26  ;;  %v5013_v25 = vadd.f32 %v8871_v44, %v4679_v45  ;;  %v4086_v44 = vpack.c.bf16 %v6135_v38, %v6134_v32  ;;  %v3018_v45 = vld [vmem:[#allocation2 + $0x148] sm:$0xff]  ;;  %v6041_v38 = vld [vmem:[%s9457_s0 + $0x2b8] sm:$0xff] }
 0x3ff   :  { %3412 = vst.msk [vmem:[#allocation2 + $0x128] sm:$0xff] %vm22_vm2, %v3348_v41  ;;  %v5953_v32 = vld [vmem:[%s9457_s0 + $0x30a] sm:$0xff] }
 0x400   :  { %5077 = vst.msk [vmem:[#allocation2 + $0xd0] sm:$0xff] %vm22_vm2, %v5013_v25 }
 0x401   :  { %v3783_v42 = vpop.f32.mrf.mxu2 }
 0x402   :  { %v3900_v29 = vadd.f32 %v3783_v42, %v3566_v5  ;;  %v4341_v40 = vpop.f32.mrf.mxu3  ;;  %v6042_v5 = vld [vmem:[%s9457_s0 + $0x2c0] sm:$0xff] }
 0x403   :  { %v4123_v33 = vld [vmem:[#allocation2 + $0xe0] sm:$0xff]  ;;  %v3246_v37 = vpop.f32.mrf.mxu1 }
 0x404   :  { %v4457_v46 = vadd.f32 %v4339_v22, %v4123_v33  ;;  %3964 = vst.msk [vmem:[#allocation2 + $0xe8] sm:$0xff] %vm22_vm2, %v3900_v29  ;;  %v3349_v31 = vadd.f32 %v3246_v37, %v3015_v34  ;;  %v6138_v42 = vld [vmem:[%s9457_s0 + $0x2b9] sm:$0xff]  ;;  %v6139_v29 = vld [vmem:[%s9457_s0 + $0x2c1] sm:$0xff] }
 0x405   :  { %v4680_v18 = vld [vmem:[#allocation2 + $0xd8] sm:$0xff]  ;;  %v8951_v47 = vpop.f32.mrf.mxu0 }
 0x406   :  { %4521 = vst.msk [vmem:[#allocation2 + $0xe0] sm:$0xff] %vm22_vm2, %v4457_v46  ;;  %v5014_v49 = vadd.f32 %v8884_v51, %v4680_v18  ;;  %5986 = vmatmul.msk.bf16.gmra.mxu1 %vm249_vm1, %v8948_v35  ;;  %6079 = vmatmul.msk.bf16.gmra.mxu2 %vm249_vm1, %v3528_v36 }
 0x407   :  { %3413 = vst.msk [vmem:[#allocation2 + $0x130] sm:$0xff] %vm22_vm2, %v3349_v31  ;;  %6176 = vmatmul.msk.bf16.gmra.mxu3 %vm249_vm1, %v4086_v44  ;;  %v3530_v44 = vpack.c.bf16 %v6042_v5, %v6041_v38  ;;  %v3019_v31 = vld [vmem:[#allocation2 + $0x150] sm:$0xff]  ;;  %v6291_v38 = vld [vmem:[%s9460_s3] sm:$0xff] }
 0x408   :  { %5078 = vst.msk [vmem:[#allocation2 + $0xd8] sm:$0xff] %vm22_vm2, %v5014_v49  ;;  %6273 = vmatmul.msk.bf16.gmra.mxu0 %vm249_vm1, %v8828_v63  ;;  %v5950_v63 = vld [vmem:[%s9457_s0 + $0x2ea] sm:$0xff]  ;;  %5483 = vmatpush.bf16.msrb.mxu1 %v6291_v38 }
 0x409   :  { %v3786_v28 = vpop.f32.mrf.mxu2  ;;  %v8988_v60 = vpack.c.bf16 %v5951_v43, %v5950_v63 }
 0x40a   :  { %v3901_v48 = vadd.f32 %v3786_v28, %v3567_v50  ;;  %v4344_v53 = vpop.f32.mrf.mxu3 }
 0x40b   :  { %v4124_v58 = vld [vmem:[#allocation2 + $0xe8] sm:$0xff]  ;;  %v3248_v51 = vpop.f32.mrf.mxu1 }
 0x40c   :  { %v4458_v52 = vadd.f32 %v4341_v40, %v4124_v58  ;;  %3965 = vst.msk [vmem:[#allocation2 + $0xf0] sm:$0xff] %vm22_vm2, %v3901_v48  ;;  %v3350_v59 = vadd.f32 %v3248_v51, %v3016_v54  ;;  %v3570_v40 = vld [vmem:[#allocation2 + $0x108] sm:$0xff]  ;;  %v3571_v58 = vld [vmem:[#allocation2 + $0x110] sm:$0xff] }
 0x40d   :  { %v4681_v8 = vld [vmem:[#allocation2 + $0xe0] sm:$0xff]  ;;  %v8964_v55 = vpop.f32.mrf.mxu0 }
 0x40e   :  { %4522 = vst.msk [vmem:[#allocation2 + $0xe8] sm:$0xff] %vm22_vm2, %v4458_v52  ;;  %v5015_v56 = vadd.f32 %v8911_v12, %v4681_v8  ;;  %v4087_v12 = vpack.c.bf16 %v6137_v62, %v6136_v17  ;;  %v3020_v8 = vld [vmem:[#allocation2 + $0x158] sm:$0xff]  ;;  %v5955_v17 = vld [vmem:[%s9457_s0 + $0x322] sm:$0xff]  ;;  %v6043_v62 = vld [vmem:[%s9457_s0 + $0x2d0] sm:$0xff] }
 0x40f   :  { %3414 = vst.msk [vmem:[#allocation2 + $0x138] sm:$0xff] %vm22_vm2, %v3350_v59 }
 0x410   :  { %5079 = vst.msk [vmem:[#allocation2 + $0xe0] sm:$0xff] %vm22_vm2, %v5015_v56 }
 0x411   :  { %v3788_v61 = vpop.f32.mrf.mxu2 }
 0x412   :  { %v3902_v3 = vadd.f32 %v3788_v61, %v3568_v0  ;;  %v4346_v11 = vpop.f32.mrf.mxu3  ;;  %v6044_v0 = vld [vmem:[%s9457_s0 + $0x2d8] sm:$0xff] }
 0x413   :  { %v4125_v4 = vld [vmem:[#allocation2 + $0xf0] sm:$0xff]  ;;  %v3251_v7 = vpop.f32.mrf.mxu1 }
 0x414   :  { %v4459_v14 = vadd.f32 %v4344_v53, %v4125_v4  ;;  %3966 = vst.msk [vmem:[#allocation2 + $0xf8] sm:$0xff] %vm22_vm2, %v3902_v3  ;;  %v3351_v15 = vadd.f32 %v3251_v7, %v3017_v10  ;;  %v6140_v61 = vld [vmem:[%s9457_s0 + $0x2d1] sm:$0xff]  ;;  %v6141_v3 = vld [vmem:[%s9457_s0 + $0x2d9] sm:$0xff] }
 0x415   :  { %v4682_v13 = vld [vmem:[#allocation2 + $0xe8] sm:$0xff]  ;;  %v8991_v16 = vpop.f32.mrf.mxu0 }
 0x416   :  { %4523 = vst.msk [vmem:[#allocation2 + $0xf0] sm:$0xff] %vm22_vm2, %v4459_v14  ;;  %v5016_v22 = vadd.f32 %v8924_v24, %v4682_v13  ;;  %5987 = vmatmul.msk.bf16.gmra.mxu1 %vm249_vm1, %v8988_v60  ;;  %6080 = vmatmul.msk.bf16.gmra.mxu2 %vm249_vm1, %v3529_v2 }
 0x417   :  { %3415 = vst.msk [vmem:[#allocation2 + $0x140] sm:$0xff] %vm22_vm2, %v3351_v15  ;;  %6177 = vmatmul.msk.bf16.gmra.mxu3 %vm249_vm1, %v4087_v12  ;;  %v3531_v12 = vpack.c.bf16 %v6044_v0, %v6043_v62  ;;  %v3021_v15 = vld [vmem:[#allocation2 + $0x160] sm:$0xff] }
 0x418   :  { %5080 = vst.msk [vmem:[#allocation2 + $0xe8] sm:$0xff] %vm22_vm2, %v5016_v22  ;;  %6274 = vmatmul.msk.bf16.gmra.mxu0 %vm249_vm1, %v8868_v20  ;;  %v5952_v20 = vld [vmem:[%s9457_s0 + $0x302] sm:$0xff] }
 0x419   :  { %v3791_v19 = vpop.f32.mrf.mxu2  ;;  %v9028_v37 = vpack.c.bf16 %v5953_v32, %v5952_v20 }
 0x41a   :  { %v3903_v21 = vadd.f32 %v3791_v19, %v3569_v23  ;;  %v4349_v26 = vpop.f32.mrf.mxu3 }
 0x41b   :  { %v4126_v41 = vld [vmem:[#allocation2 + $0xf8] sm:$0xff]  ;;  %v3253_v24 = vpop.f32.mrf.mxu1 }
 0x41c   :  { %v4460_v25 = vadd.f32 %v4346_v11, %v4126_v41  ;;  %3967 = vst.msk [vmem:[#allocation2 + $0x100] sm:$0xff] %vm22_vm2, %v3903_v21  ;;  %v3352_v30 = vadd.f32 %v3253_v24, %v3018_v45  ;;  %v3572_v11 = vld [vmem:[#allocation2 + $0x118] sm:$0xff]  ;;  %v3573_v41 = vld [vmem:[#allocation2 + $0x120] sm:$0xff] }
 0x41d   :  { %v4683_v1 = vld [vmem:[#allocation2 + $0xf0] sm:$0xff]  ;;  %v9004_v39 = vpop.f32.mrf.mxu0 }
 0x41e   :  { %4524 = vst.msk [vmem:[#allocation2 + $0xf8] sm:$0xff] %vm22_vm2, %v4460_v25  ;;  %v5017_v27 = vadd.f32 %v8951_v47, %v4683_v1  ;;  %v4088_v47 = vpack.c.bf16 %v6139_v29, %v6138_v42  ;;  %v3022_v1 = vld [vmem:[#allocation2 + $0x168] sm:$0xff]  ;;  %v5956_v42 = vld [vmem:[%s9457_s0 + $0x332] sm:$0xff]  ;;  %v5957_v29 = vld [vmem:[%s9457_s0 + $0x33a] sm:$0xff] }
 0x41f   :  { %3416 = vst.msk [vmem:[#allocation2 + $0x148] sm:$0xff] %vm22_vm2, %v3352_v30 }
 0x420   :  { %5081 = vst.msk [vmem:[#allocation2 + $0xf0] sm:$0xff] %vm22_vm2, %v5017_v27 }
 0x421   :  { %v3793_v36 = vpop.f32.mrf.mxu2 }
 0x422   :  { %v3904_v33 = vadd.f32 %v3793_v36, %v3570_v40  ;;  %v4351_v34 = vpop.f32.mrf.mxu3  ;;  %v6045_v40 = vld [vmem:[%s9457_s0 + $0x2e8] sm:$0xff]  ;;  %v6046_v36 = vld [vmem:[%s9457_s0 + $0x2f0] sm:$0xff] }
 0x423   :  { %v4127_v46 = vld [vmem:[#allocation2 + $0x100] sm:$0xff]  ;;  %v3256_v18 = vpop.f32.mrf.mxu1 }
 0x424   :  { %v4461_v49 = vadd.f32 %v4349_v26, %v4127_v46  ;;  %3968 = vst.msk [vmem:[#allocation2 + $0x108] sm:$0xff] %vm22_vm2, %v3904_v33  ;;  %v3353_v50 = vadd.f32 %v3256_v18, %v3019_v31  ;;  %v6142_v33 = vld [vmem:[%s9457_s0 + $0x2e9] sm:$0xff] }
 0x425   :  { %v4684_v28 = vld [vmem:[#allocation2 + $0xf8] sm:$0xff]  ;;  %v9031_v48 = vpop.f32.mrf.mxu0 }
 0x426   :  { %4525 = vst.msk [vmem:[#allocation2 + $0x100] sm:$0xff] %vm22_vm2, %v4461_v49  ;;  %v5018_v53 = vadd.f32 %v8964_v55, %v4684_v28  ;;  %5988 = vmatmul.msk.bf16.gmra.mxu1 %vm249_vm1, %v9028_v37  ;;  %6081 = vmatmul.msk.bf16.gmra.mxu2 %vm249_vm1, %v3530_v44  ;;  %v3574_v44 = vld [vmem:[#allocation2 + $0x128] sm:$0xff]  ;;  %v3532_v49 = vpack.c.bf16 %v6046_v36, %v6045_v40  ;;  %v3023_v28 = vld [vmem:[#allocation2 + $0x170] sm:$0xff]  ;;  %v6146_v40 = vld [vmem:[%s9457_s0 + $0x319] sm:$0xff] }
 0x427   :  { %3417 = vst.msk [vmem:[#allocation2 + $0x150] sm:$0xff] %vm22_vm2, %v3353_v50  ;;  %6178 = vmatmul.msk.bf16.gmra.mxu3 %vm249_vm1, %v4088_v47  ;;  %v9111_v47 = vpack.c.bf16 %v5957_v29, %v5956_v42  ;;  %v6050_v29 = vld [vmem:[%s9457_s0 + $0x320] sm:$0xff] }
 0x428   :  { %5082 = vst.msk [vmem:[#allocation2 + $0xf8] sm:$0xff] %vm22_vm2, %v5018_v53  ;;  %6275 = vmatmul.msk.bf16.gmra.mxu0 %vm249_vm1, %v8908_v9  ;;  %v5954_v9 = vld [vmem:[%s9457_s0 + $0x31a] sm:$0xff] }
 0x429   :  { %v3796_v54 = vpop.f32.mrf.mxu2  ;;  %v9068_v7 = vpack.c.bf16 %v5955_v17, %v5954_v9  ;;  %v6147_v36 = vld [vmem:[%s9457_s0 + $0x321] sm:$0xff] }
 0x42a   :  { %v3905_v51 = vadd.f32 %v3796_v54, %v3571_v58  ;;  %v4354_v52 = vpop.f32.mrf.mxu3 }
 0x42b   :  { %v4128_v59 = vld [vmem:[#allocation2 + $0x108] sm:$0xff]  ;;  %v3258_v55 = vpop.f32.mrf.mxu1 }
 0x42c   :  { %v4462_v56 = vadd.f32 %v4351_v34, %v4128_v59  ;;  %3969 = vst.msk [vmem:[#allocation2 + $0x110] sm:$0xff] %vm22_vm2, %v3905_v51  ;;  %v3354_v63 = vadd.f32 %v3258_v55, %v3020_v8  ;;  %v6143_v34 = vld [vmem:[%s9457_s0 + $0x2f1] sm:$0xff] }
 0x42d   :  { %v4685_v43 = vld [vmem:[#allocation2 + $0x100] sm:$0xff]  ;;  %v9044_v6 = vpop.f32.mrf.mxu0  ;;  %v4090_v53 = vpack.c.bf16 %v6143_v34, %v6142_v33  ;;  %v3575_v8 = vld [vmem:[#allocation2 + $0x130] sm:$0xff]  ;;  %v3578_v33 = vld [vmem:[#allocation2 + $0x148] sm:$0xff] }
 0x42e   :  { %4526 = vst.msk [vmem:[#allocation2 + $0x108] sm:$0xff] %vm22_vm2, %v4462_v56  ;;  %v5019_v57 = vadd.f32 %v8991_v16, %v4685_v43  ;;  %v4089_v16 = vpack.c.bf16 %v6141_v3, %v6140_v61  ;;  %v6048_v3 = vld [vmem:[%s9457_s0 + $0x308] sm:$0xff] }
 0x42f   :  { %3418 = vst.msk [vmem:[#allocation2 + $0x158] sm:$0xff] %vm22_vm2, %v3354_v63 }
 0x430   :  { %5083 = vst.msk [vmem:[#allocation2 + $0x100] sm:$0xff] %vm22_vm2, %v5019_v57 }
 0x431   :  { %v3798_v2 = vpop.f32.mrf.mxu2 }
 0x432   :  { %v3906_v4 = vadd.f32 %v3798_v2, %v3572_v11  ;;  %v4356_v10 = vpop.f32.mrf.mxu3  ;;  %v6144_v11 = vld [vmem:[%s9457_s0 + $0x301] sm:$0xff]  ;;  %v6145_v2 = vld [vmem:[%s9457_s0 + $0x309] sm:$0xff] }
 0x433   :  { %v4129_v14 = vld [vmem:[#allocation2 + $0x110] sm:$0xff]  ;;  %v3261_v13 = vpop.f32.mrf.mxu1 }
 0x434   :  { %v4463_v22 = vadd.f32 %v4354_v52, %v4129_v14  ;;  %3970 = vst.msk [vmem:[#allocation2 + $0x118] sm:$0xff] %vm22_vm2, %v3906_v4  ;;  %v3355_v23 = vadd.f32 %v3261_v13, %v3021_v15  ;;  %v3576_v4 = vld [vmem:[#allocation2 + $0x138] sm:$0xff] }
 0x435   :  { %v4686_v19 = vld [vmem:[#allocation2 + $0x108] sm:$0xff]  ;;  %v9071_v21 = vpop.f32.mrf.mxu0 }
 0x436   :  { %4527 = vst.msk [vmem:[#allocation2 + $0x110] sm:$0xff] %vm22_vm2, %v4463_v22  ;;  %v5020_v26 = vadd.f32 %v9004_v39, %v4686_v19  ;;  %5989 = vmatmul.msk.bf16.gmra.mxu1 %vm249_vm1, %v9068_v7  ;;  %6082 = vmatmul.msk.bf16.gmra.mxu2 %vm249_vm1, %v3531_v12 }
 0x437   :  { %3419 = vst.msk [vmem:[#allocation2 + $0x160] sm:$0xff] %vm22_vm2, %v3355_v23  ;;  %6179 = vmatmul.msk.bf16.gmra.mxu3 %vm249_vm1, %v4089_v16  ;;  %v3025_v16 = vld [vmem:[#allocation2 + $0x180] sm:$0xff]  ;;  %v4091_v23 = vpack.c.bf16 %v6145_v2, %v6144_v11 }
 0x438   :  { %5084 = vst.msk [vmem:[#allocation2 + $0x108] sm:$0xff] %vm22_vm2, %v5020_v26  ;;  %6276 = vmatmul.msk.bf16.gmra.mxu0 %vm249_vm1, %v8948_v35 }
 0x439   :  { %v3801_v45 = vpop.f32.mrf.mxu2 }
 0x43a   :  { %v3907_v24 = vadd.f32 %v3801_v45, %v3573_v41  ;;  %v4359_v25 = vpop.f32.mrf.mxu3 }
 0x43b   :  { %v4130_v30 = vld [vmem:[#allocation2 + $0x118] sm:$0xff]  ;;  %v3263_v39 = vpop.f32.mrf.mxu1 }
 0x43c   :  { %v4464_v27 = vadd.f32 %v4356_v10, %v4130_v30  ;;  %3971 = vst.msk [vmem:[#allocation2 + $0x120] sm:$0xff] %vm22_vm2, %v3907_v24  ;;  %v3356_v20 = vadd.f32 %v3263_v39, %v3022_v1  ;;  %v3577_v24 = vld [vmem:[#allocation2 + $0x140] sm:$0xff] }
 0x43d   :  { %v4687_v32 = vld [vmem:[#allocation2 + $0x110] sm:$0xff]  ;;  %v9087_v5 = vpop.f32.mrf.mxu0 }
 0x43e   :  { %4528 = vst.msk [vmem:[#allocation2 + $0x118] sm:$0xff] %vm22_vm2, %v4464_v27  ;;  %v5021_v35 = vadd.f32 %v9031_v48, %v4687_v32  ;;  %v3026_v27 = vld [vmem:[#allocation2 + $0x188] sm:$0xff] }
 0x43f   :  { %3420 = vst.msk [vmem:[#allocation2 + $0x168] sm:$0xff] %vm22_vm2, %v3356_v20 }
 0x440   :  { %5085 = vst.msk [vmem:[#allocation2 + $0x110] sm:$0xff] %vm22_vm2, %v5021_v35 }
 0x441   :  { %v3803_v46 = vpop.f32.mrf.mxu2 }
 0x442   :  { %v3908_v31 = vadd.f32 %v3803_v46, %v3574_v44  ;;  %v4361_v18 = vpop.f32.mrf.mxu3 }
 0x443   :  { %v4131_v50 = vld [vmem:[#allocation2 + $0x120] sm:$0xff]  ;;  %v3266_v48 = vpop.f32.mrf.mxu1 }
 0x444   :  { %v4465_v58 = vadd.f32 %v4359_v25, %v4131_v50  ;;  %3972 = vst.msk [vmem:[#allocation2 + $0x128] sm:$0xff] %vm22_vm2, %v3908_v31  ;;  %v3357_v54 = vadd.f32 %v3266_v48, %v3023_v28  ;;  %v4092_v28 = vpack.c.bf16 %v6147_v36, %v6146_v40 }
 0x445   :  { %v4688_v51 = vld [vmem:[#allocation2 + $0x118] sm:$0xff]  ;;  %v9114_v52 = vpop.f32.mrf.mxu0 }
 0x446   :  { %4529 = vst.msk [vmem:[#allocation2 + $0x120] sm:$0xff] %vm22_vm2, %v4465_v58  ;;  %v5022_v59 = vadd.f32 %v9044_v6, %v4688_v51  ;;  %5990 = vmatmul.msk.bf16.gmra.mxu1 %vm249_vm1, %v9111_v47  ;;  %6083 = vmatmul.msk.bf16.gmra.mxu2 %vm249_vm1, %v3532_v49  ;;  %v3024_v6 = vld [vmem:[#allocation2 + $0x178] sm:$0xff]  ;;  %v3027_v49 = vld [vmem:[#allocation2 + $0x190] sm:$0xff] }
 0x447   :  { %3421 = vst.msk [vmem:[#allocation2 + $0x170] sm:$0xff] %vm22_vm2, %v3357_v54  ;;  %6180 = vmatmul.msk.bf16.gmra.mxu3 %vm249_vm1, %v4090_v53 }
 0x448   :  { %5086 = vst.msk [vmem:[#allocation2 + $0x118] sm:$0xff] %vm22_vm2, %v5022_v59  ;;  %6277 = vmatmul.msk.bf16.gmra.mxu0 %vm249_vm1, %v8988_v60  ;;  %v6047_v60 = vld [vmem:[%s9457_s0 + $0x300] sm:$0xff] }
 0x449   :  { %v3806_v55 = vpop.f32.mrf.mxu2  ;;  %v3533_v15 = vpack.c.bf16 %v6048_v3, %v6047_v60  ;;  %v6149_v60 = vld [vmem:[%s9457_s0 + $0x339] sm:$0xff] }
 0x44a   :  { %v3909_v56 = vadd.f32 %v3806_v55, %v3575_v8  ;;  %v4364_v63 = vpop.f32.mrf.mxu3  ;;  %v3580_v3 = vld [vmem:[#allocation2 + $0x158] sm:$0xff] }
 0x44b   :  { %v4132_v43 = vld [vmem:[#allocation2 + $0x128] sm:$0xff]  ;;  %v3268_v57 = vpop.f32.mrf.mxu1 }
 0x44c   :  { %v4466_v9 = vadd.f32 %v4361_v18, %v4132_v43  ;;  %3973 = vst.msk [vmem:[#allocation2 + $0x130] sm:$0xff] %vm22_vm2, %v3909_v56  ;;  %v3358_v17 = vadd.f32 %v3268_v57, %v3024_v6 }
 0x44d   :  { %v4689_v62 = vld [vmem:[#allocation2 + $0x120] sm:$0xff]  ;;  %v9127_v0 = vpop.f32.mrf.mxu0 }
 0x44e   :  { %4530 = vst.msk [vmem:[#allocation2 + $0x128] sm:$0xff] %vm22_vm2, %v4466_v9  ;;  %v5023_v61 = vadd.f32 %v9071_v21, %v4689_v62 }
 0x44f   :  { %3422 = vst.msk [vmem:[#allocation2 + $0x178] sm:$0xff] %vm22_vm2, %v3358_v17 }
 0x450   :  { %5087 = vst.msk [vmem:[#allocation2 + $0x120] sm:$0xff] %vm22_vm2, %v5023_v61  ;;  %v6148_v61 = vld [vmem:[%s9457_s0 + $0x331] sm:$0xff] }
 0x451   :  { %v3808_v10 = vpop.f32.mrf.mxu2 }
 0x452   :  { %v3910_v12 = vadd.f32 %v3808_v10, %v3576_v4  ;;  %v4366_v14 = vpop.f32.mrf.mxu3 }
 0x453   :  { %v4133_v13 = vld [vmem:[#allocation2 + $0x130] sm:$0xff]  ;;  %v3271_v22 = vpop.f32.mrf.mxu1 }
 0x454   :  { %v4467_v19 = vadd.f32 %v4364_v63, %v4133_v13  ;;  %3974 = vst.msk [vmem:[#allocation2 + $0x138] sm:$0xff] %vm22_vm2, %v3910_v12  ;;  %v3359_v21 = vadd.f32 %v3271_v22, %v3025_v16  ;;  %v3028_v63 = vld [vmem:[#allocation2 + $0x198] sm:$0xff]  ;;  %v4093_v13 = vpack.c.bf16 %v6149_v60, %v6148_v61 }
 0x455   :  { %v4690_v26 = vld [vmem:[#allocation2 + $0x128] sm:$0xff]  ;;  %v4927_v41 = vpop.f32.mrf.mxu0 }
 0x456   :  { %4531 = vst.msk [vmem:[#allocation2 + $0x130] sm:$0xff] %vm22_vm2, %v4467_v19  ;;  %v5024_v45 = vadd.f32 %v9087_v5, %v4690_v26  ;;  %6084 = vmatmul.msk.bf16.gmra.mxu2 %vm249_vm1, %v3533_v15  ;;  %v3581_v26 = vld [vmem:[#allocation2 + $0x160] sm:$0xff] }
 0x457   :  { %3423 = vst.msk [vmem:[#allocation2 + $0x180] sm:$0xff] %vm22_vm2, %v3359_v21  ;;  %6181 = vmatmul.msk.bf16.gmra.mxu3 %vm249_vm1, %v4091_v23 }
 0x458   :  { %5088 = vst.msk [vmem:[#allocation2 + $0x128] sm:$0xff] %vm22_vm2, %v5024_v45  ;;  %6278 = vmatmul.msk.bf16.gmra.mxu0 %vm249_vm1, %v9028_v37  ;;  %v6049_v37 = vld [vmem:[%s9457_s0 + $0x318] sm:$0xff] }
 0x459   :  { %v3811_v25 = vpop.f32.mrf.mxu2  ;;  %v3534_v31 = vpack.c.bf16 %v6050_v29, %v6049_v37  ;;  %v3582_v37 = vld [vmem:[#allocation2 + $0x168] sm:$0xff] }
 0x45a   :  { %v3911_v30 = vadd.f32 %v3811_v25, %v3577_v24  ;;  %v4369_v1 = vpop.f32.mrf.mxu3 }
 0x45b   :  { %v4134_v39 = vld [vmem:[#allocation2 + $0x138] sm:$0xff]  ;;  %v3273_v20 = vpop.f32.mrf.mxu1 }
 0x45c   :  { %v4468_v32 = vadd.f32 %v4366_v14, %v4134_v39  ;;  %3975 = vst.msk [vmem:[#allocation2 + $0x140] sm:$0xff] %vm22_vm2, %v3911_v30  ;;  %v3360_v38 = vadd.f32 %v3273_v20, %v3026_v27  ;;  %v3029_v14 = vld [vmem:[#allocation2 + $0x1a0] sm:$0xff]  ;;  %v3030_v30 = vld [vmem:[#allocation2 + $0x1a8] sm:$0xff] }
 0x45d   :  { %v4691_v5 = vld [vmem:[#allocation2 + $0x130] sm:$0xff]  ;;  %v9155_v35 = vpop.f32.mrf.mxu0 }
 0x45e   :  { %4532 = vst.msk [vmem:[#allocation2 + $0x138] sm:$0xff] %vm22_vm2, %v4468_v32  ;;  %v5025_v42 = vadd.f32 %v9114_v52, %v4691_v5  ;;  %v3579_v52 = vld [vmem:[#allocation2 + $0x150] sm:$0xff] }
 0x45f   :  { %3424 = vst.msk [vmem:[#allocation2 + $0x188] sm:$0xff] %vm22_vm2, %v3360_v38  ;;  %v6054_v5 = vld [vmem:[%s9457_s0 + $0x350] sm:$0xff] }
 0x460   :  { %5089 = vst.msk [vmem:[#allocation2 + $0x130] sm:$0xff] %vm22_vm2, %v5025_v42  ;;  %v6151_v42 = vld [vmem:[%s9457_s0 + $0x351] sm:$0xff] }
 0x461   :  { %v3813_v34 = vpop.f32.mrf.mxu2 }
 0x462   :  { %v3912_v44 = vadd.f32 %v3813_v34, %v3578_v33  ;;  %v4371_v46 = vpop.f32.mrf.mxu3  ;;  %v6247_v34 = vld [vmem:[%s9457_s0 + $0x34a] sm:$0xff] }
 0x463   :  { %v4135_v18 = vld [vmem:[#allocation2 + $0x140] sm:$0xff]  ;;  %v3276_v50 = vpop.f32.mrf.mxu1 }
 0x464   :  { %v4469_v48 = vadd.f32 %v4369_v1, %v4135_v18  ;;  %3976 = vst.msk [vmem:[#allocation2 + $0x148] sm:$0xff] %vm22_vm2, %v3912_v44  ;;  %v3361_v53 = vadd.f32 %v3276_v50, %v3027_v49  ;;  %v6248_v44 = vld [vmem:[%s9457_s0 + $0x352] sm:$0xff] }
 0x465   :  { %v4692_v58 = vld [vmem:[#allocation2 + $0x138] sm:$0xff]  ;;  %v4932_v54 = vpop.f32.mrf.mxu0 }
 0x466   :  { %4533 = vst.msk [vmem:[#allocation2 + $0x140] sm:$0xff] %vm22_vm2, %v4469_v48  ;;  %v5026_v51 = vadd.f32 %v9127_v0, %v4692_v58  ;;  %6085 = vmatmul.msk.bf16.gmra.mxu2 %vm249_vm1, %v3534_v31  ;;  %v6052_v0 = vld [vmem:[%s9457_s0 + $0x338] sm:$0xff]  ;;  %v3031_v31 = vld [vmem:[#allocation2 + $0x1b0] sm:$0xff]  ;;  %v4652_v48 = vpack.c.bf16 %v6248_v44, %v6247_v34 }
 0x467   :  { %3425 = vst.msk [vmem:[#allocation2 + $0x190] sm:$0xff] %vm22_vm2, %v3361_v53  ;;  %6182 = vmatmul.msk.bf16.gmra.mxu3 %vm249_vm1, %v4092_v28  ;;  %v3036_v44 = vld [vmem:[#allocation2 + $0x1d8] sm:$0xff] }
 0x468   :  { %5090 = vst.msk [vmem:[#allocation2 + $0x138] sm:$0xff] %vm22_vm2, %v5026_v51  ;;  %6279 = vmatmul.msk.bf16.gmra.mxu0 %vm249_vm1, %v9068_v7  ;;  %v6051_v7 = vld [vmem:[%s9457_s0 + $0x330] sm:$0xff] }
 0x469   :  { %v3816_v59 = vpop.f32.mrf.mxu2  ;;  %v3535_v10 = vpack.c.bf16 %v6052_v0, %v6051_v7  ;;  %v3583_v51 = vld [vmem:[#allocation2 + $0x170] sm:$0xff] }
 0x46a   :  { %v3913_v8 = vadd.f32 %v3816_v59, %v3579_v52  ;;  %v4374_v55 = vpop.f32.mrf.mxu3 }
 0x46b   :  { %v4136_v56 = vld [vmem:[#allocation2 + $0x148] sm:$0xff]  ;;  %v3278_v43 = vpop.f32.mrf.mxu1 }
 0x46c   :  { %v4470_v6 = vadd.f32 %v4371_v46, %v4136_v56  ;;  %3977 = vst.msk [vmem:[#allocation2 + $0x150] sm:$0xff] %vm22_vm2, %v3913_v8  ;;  %v3362_v57 = vadd.f32 %v3278_v43, %v3028_v63  ;;  %v3032_v56 = vld [vmem:[#allocation2 + $0x1b8] sm:$0xff] }
 0x46d   :  { %v4693_v9 = vld [vmem:[#allocation2 + $0x140] sm:$0xff]  ;;  %v9183_v17 = vpop.f32.mrf.mxu0 }
 0x46e   :  { %4534 = vst.msk [vmem:[#allocation2 + $0x148] sm:$0xff] %vm22_vm2, %v4470_v6  ;;  %v5027_v62 = vadd.f32 %v4927_v41, %v4693_v9 }
 0x46f   :  { %3426 = vst.msk [vmem:[#allocation2 + $0x198] sm:$0xff] %vm22_vm2, %v3362_v57 }
 0x470   :  { %5091 = vst.msk [vmem:[#allocation2 + $0x140] sm:$0xff] %vm22_vm2, %v5027_v62  ;;  %v3584_v62 = vld [vmem:[#allocation2 + $0x178] sm:$0xff] }
 0x471   :  { %v3818_v11 = vpop.f32.mrf.mxu2 }
 0x472   :  { %v3914_v2 = vadd.f32 %v3818_v11, %v3580_v3  ;;  %v4376_v4 = vpop.f32.mrf.mxu3  ;;  %v3033_v3 = vld [vmem:[#allocation2 + $0x1c0] sm:$0xff] }
 0x473   :  { %v4137_v12 = vld [vmem:[#allocation2 + $0x150] sm:$0xff]  ;;  %v3281_v15 = vpop.f32.mrf.mxu1 }
 0x474   :  { %v4471_v16 = vadd.f32 %v4374_v55, %v4137_v12  ;;  %3978 = vst.msk [vmem:[#allocation2 + $0x158] sm:$0xff] %vm22_vm2, %v3914_v2  ;;  %v3363_v22 = vadd.f32 %v3281_v15, %v3029_v14  ;;  %v3585_v15 = vld [vmem:[#allocation2 + $0x180] sm:$0xff] }
 0x475   :  { %v4694_v23 = vld [vmem:[#allocation2 + $0x148] sm:$0xff]  ;;  %v9201_v19 = vpop.f32.mrf.mxu0 }
 0x476   :  { %4535 = vst.msk [vmem:[#allocation2 + $0x150] sm:$0xff] %vm22_vm2, %v4471_v16  ;;  %v5028_v21 = vadd.f32 %v9155_v35, %v4694_v23  ;;  %6086 = vmatmul.msk.bf16.gmra.mxu2 %vm249_vm1, %v3535_v10  ;;  %v6150_v35 = vld [vmem:[%s9457_s0 + $0x349] sm:$0xff] }
 0x477   :  { %3427 = vst.msk [vmem:[#allocation2 + $0x1a0] sm:$0xff] %vm22_vm2, %v3363_v22  ;;  %6183 = vmatmul.msk.bf16.gmra.mxu3 %vm249_vm1, %v4093_v13  ;;  %v4094_v49 = vpack.c.bf16 %v6151_v42, %v6150_v35 }
 0x478   :  { %5092 = vst.msk [vmem:[#allocation2 + $0x148] sm:$0xff] %vm22_vm2, %v5028_v21  ;;  %6280 = vmatmul.msk.bf16.gmra.mxu0 %vm249_vm1, %v9111_v47  ;;  %v6053_v47 = vld [vmem:[%s9457_s0 + $0x348] sm:$0xff] }
 0x479   :  { %v3821_v41 = vpop.f32.mrf.mxu2  ;;  %v3536_v33 = vpack.c.bf16 %v6054_v5, %v6053_v47 }
 0x47a   :  { %v3915_v45 = vadd.f32 %v3821_v41, %v3581_v26  ;;  %v4379_v24 = vpop.f32.mrf.mxu3 }
 0x47b   :  { %v4138_v25 = vld [vmem:[#allocation2 + $0x158] sm:$0xff]  ;;  %v3283_v1 = vpop.f32.mrf.mxu1 }
 0x47c   :  { %v4472_v39 = vadd.f32 %v4376_v4, %v4138_v25  ;;  %3979 = vst.msk [vmem:[#allocation2 + $0x160] sm:$0xff] %vm22_vm2, %v3915_v45  ;;  %v3364_v27 = vadd.f32 %v3283_v1, %v3030_v30  ;;  %v3586_v30 = vld [vmem:[#allocation2 + $0x188] sm:$0xff] }
 0x47d   :  { %v4695_v20 = vld [vmem:[#allocation2 + $0x150] sm:$0xff]  ;;  %v4939_v32 = vpop.f32.mrf.mxu0 }
 0x47e   :  { %4536 = vst.msk [vmem:[#allocation2 + $0x158] sm:$0xff] %vm22_vm2, %v4472_v39  ;;  %v5029_v38 = vadd.f32 %v4932_v54, %v4695_v20 }
 0x47f   :  { %3428 = vst.msk [vmem:[#allocation2 + $0x1a8] sm:$0xff] %vm22_vm2, %v3364_v27 }
 0x480   :  { %5093 = vst.msk [vmem:[#allocation2 + $0x150] sm:$0xff] %vm22_vm2, %v5029_v38 }
 0x481   :  { %v3823_v29 = vpop.f32.mrf.mxu2 }
 0x482   :  { %v3916_v40 = vadd.f32 %v3823_v29, %v3582_v37  ;;  %v4381_v36 = vpop.f32.mrf.mxu3  ;;  %v3587_v29 = vld [vmem:[#allocation2 + $0x190] sm:$0xff] }
 0x483   :  { %v4139_v46 = vld [vmem:[#allocation2 + $0x160] sm:$0xff]  ;;  %v3286_v18 = vpop.f32.mrf.mxu1 }
 0x484   :  { %v4473_v50 = vadd.f32 %v4379_v24, %v4139_v46  ;;  %3980 = vst.msk [vmem:[#allocation2 + $0x168] sm:$0xff] %vm22_vm2, %v3916_v40  ;;  %v3365_v28 = vadd.f32 %v3286_v18, %v3031_v31 }
 0x485   :  { %v4696_v53 = vld [vmem:[#allocation2 + $0x158] sm:$0xff]  ;;  %v4942_v58 = vpop.f32.mrf.mxu0 }
 0x486   :  { %4537 = vst.msk [vmem:[#allocation2 + $0x160] sm:$0xff] %vm22_vm2, %v4473_v50  ;;  %v5030_v54 = vadd.f32 %v9183_v17, %v4696_v53  ;;  %6087 = vmatmul.msk.bf16.gmra.mxu2 %vm249_vm1, %v3536_v33 }
 0x487   :  { %3429 = vst.msk [vmem:[#allocation2 + $0x1b0] sm:$0xff] %vm22_vm2, %v3365_v28  ;;  %6184 = vmatmul.msk.bf16.gmra.mxu3 %vm249_vm1, %v4094_v49 }
 0x488   :  { %5094 = vst.msk [vmem:[#allocation2 + $0x158] sm:$0xff] %vm22_vm2, %v5030_v54  ;;  %6281 = vmatmul.msk.bf16.gmra.mxu0 %vm249_vm1, %v4652_v48  ;;  %v3588_v48 = vld [vmem:[#allocation2 + $0x198] sm:$0xff] }
 0x489   :  { %v3826_v52 = vpop.f32.mrf.mxu2 }
 0x48a   :  { %v3917_v59 = vadd.f32 %v3826_v52, %v3583_v51  ;;  %v4384_v8 = vpop.f32.mrf.mxu3  ;;  %v3037_v52 = vld [vmem:[#allocation2 + $0x1e0] sm:$0xff] }
 0x48b   :  { %v4140_v55 = vld [vmem:[#allocation2 + $0x168] sm:$0xff]  ;;  %v3288_v63 = vpop.f32.mrf.mxu1 }
 0x48c   :  { %v4474_v43 = vadd.f32 %v4381_v36, %v4140_v55  ;;  %3981 = vst.msk [vmem:[#allocation2 + $0x170] sm:$0xff] %vm22_vm2, %v3917_v59  ;;  %v3366_v6 = vadd.f32 %v3288_v63, %v3032_v56 }
 0x48d   :  { %v4697_v57 = vld [vmem:[#allocation2 + $0x160] sm:$0xff]  ;;  %v4944_v9 = vpop.f32.mrf.mxu0 }
 0x48e   :  { %4538 = vst.msk [vmem:[#allocation2 + $0x168] sm:$0xff] %vm22_vm2, %v4474_v43  ;;  %v5031_v17 = vadd.f32 %v9201_v19, %v4697_v57  ;;  %v3034_v19 = vld [vmem:[#allocation2 + $0x1c8] sm:$0xff] }
 0x48f   :  { %3430 = vst.msk [vmem:[#allocation2 + $0x1b8] sm:$0xff] %vm22_vm2, %v3366_v6  ;;  %v3589_v6 = vld [vmem:[#allocation2 + $0x1a0] sm:$0xff] }
 0x490   :  { %5095 = vst.msk [vmem:[#allocation2 + $0x160] sm:$0xff] %vm22_vm2, %v5031_v17 }
 0x491   :  { %v3828_v7 = vpop.f32.mrf.mxu2 }
 0x492   :  { %v3918_v0 = vadd.f32 %v3828_v7, %v3584_v62  ;;  %v4386_v61 = vpop.f32.mrf.mxu3  ;;  %v3038_v7 = vld [vmem:[#allocation2 + $0x1e8] sm:$0xff] }
 0x493   :  { %v4141_v60 = vld [vmem:[#allocation2 + $0x170] sm:$0xff]  ;;  %v3291_v11 = vpop.f32.mrf.mxu1 }
 0x494   :  { %v4475_v2 = vadd.f32 %v4384_v8, %v4141_v60  ;;  %3982 = vst.msk [vmem:[#allocation2 + $0x178] sm:$0xff] %vm22_vm2, %v3918_v0  ;;  %v3367_v4 = vadd.f32 %v3291_v11, %v3033_v3 }
 0x495   :  { %v4698_v10 = vld [vmem:[#allocation2 + $0x168] sm:$0xff]  ;;  %v4947_v12 = vpop.f32.mrf.mxu0 }
 0x496   :  { %4539 = vst.msk [vmem:[#allocation2 + $0x170] sm:$0xff] %vm22_vm2, %v4475_v2  ;;  %v5032_v14 = vadd.f32 %v4939_v32, %v4698_v10  ;;  %v3035_v32 = vld [vmem:[#allocation2 + $0x1d0] sm:$0xff] }
 0x497   :  { %3431 = vst.msk [vmem:[#allocation2 + $0x1c0] sm:$0xff] %vm22_vm2, %v3367_v4  ;;  %v3590_v4 = vld [vmem:[#allocation2 + $0x1a8] sm:$0xff] }
 0x498   :  { %5096 = vst.msk [vmem:[#allocation2 + $0x168] sm:$0xff] %vm22_vm2, %v5032_v14 }
 0x499   :  { %v3831_v13 = vpop.f32.mrf.mxu2 }
 0x49a   :  { %v3919_v16 = vadd.f32 %v3831_v13, %v3585_v15  ;;  %v4389_v22 = vpop.f32.mrf.mxu3  ;;  %v3039_v13 = vld [vmem:[#allocation2 + $0x1f0] sm:$0xff] }
 0x49b   :  { %v4142_v23 = vld [vmem:[#allocation2 + $0x178] sm:$0xff]  ;;  %v3293_v21 = vpop.f32.mrf.mxu1 }
 0x49c   :  { %v4476_v26 = vadd.f32 %v4386_v61, %v4142_v23  ;;  %3983 = vst.msk [vmem:[#allocation2 + $0x180] sm:$0xff] %vm22_vm2, %v3919_v16  ;;  %v3368_v41 = vadd.f32 %v3293_v21, %v3034_v19 }
 0x49d   :  { %v4699_v45 = vld [vmem:[#allocation2 + $0x170] sm:$0xff]  ;;  %v4949_v24 = vpop.f32.mrf.mxu0 }
 0x49e   :  { %4540 = vst.msk [vmem:[#allocation2 + $0x178] sm:$0xff] %vm22_vm2, %v4476_v26  ;;  %v5033_v25 = vadd.f32 %v4942_v58, %v4699_v45  ;;  %v3591_v26 = vld [vmem:[#allocation2 + $0x1b0] sm:$0xff] }
 0x49f   :  { %3432 = vst.msk [vmem:[#allocation2 + $0x1c8] sm:$0xff] %vm22_vm2, %v3368_v41 }
 0x4a0   :  { %5097 = vst.msk [vmem:[#allocation2 + $0x170] sm:$0xff] %vm22_vm2, %v5033_v25 }
 0x4a1   :  { %v3833_v1 = vpop.f32.mrf.mxu2 }
 0x4a2   :  { %v3920_v39 = vadd.f32 %v3833_v1, %v3586_v30  ;;  %v4391_v27 = vpop.f32.mrf.mxu3  ;;  %v3040_v1 = vld [vmem:[#allocation2 + $0x1f8] sm:$0xff] }
 0x4a3   :  { %v4143_v20 = vld [vmem:[#allocation2 + $0x180] sm:$0xff]  ;;  %v3296_v38 = vpop.f32.mrf.mxu1 }
 0x4a4   :  { %v4477_v47 = vadd.f32 %v4389_v22, %v4143_v20  ;;  %3984 = vst.msk [vmem:[#allocation2 + $0x188] sm:$0xff] %vm22_vm2, %v3920_v39  ;;  %v3369_v5 = vadd.f32 %v3296_v38, %v3035_v32 }
 0x4a5   :  { %v4700_v35 = vld [vmem:[#allocation2 + $0x178] sm:$0xff]  ;;  %v4952_v42 = vpop.f32.mrf.mxu0 }
 0x4a6   :  { %4541 = vst.msk [vmem:[#allocation2 + $0x180] sm:$0xff] %vm22_vm2, %v4477_v47  ;;  %v5034_v37 = vadd.f32 %v4944_v9, %v4700_v35  ;;  %v3592_v47 = vld [vmem:[#allocation2 + $0x1b8] sm:$0xff] }
 0x4a7   :  { %3433 = vst.msk [vmem:[#allocation2 + $0x1d0] sm:$0xff] %vm22_vm2, %v3369_v5 }
 0x4a8   :  { %5098 = vst.msk [vmem:[#allocation2 + $0x178] sm:$0xff] %vm22_vm2, %v5034_v37 }
 0x4a9   :  { %v3836_v40 = vpop.f32.mrf.mxu2 }
 0x4aa   :  { %v3921_v36 = vadd.f32 %v3836_v40, %v3587_v29  ;;  %v4394_v33 = vpop.f32.mrf.mxu3 }
 0x4ab   :  { %v4144_v34 = vld [vmem:[#allocation2 + $0x188] sm:$0xff]  ;;  %v3298_v46 = vpop.f32.mrf.mxu1 }
 0x4ac   :  { %v4478_v31 = vadd.f32 %v4391_v27, %v4144_v34  ;;  %3985 = vst.msk [vmem:[#allocation2 + $0x190] sm:$0xff] %vm22_vm2, %v3921_v36  ;;  %v3370_v18 = vadd.f32 %v3298_v46, %v3036_v44  ;;  %v9282_v36 = vld [vmem:[%s9459_s2] ss:$0 sm:$0xff] }
 0x4ad   :  { %v4701_v49 = vld [vmem:[#allocation2 + $0x180] sm:$0xff]  ;;  %v4954_v50 = vpop.f32.mrf.mxu0 }
 0x4ae   :  { %4542 = vst.msk [vmem:[#allocation2 + $0x188] sm:$0xff] %vm22_vm2, %v4478_v31  ;;  %v5035_v28 = vadd.f32 %v4947_v12, %v4701_v49  ;;  %v5115_v44 = vld [vmem:[#allocation2] sm:$0xff]  ;;  %v5117_v31 = vld [vmem:[#allocation2 + $0x10] sm:$0xff] }
 0x4af   :  { %3434 = vst.msk [vmem:[#allocation2 + $0x1d8] sm:$0xff] %vm22_vm2, %v3370_v18  ;;  %v5151_v49 = vadd.f32 %v9282_v36, %v5115_v44  ;;  %v5127_v44 = vld [vmem:[#allocation2 + $0x60] sm:$0xff] }
 0x4b0   :  { %5099 = vst.msk [vmem:[#allocation2 + $0x180] sm:$0xff] %vm22_vm2, %v5035_v28  ;;  %v3593_v28 = vld [vmem:[#allocation2 + $0x1c0] sm:$0xff] }
 0x4b1   :  { %v3838_v53 = vpop.f32.mrf.mxu2 }
 0x4b2   :  { %v3922_v58 = vadd.f32 %v3838_v53, %v3588_v48  ;;  %v4396_v54 = vpop.f32.mrf.mxu3  ;;  %v5153_v53 = vadd.f32 %v9282_v36, %v5117_v31 }
 0x4b3   :  { %v4145_v51 = vld [vmem:[#allocation2 + $0x190] sm:$0xff]  ;;  %v3301_v59 = vpop.f32.mrf.mxu1 }
 0x4b4   :  { %v4479_v8 = vadd.f32 %v4394_v33, %v4145_v51  ;;  %3986 = vst.msk [vmem:[#allocation2 + $0x198] sm:$0xff] %vm22_vm2, %v3922_v58  ;;  %v3371_v55 = vadd.f32 %v3301_v59, %v3037_v52  ;;  %v5116_v33 = vld [vmem:[#allocation2 + $0x8] sm:$0xff]  ;;  %v5119_v51 = vld [vmem:[#allocation2 + $0x20] sm:$0xff] }
 0x4b5   :  { %v4702_v56 = vld [vmem:[#allocation2 + $0x188] sm:$0xff]  ;;  %v4957_v43 = vpop.f32.mrf.mxu0  ;;  %v5152_v18 = vadd.f32 %v9282_v36, %v5116_v33 }
 0x4b6   :  { %4543 = vst.msk [vmem:[#allocation2 + $0x190] sm:$0xff] %vm22_vm2, %v4479_v8  ;;  %v5036_v63 = vadd.f32 %v4949_v24, %v4702_v56  ;;  %v5183_v56 = vmax.f32 %v5151_v49, 0.0 }
 0x4b7   :  { %3435 = vst.msk [vmem:[#allocation2 + $0x1e0] sm:$0xff] %vm22_vm2, %v3371_v55  ;;  %v5184_v59 = vmax.f32 %v5152_v18, 0.0 }
 0x4b8   :  { %5100 = vst.msk [vmem:[#allocation2 + $0x188] sm:$0xff] %vm22_vm2, %v5036_v63  ;;  %v5120_v63 = vld [vmem:[#allocation2 + $0x28] sm:$0xff] }
 0x4b9   :  { %v3841_v57 = vpop.f32.mrf.mxu2 }
 0x4ba   :  { %v3923_v9 = vadd.f32 %v3841_v57, %v3589_v6  ;;  %v4399_v17 = vpop.f32.mrf.mxu3  ;;  %v5185_v6 = vmax.f32 %v5153_v53, 0.0  ;;  %v5155_v57 = vadd.f32 %v9282_v36, %v5119_v51 }
 0x4bb   :  { %v4146_v62 = vld [vmem:[#allocation2 + $0x198] sm:$0xff]  ;;  %v3303_v0 = vpop.f32.mrf.mxu1 }
 0x4bc   :  { %v4480_v61 = vadd.f32 %v4396_v54, %v4146_v62  ;;  %3987 = vst.msk [vmem:[#allocation2 + $0x1a0] sm:$0xff] %vm22_vm2, %v3923_v9  ;;  %v3372_v60 = vadd.f32 %v3303_v0, %v3038_v7  ;;  %v5121_v62 = vld [vmem:[#allocation2 + $0x30] sm:$0xff]  ;;  %v5216_v7 = vsel %vm22_vm2, %v5184_v59, 0.0  ;;  %v5284_v59 = vld [vmem:[#allocation2 + $0x100] sm:$0xff] }
 0x4bd   :  { %v4703_v3 = vld [vmem:[#allocation2 + $0x190] sm:$0xff]  ;;  %v4959_v2 = vpop.f32.mrf.mxu0 }
 0x4be   :  { %4544 = vst.msk [vmem:[#allocation2 + $0x198] sm:$0xff] %vm22_vm2, %v4480_v61  ;;  %v5037_v11 = vadd.f32 %v4952_v42, %v4703_v3  ;;  %v5156_v61 = vadd.f32 %v9282_v36, %v5120_v63  ;;  %v5122_v3 = vld [vmem:[#allocation2 + $0x38] sm:$0xff] }
 0x4bf   :  { %3436 = vst.msk [vmem:[#allocation2 + $0x1e8] sm:$0xff] %vm22_vm2, %v3372_v60  ;;  %v5215_v60 = vsel %vm22_vm2, %v5183_v56, 0.0 }
 0x4c0   :  { %5101 = vst.msk [vmem:[#allocation2 + $0x190] sm:$0xff] %vm22_vm2, %v5037_v11  ;;  %v3594_v11 = vld [vmem:[#allocation2 + $0x1c8] sm:$0xff] }
 0x4c1   :  { %v3843_v10 = vpop.f32.mrf.mxu2 }
 0x4c2   :  { %v3924_v12 = vadd.f32 %v3843_v10, %v3590_v4  ;;  %v4401_v14 = vpop.f32.mrf.mxu3  ;;  %v5218_v4 = vsel %vm22_vm2, %v5185_v6, 0.0  ;;  %v5187_v10 = vmax.f32 %v5155_v57, 0.0 }
 0x4c3   :  { %v4147_v15 = vld [vmem:[#allocation2 + $0x1a0] sm:$0xff]  ;;  %v3306_v16 = vpop.f32.mrf.mxu1 }
 0x4c4   :  { %v4481_v22 = vadd.f32 %v4399_v17, %v4147_v15  ;;  %3988 = vst.msk [vmem:[#allocation2 + $0x1a8] sm:$0xff] %vm22_vm2, %v3924_v12  ;;  %v3373_v23 = vadd.f32 %v3306_v16, %v3039_v13  ;;  %v5157_v12 = vadd.f32 %v9282_v36, %v5121_v62  ;;  %v5217_v13 = vadd.f32 %v5216_v7, %v5215_v60  ;;  %v5123_v16 = vld [vmem:[#allocation2 + $0x40] sm:$0xff]  ;;  %v5287_v7 = vld [vmem:[#allocation2 + $0x118] sm:$0xff] }
 0x4c5   :  { %v4704_v19 = vld [vmem:[#allocation2 + $0x198] sm:$0xff]  ;;  %v4962_v25 = vpop.f32.mrf.mxu0  ;;  %v5316_v60 = vadd.f32 %v9282_v36, %v5284_v59  ;;  %v5133_v59 = vld [vmem:[#allocation2 + $0x90] sm:$0xff] }
 0x4c6   :  { %4545 = vst.msk [vmem:[#allocation2 + $0x1a0] sm:$0xff] %vm22_vm2, %v4481_v22  ;;  %v5038_v21 = vadd.f32 %v4954_v50, %v4704_v19  ;;  %v5118_v50 = vld [vmem:[#allocation2 + $0x18] sm:$0xff]  ;;  %v5188_v19 = vmax.f32 %v5156_v61, 0.0  ;;  %v5129_v61 = vld [vmem:[#allocation2 + $0x70] sm:$0xff] }
 0x4c7   :  { %3437 = vst.msk [vmem:[#allocation2 + $0x1f0] sm:$0xff] %vm22_vm2, %v3373_v23  ;;  %v5154_v8 = vadd.f32 %v9282_v36, %v5118_v50  ;;  %v5285_v50 = vld [vmem:[#allocation2 + $0x108] sm:$0xff] }
 0x4c8   :  { %5102 = vst.msk [vmem:[#allocation2 + $0x198] sm:$0xff] %vm22_vm2, %v5038_v21  ;;  %v5158_v21 = vadd.f32 %v9282_v36, %v5122_v3 }
 0x4c9   :  { %v3846_v41 = vpop.f32.mrf.mxu2  ;;  %v5186_v0 = vmax.f32 %v5154_v8, 0.0  ;;  %v5286_v8 = vld [vmem:[#allocation2 + $0x110] sm:$0xff] }
 0x4ca   :  { %v3925_v45 = vadd.f32 %v3846_v41, %v3591_v26  ;;  %v4404_v24 = vpop.f32.mrf.mxu3  ;;  %v5219_v41 = vadd.f32 %v5218_v4, %v5217_v13  ;;  %v5318_v3 = vadd.f32 %v9282_v36, %v5286_v8  ;;  %v5288_v4 = vld [vmem:[#allocation2 + $0x120] sm:$0xff]  ;;  %v5319_v13 = vadd.f32 %v9282_v36, %v5287_v7 }
 0x4cb   :  { %v4148_v30 = vld [vmem:[#allocation2 + $0x1a8] sm:$0xff]  ;;  %v3308_v39 = vpop.f32.mrf.mxu1  ;;  %v5220_v23 = vsel %vm22_vm2, %v5186_v0, 0.0 }
 0x4cc   :  { %v4482_v27 = vadd.f32 %v4401_v14, %v4148_v30  ;;  %3989 = vst.msk [vmem:[#allocation2 + $0x1b0] sm:$0xff] %vm22_vm2, %v3925_v45  ;;  %v3374_v20 = vadd.f32 %v3308_v39, %v3040_v1  ;;  %v5124_v45 = vld [vmem:[#allocation2 + $0x48] sm:$0xff]  ;;  %v5189_v30 = vmax.f32 %v5157_v12, 0.0  ;;  %v5159_v1 = vadd.f32 %v9282_v36, %v5123_v16 }
 0x4cd   :  { %v4705_v32 = vld [vmem:[#allocation2 + $0x1a0] sm:$0xff]  ;;  %v4964_v40 = vpop.f32.mrf.mxu0 }
 0x4ce   :  { %4546 = vst.msk [vmem:[#allocation2 + $0x1a8] sm:$0xff] %vm22_vm2, %v4482_v27  ;;  %v5039_v38 = vadd.f32 %v4957_v43, %v4705_v32  ;;  %v5221_v27 = vadd.f32 %v5220_v23, %v5219_v41  ;;  %v5224_v32 = vsel %vm22_vm2, %v5188_v19, 0.0  ;;  %v5226_v33 = vsel %vm22_vm2, %v5189_v30, 0.0  ;;  %v5289_v41 = vld [vmem:[#allocation2 + $0x128] sm:$0xff] }
 0x4cf   :  { %3438 = vst.msk [vmem:[#allocation2 + $0x1f8] sm:$0xff] %vm22_vm2, %v3374_v20  ;;  %v5125_v20 = vld [vmem:[#allocation2 + $0x50] sm:$0xff]  ;;  %v5350_v30 = vmax.f32 %v5318_v3, 0.0 }
 0x4d0   :  { %5103 = vst.msk [vmem:[#allocation2 + $0x1a0] sm:$0xff] %vm22_vm2, %v5039_v38  ;;  %v5190_v38 = vmax.f32 %v5158_v21, 0.0 }
 0x4d1   :  { %v3848_v5 = vpop.f32.mrf.mxu2 }
 0x4d2   :  { %v3926_v35 = vadd.f32 %v3848_v5, %v3592_v47  ;;  %v4406_v42 = vpop.f32.mrf.mxu3  ;;  %v5160_v47 = vadd.f32 %v9282_v36, %v5124_v45  ;;  %v5126_v5 = vld [vmem:[#allocation2 + $0x58] sm:$0xff] }
 0x4d3   :  { %v4149_v37 = vld [vmem:[#allocation2 + $0x1b0] sm:$0xff]  ;;  %v5162_v49 = vadd.f32 %v9282_v36, %v5126_v5  ;;  %v5131_v5 = vld [vmem:[#allocation2 + $0x80] sm:$0xff] }
 0x4d4   :  { %v4483_v29 = vadd.f32 %v4404_v24, %v4149_v37  ;;  %3990 = vst.msk [vmem:[#allocation2 + $0x1b8] sm:$0xff] %vm22_vm2, %v3926_v35  ;;  %v3595_v37 = vld [vmem:[#allocation2 + $0x1d0] sm:$0xff]  ;;  %v5192_v53 = vmax.f32 %v5160_v47, 0.0 }
 0x4d5   :  { %v4706_v34 = vld [vmem:[#allocation2 + $0x1a8] sm:$0xff]  ;;  %v9293_v17 = vpop.f32.mrf.mxu0 }
 0x4d6   :  { %4547 = vst.msk [vmem:[#allocation2 + $0x1b0] sm:$0xff] %vm22_vm2, %v4483_v29  ;;  %v5040_v46 = vadd.f32 %v4959_v2, %v4706_v34  ;;  %v5191_v34 = vmax.f32 %v5159_v1, 0.0  ;;  %v5232_v0 = vsel %vm22_vm2, %v5192_v53, 0.0  ;;  %v5320_v1 = vadd.f32 %v9282_v36, %v5288_v4 }
 0x4d8   :  { %5104 = vst.msk [vmem:[#allocation2 + $0x1a8] sm:$0xff] %vm22_vm2, %v5040_v46  ;;  %v5230_v56 = vsel %vm22_vm2, %v5191_v34, 0.0 }
 0x4d9   :  { %v3851_v48 = vpop.f32.mrf.mxu2 }
 0x4da   :  { %v3927_v58 = vadd.f32 %v3851_v48, %v3593_v28  ;;  %v4409_v54 = vpop.f32.mrf.mxu3  ;;  %v5228_v48 = vsel %vm22_vm2, %v5190_v38, 0.0  ;;  %v5290_v38 = vld [vmem:[#allocation2 + $0x130] sm:$0xff] }
 0x4db   :  { %v4150_v52 = vld [vmem:[#allocation2 + $0x1b8] sm:$0xff] }
 0x4dc   :  { %v4484_v55 = vadd.f32 %v4406_v42, %v4150_v52  ;;  %3991 = vst.msk [vmem:[#allocation2 + $0x1c0] sm:$0xff] %vm22_vm2, %v3927_v58  ;;  %v5128_v58 = vld [vmem:[#allocation2 + $0x68] sm:$0xff]  ;;  %v5163_v52 = vadd.f32 %v9282_v36, %v5127_v44 }
 0x4dd   :  { %v4707_v43 = vld [vmem:[#allocation2 + $0x1b0] sm:$0xff]  ;;  %v9310_v35 = vpop.f32.mrf.mxu0  ;;  %v5164_v62 = vadd.f32 %v9282_v36, %v5128_v58  ;;  %v5167_v58 = vadd.f32 %v9282_v36, %v5131_v5  ;;  %v3598_v5 = vld [vmem:[#allocation2 + $0x1e8] sm:$0xff] }
 0x4de   :  { %4548 = vst.msk [vmem:[#allocation2 + $0x1b8] sm:$0xff] %vm22_vm2, %v4484_v55  ;;  %v5041_v9 = vadd.f32 %v4962_v25, %v4707_v43  ;;  %v5222_v25 = vsel %vm22_vm2, %v5187_v10, 0.0  ;;  %v5317_v43 = vadd.f32 %v9282_v36, %v5285_v50  ;;  %v3596_v10 = vld [vmem:[#allocation2 + $0x1d8] sm:$0xff]  ;;  %v5352_v50 = vmax.f32 %v5320_v1, 0.0 }
 0x4df   :  { %v5223_v42 = vadd.f32 %v5222_v25, %v5221_v27  ;;  %v5196_v21 = vmax.f32 %v5164_v62, 0.0  ;;  %v5348_v25 = vmax.f32 %v5316_v60, 0.0  ;;  %v5293_v62 = vld [vmem:[#allocation2 + $0x148] sm:$0xff] }
 0x4e0   :  { %5105 = vst.msk [vmem:[#allocation2 + $0x1b0] sm:$0xff] %vm22_vm2, %v5041_v9  ;;  %v5194_v9 = vmax.f32 %v5162_v49, 0.0  ;;  %v5383_v49 = vsel %vm22_vm2, %v5350_v30, 0.0  ;;  %v5135_v30 = vld [vmem:[#allocation2 + $0xa0] sm:$0xff] }
 0x4e1   :  { %v3853_v2 = vpop.f32.mrf.mxu2  ;;  %v5225_v18 = vadd.f32 %v5224_v32, %v5223_v42 }
 0x4e2   :  { %v3928_v14 = vadd.f32 %v3853_v2, %v3594_v11  ;;  %v4411_v15 = vpop.f32.mrf.mxu3  ;;  %v5195_v2 = vmax.f32 %v5163_v52, 0.0  ;;  %v5236_v19 = vsel %vm22_vm2, %v5194_v9, 0.0 }
 0x4e3   :  { %v4151_v22 = vld [vmem:[#allocation2 + $0x1c0] sm:$0xff]  ;;  %v5227_v51 = vadd.f32 %v5226_v33, %v5225_v18  ;;  %v5380_v18 = vsel %vm22_vm2, %v5348_v25, 0.0  ;;  %v5295_v25 = vld [vmem:[#allocation2 + $0x158] sm:$0xff] }
 0x4e4   :  { %v4485_v26 = vadd.f32 %v4409_v54, %v4151_v22  ;;  %3992 = vst.msk [vmem:[#allocation2 + $0x1c8] sm:$0xff] %vm22_vm2, %v3928_v14  ;;  %v5130_v14 = vld [vmem:[#allocation2 + $0x78] sm:$0xff] }
 0x4e5   :  { %v4708_v24 = vld [vmem:[#allocation2 + $0x1b8] sm:$0xff]  ;;  %v5229_v57 = vadd.f32 %v5228_v48, %v5227_v51  ;;  %v9329_v22 = vpop.f32.mrf.mxu0  ;;  %v5166_v32 = vadd.f32 %v9282_v36, %v5130_v14  ;;  %v3597_v51 = vld [vmem:[#allocation2 + $0x1e0] sm:$0xff]  ;;  %v5294_v14 = vld [vmem:[#allocation2 + $0x150] sm:$0xff] }
 0x4e6   :  { %4549 = vst.msk [vmem:[#allocation2 + $0x1c0] sm:$0xff] %vm22_vm2, %v4485_v26  ;;  %v5042_v39 = vadd.f32 %v4964_v40, %v4708_v24  ;;  %v5161_v40 = vadd.f32 %v9282_v36, %v5125_v20  ;;  %v5165_v26 = vadd.f32 %v9282_v36, %v5129_v61  ;;  %v5238_v20 = vsel %vm22_vm2, %v5195_v2, 0.0 }
 0x4e7   :  { %v5231_v11 = vadd.f32 %v5230_v56, %v5229_v57  ;;  %v5198_v53 = vmax.f32 %v5166_v32, 0.0  ;;  %v5387_v61 = vsel %vm22_vm2, %v5352_v50, 0.0 }
 0x4e8   :  { %5106 = vst.msk [vmem:[#allocation2 + $0x1b8] sm:$0xff] %vm22_vm2, %v5042_v39  ;;  %v5193_v63 = vmax.f32 %v5161_v40, 0.0  ;;  %v5240_v40 = vsel %vm22_vm2, %v5196_v21, 0.0  ;;  %v5197_v44 = vmax.f32 %v5165_v26, 0.0 }
 0x4e9   :  { %v3856_v29 = vpop.f32.mrf.mxu2  ;;  %v5233_v23 = vadd.f32 %v5232_v0, %v5231_v11  ;;  %v5134_v0 = vld [vmem:[#allocation2 + $0x98] sm:$0xff]  ;;  %v5244_v4 = vsel %vm22_vm2, %v5198_v53, 0.0 }
 0x4ea   :  { %v3929_v46 = vadd.f32 %v3856_v29, %v3595_v37  ;;  %v4414_v31 = vpop.f32.mrf.mxu3  ;;  %v5351_v37 = vmax.f32 %v5319_v13, 0.0  ;;  %v5321_v29 = vadd.f32 %v9282_v36, %v5289_v41 }
 0x4eb   :  { %v4152_v28 = vld [vmem:[#allocation2 + $0x1c8] sm:$0xff] }
 0x4ec   :  { %v4486_v54 = vadd.f32 %v4411_v15, %v4152_v28  ;;  %3993 = vst.msk [vmem:[#allocation2 + $0x1d0] sm:$0xff] %vm22_vm2, %v3929_v46  ;;  %v5349_v15 = vmax.f32 %v5317_v43, 0.0  ;;  %v5291_v46 = vld [vmem:[#allocation2 + $0x138] sm:$0xff]  ;;  %v5322_v28 = vadd.f32 %v9282_v36, %v5290_v38  ;;  %v5385_v8 = vsel %vm22_vm2, %v5351_v37, 0.0  ;;  %v5136_v37 = vld [vmem:[#allocation2 + $0xa8] sm:$0xff] }
 0x4ed   :  { %v4709_v55 = vld [vmem:[#allocation2 + $0x1c0] sm:$0xff]  ;;  %v5323_v56 = vadd.f32 %v9282_v36, %v5291_v46  ;;  %v4974_v2 = vpop.f32.mrf.mxu0 }
 0x4ee   :  { %4550 = vst.msk [vmem:[#allocation2 + $0x1c8] sm:$0xff] %vm22_vm2, %v4486_v54  ;;  %v5043_v6 = vadd.f32 %v9293_v17, %v4709_v55  ;;  %v5234_v17 = vsel %vm22_vm2, %v5193_v63, 0.0  ;;  %v5381_v42 = vsel %vm22_vm2, %v5349_v15, 0.0  ;;  %v5292_v54 = vld [vmem:[#allocation2 + $0x140] sm:$0xff]  ;;  %v5353_v55 = vmax.f32 %v5321_v29, 0.0 }
 0x4ef   :  { %v5235_v27 = vadd.f32 %v5234_v17, %v5233_v23  ;;  %v5354_v60 = vmax.f32 %v5322_v28, 0.0  ;;  %v5324_v3 = vadd.f32 %v9282_v36, %v5292_v54  ;;  %v5355_v23 = vmax.f32 %v5323_v56, 0.0  ;;  %v5137_v28 = vld [vmem:[#allocation2 + $0xb0] sm:$0xff]  ;;  %v5138_v56 = vld [vmem:[#allocation2 + $0xb8] sm:$0xff] }
 0x4f0   :  { %5107 = vst.msk [vmem:[#allocation2 + $0x1c0] sm:$0xff] %vm22_vm2, %v5043_v6  ;;  %v5242_v6 = vsel %vm22_vm2, %v5197_v44, 0.0 }
 0x4f1   :  { %v3858_v12 = vpop.f32.mrf.mxu2  ;;  %v5237_v34 = vadd.f32 %v5236_v19, %v5235_v27  ;;  %v5325_v19 = vadd.f32 %v9282_v36, %v5293_v62  ;;  %v5391_v1 = vsel %vm22_vm2, %v5354_v60, 0.0  ;;  %v5326_v27 = vadd.f32 %v9282_v36, %v5294_v14  ;;  %v5299_v60 = vld [vmem:[#allocation2 + $0x178] sm:$0xff] }
 0x4f2   :  { %v3930_v16 = vadd.f32 %v3858_v12, %v3596_v10  ;;  %v4416_v24 = vpop.f32.mrf.mxu3  ;;  %v5199_v10 = vmax.f32 %v5167_v58, 0.0  ;;  %v5169_v12 = vadd.f32 %v9282_v36, %v5133_v59  ;;  %v5393_v29 = vsel %vm22_vm2, %v5355_v23, 0.0 }
 0x4f3   :  { %v4153_v45 = vld [vmem:[#allocation2 + $0x1d0] sm:$0xff]  ;;  %v5239_v48 = vadd.f32 %v5238_v20, %v5237_v34  ;;  %v5327_v34 = vadd.f32 %v9282_v36, %v5295_v25  ;;  %v5358_v53 = vmax.f32 %v5326_v27, 0.0 }
 0x4f4   :  { %v4487_v39 = vadd.f32 %v4414_v31, %v4153_v45  ;;  %3994 = vst.msk [vmem:[#allocation2 + $0x1d8] sm:$0xff] %vm22_vm2, %v3930_v16  ;;  %v5132_v31 = vld [vmem:[#allocation2 + $0x88] sm:$0xff]  ;;  %v5389_v16 = vsel %vm22_vm2, %v5353_v55, 0.0  ;;  %v5170_v45 = vadd.f32 %v9282_v36, %v5134_v0  ;;  %v5246_v32 = vsel %vm22_vm2, %v5199_v10, 0.0 }
 0x4f5   :  { %v4710_v47 = vld [vmem:[#allocation2 + $0x1c8] sm:$0xff]  ;;  %v5241_v43 = vadd.f32 %v5240_v40, %v5239_v48  ;;  %v5168_v57 = vadd.f32 %v9282_v36, %v5132_v31  ;;  %v5201_v38 = vmax.f32 %v5169_v12, 0.0  ;;  %v5171_v31 = vadd.f32 %v9282_v36, %v5135_v30 }
 0x4f6   :  { %4551 = vst.msk [vmem:[#allocation2 + $0x1d0] sm:$0xff] %vm22_vm2, %v4487_v39  ;;  %v5044_v33 = vadd.f32 %v9310_v35, %v4710_v47  ;;  %v5382_v35 = vadd.f32 %v5381_v42, %v5380_v18  ;;  %v5356_v39 = vmax.f32 %v5324_v3, 0.0  ;;  %v5202_v46 = vmax.f32 %v5170_v45, 0.0 }
 0x4f7   :  { %v5243_v26 = vadd.f32 %v5242_v6, %v5241_v43  ;;  %v5200_v41 = vmax.f32 %v5168_v57, 0.0  ;;  %v5359_v43 = vmax.f32 %v5327_v34, 0.0  ;;  %v5173_v0 = vadd.f32 %v9282_v36, %v5137_v28  ;;  %v5303_v28 = vld [vmem:[#allocation2 + $0x198] sm:$0xff] }
 0x4f8   :  { %5108 = vst.msk [vmem:[#allocation2 + $0x1c8] sm:$0xff] %vm22_vm2, %v5044_v33  ;;  %v5384_v9 = vadd.f32 %v5383_v49, %v5382_v35  ;;  %v5357_v33 = vmax.f32 %v5325_v19, 0.0  ;;  %v5297_v49 = vld [vmem:[#allocation2 + $0x168] sm:$0xff]  ;;  %v5395_v48 = vsel %vm22_vm2, %v5356_v39, 0.0  ;;  %v5139_v19 = vld [vmem:[#allocation2 + $0xc0] sm:$0xff] }
 0x4f9   :  { %v3861_v52 = vpop.f32.mrf.mxu2  ;;  %v5245_v20 = vadd.f32 %v5244_v4, %v5243_v26  ;;  %v5248_v44 = vsel %vm22_vm2, %v5200_v41, 0.0  ;;  %v5329_v6 = vadd.f32 %v9282_v36, %v5297_v49  ;;  %v5399_v4 = vsel %vm22_vm2, %v5358_v53, 0.0  ;;  %v5301_v39 = vld [vmem:[#allocation2 + $0x188] sm:$0xff]  ;;  %v5141_v53 = vld [vmem:[#allocation2 + $0xd0] sm:$0xff] }
 0x4fa   :  { %v3931_v63 = vadd.f32 %v3861_v52, %v3597_v51  ;;  %v5386_v17 = vadd.f32 %v5385_v8, %v5384_v9  ;;  %v4419_v13 = vpop.f32.mrf.mxu3  ;;  %v5250_v51 = vsel %vm22_vm2, %v5201_v38, 0.0  ;;  %v5172_v52 = vadd.f32 %v9282_v36, %v5136_v37  ;;  %v5298_v8 = vld [vmem:[#allocation2 + $0x170] sm:$0xff]  ;;  %v4977_v9 = vpop.f32.mrf.mxu0 }
 0x4fb   :  { %v4154_v7 = vld [vmem:[#allocation2 + $0x1d8] sm:$0xff]  ;;  %v5247_v54 = vadd.f32 %v5246_v32, %v5245_v20  ;;  %v5330_v12 = vadd.f32 %v9282_v36, %v5298_v8  ;;  %v5361_v26 = vmax.f32 %v5329_v6, 0.0  ;;  %v5331_v41 = vadd.f32 %v9282_v36, %v5299_v60  ;;  %v5140_v20 = vld [vmem:[#allocation2 + $0xc8] sm:$0xff] }
 0x4fc   :  { %v4488_v11 = vadd.f32 %v4416_v24, %v4154_v7  ;;  %3995 = vst.msk [vmem:[#allocation2 + $0x1e0] sm:$0xff] %vm22_vm2, %v3931_v63  ;;  %v5388_v24 = vadd.f32 %v5387_v61, %v5386_v17  ;;  %v5397_v63 = vsel %vm22_vm2, %v5357_v33, 0.0  ;;  %v5203_v7 = vmax.f32 %v5171_v31, 0.0  ;;  %v5302_v33 = vld [vmem:[#allocation2 + $0x190] sm:$0xff] }
 0x4fd   :  { %v4711_v15 = vld [vmem:[#allocation2 + $0x1d0] sm:$0xff]  ;;  %v5249_v62 = vadd.f32 %v5248_v44, %v5247_v54  ;;  %v5204_v14 = vmax.f32 %v5172_v52, 0.0  ;;  %v5205_v30 = vmax.f32 %v5173_v0, 0.0  ;;  %v5362_v38 = vmax.f32 %v5330_v12, 0.0  ;;  %v5143_v12 = vld [vmem:[#allocation2 + $0xe0] sm:$0xff] }
 0x4fe   :  { %4552 = vst.msk [vmem:[#allocation2 + $0x1d8] sm:$0xff] %vm22_vm2, %v4488_v11  ;;  %v5045_v21 = vadd.f32 %v9329_v22, %v4711_v15  ;;  %v5390_v47 = vadd.f32 %v5389_v16, %v5388_v24  ;;  %v5296_v22 = vld [vmem:[#allocation2 + $0x160] sm:$0xff]  ;;  %v5252_v11 = vsel %vm22_vm2, %v5202_v46, 0.0  ;;  %v3599_v16 = vld [vmem:[#allocation2 + $0x1f0] sm:$0xff]  ;;  %v5254_v25 = vsel %vm22_vm2, %v5203_v7, 0.0 }
 0x4ff   :  { %v5328_v58 = vadd.f32 %v9282_v36, %v5296_v22  ;;  %v5251_v17 = vadd.f32 %v5250_v51, %v5249_v62  ;;  %v5175_v37 = vadd.f32 %v9282_v36, %v5139_v19  ;;  %v5363_v44 = vmax.f32 %v5331_v41, 0.0 }
 0x500   :  { %5109 = vst.msk [vmem:[#allocation2 + $0x1d0] sm:$0xff] %vm22_vm2, %v5045_v21  ;;  %v5392_v18 = vadd.f32 %v5391_v1, %v5390_v47  ;;  %v5401_v21 = vsel %vm22_vm2, %v5359_v43, 0.0  ;;  %v5333_v46 = vadd.f32 %v9282_v36, %v5301_v39  ;;  %v5176_v49 = vadd.f32 %v9282_v36, %v5140_v20  ;;  %v3600_v43 = vld [vmem:[#allocation2 + $0x1f8] sm:$0xff] }
 0x501   :  { %v3863_v42 = vpop.f32.mrf.mxu2  ;;  %v5360_v10 = vmax.f32 %v5328_v58, 0.0  ;;  %v5253_v24 = vadd.f32 %v5252_v11, %v5251_v17  ;;  %v5407_v58 = vsel %vm22_vm2, %v5362_v38, 0.0  ;;  %v5334_v54 = vadd.f32 %v9282_v36, %v5302_v33 }
 0x502   :  { %v3932_v40 = vadd.f32 %v3863_v42, %v3598_v5  ;;  %v5394_v59 = vadd.f32 %v5393_v29, %v5392_v18  ;;  %v4421_v3 = vpop.f32.mrf.mxu3  ;;  %v5256_v5 = vsel %vm22_vm2, %v5204_v14, 0.0  ;;  %v4979_v51 = vpop.f32.mrf.mxu0  ;;  %v5207_v8 = vmax.f32 %v5175_v37, 0.0 }
 0x503   :  { %v4155_v50 = vld [vmem:[#allocation2 + $0x1e0] sm:$0xff]  ;;  %v5403_v32 = vsel %vm22_vm2, %v5360_v10, 0.0  ;;  %v5255_v18 = vadd.f32 %v5254_v25, %v5253_v24  ;;  %v5365_v62 = vmax.f32 %v5333_v46, 0.0  ;;  %v5335_v7 = vadd.f32 %v9282_v36, %v5303_v28 }
 0x504   :  { %v4489_v35 = vadd.f32 %v4419_v13, %v4155_v50  ;;  %3996 = vst.msk [vmem:[#allocation2 + $0x1e8] sm:$0xff] %vm22_vm2, %v3932_v40  ;;  %v5396_v61 = vadd.f32 %v5395_v48, %v5394_v59  ;;  %v5300_v13 = vld [vmem:[#allocation2 + $0x180] sm:$0xff]  ;;  %v5405_v40 = vsel %vm22_vm2, %v5361_v26, 0.0  ;;  %v5258_v48 = vsel %vm22_vm2, %v5205_v30, 0.0  ;;  %v5144_v30 = vld [vmem:[#allocation2 + $0xe8] sm:$0xff] }
 0x505   :  { %v4712_v55 = vld [vmem:[#allocation2 + $0x1d8] sm:$0xff]  ;;  %v5332_v47 = vadd.f32 %v9282_v36, %v5300_v13  ;;  %v5257_v52 = vadd.f32 %v5256_v5, %v5255_v18  ;;  %v5208_v60 = vmax.f32 %v5176_v49, 0.0  ;;  %v5366_v14 = vmax.f32 %v5334_v54, 0.0 }
 0x506   :  { %4553 = vst.msk [vmem:[#allocation2 + $0x1e0] sm:$0xff] %vm22_vm2, %v4489_v35  ;;  %v5046_v57 = vadd.f32 %v4974_v2, %v4712_v55  ;;  %v5174_v2 = vadd.f32 %v9282_v36, %v5138_v56  ;;  %v5398_v15 = vadd.f32 %v5397_v63, %v5396_v61  ;;  %v5304_v56 = vld [vmem:[#allocation2 + $0x1a0] sm:$0xff]  ;;  %v5413_v41 = vsel %vm22_vm2, %v5365_v62, 0.0 }
 0x507   :  { %v5364_v35 = vmax.f32 %v5332_v47, 0.0  ;;  %v5259_v61 = vadd.f32 %v5258_v48, %v5257_v52  ;;  %v5179_v20 = vadd.f32 %v9282_v36, %v5143_v12  ;;  %v5415_v47 = vsel %vm22_vm2, %v5366_v14, 0.0 }
 0x508   :  { %5110 = vst.msk [vmem:[#allocation2 + $0x1d8] sm:$0xff] %vm22_vm2, %v5046_v57  ;;  %v5400_v1 = vadd.f32 %v5399_v4, %v5398_v15  ;;  %v5206_v42 = vmax.f32 %v5174_v2, 0.0  ;;  %v5142_v57 = vld [vmem:[#allocation2 + $0xd8] sm:$0xff]  ;;  %v5305_v4 = vld [vmem:[#allocation2 + $0x1a8] sm:$0xff]  ;;  %v5336_v2 = vadd.f32 %v9282_v36, %v5304_v56  ;;  %v5180_v33 = vadd.f32 %v9282_v36, %v5144_v30  ;;  %v5310_v56 = vld [vmem:[#allocation2 + $0x1d0] sm:$0xff] }
 0x509   :  { %v3866_v23 = vpop.f32.mrf.mxu2  ;;  %v5411_v17 = vsel %vm22_vm2, %v5364_v35, 0.0  ;;  %v5337_v24 = vadd.f32 %v9282_v36, %v5305_v4  ;;  %v5211_v35 = vmax.f32 %v5179_v20, 0.0  ;;  %v5342_v12 = vadd.f32 %v9282_v36, %v5310_v56 }
 0x50a   :  { %v3933_v45 = vadd.f32 %v3866_v23, %v3599_v16  ;;  %v5402_v29 = vadd.f32 %v5401_v21, %v5400_v1  ;;  %v5260_v59 = vsel %vm22_vm2, %v5206_v42, 0.0  ;;  %v4424_v63 = vpop.f32.mrf.mxu3  ;;  %v5262_v16 = vsel %vm22_vm2, %v5207_v8, 0.0  ;;  %v5306_v21 = vld [vmem:[#allocation2 + $0x1b0] sm:$0xff] }
 0x50b   :  { %v4156_v27 = vld [vmem:[#allocation2 + $0x1e8] sm:$0xff]  ;;  %v5261_v13 = vadd.f32 %v5260_v59, %v5259_v61  ;;  %v5178_v23 = vadd.f32 %v9282_v36, %v5142_v57  ;;  %v5338_v5 = vadd.f32 %v9282_v36, %v5306_v21  ;;  %v5145_v42 = vld [vmem:[#allocation2 + $0xf0] sm:$0xff] }
 0x50c   :  { %v4490_v22 = vadd.f32 %v4421_v3, %v4156_v27  ;;  %3997 = vst.msk [vmem:[#allocation2 + $0x1f0] sm:$0xff] %vm22_vm2, %v3933_v45  ;;  %v5404_v50 = vadd.f32 %v5403_v32, %v5402_v29  ;;  %v5177_v3 = vadd.f32 %v9282_v36, %v5141_v53  ;;  %v5367_v45 = vmax.f32 %v5335_v7, 0.0  ;;  %v5307_v27 = vld [vmem:[#allocation2 + $0x1b8] sm:$0xff]  ;;  %v5308_v29 = vld [vmem:[#allocation2 + $0x1c0] sm:$0xff]  ;;  %v4982_v53 = vpop.f32.mrf.mxu0 }
 0x50d   :  { %v4713_v34 = vld [vmem:[#allocation2 + $0x1e0] sm:$0xff]  ;;  %v5264_v32 = vsel %vm22_vm2, %v5208_v60, 0.0  ;;  %v5263_v38 = vadd.f32 %v5262_v16, %v5261_v13  ;;  %v5339_v46 = vadd.f32 %v9282_v36, %v5307_v27  ;;  %v5370_v52 = vmax.f32 %v5338_v5, 0.0 }
 0x50e   :  { %4554 = vst.msk [vmem:[#allocation2 + $0x1e8] sm:$0xff] %vm22_vm2, %v4490_v22  ;;  %v5047_v31 = vadd.f32 %v4977_v9, %v4713_v34  ;;  %v5406_v55 = vadd.f32 %v5405_v40, %v5404_v50  ;;  %v5409_v9 = vsel %vm22_vm2, %v5363_v44, 0.0  ;;  %v5209_v1 = vmax.f32 %v5177_v3, 0.0  ;;  %v5309_v50 = vld [vmem:[#allocation2 + $0x1c8] sm:$0xff] }
 0x50f   :  { %v5368_v22 = vmax.f32 %v5336_v2, 0.0  ;;  %v5210_v34 = vmax.f32 %v5178_v23, 0.0  ;;  %v5417_v40 = vsel %vm22_vm2, %v5367_v45, 0.0  ;;  %v5369_v44 = vmax.f32 %v5337_v24, 0.0  ;;  %v5311_v60 = vld [vmem:[#allocation2 + $0x1d8] sm:$0xff] }
 0x510   :  { %5111 = vst.msk [vmem:[#allocation2 + $0x1e0] sm:$0xff] %vm22_vm2, %v5047_v31  ;;  %v5408_v11 = vadd.f32 %v5407_v58, %v5406_v55  ;;  %v5146_v31 = vld [vmem:[#allocation2 + $0xf8] sm:$0xff]  ;;  %v5265_v18 = vadd.f32 %v5264_v32, %v5263_v38  ;;  %v5181_v58 = vadd.f32 %v9282_v36, %v5145_v42  ;;  %v5266_v54 = vsel %vm22_vm2, %v5209_v1, 0.0 }
 0x511   :  { %v3868_v6 = vpop.f32.mrf.mxu2  ;;  %v5340_v59 = vadd.f32 %v9282_v36, %v5308_v29  ;;  %v5268_v57 = vsel %vm22_vm2, %v5210_v34, 0.0  ;;  %v5371_v62 = vmax.f32 %v5339_v46, 0.0  ;;  %v5341_v7 = vadd.f32 %v9282_v36, %v5309_v50 }
 0x512   :  { %v3934_v0 = vadd.f32 %v3868_v6, %v3600_v43  ;;  %v5410_v19 = vadd.f32 %v5409_v9, %v5408_v11  ;;  %v4426_v48 = vpop.f32.mrf.mxu3  ;;  %v5182_v43 = vadd.f32 %v9282_v36, %v5146_v31  ;;  %v5212_v6 = vmax.f32 %v5180_v33, 0.0 }
 0x513   :  { %v4157_v10 = vld [vmem:[#allocation2 + $0x1f0] sm:$0xff]  ;;  %v5421_v9 = vsel %vm22_vm2, %v5369_v44, 0.0  ;;  %v5267_v3 = vadd.f32 %v5266_v54, %v5265_v18  ;;  %v5270_v11 = vsel %vm22_vm2, %v5211_v35, 0.0  ;;  %v5423_v4 = vsel %vm22_vm2, %v5370_v52, 0.0 }
 0x514   :  { %v4491_v15 = vadd.f32 %v4424_v63, %v4157_v10  ;;  %3998 = vst.msk [vmem:[#allocation2 + $0x1f8] sm:$0xff] %vm22_vm2, %v3934_v0  ;;  %v5412_v39 = vadd.f32 %v5411_v17, %v5410_v19  ;;  %v5372_v10 = vmax.f32 %v5340_v59, 0.0  ;;  %v5213_v17 = vmax.f32 %v5181_v58, 0.0  ;;  %v4984_v20 = vpop.f32.mrf.mxu0 }
 0x515   :  { %v4714_v26 = vld [vmem:[#allocation2 + $0x1e8] sm:$0xff]  ;;  %v5269_v13 = vadd.f32 %v5268_v57, %v5267_v3  ;;  %v5425_v16 = vsel %vm22_vm2, %v5371_v62, 0.0  ;;  %v5373_v23 = vmax.f32 %v5341_v7, 0.0  ;;  %v5343_v19 = vadd.f32 %v9282_v36, %v5311_v60 }
 0x516   :  { %4555 = vst.msk [vmem:[#allocation2 + $0x1f0] sm:$0xff] %vm22_vm2, %v4491_v15  ;;  %v5048_v25 = vadd.f32 %v4979_v51, %v4714_v26  ;;  %v5414_v37 = vadd.f32 %v5413_v41, %v5412_v39  ;;  %v5419_v51 = vsel %vm22_vm2, %v5368_v22, 0.0  ;;  %v5214_v15 = vmax.f32 %v5182_v43, 0.0 }
 0x517   :  { %v5312_v2 = vld [vmem:[#allocation2 + $0x1e0] sm:$0xff]  ;;  %v5272_v21 = vsel %vm22_vm2, %v5212_v6, 0.0  ;;  %v5271_v41 = vadd.f32 %v5270_v11, %v5269_v13  ;;  %v5427_v24 = vsel %vm22_vm2, %v5372_v10, 0.0  ;;  %v5274_v30 = vsel %vm22_vm2, %v5213_v17, 0.0 }
 0x518   :  { %5112 = vst.msk [vmem:[#allocation2 + $0x1e8] sm:$0xff] %vm22_vm2, %v5048_v25  ;;  %v5416_v49 = vadd.f32 %v5415_v47, %v5414_v37  ;;  %v5374_v25 = vmax.f32 %v5342_v12, 0.0  ;;  %v5344_v1 = vadd.f32 %v9282_v36, %v5312_v2  ;;  %v5276_v38 = vsel %vm22_vm2, %v5214_v15, 0.0  ;;  %v6299_v17 = vld [vmem:[%s9461_s4] ss:$0 sm:$0xff] }
 0x519   :  { %v5273_v32 = vadd.f32 %v5272_v21, %v5271_v41  ;;  %v5429_v47 = vsel %vm22_vm2, %v5373_v23, 0.0  ;;  %v5375_v22 = vmax.f32 %v5343_v19, 0.0 }
 0x51a   :  { %v5418_v55 = vadd.f32 %v5417_v40, %v5416_v49  ;;  %v5376_v40 = vmax.f32 %v5344_v1, 0.0  ;;  %v5431_v44 = vsel %vm22_vm2, %v5374_v25, 0.0 }
 0x51b   :  { %v4158_v28 = vld [vmem:[#allocation2 + $0x1f8] sm:$0xff]  ;;  %v5275_v29 = vadd.f32 %v5274_v30, %v5273_v32  ;;  %v5433_v49 = vsel %vm22_vm2, %v5375_v22, 0.0 }
 0x51c   :  { %v4492_v8 = vadd.f32 %v4426_v48, %v4158_v28  ;;  %v5420_v61 = vadd.f32 %v5419_v51, %v5418_v55  ;;  %v5435_v48 = vsel %vm22_vm2, %v5376_v40, 0.0 }
 0x51d   :  { %v4715_v63 = vld [vmem:[#allocation2 + $0x1f0] sm:$0xff]  ;;  %v5277_v46 = vadd.f32 %v5276_v38, %v5275_v29 }
 0x51e   :  { %4556 = vst.msk [vmem:[#allocation2 + $0x1f8] sm:$0xff] %vm22_vm2, %v4492_v8  ;;  %v5049_v0 = vadd.f32 %v4982_v53, %v4715_v63  ;;  %v5422_v14 = vadd.f32 %v5421_v9, %v5420_v61 }
 0x51f   :  { %v5313_v45 = vld [vmem:[#allocation2 + $0x1e8] sm:$0xff]  ;;  %v5278_v53 = vrot.slane %v5277_v46, 4 }
 0x520   :  { %5113 = vst.msk [vmem:[#allocation2 + $0x1f0] sm:$0xff] %vm22_vm2, %v5049_v0  ;;  %v5424_v26 = vadd.f32 %v5423_v4, %v5422_v14  ;;  %v5345_v42 = vadd.f32 %v9282_v36, %v5313_v45 }
 0x521   :  { %v5279_v8 = vadd.f32 %v5278_v53, %v5277_v46 }
 0x522   :  { %v5426_v39 = vadd.f32 %v5425_v16, %v5424_v26  ;;  %v5377_v18 = vmax.f32 %v5345_v42, 0.0 }
 0x523   :  { %v5280_v6 = vrot.slane %v5279_v8, 2 }
 0x524   :  { %v5428_v37 = vadd.f32 %v5427_v24, %v5426_v39  ;;  %v5437_v35 = vsel %vm22_vm2, %v5377_v18, 0.0 }
 0x525   :  { %v4716_v27 = vld [vmem:[#allocation2 + $0x1f8] sm:$0xff]  ;;  %v5281_v62 = vadd.f32 %v5280_v6, %v5279_v8 }
 0x526   :  { %v5050_v5 = vadd.f32 %v4984_v20, %v4716_v27  ;;  %v5430_v31 = vadd.f32 %v5429_v47, %v5428_v37 }
 0x527   :  { %v5314_v33 = vld [vmem:[#allocation2 + $0x1f0] sm:$0xff]  ;;  %v5282_v61 = vrot.slane %v5281_v62, 1 }
 0x528   :  { %5114 = vst.msk [vmem:[#allocation2 + $0x1f8] sm:$0xff] %vm22_vm2, %v5050_v5  ;;  %v5346_v34 = vadd.f32 %v9282_v36, %v5314_v33  ;;  %v5432_v50 = vadd.f32 %v5431_v44, %v5430_v31 }
 0x529   :  { %v5283_v11 = vadd.f32 %v5282_v61, %v5281_v62 }
 0x52a   :  { %v5378_v28 = vmax.f32 %v5346_v34, 0.0  ;;  %v5434_v58 = vadd.f32 %v5433_v49, %v5432_v50 }
 0x52c   :  { %v5436_v51 = vadd.f32 %v5435_v48, %v5434_v58  ;;  %v5439_v59 = vsel %vm22_vm2, %v5378_v28, 0.0 }
 0x52e   :  { %v5438_v55 = vadd.f32 %v5437_v35, %v5436_v51 }
 0x52f   :  { %v5315_v54 = vld [vmem:[#allocation2 + $0x1f8] sm:$0xff] }
 0x530   :  { %v5347_v52 = vadd.f32 %v9282_v36, %v5315_v54  ;;  %v5440_v63 = vadd.f32 %v5439_v59, %v5438_v55 }
 0x532   :  { %v5379_v56 = vmax.f32 %v5347_v52, 0.0 }
 0x534   :  { %v5441_v43 = vsel %vm22_vm2, %v5379_v56, 0.0 }
 0x535   :  { %v5442_v57 = vadd.f32 %v5441_v43, %v5440_v63 }
 0x537   :  { %v5443_v9 = vrot.slane %v5442_v57, 4 }
 0x539   :  { %v5444_v7 = vadd.f32 %v5443_v9, %v5442_v57 }
 0x53b   :  { %v5445_v0 = vrot.slane %v5444_v7, 2 }
 0x53d   :  { %v5446_v60 = vadd.f32 %v5445_v0, %v5444_v7 }
 0x53f   :  { %v5447_v3 = vrot.slane %v5446_v60, 1 }
 0x541   :  { %v5448_v36 = vadd.f32 %v5447_v3, %v5446_v60 }
 0x543   :  { %v5450_v4 = vsel %vm5449_vm3, %v5283_v11, %v5448_v36 }
 0x544   :  { %v5451_v10 = vmul.f32 0.00390625, %v5450_v4 }
 0x546   :  { %v5452_v12 = vpack.c.bf16 %v5451_v10, %v5451_v10 }
 0x548   :  { %6290 = vmatmul.msk.bf16.vlgmr.msrb.gmra.mxu1 %vm22_vm2, %v5452_v12 }
 0x5c5   :  { %v5485_v14 = vpop.f32.mrf.mxu1 }
 0x5c6   :  { %v5486_v2 = vadd.f32 %v6299_v17, %v5485_v14 }
 0x5c8   :  { %5489 = vst [vmem:[#allocation3] sm:$0x3] %v5486_v2 }
 0x5c9   :  { %5500 = dma.vmem_to_hbm [thread:$0]  %s5496_s17, 32, %s5498_s20, [#allocation4]  }
 0x5cd   :  { %v5487_v15 = vpop.f32.mrf.mxu1 }
 0x5ce   :  { %6324 = dma.done.wait [#allocation4], 32  }
 0x5cf   :  { %6325 = vsyncadd [#allocation4], 4294967264 }
 0x5d0   :  { %5505 = vsyncpa [#allocation4], 1 }

</bundles_post_ra>
